<compile_context>
chip_gen: v6e
topology: v6e:2x2x1
jax: 0.10.0
libtpu: 0.0.40
codegen_flags: <defaults>
</compile_context>

<pallas_src>
import functools

import jax
import jax.numpy as jnp
from jax import lax
from jax.experimental import pallas as pl
from jax.experimental.pallas import tpu as pltpu


# ----------------------------- Pallas kernels ------------------------------

def _conv_pool_kernel(a_ref, w_ref, b_ref, o_ref):
    """Fused 3x3 conv (as matmul) + 2x2 max-pool + bias + ReLU.

    a_ref: (4, tg, G*K) bf16 -- im2col rows for the 4 corners of each pooled
           pixel, with G pooled pixels packed per row (lane-dense grouping).
    w_ref: (G*K, G*Cout) bf16 -- block-diagonal conv weight (G copies).
    b_ref: (1, G*Cout) f32    -- per-channel bias tiled G times.
    o_ref: (tg, G*Cout)       -- pooled, biased, ReLU'd outputs (128-lane dense).
    """
    w = w_ref[...]
    acc = jnp.dot(a_ref[0], w, preferred_element_type=jnp.float32)
    for c in range(1, 4):
        acc = jnp.maximum(
            acc, jnp.dot(a_ref[c], w, preferred_element_type=jnp.float32))
    # max-pool commutes with the per-channel bias add and the monotone ReLU.
    o_ref[...] = jnp.maximum(acc + b_ref[...], 0.0).astype(o_ref.dtype)


def _fc_kernel(x_ref, w_ref, b_ref, o_ref, *, n_out):
    """Tiny fully-connected layer as a VPU multiply + lane reduction.

    x_ref: (B, K) f32, w_ref: (N, K) f32 (PyTorch layout, lane-dense),
    b_ref: (1, N) f32, o_ref: (B, N) f32.
    """
    x = x_ref[...]
    cols = [jnp.sum(x * w_ref[n:n + 1, :], axis=1, keepdims=True)
            for n in range(n_out)]
    o_ref[...] = jnp.concatenate(cols, axis=1) + b_ref[...]


# ------------------------------ host wrappers -------------------------------

def _pick_tile(m, want):
    """Largest tile <= want that divides m (avoids silent whole-array blocks)."""
    t = min(want, m)
    while t > 16 and m % t:
        t //= 2
    return t if m % t == 0 else m


def _corner_major_patches(x_nhwc):
    """SAME-padded 3x3 im2col in bf16, rows grouped corner-major for 2x2 pooling.

    (B, H, W, C) -> (4, B*(H//2)*(W//2), Kp), column order (ky, kx, c), corner
    index c4 = 2*py + px for conv output pixel (2*yo+py, 2*xo+px).  Corners are
    extracted with stride-2 slices directly (no full-res patch tensor + 6-D
    transpose round trip).
    """
    # TODO(synk): patch gathering stays as (bf16) XLA glue; building it in-kernel
    # would either split the K=9*Cin contraction (~9x more MXU pushes at Cin=3/16)
    # or require lane-concat relayouts costlier than the ~4 MB HBM round trip.
    B, H, W, C = x_nhwc.shape
    assert H % 2 == 0 and W % 2 == 0
    Ho, Wo = H // 2, W // 2
    xb = x_nhwc.astype(jnp.bfloat16)
    xp = jnp.pad(xb, ((0, 0), (1, 1), (1, 1), (0, 0)))
    corners = []
    for py in range(2):
        for px in range(2):
            cols = [xp[:, py + ky:py + ky + H:2, px + kx:px + kx + W:2, :]
                    for ky in range(3) for kx in range(3)]
            corners.append(jnp.concatenate(cols, axis=-1))   # (B, Ho, Wo, 9C)
    a = jnp.stack(corners, axis=0)                            # (4, B, Ho, Wo, 9C)
    kc = 9 * C
    pad_k = (-kc) % 16                                        # bf16-friendly K
    if pad_k:
        a = jnp.pad(a, ((0, 0), (0, 0), (0, 0), (0, 0), (0, pad_k)))
    kp = kc + pad_k
    return a.reshape(4, B * Ho * Wo, kp), kc, kp


def conv3x3_relu_pool(x_nhwc, w_oihw, bias, *, tm_groups, out_dtype=jnp.float32):
    """PyTorch Conv2d(k=3, s=1, p=1) + ReLU + MaxPool2d(2, 2) in one pallas_call."""
    B, H, W, Cin = x_nhwc.shape
    Cout = w_oihw.shape[0]
    Ho, Wo = H // 2, W // 2
    a, kc, kp = _corner_major_patches(x_nhwc)                 # (4, M, Kp) bf16
    M = a.shape[1]

    # Pack G pooled pixels per output row so stores are 128-lane dense and the
    # MXU n-dim is fully used.  The row regrouping is a free row-major reshape.
    G = max(1, 128 // Cout)
    while M % G:
        G //= 2
    Mg = M // G
    a = a.reshape(4, Mg, G * kp)

    # PyTorch weight (Cout, Cin, kh, kw) -> rows ordered (ky, kx, cin); zero-pad
    # K, then expand block-diagonally to (G*Kp, G*Cout).
    wm = jnp.transpose(w_oihw, (2, 3, 1, 0)).reshape(kc, Cout)
    wm = jnp.pad(wm, ((0, kp - kc), (0, 0)))
    wg = jnp.kron(jnp.eye(G, dtype=wm.dtype), wm).astype(jnp.bfloat16)
    bg = jnp.tile(bias.astype(jnp.float32), G).reshape(1, G * Cout)

    tg = _pick_tile(Mg, tm_groups)
    out = pl.pallas_call(
        _conv_pool_kernel,
        out_shape=jax.ShapeDtypeStruct((Mg, G * Cout), out_dtype),
        grid=(Mg // tg,),
        in_specs=[
            pl.BlockSpec((4, tg, G * kp), lambda i: (0, i, 0)),
            pl.BlockSpec((G * kp, G * Cout), lambda i: (0, 0)),
            pl.BlockSpec((1, G * Cout), lambda i: (0, 0)),
        ],
        out_specs=pl.BlockSpec((tg, G * Cout), lambda i: (i, 0)),
        compiler_params=pltpu.CompilerParams(
            dimension_semantics=("parallel",)),
    )(a, wg, bg)
    return out.reshape(B, Ho, Wo, Cout)


def linear(flat, wfc, bias):
    """logits = flat @ wfc.T + bias, with wfc kept in its (N, K) lane-dense layout."""
    B, K = flat.shape
    N = wfc.shape[0]
    kernel = functools.partial(_fc_kernel, n_out=N)
    return pl.pallas_call(
        kernel,
        out_shape=jax.ShapeDtypeStruct((B, N), jnp.float32),
        grid=(1,),
        in_specs=[
            pl.BlockSpec((B, K), lambda i: (0, 0)),
            pl.BlockSpec((N, K), lambda i: (0, 0)),
            pl.BlockSpec((1, N), lambda i: (0, 0)),
        ],
        out_specs=pl.BlockSpec((B, N), lambda i: (0, 0)),
    )(flat, wfc, bias.reshape(1, N))


def simple_cnn_forward(x_nchw, p):
    x = jnp.transpose(x_nchw, (0, 2, 3, 1))                  # NCHW -> NHWC
    # Stage 1 emits bf16 directly: it only feeds the bf16 patch builder.
    x = conv3x3_relu_pool(x, p["w1"], p["b1"], tm_groups=256,
                          out_dtype=jnp.bfloat16)            # (B, 64, 64, 16)
    x = conv3x3_relu_pool(x, p["w2"], p["b2"], tm_groups=128,
                          out_dtype=jnp.float32)             # (B, 32, 32, 32)
    B, Ho, Wo, C2 = x.shape
    # PyTorch x.view(B, -1) flattens in (C, H, W) order; instead of transposing
    # the activation, fold the (C,H,W)->(H,W,C) column permutation into the FC
    # weight (batch-size independent) and flatten the NHWC activation in place.
    flat = x.reshape(B, -1)                                   # (B, 32*32*32)
    N = p["wfc"].shape[0]
    wfc_p = p["wfc"].reshape(N, C2, Ho, Wo).transpose(0, 2, 3, 1).reshape(N, -1)
    return linear(flat, wfc_p, p["bfc"])                      # (B, 2)


# --------------------------- params & reference ----------------------------

def init_params(key):
    k1, k2, k3 = jax.random.split(key, 3)
    return dict(
        w1=jax.random.normal(k1, (16, 3, 3, 3), jnp.float32) * 0.1,
        b1=jnp.linspace(-0.1, 0.1, 16).astype(jnp.float32),
        w2=jax.random.normal(k2, (32, 16, 3, 3), jnp.float32) * 0.05,
        b2=jnp.linspace(-0.1, 0.1, 32).astype(jnp.float32),
        wfc=jax.random.normal(k3, (2, 32 * 32 * 32), jnp.float32) * 0.01,
        bfc=jnp.array([0.01, -0.01], jnp.float32),
    )


def reference_forward(x_nchw, p):
    """Pure-JAX f32 reference with identical semantics (correctness check)."""
    x = jnp.transpose(x_nchw, (0, 2, 3, 1))

    def conv(x, w, b):
        w_hwio = jnp.transpose(w, (2, 3, 1, 0))
        y = lax.conv_general_dilated(
            x, w_hwio, (1, 1), "SAME",
            dimension_numbers=("NHWC", "HWIO", "NHWC"))
        return jnp.maximum(y + b, 0.0)

    def pool(x):
        B, H, W, C = x.shape
        return x.reshape(B, H // 2, 2, W // 2, 2, C).max(axis=(2, 4))

    x = pool(conv(x, p["w1"], p["b1"]))
    x = pool(conv(x, p["w2"], p["b2"]))
    B = x.shape[0]
    flat = jnp.transpose(x, (0, 3, 1, 2)).reshape(B, -1)
    return flat @ p["wfc"].T + p["bfc"]


# ------------------------------------ main ----------------------------------

if __name__ == "__main__":
    key = jax.random.PRNGKey(0)
    k_in, k_par = jax.random.split(key)
    # The module's fc1 (32*32*32 -> 2) implies a 3x128x128 input.
    x = jax.random.normal(k_in, (2, 3, 128, 128), jnp.float32)
    params = init_params(k_par)

    fwd = jax.jit(simple_cnn_forward)
    out = jax.block_until_ready(fwd(x, params))
    ref = jax.block_until_ready(reference_forward(x, params))

    assert out.shape == (2, 2), out.shape
    assert jnp.allclose(out, ref, atol=5e-2, rtol=5e-2), (out, ref)
    print("KERNEL_OK")
</pallas_src>

<mosaic_0001>
module attributes {stable_mosaic.version = 11 : i64} {
  func.func @_conv_pool_kernel(%arg0: i32, %arg1: memref<4x256x256xbf16, #tpu.memory_space<vmem>>, %arg2: memref<256x128xbf16, #tpu.memory_space<vmem>>, %arg3: memref<1x128xf32, #tpu.memory_space<vmem>>, %arg4: memref<256x128xbf16, #tpu.memory_space<vmem>>) attributes {dimension_semantics = [#tpu.dimension_semantics<parallel>], iteration_bounds = array<i64: 4>, scalar_prefetch = 0 : i64, scratch_operands = 0 : i64, tpu.core_type = #tpu.core_type<tc>, window_params = [{transform_indices = @transform_0, window_bounds = array<i64: 4, 256, 256>}, {pipeline_mode = #tpu.pipeline_mode<synchronous>, transform_indices = @transform_1, window_bounds = array<i64: 256, 128>}, {pipeline_mode = #tpu.pipeline_mode<synchronous>, transform_indices = @transform_2, window_bounds = array<i64: 1, 128>}, {transform_indices = @transform_3, window_bounds = array<i64: 256, 128>}]} {
    %c0 = arith.constant 0 : index
    %c0_0 = arith.constant 0 : index
    %0 = vector.load %arg2[%c0, %c0_0] : memref<256x128xbf16, #tpu.memory_space<vmem>>, vector<256x128xbf16>
    %c0_1 = arith.constant 0 : index
    %c0_2 = arith.constant 0 : index
    %c0_3 = arith.constant 0 : index
    %1 = vector.load %arg1[%c0_1, %c0_2, %c0_3] : memref<4x256x256xbf16, #tpu.memory_space<vmem>>, vector<1x256x256xbf16>
    %2 = vector.shape_cast %1 : vector<1x256x256xbf16> to vector<256x256xbf16>
    %cst = arith.constant dense<0.000000e+00> : vector<256x128xf32>
    %3 = tpu.matmul %2, %0, %cst {dimension_numbers = #tpu.dot_dimension_numbers<[1], [0], [0], [1], [0, 0, 1, 1], [], []>} : vector<256x256xbf16>, vector<256x128xbf16>, vector<256x128xf32> -> vector<256x128xf32>
    %c1 = arith.constant 1 : index
    %c0_4 = arith.constant 0 : index
    %c0_5 = arith.constant 0 : index
    %4 = vector.load %arg1[%c1, %c0_4, %c0_5] : memref<4x256x256xbf16, #tpu.memory_space<vmem>>, vector<1x256x256xbf16>
    %5 = vector.shape_cast %4 : vector<1x256x256xbf16> to vector<256x256xbf16>
    %cst_6 = arith.constant dense<0.000000e+00> : vector<256x128xf32>
    %6 = tpu.matmul %5, %0, %cst_6 {dimension_numbers = #tpu.dot_dimension_numbers<[1], [0], [0], [1], [0, 0, 1, 1], [], []>} : vector<256x256xbf16>, vector<256x128xbf16>, vector<256x128xf32> -> vector<256x128xf32>
    %7 = arith.maximumf %3, %6 : vector<256x128xf32>
    %c2 = arith.constant 2 : index
    %c0_7 = arith.constant 0 : index
    %c0_8 = arith.constant 0 : index
    %8 = vector.load %arg1[%c2, %c0_7, %c0_8] : memref<4x256x256xbf16, #tpu.memory_space<vmem>>, vector<1x256x256xbf16>
    %9 = vector.shape_cast %8 : vector<1x256x256xbf16> to vector<256x256xbf16>
    %cst_9 = arith.constant dense<0.000000e+00> : vector<256x128xf32>
    %10 = tpu.matmul %9, %0, %cst_9 {dimension_numbers = #tpu.dot_dimension_numbers<[1], [0], [0], [1], [0, 0, 1, 1], [], []>} : vector<256x256xbf16>, vector<256x128xbf16>, vector<256x128xf32> -> vector<256x128xf32>
    %11 = arith.maximumf %7, %10 : vector<256x128xf32>
    %c3 = arith.constant 3 : index
    %c0_10 = arith.constant 0 : index
    %c0_11 = arith.constant 0 : index
    %12 = vector.load %arg1[%c3, %c0_10, %c0_11] : memref<4x256x256xbf16, #tpu.memory_space<vmem>>, vector<1x256x256xbf16>
    %13 = vector.shape_cast %12 : vector<1x256x256xbf16> to vector<256x256xbf16>
    %cst_12 = arith.constant dense<0.000000e+00> : vector<256x128xf32>
    %14 = tpu.matmul %13, %0, %cst_12 {dimension_numbers = #tpu.dot_dimension_numbers<[1], [0], [0], [1], [0, 0, 1, 1], [], []>} : vector<256x256xbf16>, vector<256x128xbf16>, vector<256x128xf32> -> vector<256x128xf32>
    %15 = arith.maximumf %11, %14 : vector<256x128xf32>
    %c0_13 = arith.constant 0 : index
    %c0_14 = arith.constant 0 : index
    %16 = vector.load %arg3[%c0_13, %c0_14] : memref<1x128xf32, #tpu.memory_space<vmem>>, vector<1x128xf32>
    %17 = vector.broadcast %16 : vector<1x128xf32> to vector<256x128xf32>
    %18 = arith.addf %15, %17 : vector<256x128xf32>
    %cst_15 = arith.constant 0.000000e+00 : f32
    %19 = vector.broadcast %cst_15 : f32 to vector<256x128xf32>
    %20 = arith.maximumf %18, %19 : vector<256x128xf32>
    %21 = arith.truncf %20 : vector<256x128xf32> to vector<256x128xbf16>
    %c0_16 = arith.constant 0 : index
    %c0_17 = arith.constant 0 : index
    %22 = vector.load %arg4[%c0_16, %c0_17] : memref<256x128xbf16, #tpu.memory_space<vmem>>, vector<256x128xbf16>
    tpu.vector_store %arg4[%c0_16, %c0_17], %21 {strides = array<i32>} : memref<256x128xbf16, #tpu.memory_space<vmem>>, vector<256x128xbf16>,
    return
  }
  func.func @transform_0(%arg0: i32) -> (i32, i32, i32) {
    %c0_i32 = arith.constant 0 : i32
    %c0_i32_0 = arith.constant 0 : i32
    %c0_i32_1 = arith.constant 0 : i32
    return %c0_i32, %arg0, %c0_i32_0 : i32, i32, i32
  }
  func.func @transform_1(%arg0: i32) -> (i32, i32) {
    %c0_i32 = arith.constant 0 : i32
    %c0_i32_0 = arith.constant 0 : i32
    %c0_i32_1 = arith.constant 0 : i32
    return %c0_i32, %c0_i32_0 : i32, i32
  }
  func.func @transform_2(%arg0: i32) -> (i32, i32) {
    %c0_i32 = arith.constant 0 : i32
    %c0_i32_0 = arith.constant 0 : i32
    %c0_i32_1 = arith.constant 0 : i32
    return %c0_i32, %c0_i32_0 : i32, i32
  }
  func.func @transform_3(%arg0: i32) -> (i32, i32) {
    %c0_i32 = arith.constant 0 : i32
    %c0_i32_0 = arith.constant 0 : i32
    return %arg0, %c0_i32 : i32, i32
  }
}

module attributes {stable_mosaic.version = 11 : i64} {
  func.func @_conv_pool_kernel(%arg0: i32, %arg1: memref<4x128x576xbf16, #tpu.memory_space<vmem>>, %arg2: memref<576x128xbf16, #tpu.memory_space<vmem>>, %arg3: memref<1x128xf32, #tpu.memory_space<vmem>>, %arg4: memref<128x128xf32, #tpu.memory_space<vmem>>) attributes {dimension_semantics = [#tpu.dimension_semantics<parallel>], iteration_bounds = array<i64: 4>, scalar_prefetch = 0 : i64, scratch_operands = 0 : i64, tpu.core_type = #tpu.core_type<tc>, window_params = [{transform_indices = @transform_0, window_bounds = array<i64: 4, 128, 576>}, {pipeline_mode = #tpu.pipeline_mode<synchronous>, transform_indices = @transform_1, window_bounds = array<i64: 576, 128>}, {pipeline_mode = #tpu.pipeline_mode<synchronous>, transform_indices = @transform_2, window_bounds = array<i64: 1, 128>}, {transform_indices = @transform_3, window_bounds = array<i64: 128, 128>}]} {
    %c0 = arith.constant 0 : index
    %c0_0 = arith.constant 0 : index
    %0 = vector.load %arg2[%c0, %c0_0] : memref<576x128xbf16, #tpu.memory_space<vmem>>, vector<576x128xbf16>
    %c0_1 = arith.constant 0 : index
    %c0_2 = arith.constant 0 : index
    %c0_3 = arith.constant 0 : index
    %1 = vector.load %arg1[%c0_1, %c0_2, %c0_3] : memref<4x128x576xbf16, #tpu.memory_space<vmem>>, vector<1x128x576xbf16>
    %2 = vector.shape_cast %1 : vector<1x128x576xbf16> to vector<128x576xbf16>
    %cst = arith.constant dense<0.000000e+00> : vector<128x128xf32>
    %3 = tpu.matmul %2, %0, %cst {dimension_numbers = #tpu.dot_dimension_numbers<[1], [0], [0], [1], [0, 0, 1, 1], [], []>} : vector<128x576xbf16>, vector<576x128xbf16>, vector<128x128xf32> -> vector<128x128xf32>
    %c1 = arith.constant 1 : index
    %c0_4 = arith.constant 0 : index
    %c0_5 = arith.constant 0 : index
    %4 = vector.load %arg1[%c1, %c0_4, %c0_5] : memref<4x128x576xbf16, #tpu.memory_space<vmem>>, vector<1x128x576xbf16>
    %5 = vector.shape_cast %4 : vector<1x128x576xbf16> to vector<128x576xbf16>
    %cst_6 = arith.constant dense<0.000000e+00> : vector<128x128xf32>
    %6 = tpu.matmul %5, %0, %cst_6 {dimension_numbers = #tpu.dot_dimension_numbers<[1], [0], [0], [1], [0, 0, 1, 1], [], []>} : vector<128x576xbf16>, vector<576x128xbf16>, vector<128x128xf32> -> vector<128x128xf32>
    %7 = arith.maximumf %3, %6 : vector<128x128xf32>
    %c2 = arith.constant 2 : index
    %c0_7 = arith.constant 0 : index
    %c0_8 = arith.constant 0 : index
    %8 = vector.load %arg1[%c2, %c0_7, %c0_8] : memref<4x128x576xbf16, #tpu.memory_space<vmem>>, vector<1x128x576xbf16>
    %9 = vector.shape_cast %8 : vector<1x128x576xbf16> to vector<128x576xbf16>
    %cst_9 = arith.constant dense<0.000000e+00> : vector<128x128xf32>
    %10 = tpu.matmul %9, %0, %cst_9 {dimension_numbers = #tpu.dot_dimension_numbers<[1], [0], [0], [1], [0, 0, 1, 1], [], []>} : vector<128x576xbf16>, vector<576x128xbf16>, vector<128x128xf32> -> vector<128x128xf32>
    %11 = arith.maximumf %7, %10 : vector<128x128xf32>
    %c3 = arith.constant 3 : index
    %c0_10 = arith.constant 0 : index
    %c0_11 = arith.constant 0 : index
    %12 = vector.load %arg1[%c3, %c0_10, %c0_11] : memref<4x128x576xbf16, #tpu.memory_space<vmem>>, vector<1x128x576xbf16>
    %13 = vector.shape_cast %12 : vector<1x128x576xbf16> to vector<128x576xbf16>
    %cst_12 = arith.constant dense<0.000000e+00> : vector<128x128xf32>
    %14 = tpu.matmul %13, %0, %cst_12 {dimension_numbers = #tpu.dot_dimension_numbers<[1], [0], [0], [1], [0, 0, 1, 1], [], []>} : vector<128x576xbf16>, vector<576x128xbf16>, vector<128x128xf32> -> vector<128x128xf32>
    %15 = arith.maximumf %11, %14 : vector<128x128xf32>
    %c0_13 = arith.constant 0 : index
    %c0_14 = arith.constant 0 : index
    %16 = vector.load %arg3[%c0_13, %c0_14] : memref<1x128xf32, #tpu.memory_space<vmem>>, vector<1x128xf32>
    %17 = vector.broadcast %16 : vector<1x128xf32> to vector<128x128xf32>
    %18 = arith.addf %15, %17 : vector<128x128xf32>
    %cst_15 = arith.constant 0.000000e+00 : f32
    %19 = vector.broadcast %cst_15 : f32 to vector<128x128xf32>
    %20 = arith.maximumf %18, %19 : vector<128x128xf32>
    %c0_16 = arith.constant 0 : index
    %c0_17 = arith.constant 0 : index
    %21 = vector.load %arg4[%c0_16, %c0_17] : memref<128x128xf32, #tpu.memory_space<vmem>>, vector<128x128xf32>
    tpu.vector_store %arg4[%c0_16, %c0_17], %20 {strides = array<i32>} : memref<128x128xf32, #tpu.memory_space<vmem>>, vector<128x128xf32>,
    return
  }
  func.func @transform_0(%arg0: i32) -> (i32, i32, i32) {
    %c0_i32 = arith.constant 0 : i32
    %c0_i32_0 = arith.constant 0 : i32
    %c0_i32_1 = arith.constant 0 : i32
    return %c0_i32, %arg0, %c0_i32_0 : i32, i32, i32
  }
  func.func @transform_1(%arg0: i32) -> (i32, i32) {
    %c0_i32 = arith.constant 0 : i32
    %c0_i32_0 = arith.constant 0 : i32
    %c0_i32_1 = arith.constant 0 : i32
    return %c0_i32, %c0_i32_0 : i32, i32
  }
  func.func @transform_2(%arg0: i32) -> (i32, i32) {
    %c0_i32 = arith.constant 0 : i32
    %c0_i32_0 = arith.constant 0 : i32
    %c0_i32_1 = arith.constant 0 : i32
    return %c0_i32, %c0_i32_0 : i32, i32
  }
  func.func @transform_3(%arg0: i32) -> (i32, i32) {
    %c0_i32 = arith.constant 0 : i32
    %c0_i32_0 = arith.constant 0 : i32
    return %arg0, %c0_i32 : i32, i32
  }
}

module attributes {stable_mosaic.version = 11 : i64} {
  func.func @_fc_kernel(%arg0: i32, %arg1: memref<2x32768xf32, #tpu.memory_space<vmem>>, %arg2: memref<2x32768xf32, #tpu.memory_space<vmem>>, %arg3: memref<1x2xf32, #tpu.memory_space<vmem>>, %arg4: memref<2x2xf32, #tpu.memory_space<vmem>>) attributes {dimension_semantics = [#tpu.dimension_semantics<arbitrary>], iteration_bounds = array<i64: 1>, scalar_prefetch = 0 : i64, scratch_operands = 0 : i64, tpu.core_type = #tpu.core_type<tc>, window_params = [{pipeline_mode = #tpu.pipeline_mode<synchronous>, transform_indices = @transform_0, window_bounds = array<i64: 2, 32768>}, {pipeline_mode = #tpu.pipeline_mode<synchronous>, transform_indices = @transform_1, window_bounds = array<i64: 2, 32768>}, {pipeline_mode = #tpu.pipeline_mode<synchronous>, transform_indices = @transform_2, window_bounds = array<i64: 1, 2>}, {pipeline_mode = #tpu.pipeline_mode<synchronous>, transform_indices = @transform_3, window_bounds = array<i64: 2, 2>}]} {
    %c0 = arith.constant 0 : index
    %c0_0 = arith.constant 0 : index
    %0 = vector.load %arg1[%c0, %c0_0] : memref<2x32768xf32, #tpu.memory_space<vmem>>, vector<2x32768xf32>
    %c0_1 = arith.constant 0 : index
    %c0_2 = arith.constant 0 : index
    %1 = vector.load %arg2[%c0_1, %c0_2] : memref<2x32768xf32, #tpu.memory_space<vmem>>, vector<1x32768xf32>
    %2 = vector.broadcast %1 : vector<1x32768xf32> to vector<2x32768xf32>
    %3 = arith.mulf %0, %2 : vector<2x32768xf32>
    %cst = arith.constant dense<0.000000e+00> : vector<2xf32>
    %4 = vector.multi_reduction <add>, %3, %cst [1] : vector<2x32768xf32> to vector<2xf32>
    %5 = vector.shape_cast %4 : vector<2xf32> to vector<2x1xf32>
    %c1 = arith.constant 1 : index
    %c0_3 = arith.constant 0 : index
    %6 = vector.load %arg2[%c1, %c0_3] : memref<2x32768xf32, #tpu.memory_space<vmem>>, vector<1x32768xf32>
    %7 = vector.broadcast %6 : vector<1x32768xf32> to vector<2x32768xf32>
    %8 = arith.mulf %0, %7 : vector<2x32768xf32>
    %cst_4 = arith.constant dense<0.000000e+00> : vector<2xf32>
    %9 = vector.multi_reduction <add>, %8, %cst_4 [1] : vector<2x32768xf32> to vector<2xf32>
    %10 = vector.shape_cast %9 : vector<2xf32> to vector<2x1xf32>
    %11 = tpu.concatenate %5, %10 in 1 : vector<2x1xf32>, vector<2x1xf32> -> vector<2x2xf32>
    %c0_5 = arith.constant 0 : index
    %c0_6 = arith.constant 0 : index
    %12 = vector.load %arg3[%c0_5, %c0_6] : memref<1x2xf32, #tpu.memory_space<vmem>>, vector<1x2xf32>
    %13 = vector.broadcast %12 : vector<1x2xf32> to vector<2x2xf32>
    %14 = arith.addf %11, %13 : vector<2x2xf32>
    %c0_7 = arith.constant 0 : index
    %c0_8 = arith.constant 0 : index
    %15 = vector.load %arg4[%c0_7, %c0_8] : memref<2x2xf32, #tpu.memory_space<vmem>>, vector<2x2xf32>
    tpu.vector_store %arg4[%c0_7, %c0_8], %14 {strides = array<i32>} : memref<2x2xf32, #tpu.memory_space<vmem>>, vector<2x2xf32>,
    return
  }
  func.func @transform_0(%arg0: i32) -> (i32, i32) {
    %c0_i32 = arith.constant 0 : i32
    %c0_i32_0 = arith.constant 0 : i32
    %c0_i32_1 = arith.constant 0 : i32
    return %c0_i32, %c0_i32_0 : i32, i32
  }
  func.func @transform_1(%arg0: i32) -> (i32, i32) {
    %c0_i32 = arith.constant 0 : i32
    %c0_i32_0 = arith.constant 0 : i32
    %c0_i32_1 = arith.constant 0 : i32
    return %c0_i32, %c0_i32_0 : i32, i32
  }
  func.func @transform_2(%arg0: i32) -> (i32, i32) {
    %c0_i32 = arith.constant 0 : i32
    %c0_i32_0 = arith.constant 0 : i32
    %c0_i32_1 = arith.constant 0 : i32
    return %c0_i32, %c0_i32_0 : i32, i32
  }
  func.func @transform_3(%arg0: i32) -> (i32, i32) {
    %c0_i32 = arith.constant 0 : i32
    %c0_i32_0 = arith.constant 0 : i32
    %c0_i32_1 = arith.constant 0 : i32
    return %c0_i32, %c0_i32_0 : i32, i32
  }
}

</mosaic_0001>

<bundles_post_ra>
// kernel: tile.13
= control target key start
LH: loop header
LB: loop body
LE: loop exit
PB: predicated region body
PF: predicated region fallthrough
CT: control target
= control target key end

     0   :  { %s22_s0 = inlined_call_operand.vmem [shape: f32[16], index: 0, kind: input, shape index: {}]   ;;  %s23_s1 = inlined_call_operand.vmem [shape: f32[8,16], index: 1, kind: output, shape index: {}]  }
   0x1   :  { %v4_v0 = vld [vmem:[%s22_s0] ss:$0 sm:$0xff] }
   0x2   :  { %5 = vst [vmem:[%s23_s1] sm:$0xff] %v4_v0 }

// kernel: tile.14
= control target key start
LH: loop header
LB: loop body
LE: loop exit
PB: predicated region body
PF: predicated region fallthrough
CT: control target
= control target key end

     0   :  { %s69_s10 = smov 112   ;;  %s70_s11 = smov 80   ;;  %vm3_vm0 = vcmask 130048   ;;  %vm9_vm1 = vcmask 1048448   ;;  %vm15_vm2 = vcmask 917248   ;;  %vm21_vm3 = vcmask 786048   ;;  %s113_s0 = inlined_call_operand.vmem [shape: f32[8,16], index: 0, kind: input, shape index: {}]   ;;  %s114_s1 = inlined_call_operand.vmem [shape: f32[1,128], index: 1, kind: output, shape index: {}]  }
   0x1   :  { %v55_v0 = vld [vmem:[%s113_s0 + $0x7] sm:$0x1]   ;;  %v57_v1 = vld [vmem:[%s113_s0 + $0x5] sm:$0x1]   ;;  %v56_v2 = vld [vmem:[%s113_s0 + $0x6] sm:$0x1]  }
   0x2   :  { %7 = vrot.lane.b32.xlu0 %v55_v0, %s69_s10  ;;  %19 = vrot.lane.b32.xlu1 %v57_v1, %s70_s11  ;;  %v58_v3 = vld [vmem:[%s113_s0 + $0x4] sm:$0x1]   ;;  %v2_v4 = vld [vmem:[%s113_s0] sm:$0x1]   ;;  %s71_s18 = smov 96   ;;  %s72_s19 = smov 64  }
   0x3   :  { %4 = vst.msk [vmem:[#allocation0] sm:$0x1] %vm3_vm0, %v2_v4   ;;  %v59_v5 = vld [vmem:[%s113_s0 + $0x3] sm:$0x1]   ;;  %v60_v6 = vld [vmem:[%s113_s0 + $0x2] sm:$0x1]  }
   0x4   :  { %s73_s24 = smov 48   ;;  %s74_s25 = smov 32   ;;  %v61_v7 = vld [vmem:[%s113_s0 + $0x1] sm:$0x1]   ;;  %vm27_vm4 = vcmask 654848   ;;  %vm33_vm5 = vcmask 523648  }
   0x5   :  { %s75_s0 = smov 16   ;;  %vm39_vm6 = vcmask 392448   ;;  %vm45_vm7 = vcmask 261248  }
   0x6   :  { %13 = vrot.lane.b32.xlu0 %v56_v2, %s71_s18  ;;  %25 = vrot.lane.b32.xlu1 %v58_v3, %s72_s19 }
   0xa   :  { %31 = vrot.lane.b32.xlu0 %v59_v5, %s73_s24  ;;  %37 = vrot.lane.b32.xlu1 %v60_v6, %s74_s25 }
   0xe   :  { %43 = vrot.lane.b32.xlu0 %v61_v7, %s75_s0 }
  0x74   :  { %v8_v8 = vpop.permute.xlu0 %7   ;;  %v20_v9 = vpop.permute.xlu1 %19  }
  0x75   :  { %10 = vst.msk [vmem:[#allocation0] sm:$0x1] %vm9_vm1, %v8_v8  }
  0x78   :  { %v14_v10 = vpop.permute.xlu0 %13   ;;  %v26_v11 = vpop.permute.xlu1 %25  }
  0x79   :  { %16 = vst.msk [vmem:[#allocation0] sm:$0x1] %vm15_vm2, %v14_v10  }
  0x7a   :  { %22 = vst.msk [vmem:[#allocation0] sm:$0x1] %vm21_vm3, %v20_v9  }
  0x7b   :  { %28 = vst.msk [vmem:[#allocation0] sm:$0x1] %vm27_vm4, %v26_v11  }
  0x7c   :  { %v32_v12 = vpop.permute.xlu0 %31   ;;  %v38_v13 = vpop.permute.xlu1 %37  }
  0x7d   :  { %34 = vst.msk [vmem:[#allocation0] sm:$0x1] %vm33_vm5, %v32_v12  }
  0x7e   :  { %40 = vst.msk [vmem:[#allocation0] sm:$0x1] %vm39_vm6, %v38_v13  }
  0x80   :  { %v44_v14 = vpop.permute.xlu0 %43  }
  0x81   :  { %46 = vst.msk [vmem:[#allocation0] sm:$0x1] %vm45_vm7, %v44_v14  }
  0x88   :  { %v51_v15 = vld [vmem:[#allocation0] sm:$0x1] }
  0x89   :  { %54 = vst [vmem:[%s114_s1] sm:$0x1] %v51_v15 }

// kernel: simple_cnn_forward.3
= control target key start
LH: loop header
LB: loop body
LE: loop exit
PB: predicated region body
PF: predicated region fallthrough
CT: control target
= control target key end

     0   :  { %s3791_s12 = smov 0   ;;  %s3793_s13 = smov 0   ;;  %s4708_s0 = inlined_call_operand.vmem [shape: bf16[4,1024,256], index: 0, kind: input, shape index: {}]   ;;  %s4709_s1 = inlined_call_operand.vmem [shape: bf16[256,128], index: 1, kind: input, shape index: {}]   ;;  %s4710_s2 = inlined_call_operand.vmem [shape: f32[1,128], index: 2, kind: input, shape index: {}]   ;;  %s4711_s3 = inlined_call_operand.vmem [shape: bf16[1024,128], index: 3, kind: output, shape index: {}]  }
   0x1   :  { %s3795_s14 = smov 0  }
   0x2 LB: > { %s2651_s15 = sadd.s32 4294967295, %s3769_s14   ;;  %s3808_s16 = sadd.s32 1, %s3769_s14   ;;  %s3769_s14 = sphi %s3795_s14, %s4803_s14   ;;  %s3765_s13 = sphi %s3793_s13, %s4802_s13   ;;  %s3761_s12 = sphi %s3791_s12, %s4801_s12  }
   0x3   : > { %s17_s17 = ssub.s32 %s3769_s14, %s3808_s16  ;;  %s20_s18 = sadd.s32 1, %s3765_s13 }
   0x4   : > { %p18_p0 = scmp.eq.s32.totalorder %s17_s17, 0  ;;  %p27_p1 = scmp.ne.s32.totalorder %s3765_s13, %s3761_s12 }
   0x5   : > { %p28_p2 = scmp.eq.s32.totalorder %s3769_s14, 0  ;;  %p2654_p4 = scmp.ge.s32.totalorder %s3769_s14, 4 }
   0x6   : > { %s3817_s19 = scalar_select %p18_p0, %s3765_s13, %s20_s18  }
   0x7   : > { %p29_p3 = por %p28_p2, %p27_p1  ;;  %127 = sbr.rel (%p2654_p4) target bundleno = 80 (0x50), region = 24 }
   0xc   : > { %130 = sbr.rel (!%p29_p3) target bundleno = 80 (0x50), region = 28  ;;  %s132_s20 = sand.u32 (%p29_p3), 1, %s3765_s13  }
   0xd   : > { %s2939_s21 = sshll.u32 (%p29_p3), %s3769_s14, 8  ;;  %s2655_s22 = sshll.u32 (%p29_p3), %s132_s20, 10 }
   0xe   : > { %s3825_s25 = scalar_lea.vmem (%p29_p3), %s4708_s0, %s2939_s21  ;;  %s3830_s26 = scalar_lea.vmem (%p29_p3), [#allocation2], %s2655_s22 }
   0xf   : > { %v421_v0 = vld [vmem:[%s3825_s25] sm:$0xff] (%p29_p3)  ;;  %v423_v1 = vld [vmem:[%s3825_s25 + $0x8] sm:$0xff] (%p29_p3)  ;;  %v425_v2 = vld [vmem:[%s3825_s25 + $0x10] sm:$0xff] (%p29_p3) }
  0x10   : > { %422 = vst [vmem:[%s3830_s26] sm:$0xff] (%p29_p3), %v421_v0  ;;  %424 = vst [vmem:[%s3830_s26 + $0x8] sm:$0xff] (%p29_p3), %v423_v1  ;;  %v427_v3 = vld [vmem:[%s3825_s25 + $0x18] sm:$0xff] (%p29_p3)  ;;  %v429_v4 = vld [vmem:[%s3825_s25 + $0x20] sm:$0xff] (%p29_p3) }
  0x11   : > { %426 = vst [vmem:[%s3830_s26 + $0x10] sm:$0xff] %v425_v2  ;;  %v431_v5 = vld [vmem:[%s3825_s25 + $0x28] sm:$0xff]  ;;  %428 = vst [vmem:[%s3830_s26 + $0x18] sm:$0xff] %v427_v3  ;;  %v433_v6 = vld [vmem:[%s3825_s25 + $0x30] sm:$0xff] }
  0x12   : > { %430 = vst [vmem:[%s3830_s26 + $0x20] sm:$0xff] %v429_v4  ;;  %432 = vst [vmem:[%s3830_s26 + $0x28] sm:$0xff] %v431_v5  ;;  %v435_v7 = vld [vmem:[%s3825_s25 + $0x38] sm:$0xff]  ;;  %v437_v8 = vld [vmem:[%s3825_s25 + $0x40] sm:$0xff] }
  0x13   : > { %434 = vst [vmem:[%s3830_s26 + $0x30] sm:$0xff] %v433_v6  ;;  %436 = vst [vmem:[%s3830_s26 + $0x38] sm:$0xff] %v435_v7  ;;  %v439_v9 = vld [vmem:[%s3825_s25 + $0x48] sm:$0xff]  ;;  %v441_v10 = vld [vmem:[%s3825_s25 + $0x50] sm:$0xff] }
  0x14   : > { %438 = vst [vmem:[%s3830_s26 + $0x40] sm:$0xff] %v437_v8  ;;  %v443_v11 = vld [vmem:[%s3825_s25 + $0x58] sm:$0xff]  ;;  %440 = vst [vmem:[%s3830_s26 + $0x48] sm:$0xff] %v439_v9  ;;  %v445_v12 = vld [vmem:[%s3825_s25 + $0x60] sm:$0xff] }
  0x15   : > { %442 = vst [vmem:[%s3830_s26 + $0x50] sm:$0xff] %v441_v10  ;;  %444 = vst [vmem:[%s3830_s26 + $0x58] sm:$0xff] %v443_v11  ;;  %v447_v13 = vld [vmem:[%s3825_s25 + $0x68] sm:$0xff]  ;;  %v449_v14 = vld [vmem:[%s3825_s25 + $0x70] sm:$0xff] }
  0x16   : > { %446 = vst [vmem:[%s3830_s26 + $0x60] sm:$0xff] %v445_v12  ;;  %448 = vst [vmem:[%s3830_s26 + $0x68] sm:$0xff] %v447_v13  ;;  %v451_v15 = vld [vmem:[%s3825_s25 + $0x78] sm:$0xff]  ;;  %v453_v16 = vld [vmem:[%s3825_s25 + $0x80] sm:$0xff] }
  0x17   : > { %450 = vst [vmem:[%s3830_s26 + $0x70] sm:$0xff] %v449_v14  ;;  %v455_v17 = vld [vmem:[%s3825_s25 + $0x88] sm:$0xff]  ;;  %452 = vst [vmem:[%s3830_s26 + $0x78] sm:$0xff] %v451_v15  ;;  %v457_v18 = vld [vmem:[%s3825_s25 + $0x90] sm:$0xff] }
  0x18   : > { %454 = vst [vmem:[%s3830_s26 + $0x80] sm:$0xff] %v453_v16  ;;  %456 = vst [vmem:[%s3830_s26 + $0x88] sm:$0xff] %v455_v17  ;;  %v459_v19 = vld [vmem:[%s3825_s25 + $0x98] sm:$0xff]  ;;  %v461_v20 = vld [vmem:[%s3825_s25 + $0xa0] sm:$0xff] }
  0x19   : > { %458 = vst [vmem:[%s3830_s26 + $0x90] sm:$0xff] %v457_v18  ;;  %460 = vst [vmem:[%s3830_s26 + $0x98] sm:$0xff] %v459_v19  ;;  %v463_v21 = vld [vmem:[%s3825_s25 + $0xa8] sm:$0xff]  ;;  %v465_v22 = vld [vmem:[%s3825_s25 + $0xb0] sm:$0xff] }
  0x1a   : > { %462 = vst [vmem:[%s3830_s26 + $0xa0] sm:$0xff] %v461_v20  ;;  %v467_v23 = vld [vmem:[%s3825_s25 + $0xb8] sm:$0xff]  ;;  %464 = vst [vmem:[%s3830_s26 + $0xa8] sm:$0xff] %v463_v21  ;;  %v469_v24 = vld [vmem:[%s3825_s25 + $0xc0] sm:$0xff] }
  0x1b   : > { %466 = vst [vmem:[%s3830_s26 + $0xb0] sm:$0xff] %v465_v22  ;;  %468 = vst [vmem:[%s3830_s26 + $0xb8] sm:$0xff] %v467_v23  ;;  %v471_v25 = vld [vmem:[%s3825_s25 + $0xc8] sm:$0xff]  ;;  %v473_v26 = vld [vmem:[%s3825_s25 + $0xd0] sm:$0xff] }
  0x1c   : > { %470 = vst [vmem:[%s3830_s26 + $0xc0] sm:$0xff] %v469_v24  ;;  %472 = vst [vmem:[%s3830_s26 + $0xc8] sm:$0xff] %v471_v25  ;;  %v475_v27 = vld [vmem:[%s3825_s25 + $0xd8] sm:$0xff]  ;;  %v477_v28 = vld [vmem:[%s3825_s25 + $0xe0] sm:$0xff] }
  0x1d   : > { %474 = vst [vmem:[%s3830_s26 + $0xd0] sm:$0xff] %v473_v26  ;;  %v479_v29 = vld [vmem:[%s3825_s25 + $0xe8] sm:$0xff]  ;;  %476 = vst [vmem:[%s3830_s26 + $0xd8] sm:$0xff] %v475_v27  ;;  %v481_v30 = vld [vmem:[%s3825_s25 + $0xf0] sm:$0xff] }
  0x1e   : > { %478 = vst [vmem:[%s3830_s26 + $0xe0] sm:$0xff] %v477_v28  ;;  %480 = vst [vmem:[%s3830_s26 + $0xe8] sm:$0xff] %v479_v29  ;;  %v483_v31 = vld [vmem:[%s3825_s25 + $0xf8] sm:$0xff]  ;;  %v485_v32 = vld [vmem:[%s3825_s25 + $0x400] sm:$0xff] }
  0x1f   : > { %482 = vst [vmem:[%s3830_s26 + $0xf0] sm:$0xff] %v481_v30  ;;  %484 = vst [vmem:[%s3830_s26 + $0xf8] sm:$0xff] %v483_v31  ;;  %v487_v33 = vld [vmem:[%s3825_s25 + $0x408] sm:$0xff]  ;;  %v489_v34 = vld [vmem:[%s3825_s25 + $0x410] sm:$0xff] }
  0x20   : > { %486 = vst [vmem:[%s3830_s26 + $0x100] sm:$0xff] %v485_v32  ;;  %v491_v35 = vld [vmem:[%s3825_s25 + $0x418] sm:$0xff]  ;;  %488 = vst [vmem:[%s3830_s26 + $0x108] sm:$0xff] %v487_v33  ;;  %v493_v36 = vld [vmem:[%s3825_s25 + $0x420] sm:$0xff] }
  0x21   : > { %490 = vst [vmem:[%s3830_s26 + $0x110] sm:$0xff] %v489_v34  ;;  %492 = vst [vmem:[%s3830_s26 + $0x118] sm:$0xff] %v491_v35  ;;  %v495_v37 = vld [vmem:[%s3825_s25 + $0x428] sm:$0xff]  ;;  %v497_v38 = vld [vmem:[%s3825_s25 + $0x430] sm:$0xff] }
  0x22   : > { %494 = vst [vmem:[%s3830_s26 + $0x120] sm:$0xff] %v493_v36  ;;  %496 = vst [vmem:[%s3830_s26 + $0x128] sm:$0xff] %v495_v37  ;;  %v499_v39 = vld [vmem:[%s3825_s25 + $0x438] sm:$0xff]  ;;  %v501_v40 = vld [vmem:[%s3825_s25 + $0x440] sm:$0xff] }
  0x23   : > { %498 = vst [vmem:[%s3830_s26 + $0x130] sm:$0xff] %v497_v38  ;;  %v503_v41 = vld [vmem:[%s3825_s25 + $0x448] sm:$0xff]  ;;  %500 = vst [vmem:[%s3830_s26 + $0x138] sm:$0xff] %v499_v39  ;;  %v505_v42 = vld [vmem:[%s3825_s25 + $0x450] sm:$0xff] }
  0x24   : > { %502 = vst [vmem:[%s3830_s26 + $0x140] sm:$0xff] %v501_v40  ;;  %504 = vst [vmem:[%s3830_s26 + $0x148] sm:$0xff] %v503_v41  ;;  %v507_v43 = vld [vmem:[%s3825_s25 + $0x458] sm:$0xff]  ;;  %v509_v44 = vld [vmem:[%s3825_s25 + $0x460] sm:$0xff] }
  0x25   : > { %506 = vst [vmem:[%s3830_s26 + $0x150] sm:$0xff] %v505_v42  ;;  %508 = vst [vmem:[%s3830_s26 + $0x158] sm:$0xff] %v507_v43  ;;  %v511_v45 = vld [vmem:[%s3825_s25 + $0x468] sm:$0xff]  ;;  %v513_v46 = vld [vmem:[%s3825_s25 + $0x470] sm:$0xff] }
  0x26   : > { %510 = vst [vmem:[%s3830_s26 + $0x160] sm:$0xff] %v509_v44  ;;  %v515_v47 = vld [vmem:[%s3825_s25 + $0x478] sm:$0xff]  ;;  %512 = vst [vmem:[%s3830_s26 + $0x168] sm:$0xff] %v511_v45  ;;  %v517_v48 = vld [vmem:[%s3825_s25 + $0x480] sm:$0xff] }
  0x27   : > { %514 = vst [vmem:[%s3830_s26 + $0x170] sm:$0xff] %v513_v46  ;;  %516 = vst [vmem:[%s3830_s26 + $0x178] sm:$0xff] %v515_v47  ;;  %v519_v49 = vld [vmem:[%s3825_s25 + $0x488] sm:$0xff]  ;;  %v521_v50 = vld [vmem:[%s3825_s25 + $0x490] sm:$0xff] }
  0x28   : > { %518 = vst [vmem:[%s3830_s26 + $0x180] sm:$0xff] %v517_v48  ;;  %520 = vst [vmem:[%s3830_s26 + $0x188] sm:$0xff] %v519_v49  ;;  %v523_v51 = vld [vmem:[%s3825_s25 + $0x498] sm:$0xff]  ;;  %v525_v52 = vld [vmem:[%s3825_s25 + $0x4a0] sm:$0xff] }
  0x29   : > { %522 = vst [vmem:[%s3830_s26 + $0x190] sm:$0xff] %v521_v50  ;;  %v527_v53 = vld [vmem:[%s3825_s25 + $0x4a8] sm:$0xff]  ;;  %524 = vst [vmem:[%s3830_s26 + $0x198] sm:$0xff] %v523_v51  ;;  %v529_v54 = vld [vmem:[%s3825_s25 + $0x4b0] sm:$0xff] }
  0x2a   : > { %526 = vst [vmem:[%s3830_s26 + $0x1a0] sm:$0xff] %v525_v52  ;;  %528 = vst [vmem:[%s3830_s26 + $0x1a8] sm:$0xff] %v527_v53  ;;  %v531_v55 = vld [vmem:[%s3825_s25 + $0x4b8] sm:$0xff]  ;;  %v533_v56 = vld [vmem:[%s3825_s25 + $0x4c0] sm:$0xff] }
  0x2b   : > { %530 = vst [vmem:[%s3830_s26 + $0x1b0] sm:$0xff] %v529_v54  ;;  %532 = vst [vmem:[%s3830_s26 + $0x1b8] sm:$0xff] %v531_v55  ;;  %v535_v57 = vld [vmem:[%s3825_s25 + $0x4c8] sm:$0xff]  ;;  %v537_v58 = vld [vmem:[%s3825_s25 + $0x4d0] sm:$0xff] }
  0x2c   : > { %534 = vst [vmem:[%s3830_s26 + $0x1c0] sm:$0xff] %v533_v56  ;;  %v539_v59 = vld [vmem:[%s3825_s25 + $0x4d8] sm:$0xff]  ;;  %536 = vst [vmem:[%s3830_s26 + $0x1c8] sm:$0xff] %v535_v57  ;;  %v541_v60 = vld [vmem:[%s3825_s25 + $0x4e0] sm:$0xff] }
  0x2d   : > { %538 = vst [vmem:[%s3830_s26 + $0x1d0] sm:$0xff] %v537_v58  ;;  %540 = vst [vmem:[%s3830_s26 + $0x1d8] sm:$0xff] %v539_v59  ;;  %v543_v61 = vld [vmem:[%s3825_s25 + $0x4e8] sm:$0xff]  ;;  %v545_v62 = vld [vmem:[%s3825_s25 + $0x4f0] sm:$0xff] }
  0x2e   : > { %542 = vst [vmem:[%s3830_s26 + $0x1e0] sm:$0xff] %v541_v60  ;;  %544 = vst [vmem:[%s3830_s26 + $0x1e8] sm:$0xff] %v543_v61  ;;  %v547_v63 = vld [vmem:[%s3825_s25 + $0x4f8] sm:$0xff]  ;;  %v549_v0 = vld [vmem:[%s3825_s25 + $0x800] sm:$0xff] }
  0x2f   : > { %546 = vst [vmem:[%s3830_s26 + $0x1f0] sm:$0xff] %v545_v62  ;;  %v551_v1 = vld [vmem:[%s3825_s25 + $0x808] sm:$0xff]  ;;  %548 = vst [vmem:[%s3830_s26 + $0x1f8] sm:$0xff] %v547_v63  ;;  %v553_v2 = vld [vmem:[%s3825_s25 + $0x810] sm:$0xff] }
  0x30   : > { %550 = vst [vmem:[%s3830_s26 + $0x200] sm:$0xff] %v549_v0  ;;  %552 = vst [vmem:[%s3830_s26 + $0x208] sm:$0xff] %v551_v1  ;;  %v555_v3 = vld [vmem:[%s3825_s25 + $0x818] sm:$0xff]  ;;  %v557_v4 = vld [vmem:[%s3825_s25 + $0x820] sm:$0xff] }
  0x31   : > { %554 = vst [vmem:[%s3830_s26 + $0x210] sm:$0xff] %v553_v2  ;;  %556 = vst [vmem:[%s3830_s26 + $0x218] sm:$0xff] %v555_v3  ;;  %v559_v5 = vld [vmem:[%s3825_s25 + $0x828] sm:$0xff]  ;;  %v561_v6 = vld [vmem:[%s3825_s25 + $0x830] sm:$0xff] }
  0x32   : > { %558 = vst [vmem:[%s3830_s26 + $0x220] sm:$0xff] %v557_v4  ;;  %v563_v7 = vld [vmem:[%s3825_s25 + $0x838] sm:$0xff]  ;;  %560 = vst [vmem:[%s3830_s26 + $0x228] sm:$0xff] %v559_v5  ;;  %v565_v8 = vld [vmem:[%s3825_s25 + $0x840] sm:$0xff] }
  0x33   : > { %562 = vst [vmem:[%s3830_s26 + $0x230] sm:$0xff] %v561_v6  ;;  %564 = vst [vmem:[%s3830_s26 + $0x238] sm:$0xff] %v563_v7  ;;  %v567_v9 = vld [vmem:[%s3825_s25 + $0x848] sm:$0xff]  ;;  %v569_v10 = vld [vmem:[%s3825_s25 + $0x850] sm:$0xff] }
  0x34   : > { %566 = vst [vmem:[%s3830_s26 + $0x240] sm:$0xff] %v565_v8  ;;  %568 = vst [vmem:[%s3830_s26 + $0x248] sm:$0xff] %v567_v9  ;;  %v571_v11 = vld [vmem:[%s3825_s25 + $0x858] sm:$0xff]  ;;  %v573_v12 = vld [vmem:[%s3825_s25 + $0x860] sm:$0xff] }
  0x35   : > { %570 = vst [vmem:[%s3830_s26 + $0x250] sm:$0xff] %v569_v10  ;;  %v575_v13 = vld [vmem:[%s3825_s25 + $0x868] sm:$0xff]  ;;  %572 = vst [vmem:[%s3830_s26 + $0x258] sm:$0xff] %v571_v11  ;;  %v577_v14 = vld [vmem:[%s3825_s25 + $0x870] sm:$0xff] }
  0x36   : > { %574 = vst [vmem:[%s3830_s26 + $0x260] sm:$0xff] %v573_v12  ;;  %576 = vst [vmem:[%s3830_s26 + $0x268] sm:$0xff] %v575_v13  ;;  %v579_v15 = vld [vmem:[%s3825_s25 + $0x878] sm:$0xff]  ;;  %v581_v16 = vld [vmem:[%s3825_s25 + $0x880] sm:$0xff] }
  0x37   : > { %578 = vst [vmem:[%s3830_s26 + $0x270] sm:$0xff] %v577_v14  ;;  %580 = vst [vmem:[%s3830_s26 + $0x278] sm:$0xff] %v579_v15  ;;  %v583_v17 = vld [vmem:[%s3825_s25 + $0x888] sm:$0xff]  ;;  %v585_v18 = vld [vmem:[%s3825_s25 + $0x890] sm:$0xff] }
  0x38   : > { %582 = vst [vmem:[%s3830_s26 + $0x280] sm:$0xff] %v581_v16  ;;  %v587_v19 = vld [vmem:[%s3825_s25 + $0x898] sm:$0xff]  ;;  %584 = vst [vmem:[%s3830_s26 + $0x288] sm:$0xff] %v583_v17  ;;  %v589_v20 = vld [vmem:[%s3825_s25 + $0x8a0] sm:$0xff] }
  0x39   : > { %586 = vst [vmem:[%s3830_s26 + $0x290] sm:$0xff] %v585_v18  ;;  %588 = vst [vmem:[%s3830_s26 + $0x298] sm:$0xff] %v587_v19  ;;  %v591_v21 = vld [vmem:[%s3825_s25 + $0x8a8] sm:$0xff]  ;;  %v593_v22 = vld [vmem:[%s3825_s25 + $0x8b0] sm:$0xff] }
  0x3a   : > { %590 = vst [vmem:[%s3830_s26 + $0x2a0] sm:$0xff] %v589_v20  ;;  %592 = vst [vmem:[%s3830_s26 + $0x2a8] sm:$0xff] %v591_v21  ;;  %v595_v23 = vld [vmem:[%s3825_s25 + $0x8b8] sm:$0xff]  ;;  %v597_v24 = vld [vmem:[%s3825_s25 + $0x8c0] sm:$0xff] }
  0x3b   : > { %594 = vst [vmem:[%s3830_s26 + $0x2b0] sm:$0xff] %v593_v22  ;;  %v599_v25 = vld [vmem:[%s3825_s25 + $0x8c8] sm:$0xff]  ;;  %596 = vst [vmem:[%s3830_s26 + $0x2b8] sm:$0xff] %v595_v23  ;;  %v601_v26 = vld [vmem:[%s3825_s25 + $0x8d0] sm:$0xff] }
  0x3c   : > { %598 = vst [vmem:[%s3830_s26 + $0x2c0] sm:$0xff] %v597_v24  ;;  %600 = vst [vmem:[%s3830_s26 + $0x2c8] sm:$0xff] %v599_v25  ;;  %v603_v27 = vld [vmem:[%s3825_s25 + $0x8d8] sm:$0xff]  ;;  %v605_v28 = vld [vmem:[%s3825_s25 + $0x8e0] sm:$0xff] }
  0x3d   : > { %602 = vst [vmem:[%s3830_s26 + $0x2d0] sm:$0xff] %v601_v26  ;;  %604 = vst [vmem:[%s3830_s26 + $0x2d8] sm:$0xff] %v603_v27  ;;  %v607_v29 = vld [vmem:[%s3825_s25 + $0x8e8] sm:$0xff]  ;;  %v609_v30 = vld [vmem:[%s3825_s25 + $0x8f0] sm:$0xff] }
  0x3e   : > { %606 = vst [vmem:[%s3830_s26 + $0x2e0] sm:$0xff] %v605_v28  ;;  %v611_v31 = vld [vmem:[%s3825_s25 + $0x8f8] sm:$0xff]  ;;  %608 = vst [vmem:[%s3830_s26 + $0x2e8] sm:$0xff] %v607_v29  ;;  %v613_v32 = vld [vmem:[%s3825_s25 + $0xc00] sm:$0xff] }
  0x3f   : > { %610 = vst [vmem:[%s3830_s26 + $0x2f0] sm:$0xff] %v609_v30  ;;  %612 = vst [vmem:[%s3830_s26 + $0x2f8] sm:$0xff] %v611_v31  ;;  %v615_v33 = vld [vmem:[%s3825_s25 + $0xc08] sm:$0xff]  ;;  %v617_v34 = vld [vmem:[%s3825_s25 + $0xc10] sm:$0xff] }
  0x40   : > { %614 = vst [vmem:[%s3830_s26 + $0x300] sm:$0xff] %v613_v32  ;;  %616 = vst [vmem:[%s3830_s26 + $0x308] sm:$0xff] %v615_v33  ;;  %v619_v35 = vld [vmem:[%s3825_s25 + $0xc18] sm:$0xff]  ;;  %v621_v36 = vld [vmem:[%s3825_s25 + $0xc20] sm:$0xff] }
  0x41   : > { %618 = vst [vmem:[%s3830_s26 + $0x310] sm:$0xff] %v617_v34  ;;  %v623_v37 = vld [vmem:[%s3825_s25 + $0xc28] sm:$0xff]  ;;  %620 = vst [vmem:[%s3830_s26 + $0x318] sm:$0xff] %v619_v35  ;;  %v625_v38 = vld [vmem:[%s3825_s25 + $0xc30] sm:$0xff] }
  0x42   : > { %622 = vst [vmem:[%s3830_s26 + $0x320] sm:$0xff] %v621_v36  ;;  %624 = vst [vmem:[%s3830_s26 + $0x328] sm:$0xff] %v623_v37  ;;  %v627_v39 = vld [vmem:[%s3825_s25 + $0xc38] sm:$0xff]  ;;  %v629_v40 = vld [vmem:[%s3825_s25 + $0xc40] sm:$0xff] }
  0x43   : > { %626 = vst [vmem:[%s3830_s26 + $0x330] sm:$0xff] %v625_v38  ;;  %628 = vst [vmem:[%s3830_s26 + $0x338] sm:$0xff] %v627_v39  ;;  %v631_v41 = vld [vmem:[%s3825_s25 + $0xc48] sm:$0xff]  ;;  %v633_v42 = vld [vmem:[%s3825_s25 + $0xc50] sm:$0xff] }
  0x44   : > { %630 = vst [vmem:[%s3830_s26 + $0x340] sm:$0xff] %v629_v40  ;;  %v635_v43 = vld [vmem:[%s3825_s25 + $0xc58] sm:$0xff]  ;;  %632 = vst [vmem:[%s3830_s26 + $0x348] sm:$0xff] %v631_v41  ;;  %v637_v44 = vld [vmem:[%s3825_s25 + $0xc60] sm:$0xff] }
  0x45   : > { %634 = vst [vmem:[%s3830_s26 + $0x350] sm:$0xff] %v633_v42  ;;  %636 = vst [vmem:[%s3830_s26 + $0x358] sm:$0xff] %v635_v43  ;;  %v639_v45 = vld [vmem:[%s3825_s25 + $0xc68] sm:$0xff]  ;;  %v641_v46 = vld [vmem:[%s3825_s25 + $0xc70] sm:$0xff] }
  0x46   : > { %638 = vst [vmem:[%s3830_s26 + $0x360] sm:$0xff] %v637_v44  ;;  %640 = vst [vmem:[%s3830_s26 + $0x368] sm:$0xff] %v639_v45  ;;  %v643_v47 = vld [vmem:[%s3825_s25 + $0xc78] sm:$0xff]  ;;  %v645_v48 = vld [vmem:[%s3825_s25 + $0xc80] sm:$0xff] }
  0x47   : > { %642 = vst [vmem:[%s3830_s26 + $0x370] sm:$0xff] %v641_v46  ;;  %v647_v49 = vld [vmem:[%s3825_s25 + $0xc88] sm:$0xff]  ;;  %644 = vst [vmem:[%s3830_s26 + $0x378] sm:$0xff] %v643_v47  ;;  %v649_v50 = vld [vmem:[%s3825_s25 + $0xc90] sm:$0xff] }
  0x48   : > { %646 = vst [vmem:[%s3830_s26 + $0x380] sm:$0xff] %v645_v48  ;;  %648 = vst [vmem:[%s3830_s26 + $0x388] sm:$0xff] %v647_v49  ;;  %v651_v51 = vld [vmem:[%s3825_s25 + $0xc98] sm:$0xff]  ;;  %v653_v52 = vld [vmem:[%s3825_s25 + $0xca0] sm:$0xff] }
  0x49   : > { %650 = vst [vmem:[%s3830_s26 + $0x390] sm:$0xff] %v649_v50  ;;  %652 = vst [vmem:[%s3830_s26 + $0x398] sm:$0xff] %v651_v51  ;;  %v655_v53 = vld [vmem:[%s3825_s25 + $0xca8] sm:$0xff]  ;;  %v657_v54 = vld [vmem:[%s3825_s25 + $0xcb0] sm:$0xff] }
  0x4a   : > { %654 = vst [vmem:[%s3830_s26 + $0x3a0] sm:$0xff] %v653_v52  ;;  %v659_v55 = vld [vmem:[%s3825_s25 + $0xcb8] sm:$0xff]  ;;  %656 = vst [vmem:[%s3830_s26 + $0x3a8] sm:$0xff] %v655_v53  ;;  %v661_v56 = vld [vmem:[%s3825_s25 + $0xcc0] sm:$0xff] }
  0x4b   : > { %658 = vst [vmem:[%s3830_s26 + $0x3b0] sm:$0xff] %v657_v54  ;;  %660 = vst [vmem:[%s3830_s26 + $0x3b8] sm:$0xff] %v659_v55  ;;  %v663_v57 = vld [vmem:[%s3825_s25 + $0xcc8] sm:$0xff]  ;;  %v665_v58 = vld [vmem:[%s3825_s25 + $0xcd0] sm:$0xff] }
  0x4c   : > { %662 = vst [vmem:[%s3830_s26 + $0x3c0] sm:$0xff] %v661_v56  ;;  %664 = vst [vmem:[%s3830_s26 + $0x3c8] sm:$0xff] %v663_v57  ;;  %v667_v59 = vld [vmem:[%s3825_s25 + $0xcd8] sm:$0xff]  ;;  %v669_v60 = vld [vmem:[%s3825_s25 + $0xce0] sm:$0xff] }
  0x4d   : > { %666 = vst [vmem:[%s3830_s26 + $0x3d0] sm:$0xff] %v665_v58  ;;  %v671_v61 = vld [vmem:[%s3825_s25 + $0xce8] sm:$0xff]  ;;  %668 = vst [vmem:[%s3830_s26 + $0x3d8] sm:$0xff] %v667_v59  ;;  %v673_v62 = vld [vmem:[%s3825_s25 + $0xcf0] sm:$0xff] }
  0x4e   : > { %670 = vst [vmem:[%s3830_s26 + $0x3e0] sm:$0xff] %v669_v60  ;;  %672 = vst [vmem:[%s3830_s26 + $0x3e8] sm:$0xff] %v671_v61  ;;  %v675_v63 = vld [vmem:[%s3825_s25 + $0xcf8] sm:$0xff] }
  0x4f   : > { %674 = vst [vmem:[%s3830_s26 + $0x3f0] sm:$0xff] %v673_v62  ;;  %676 = vst [vmem:[%s3830_s26 + $0x3f8] sm:$0xff] %v675_v63 }
  0x50 PF: > { %p2659_p5 = scmp.ge.s32.totalorder %s3769_s14, 1  ;;  %p681_p6 = scmp.lt.s32.totalorder %s3769_s14, 5 }
  0x52   : > { %p682_p7 = pnand %p2659_p5, %p681_p6 }
  0x54   : > { %685 = sbr.rel (%p682_p7) target bundleno = 582 (0x246), region = 66 }
  0x59   : > { %v3539_v0 = vld [vmem:[%s4709_s1 + $0x78] sm:$0xff]   ;;  %v4096_v2 = vld [vmem:[%s4709_s1 + $0x70] sm:$0xff]   ;;  %v4108_v4 = vld [vmem:[%s4709_s1 + $0x68] sm:$0xff]   ;;  %s688_s20 = sand.u32 1, %s3761_s12   ;;  %s2661_s18 = sshll.u32 %s2651_s15, 5 }
  0x5a   : > { %v3540_v1 = vld [vmem:[%s4709_s1 + $0x38] sm:$0xff]   ;;  %3067 = vmatprep.subr.bf16.mxu0 %v3539_v0  ;;  %3179 = vmatprep.subr.bf16.mxu1 %v3539_v0  ;;  %v4101_v3 = vld [vmem:[%s4709_s1 + $0x30] sm:$0xff]   ;;  %v4115_v5 = vld [vmem:[%s4709_s1 + $0x28] sm:$0xff]   ;;  %s2660_s23 = sshll.u32 %s688_s20, 10  ;;  %p713_p8 = scmp.lt.s32.totalorder %s2661_s18, 127 }
  0x5b   : > { %3068 = vmatpush3.bf16.msra.mxu0 %v3540_v1  ;;  %3180 = vmatpush3.bf16.msra.mxu1 %v3540_v1  ;;  %v4122_v6 = vld [vmem:[%s4709_s1 + $0x60] sm:$0xff]   ;;  %v4137_v8 = vld [vmem:[%s4709_s1 + $0x58] sm:$0xff]   ;;  %v4151_v10 = vld [vmem:[%s4709_s1 + $0x50] sm:$0xff]   ;;  %s4153_s29 = scalar_lea.vmem [#allocation2], %s2660_s23 }
  0x5c   : > { %3069 = vmatprep.subr.bf16.mxu0 %v4096_v2  ;;  %3181 = vmatprep.subr.bf16.mxu1 %v4096_v2  ;;  %v4130_v7 = vld [vmem:[%s4709_s1 + $0x20] sm:$0xff]   ;;  %v4144_v9 = vld [vmem:[%s4709_s1 + $0x18] sm:$0xff]   ;;  %v4162_v13 = vld [vmem:[%s4709_s1 + $0x10] sm:$0xff]   ;;  %s4805_s18 = smov (!%p713_p8, %s2661_s18), 127 }
  0x5d   : > { %v3557_v11 = vld [vmem:[%s4153_s29 + $0x4] ss:$8 sps:$4 sm:$0xff]   ;;  %v3555_v18 = vld [vmem:[%s4153_s29] ss:$8 sps:$4 sm:$0xff]   ;;  %v3561_v20 = vld [vmem:[%s4153_s29 + $0x14] ss:$8 sps:$4 sm:$0xff]  }
  0x5e   : > { %v3560_v12 = vld [vmem:[%s4153_s29 + $0x104] ss:$8 sps:$4 sm:$0xff]   ;;  %1071 = vmatprep.mubr.bf16.mxu0 %v3557_v11  ;;  %v3558_v19 = vld [vmem:[%s4153_s29 + $0x100] ss:$8 sps:$4 sm:$0xff]   ;;  %v3563_v21 = vld [vmem:[%s4153_s29 + $0x114] ss:$8 sps:$4 sm:$0xff]  }
  0x5f   : > { %3070 = vmatpush3.bf16.msra.mxu0 %v4101_v3  ;;  %3182 = vmatpush3.bf16.msra.mxu1 %v4101_v3  ;;  %v4169_v14 = vld [vmem:[%s4709_s1 + $0x48] sm:$0xff]   ;;  %v4183_v16 = vld [vmem:[%s4709_s1 + $0x40] sm:$0xff]   ;;  %v3565_v22 = vld [vmem:[%s4153_s29 + $0x10] ss:$8 sps:$4 sm:$0xff]   ;;  %s2662_s14 = sshll.u32 %s4805_s18, 2 }
  0x60   : > { %3071 = vmatprep.subr.bf16.mxu0 %v4108_v4  ;;  %3183 = vmatprep.subr.bf16.mxu1 %v4108_v4  ;;  %v4176_v15 = vld [vmem:[%s4709_s1 + $0x8] sm:$0xff]   ;;  %v4190_v17 = vld [vmem:[%s4709_s1] sm:$0xff]   ;;  %v3566_v23 = vld [vmem:[%s4153_s29 + $0x110] ss:$8 sps:$4 sm:$0xff]   ;;  %s4563_s23 = scalar_lea.vmem %s4711_s3, %s2662_s14 }
  0x61   : > { %1425 = vmatprep.mubr.bf16.mxu1 %v3560_v12  ;;  %v3567_v24 = vld [vmem:[%s4153_s29 + $0x24] ss:$8 sps:$4 sm:$0xff]   ;;  %v3571_v26 = vld [vmem:[%s4153_s29 + $0x20] ss:$8 sps:$4 sm:$0xff]   ;;  %v3573_v28 = vld [vmem:[%s4153_s29 + $0x34] ss:$8 sps:$4 sm:$0xff]  }
  0x62   : > { %v3569_v25 = vld [vmem:[%s4153_s29 + $0x124] ss:$8 sps:$4 sm:$0xff]   ;;  %v3572_v27 = vld [vmem:[%s4153_s29 + $0x120] ss:$8 sps:$4 sm:$0xff]   ;;  %v3575_v29 = vld [vmem:[%s4153_s29 + $0x134] ss:$8 sps:$4 sm:$0xff]  }
  0x63   : > { %3072 = vmatpush3.bf16.msra.mxu0 %v4115_v5  ;;  %3184 = vmatpush3.bf16.msra.mxu1 %v4115_v5  ;;  %v3577_v30 = vld [vmem:[%s4153_s29 + $0x30] ss:$8 sps:$4 sm:$0xff]   ;;  %v3579_v32 = vld [vmem:[%s4153_s29 + $0x44] ss:$8 sps:$4 sm:$0xff]   ;;  %v3583_v34 = vld [vmem:[%s4153_s29 + $0x40] ss:$8 sps:$4 sm:$0xff]  }
  0x64   : > { %3073 = vmatprep.subr.bf16.mxu0 %v4122_v6  ;;  %3185 = vmatprep.subr.bf16.mxu1 %v4122_v6  ;;  %v3578_v31 = vld [vmem:[%s4153_s29 + $0x130] ss:$8 sps:$4 sm:$0xff]   ;;  %v3581_v33 = vld [vmem:[%s4153_s29 + $0x144] ss:$8 sps:$4 sm:$0xff]   ;;  %v3584_v35 = vld [vmem:[%s4153_s29 + $0x140] ss:$8 sps:$4 sm:$0xff]  }
  0x65   : > { %v3585_v36 = vld [vmem:[%s4153_s29 + $0x54] ss:$8 sps:$4 sm:$0xff]   ;;  %v3589_v38 = vld [vmem:[%s4153_s29 + $0x50] ss:$8 sps:$4 sm:$0xff]   ;;  %v3591_v40 = vld [vmem:[%s4153_s29 + $0x64] ss:$8 sps:$4 sm:$0xff]  }
  0x66   : > { %v3587_v37 = vld [vmem:[%s4153_s29 + $0x154] ss:$8 sps:$4 sm:$0xff]   ;;  %v3590_v39 = vld [vmem:[%s4153_s29 + $0x150] ss:$8 sps:$4 sm:$0xff]   ;;  %v3593_v41 = vld [vmem:[%s4153_s29 + $0x164] ss:$8 sps:$4 sm:$0xff]  }
  0x67   : > { %3074 = vmatpush3.bf16.msra.mxu0 %v4130_v7  ;;  %3186 = vmatpush3.bf16.msra.mxu1 %v4130_v7  ;;  %v3595_v42 = vld [vmem:[%s4153_s29 + $0x60] ss:$8 sps:$4 sm:$0xff]   ;;  %v3597_v44 = vld [vmem:[%s4153_s29 + $0x74] ss:$8 sps:$4 sm:$0xff]   ;;  %v3601_v46 = vld [vmem:[%s4153_s29 + $0x70] ss:$8 sps:$4 sm:$0xff]  }
  0x68   : > { %3075 = vmatprep.subr.bf16.mxu0 %v4137_v8  ;;  %3187 = vmatprep.subr.bf16.mxu1 %v4137_v8  ;;  %v3596_v43 = vld [vmem:[%s4153_s29 + $0x160] ss:$8 sps:$4 sm:$0xff]   ;;  %v3599_v45 = vld [vmem:[%s4153_s29 + $0x174] ss:$8 sps:$4 sm:$0xff]   ;;  %v3602_v47 = vld [vmem:[%s4153_s29 + $0x170] ss:$8 sps:$4 sm:$0xff]  }
  0x69   : > { %v3603_v48 = vld [vmem:[%s4153_s29 + $0x84] ss:$8 sps:$4 sm:$0xff]   ;;  %v3607_v50 = vld [vmem:[%s4153_s29 + $0x80] ss:$8 sps:$4 sm:$0xff]   ;;  %v3609_v52 = vld [vmem:[%s4153_s29 + $0x94] ss:$8 sps:$4 sm:$0xff]  }
  0x6a   : > { %v3605_v49 = vld [vmem:[%s4153_s29 + $0x184] ss:$8 sps:$4 sm:$0xff]   ;;  %v3608_v51 = vld [vmem:[%s4153_s29 + $0x180] ss:$8 sps:$4 sm:$0xff]   ;;  %v3611_v53 = vld [vmem:[%s4153_s29 + $0x194] ss:$8 sps:$4 sm:$0xff]  }
  0x6b   : > { %3076 = vmatpush3.bf16.msra.mxu0 %v4144_v9  ;;  %3188 = vmatpush3.bf16.msra.mxu1 %v4144_v9  ;;  %v3613_v54 = vld [vmem:[%s4153_s29 + $0x90] ss:$8 sps:$4 sm:$0xff]   ;;  %v3615_v56 = vld [vmem:[%s4153_s29 + $0xa4] ss:$8 sps:$4 sm:$0xff]   ;;  %v3619_v58 = vld [vmem:[%s4153_s29 + $0xa0] ss:$8 sps:$4 sm:$0xff]  }
  0x6c   : > { %3077 = vmatprep.subr.bf16.mxu0 %v4151_v10  ;;  %3189 = vmatprep.subr.bf16.mxu1 %v4151_v10  ;;  %v3614_v55 = vld [vmem:[%s4153_s29 + $0x190] ss:$8 sps:$4 sm:$0xff]   ;;  %v3617_v57 = vld [vmem:[%s4153_s29 + $0x1a4] ss:$8 sps:$4 sm:$0xff]   ;;  %v3620_v59 = vld [vmem:[%s4153_s29 + $0x1a0] ss:$8 sps:$4 sm:$0xff]  }
  0x6d   : > { %v3621_v60 = vld [vmem:[%s4153_s29 + $0xb4] ss:$8 sps:$4 sm:$0xff]   ;;  %v3625_v62 = vld [vmem:[%s4153_s29 + $0xb0] ss:$8 sps:$4 sm:$0xff]   ;;  %v3644_v11 = vld [vmem:[%s4153_s29 + $0x1e0] ss:$8 sps:$4 sm:$0xff]  }
  0x6e   : > { %v3623_v61 = vld [vmem:[%s4153_s29 + $0x1b4] ss:$8 sps:$4 sm:$0xff]   ;;  %v3626_v63 = vld [vmem:[%s4153_s29 + $0x1b0] ss:$8 sps:$4 sm:$0xff]  }
  0x6f   : > { %3078 = vmatpush3.bf16.msra.mxu0 %v4162_v13  ;;  %3190 = vmatpush3.bf16.msra.mxu1 %v4162_v13  ;;  %v3645_v12 = vld [vmem:[%s4153_s29 + $0xf4] ss:$8 sps:$4 sm:$0xff]  }
  0x70   : > { %3079 = vmatprep.subr.bf16.mxu0 %v4169_v14  ;;  %3191 = vmatprep.subr.bf16.mxu1 %v4169_v14 }
  0x73   : > { %3080 = vmatpush3.bf16.msra.mxu0 %v4176_v15  ;;  %3192 = vmatpush3.bf16.msra.mxu1 %v4176_v15 }
  0x74   : > { %3081 = vmatprep.subr.bf16.mxu0 %v4183_v16  ;;  %3193 = vmatprep.subr.bf16.mxu1 %v4183_v16 }
  0x77   : > { %3082 = vmatpush3.bf16.msra.mxu0 %v4190_v17  ;;  %3194 = vmatpush3.bf16.msra.mxu1 %v4190_v17 }
  0x78   : > { %3291 = vmatprep.subr.bf16.mxu0 %v3539_v0  ;;  %3403 = vmatprep.subr.bf16.mxu1 %v3539_v0  ;;  %v3627_v0 = vld [vmem:[%s4153_s29 + $0xc4] ss:$8 sps:$4 sm:$0xff]  }
  0x7a   : > { %1072 = vmatmul.mubr.bf16.vlgmr.msra.gmra.mxu0 %v3555_v18  ;;  %1426 = vmatmul.mubr.bf16.vlgmr.msra.gmra.mxu1 %v3558_v19  ;;  %v3651_v18 = vld [vmem:[%s4153_s29 + $0x200] ss:$8 sps:$4 sm:$0xff]  }
  0x7b   : > { %3292 = vmatpush3.bf16.msra.mxu0 %v3540_v1  ;;  %3404 = vmatpush3.bf16.msra.mxu1 %v3540_v1  ;;  %v3629_v1 = vld [vmem:[%s4153_s29 + $0x1c4] ss:$8 sps:$4 sm:$0xff]   ;;  %v3654_v19 = vld [vmem:[%s4153_s29 + $0x300] ss:$8 sps:$4 sm:$0xff]  }
  0x7c   : > { %1079 = vmatprep.mubr.bf16.mxu0 %v3561_v20  ;;  %1433 = vmatprep.mubr.bf16.mxu1 %v3563_v21  ;;  %v3657_v20 = vld [vmem:[%s4153_s29 + $0x214] ss:$8 sps:$4 sm:$0xff]  }
  0x7d   : > { %3293 = vmatprep.subr.bf16.mxu0 %v4096_v2  ;;  %3405 = vmatprep.subr.bf16.mxu1 %v4096_v2  ;;  %v3631_v2 = vld [vmem:[%s4153_s29 + $0xc0] ss:$8 sps:$4 sm:$0xff]   ;;  %v3659_v21 = vld [vmem:[%s4153_s29 + $0x314] ss:$8 sps:$4 sm:$0xff]  }
  0x7f   : > { %3294 = vmatpush3.bf16.msra.mxu0 %v4101_v3  ;;  %3406 = vmatpush3.bf16.msra.mxu1 %v4101_v3  ;;  %v3632_v3 = vld [vmem:[%s4153_s29 + $0x1c0] ss:$8 sps:$4 sm:$0xff]  }
  0x80   : > { %3295 = vmatprep.subr.bf16.mxu0 %v4108_v4  ;;  %3407 = vmatprep.subr.bf16.mxu1 %v4108_v4  ;;  %v3633_v4 = vld [vmem:[%s4153_s29 + $0xd4] ss:$8 sps:$4 sm:$0xff]  }
  0x82   : > { %1080 = vmatmul.mubr.bf16.gmra.mxu0 %v3565_v22  ;;  %1434 = vmatmul.mubr.bf16.gmra.mxu1 %v3566_v23  ;;  %v3661_v22 = vld [vmem:[%s4153_s29 + $0x210] ss:$8 sps:$4 sm:$0xff]  }
  0x83   : > { %1087 = vmatprep.mubr.bf16.mxu0 %v3567_v24  ;;  %1441 = vmatprep.mubr.bf16.mxu1 %v3569_v25  ;;  %v3662_v23 = vld [vmem:[%s4153_s29 + $0x310] ss:$8 sps:$4 sm:$0xff]   ;;  %v3663_v24 = vld [vmem:[%s4153_s29 + $0x224] ss:$8 sps:$4 sm:$0xff]  }
  0x84   : > { %3296 = vmatpush3.bf16.msra.mxu0 %v4115_v5  ;;  %3408 = vmatpush3.bf16.msra.mxu1 %v4115_v5  ;;  %v3635_v5 = vld [vmem:[%s4153_s29 + $0x1d4] ss:$8 sps:$4 sm:$0xff]   ;;  %v3665_v25 = vld [vmem:[%s4153_s29 + $0x324] ss:$8 sps:$4 sm:$0xff]  }
  0x85   : > { %3297 = vmatprep.subr.bf16.mxu0 %v4122_v6  ;;  %3409 = vmatprep.subr.bf16.mxu1 %v4122_v6  ;;  %v3637_v6 = vld [vmem:[%s4153_s29 + $0xd0] ss:$8 sps:$4 sm:$0xff]  }
  0x88   : > { %3298 = vmatpush3.bf16.msra.mxu0 %v4130_v7  ;;  %3410 = vmatpush3.bf16.msra.mxu1 %v4130_v7  ;;  %v3638_v7 = vld [vmem:[%s4153_s29 + $0x1d0] ss:$8 sps:$4 sm:$0xff]  }
  0x89   : > { %3299 = vmatprep.subr.bf16.mxu0 %v4137_v8  ;;  %3411 = vmatprep.subr.bf16.mxu1 %v4137_v8  ;;  %v3639_v8 = vld [vmem:[%s4153_s29 + $0xe4] ss:$8 sps:$4 sm:$0xff]  }
  0x8a   : > { %1088 = vmatmul.mubr.bf16.gmra.mxu0 %v3571_v26  ;;  %1442 = vmatmul.mubr.bf16.gmra.mxu1 %v3572_v27  ;;  %v3667_v26 = vld [vmem:[%s4153_s29 + $0x220] ss:$8 sps:$4 sm:$0xff]  }
  0x8b   : > { %1095 = vmatprep.mubr.bf16.mxu0 %v3573_v28  ;;  %1449 = vmatprep.mubr.bf16.mxu1 %v3575_v29  ;;  %v3668_v27 = vld [vmem:[%s4153_s29 + $0x320] ss:$8 sps:$4 sm:$0xff]   ;;  %v3669_v28 = vld [vmem:[%s4153_s29 + $0x234] ss:$8 sps:$4 sm:$0xff]  }
  0x8c   : > { %3300 = vmatpush3.bf16.msra.mxu0 %v4144_v9  ;;  %3412 = vmatpush3.bf16.msra.mxu1 %v4144_v9  ;;  %v3641_v9 = vld [vmem:[%s4153_s29 + $0x1e4] ss:$8 sps:$4 sm:$0xff]   ;;  %v3671_v29 = vld [vmem:[%s4153_s29 + $0x334] ss:$8 sps:$4 sm:$0xff]  }
  0x8d   : > { %3301 = vmatprep.subr.bf16.mxu0 %v4151_v10  ;;  %3413 = vmatprep.subr.bf16.mxu1 %v4151_v10  ;;  %v3643_v10 = vld [vmem:[%s4153_s29 + $0xe0] ss:$8 sps:$4 sm:$0xff]  }
  0x90   : > { %3302 = vmatpush3.bf16.msra.mxu0 %v4162_v13  ;;  %3414 = vmatpush3.bf16.msra.mxu1 %v4162_v13  ;;  %v3647_v13 = vld [vmem:[%s4153_s29 + $0x1f4] ss:$8 sps:$4 sm:$0xff]  }
  0x91   : > { %3303 = vmatprep.subr.bf16.mxu0 %v4169_v14  ;;  %3415 = vmatprep.subr.bf16.mxu1 %v4169_v14  ;;  %v3649_v14 = vld [vmem:[%s4153_s29 + $0xf0] ss:$8 sps:$4 sm:$0xff]  }
  0x92   : > { %1096 = vmatmul.mubr.bf16.gmra.mxu0 %v3577_v30  ;;  %1450 = vmatmul.mubr.bf16.gmra.mxu1 %v3578_v31  ;;  %v3673_v30 = vld [vmem:[%s4153_s29 + $0x230] ss:$8 sps:$4 sm:$0xff]  }
  0x93   : > { %1103 = vmatprep.mubr.bf16.mxu0 %v3579_v32  ;;  %1457 = vmatprep.mubr.bf16.mxu1 %v3581_v33  ;;  %v3674_v31 = vld [vmem:[%s4153_s29 + $0x330] ss:$8 sps:$4 sm:$0xff]   ;;  %v3675_v32 = vld [vmem:[%s4153_s29 + $0x244] ss:$8 sps:$4 sm:$0xff]  }
  0x94   : > { %3304 = vmatpush3.bf16.msra.mxu0 %v4176_v15  ;;  %3416 = vmatpush3.bf16.msra.mxu1 %v4176_v15  ;;  %v3650_v15 = vld [vmem:[%s4153_s29 + $0x1f0] ss:$8 sps:$4 sm:$0xff]   ;;  %v3677_v33 = vld [vmem:[%s4153_s29 + $0x344] ss:$8 sps:$4 sm:$0xff]  }
  0x95   : > { %3305 = vmatprep.subr.bf16.mxu0 %v4183_v16  ;;  %3417 = vmatprep.subr.bf16.mxu1 %v4183_v16  ;;  %v3653_v16 = vld [vmem:[%s4153_s29 + $0x204] ss:$8 sps:$4 sm:$0xff]  }
  0x98   : > { %3306 = vmatpush3.bf16.msra.mxu0 %v4190_v17  ;;  %3418 = vmatpush3.bf16.msra.mxu1 %v4190_v17  ;;  %v3656_v17 = vld [vmem:[%s4153_s29 + $0x304] ss:$8 sps:$4 sm:$0xff]  }
  0x9a   : > { %1104 = vmatmul.mubr.bf16.gmra.mxu0 %v3583_v34  ;;  %1458 = vmatmul.mubr.bf16.gmra.mxu1 %v3584_v35  ;;  %v3679_v34 = vld [vmem:[%s4153_s29 + $0x240] ss:$8 sps:$4 sm:$0xff]  }
  0x9b   : > { %1111 = vmatprep.mubr.bf16.mxu0 %v3585_v36  ;;  %1465 = vmatprep.mubr.bf16.mxu1 %v3587_v37  ;;  %v3680_v35 = vld [vmem:[%s4153_s29 + $0x340] ss:$8 sps:$4 sm:$0xff]   ;;  %v3681_v36 = vld [vmem:[%s4153_s29 + $0x254] ss:$8 sps:$4 sm:$0xff]  }
  0x9c   : > { %v3683_v37 = vld [vmem:[%s4153_s29 + $0x354] ss:$8 sps:$4 sm:$0xff]  }
  0xa2   : > { %1112 = vmatmul.mubr.bf16.gmra.mxu0 %v3589_v38  ;;  %1466 = vmatmul.mubr.bf16.gmra.mxu1 %v3590_v39  ;;  %v3685_v38 = vld [vmem:[%s4153_s29 + $0x250] ss:$8 sps:$4 sm:$0xff]  }
  0xa3   : > { %1119 = vmatprep.mubr.bf16.mxu0 %v3591_v40  ;;  %1473 = vmatprep.mubr.bf16.mxu1 %v3593_v41  ;;  %v3686_v39 = vld [vmem:[%s4153_s29 + $0x350] ss:$8 sps:$4 sm:$0xff]   ;;  %v3687_v40 = vld [vmem:[%s4153_s29 + $0x264] ss:$8 sps:$4 sm:$0xff]  }
  0xa4   : > { %v3689_v41 = vld [vmem:[%s4153_s29 + $0x364] ss:$8 sps:$4 sm:$0xff]  }
  0xaa   : > { %1120 = vmatmul.mubr.bf16.gmra.mxu0 %v3595_v42  ;;  %1474 = vmatmul.mubr.bf16.gmra.mxu1 %v3596_v43  ;;  %v3691_v42 = vld [vmem:[%s4153_s29 + $0x260] ss:$8 sps:$4 sm:$0xff]  }
  0xab   : > { %1127 = vmatprep.mubr.bf16.mxu0 %v3597_v44  ;;  %1481 = vmatprep.mubr.bf16.mxu1 %v3599_v45  ;;  %v3692_v43 = vld [vmem:[%s4153_s29 + $0x360] ss:$8 sps:$4 sm:$0xff]   ;;  %v3693_v44 = vld [vmem:[%s4153_s29 + $0x274] ss:$8 sps:$4 sm:$0xff]  }
  0xac   : > { %v3695_v45 = vld [vmem:[%s4153_s29 + $0x374] ss:$8 sps:$4 sm:$0xff]  }
  0xb2   : > { %1128 = vmatmul.mubr.bf16.gmra.mxu0 %v3601_v46  ;;  %1482 = vmatmul.mubr.bf16.gmra.mxu1 %v3602_v47  ;;  %v3697_v46 = vld [vmem:[%s4153_s29 + $0x270] ss:$8 sps:$4 sm:$0xff]  }
  0xb3   : > { %1135 = vmatprep.mubr.bf16.mxu0 %v3603_v48  ;;  %1489 = vmatprep.mubr.bf16.mxu1 %v3605_v49  ;;  %v3698_v47 = vld [vmem:[%s4153_s29 + $0x370] ss:$8 sps:$4 sm:$0xff]   ;;  %v3699_v48 = vld [vmem:[%s4153_s29 + $0x284] ss:$8 sps:$4 sm:$0xff]  }
  0xb4   : > { %v3701_v49 = vld [vmem:[%s4153_s29 + $0x384] ss:$8 sps:$4 sm:$0xff]  }
  0xba   : > { %1136 = vmatmul.mubr.bf16.gmra.mxu0 %v3607_v50  ;;  %1490 = vmatmul.mubr.bf16.gmra.mxu1 %v3608_v51  ;;  %v3703_v50 = vld [vmem:[%s4153_s29 + $0x280] ss:$8 sps:$4 sm:$0xff]  }
  0xbb   : > { %1143 = vmatprep.mubr.bf16.mxu0 %v3609_v52  ;;  %1497 = vmatprep.mubr.bf16.mxu1 %v3611_v53  ;;  %v3704_v51 = vld [vmem:[%s4153_s29 + $0x380] ss:$8 sps:$4 sm:$0xff]   ;;  %v3705_v52 = vld [vmem:[%s4153_s29 + $0x294] ss:$8 sps:$4 sm:$0xff]  }
  0xbc   : > { %v3707_v53 = vld [vmem:[%s4153_s29 + $0x394] ss:$8 sps:$4 sm:$0xff]  }
  0xc2   : > { %1144 = vmatmul.mubr.bf16.gmra.mxu0 %v3613_v54  ;;  %1498 = vmatmul.mubr.bf16.gmra.mxu1 %v3614_v55 }
  0xc3   : > { %1151 = vmatprep.mubr.bf16.mxu0 %v3615_v56  ;;  %1505 = vmatprep.mubr.bf16.mxu1 %v3617_v57 }
  0xca   : > { %1152 = vmatmul.mubr.bf16.gmra.mxu0 %v3619_v58  ;;  %1506 = vmatmul.mubr.bf16.gmra.mxu1 %v3620_v59 }
  0xcb   : > { %1159 = vmatprep.mubr.bf16.mxu0 %v3621_v60  ;;  %1513 = vmatprep.mubr.bf16.mxu1 %v3623_v61 }
  0xd2   : > { %1160 = vmatmul.mubr.bf16.gmra.mxu0 %v3625_v62  ;;  %1514 = vmatmul.mubr.bf16.gmra.mxu1 %v3626_v63  ;;  %v3709_v62 = vld [vmem:[%s4153_s29 + $0x290] ss:$8 sps:$4 sm:$0xff]  }
  0xd3   : > { %1167 = vmatprep.mubr.bf16.mxu0 %v3627_v0  ;;  %1521 = vmatprep.mubr.bf16.mxu1 %v3629_v1  ;;  %v3710_v63 = vld [vmem:[%s4153_s29 + $0x390] ss:$8 sps:$4 sm:$0xff]   ;;  %v3711_v1 = vld [vmem:[%s4153_s29 + $0x2a4] ss:$8 sps:$4 sm:$0xff]  }
  0xda   : > { %1168 = vmatmul.mubr.bf16.gmra.mxu0 %v3631_v2  ;;  %1522 = vmatmul.mubr.bf16.gmra.mxu1 %v3632_v3  ;;  %v3713_v2 = vld [vmem:[%s4153_s29 + $0x3a4] ss:$8 sps:$4 sm:$0xff]  }
  0xdb   : > { %1175 = vmatprep.mubr.bf16.mxu0 %v3633_v4  ;;  %1529 = vmatprep.mubr.bf16.mxu1 %v3635_v5 }
  0xe2   : > { %1176 = vmatmul.mubr.bf16.gmra.mxu0 %v3637_v6  ;;  %1530 = vmatmul.mubr.bf16.gmra.mxu1 %v3638_v7 }
  0xe3   : > { %1183 = vmatprep.mubr.bf16.mxu0 %v3639_v8  ;;  %1537 = vmatprep.mubr.bf16.mxu1 %v3641_v9 }
  0xea   : > { %1184 = vmatmul.mubr.bf16.gmra.mxu0 %v3643_v10  ;;  %1538 = vmatmul.mubr.bf16.gmra.mxu1 %v3644_v11 }
  0xeb   : > { %1191 = vmatprep.mubr.bf16.mxu0 %v3645_v12  ;;  %1545 = vmatprep.mubr.bf16.mxu1 %v3647_v13 }
  0xf2   : > { %1192 = vmatmul.mubr.bf16.gmra.mxu0 %v3649_v14  ;;  %1546 = vmatmul.mubr.bf16.gmra.mxu1 %v3650_v15 }
  0xf3   : > { %1811 = vmatprep.mubr.bf16.mxu0 %v3653_v16  ;;  %2197 = vmatprep.mubr.bf16.mxu1 %v3656_v17  ;;  %v3715_v16 = vld [vmem:[%s4153_s29 + $0x2a0] ss:$8 sps:$4 sm:$0xff]  }
  0xf4   : > { %v3716_v17 = vld [vmem:[%s4153_s29 + $0x3a0] ss:$8 sps:$4 sm:$0xff]  }
  0xfa   : > { %1812 = vmatmul.mubr.bf16.vlgmr.msra.gmra.mxu0 %v3651_v18  ;;  %2198 = vmatmul.mubr.bf16.vlgmr.msra.gmra.mxu1 %v3654_v19  ;;  %v3717_v19 = vld [vmem:[%s4153_s29 + $0x2b4] ss:$8 sps:$4 sm:$0xff]  }
  0xfb   : > { %1819 = vmatprep.mubr.bf16.mxu0 %v3657_v20  ;;  %2205 = vmatprep.mubr.bf16.mxu1 %v3659_v21  ;;  %v3719_v20 = vld [vmem:[%s4153_s29 + $0x3b4] ss:$8 sps:$4 sm:$0xff]  }
 0x102   : > { %1820 = vmatmul.mubr.bf16.gmra.mxu0 %v3661_v22  ;;  %2206 = vmatmul.mubr.bf16.gmra.mxu1 %v3662_v23 }
 0x103   : > { %1827 = vmatprep.mubr.bf16.mxu0 %v3663_v24  ;;  %2213 = vmatprep.mubr.bf16.mxu1 %v3665_v25 }
 0x10a   : > { %1828 = vmatmul.mubr.bf16.gmra.mxu0 %v3667_v26  ;;  %2214 = vmatmul.mubr.bf16.gmra.mxu1 %v3668_v27 }
 0x10b   : > { %1835 = vmatprep.mubr.bf16.mxu0 %v3669_v28  ;;  %2221 = vmatprep.mubr.bf16.mxu1 %v3671_v29 }
 0x112   : > { %1836 = vmatmul.mubr.bf16.gmra.mxu0 %v3673_v30  ;;  %2222 = vmatmul.mubr.bf16.gmra.mxu1 %v3674_v31 }
 0x113   : > { %1843 = vmatprep.mubr.bf16.mxu0 %v3675_v32  ;;  %2229 = vmatprep.mubr.bf16.mxu1 %v3677_v33 }
 0x11a   : > { %1844 = vmatmul.mubr.bf16.gmra.mxu0 %v3679_v34  ;;  %2230 = vmatmul.mubr.bf16.gmra.mxu1 %v3680_v35  ;;  %v3721_v34 = vld [vmem:[%s4153_s29 + $0x2b0] ss:$8 sps:$4 sm:$0xff]  }
 0x11b   : > { %1851 = vmatprep.mubr.bf16.mxu0 %v3681_v36  ;;  %2237 = vmatprep.mubr.bf16.mxu1 %v3683_v37  ;;  %v3722_v35 = vld [vmem:[%s4153_s29 + $0x3b0] ss:$8 sps:$4 sm:$0xff]   ;;  %v3725_v37 = vld [vmem:[%s4153_s29 + $0x2c4] ss:$8 sps:$4 sm:$0xff]  }
 0x122   : > { %1852 = vmatmul.mubr.bf16.gmra.mxu0 %v3685_v38  ;;  %2238 = vmatmul.mubr.bf16.gmra.mxu1 %v3686_v39  ;;  %v3728_v38 = vld [vmem:[%s4153_s29 + $0x3c4] ss:$8 sps:$4 sm:$0xff]  }
 0x123   : > { %1859 = vmatprep.mubr.bf16.mxu0 %v3687_v40  ;;  %2245 = vmatprep.mubr.bf16.mxu1 %v3689_v41 }
 0x12a   : > { %1860 = vmatmul.mubr.bf16.gmra.mxu0 %v3691_v42  ;;  %2246 = vmatmul.mubr.bf16.gmra.mxu1 %v3692_v43 }
 0x12b   : > { %1867 = vmatprep.mubr.bf16.mxu0 %v3693_v44  ;;  %2253 = vmatprep.mubr.bf16.mxu1 %v3695_v45 }
 0x132   : > { %1868 = vmatmul.mubr.bf16.gmra.mxu0 %v3697_v46  ;;  %2254 = vmatmul.mubr.bf16.gmra.mxu1 %v3698_v47 }
 0x133   : > { %1875 = vmatprep.mubr.bf16.mxu0 %v3699_v48  ;;  %2261 = vmatprep.mubr.bf16.mxu1 %v3701_v49 }
 0x13a   : > { %v3083_v54 = vpop.f32.mrf.mxu0  ;;  %v3195_v55 = vpop.f32.mrf.mxu1  ;;  %1876 = vmatmul.mubr.bf16.gmra.mxu0 %v3703_v50  ;;  %2262 = vmatmul.mubr.bf16.gmra.mxu1 %v3704_v51 }
 0x13b   : > { %1883 = vmatprep.mubr.bf16.mxu0 %v3705_v52  ;;  %2269 = vmatprep.mubr.bf16.mxu1 %v3707_v53  ;;  %v3723_v52 = vld [vmem:[%s4153_s29 + $0x2c0] ss:$8 sps:$4 sm:$0xff]  }
 0x13c   : > { %v3084_v56 = vpop.f32.mrf.mxu0  ;;  %v3196_v57 = vpop.f32.mrf.mxu1  ;;  %v3726_v53 = vld [vmem:[%s4153_s29 + $0x3c0] ss:$8 sps:$4 sm:$0xff]  }
 0x13d   : > { %v4324_v58 = vadd.f32 %v3084_v56, %v3083_v54  ;;  %v4326_v59 = vadd.f32 %v3196_v57, %v3195_v55  ;;  %v3731_v55 = vld [vmem:[%s4153_s29 + $0x2d4] ss:$8 sps:$4 sm:$0xff]  }
 0x13e   : > { %v3086_v60 = vpop.f32.mrf.mxu0  ;;  %v3198_v61 = vpop.f32.mrf.mxu1  ;;  %v3734_v56 = vld [vmem:[%s4153_s29 + $0x3d4] ss:$8 sps:$4 sm:$0xff]  }
 0x140   : > { %v3087_v3 = vpop.f32.mrf.mxu0  ;;  %v3199_v4 = vpop.f32.mrf.mxu1 }
 0x141   : > { %v4334_v5 = vadd.f32 %v3087_v3, %v3086_v60  ;;  %v4336_v6 = vadd.f32 %v3199_v4, %v3198_v61 }
 0x142   : > { %v3089_v7 = vpop.f32.mrf.mxu0  ;;  %v3201_v8 = vpop.f32.mrf.mxu1  ;;  %1884 = vmatmul.mubr.bf16.gmra.mxu0 %v3709_v62  ;;  %2270 = vmatmul.mubr.bf16.gmra.mxu1 %v3710_v63 }
 0x143   : > { %1891 = vmatprep.mubr.bf16.mxu0 %v3711_v1  ;;  %2277 = vmatprep.mubr.bf16.mxu1 %v3713_v2 }
 0x144   : > { %v3090_v10 = vpop.f32.mrf.mxu0  ;;  %v3202_v11 = vpop.f32.mrf.mxu1 }
 0x145   : > { %v4340_v12 = vadd.f32 %v3090_v10, %v3089_v7  ;;  %v4342_v13 = vadd.f32 %v3202_v11, %v3201_v8 }
 0x146   : > { %v3092_v14 = vpop.f32.mrf.mxu0  ;;  %v3204_v15 = vpop.f32.mrf.mxu1 }
 0x148   : > { %v3093_v21 = vpop.f32.mrf.mxu0  ;;  %v3205_v22 = vpop.f32.mrf.mxu1 }
 0x149   : > { %v4350_v23 = vadd.f32 %v3093_v21, %v3092_v14  ;;  %v4352_v24 = vadd.f32 %v3205_v22, %v3204_v15  ;;  %v3729_v14 = vld [vmem:[%s4153_s29 + $0x2d0] ss:$8 sps:$4 sm:$0xff]  }
 0x14a   : > { %v3095_v25 = vpop.f32.mrf.mxu0  ;;  %v3207_v26 = vpop.f32.mrf.mxu1  ;;  %1892 = vmatmul.mubr.bf16.gmra.mxu0 %v3715_v16  ;;  %2278 = vmatmul.mubr.bf16.gmra.mxu1 %v3716_v17  ;;  %v3732_v15 = vld [vmem:[%s4153_s29 + $0x3d0] ss:$8 sps:$4 sm:$0xff]   ;;  %v3737_v17 = vld [vmem:[%s4153_s29 + $0x2e4] ss:$8 sps:$4 sm:$0xff]  }
 0x14b   : > { %1899 = vmatprep.mubr.bf16.mxu0 %v3717_v19  ;;  %2285 = vmatprep.mubr.bf16.mxu1 %v3719_v20  ;;  %v3740_v19 = vld [vmem:[%s4153_s29 + $0x3e4] ss:$8 sps:$4 sm:$0xff]  }
 0x14c   : > { %v3096_v28 = vpop.f32.mrf.mxu0  ;;  %v3208_v29 = vpop.f32.mrf.mxu1 }
 0x14d   : > { %v4356_v30 = vadd.f32 %v3096_v28, %v3095_v25  ;;  %v4358_v31 = vadd.f32 %v3208_v29, %v3207_v26 }
 0x14e   : > { %v3098_v32 = vpop.f32.mrf.mxu0  ;;  %v3210_v33 = vpop.f32.mrf.mxu1 }
 0x150   : > { %v3099_v39 = vpop.f32.mrf.mxu0  ;;  %v3211_v40 = vpop.f32.mrf.mxu1 }
 0x151   : > { %v4366_v41 = vadd.f32 %v3099_v39, %v3098_v32  ;;  %v4368_v42 = vadd.f32 %v3211_v40, %v3210_v33  ;;  %v3735_v39 = vld [vmem:[%s4153_s29 + $0x2e0] ss:$8 sps:$4 sm:$0xff]  }
 0x152   : > { %v3101_v43 = vpop.f32.mrf.mxu0  ;;  %v3213_v44 = vpop.f32.mrf.mxu1  ;;  %1900 = vmatmul.mubr.bf16.gmra.mxu0 %v3721_v34  ;;  %2286 = vmatmul.mubr.bf16.gmra.mxu1 %v3722_v35  ;;  %v3738_v40 = vld [vmem:[%s4153_s29 + $0x3e0] ss:$8 sps:$4 sm:$0xff]  }
 0x153   : > { %1907 = vmatprep.mubr.bf16.mxu0 %v3725_v37  ;;  %2293 = vmatprep.mubr.bf16.mxu1 %v3728_v38 }
 0x154   : > { %v3102_v46 = vpop.f32.mrf.mxu0  ;;  %v3214_v47 = vpop.f32.mrf.mxu1 }
 0x155   : > { %v4372_v48 = vadd.f32 %v3102_v46, %v3101_v43  ;;  %v4374_v49 = vadd.f32 %v3214_v47, %v3213_v44  ;;  %v3743_v44 = vld [vmem:[%s4153_s29 + $0x2f4] ss:$8 sps:$4 sm:$0xff]  }
 0x156   : > { %v3104_v50 = vpop.f32.mrf.mxu0  ;;  %v3216_v51 = vpop.f32.mrf.mxu1  ;;  %v3746_v46 = vld [vmem:[%s4153_s29 + $0x3f4] ss:$8 sps:$4 sm:$0xff]  }
 0x158   : > { %v3105_v57 = vpop.f32.mrf.mxu0  ;;  %v3217_v60 = vpop.f32.mrf.mxu1 }
 0x159   : > { %v4382_v61 = vadd.f32 %v3105_v57, %v3104_v50  ;;  %v4384_v62 = vadd.f32 %v3217_v60, %v3216_v51 }
 0x15a   : > { %v3107_v63 = vpop.f32.mrf.mxu0  ;;  %v3219_v1 = vpop.f32.mrf.mxu1  ;;  %1908 = vmatmul.mubr.bf16.gmra.mxu0 %v3723_v52  ;;  %2294 = vmatmul.mubr.bf16.gmra.mxu1 %v3726_v53 }
 0x15b   : > { %1915 = vmatprep.mubr.bf16.mxu0 %v3731_v55  ;;  %2301 = vmatprep.mubr.bf16.mxu1 %v3734_v56 }
 0x15c   : > { %v3108_v3 = vpop.f32.mrf.mxu0  ;;  %v3220_v4 = vpop.f32.mrf.mxu1 }
 0x15d   : > { %v4388_v7 = vadd.f32 %v3108_v3, %v3107_v63  ;;  %v4390_v8 = vadd.f32 %v3220_v4, %v3219_v1 }
 0x15e   : > { %v3110_v10 = vpop.f32.mrf.mxu0  ;;  %v3222_v11 = vpop.f32.mrf.mxu1 }
 0x160   : > { %v3111_v20 = vpop.f32.mrf.mxu0  ;;  %v3223_v21 = vpop.f32.mrf.mxu1 }
 0x161   : > { %v4398_v22 = vadd.f32 %v3111_v20, %v3110_v10  ;;  %v4400_v25 = vadd.f32 %v3223_v21, %v3222_v11  ;;  %v3741_v10 = vld [vmem:[%s4153_s29 + $0x2f0] ss:$8 sps:$4 sm:$0xff]  }
 0x162   : > { %v3113_v26 = vpop.f32.mrf.mxu0  ;;  %v3225_v28 = vpop.f32.mrf.mxu1  ;;  %1916 = vmatmul.mubr.bf16.gmra.mxu0 %v3729_v14  ;;  %2302 = vmatmul.mubr.bf16.gmra.mxu1 %v3732_v15  ;;  %v3744_v11 = vld [vmem:[%s4153_s29 + $0x3f0] ss:$8 sps:$4 sm:$0xff]  }
 0x163   : > { %1923 = vmatprep.mubr.bf16.mxu0 %v3737_v17  ;;  %2309 = vmatprep.mubr.bf16.mxu1 %v3740_v19 }
 0x164   : > { %v3114_v32 = vpop.f32.mrf.mxu0  ;;  %v3226_v33 = vpop.f32.mrf.mxu1 }
 0x165   : > { %v4404_v34 = vadd.f32 %v3114_v32, %v3113_v26  ;;  %v4406_v35 = vadd.f32 %v3226_v33, %v3225_v28 }
 0x166   : > { %v3116_v37 = vpop.f32.mrf.mxu0  ;;  %v3228_v38 = vpop.f32.mrf.mxu1 }
 0x168   : > { %v3117_v47 = vpop.f32.mrf.mxu0  ;;  %v3229_v50 = vpop.f32.mrf.mxu1 }
 0x169   : > { %v4414_v51 = vadd.f32 %v3117_v47, %v3116_v37  ;;  %v4416_v52 = vadd.f32 %v3229_v50, %v3228_v38 }
 0x16a   : > { %v3119_v53 = vpop.f32.mrf.mxu0  ;;  %v3231_v55 = vpop.f32.mrf.mxu1  ;;  %1924 = vmatmul.mubr.bf16.gmra.mxu0 %v3735_v39  ;;  %2310 = vmatmul.mubr.bf16.gmra.mxu1 %v3738_v40 }
 0x16b   : > { %1931 = vmatprep.mubr.bf16.mxu0 %v3743_v44  ;;  %2317 = vmatprep.mubr.bf16.mxu1 %v3746_v46 }
 0x16c   : > { %v3120_v57 = vpop.f32.mrf.mxu0  ;;  %v3232_v60 = vpop.f32.mrf.mxu1 }
 0x16d   : > { %v4420_v63 = vadd.f32 %v3120_v57, %v3119_v53  ;;  %v4422_v1 = vadd.f32 %v3232_v60, %v3231_v55 }
 0x16e   : > { %v3122_v3 = vpop.f32.mrf.mxu0  ;;  %v3234_v4 = vpop.f32.mrf.mxu1 }
 0x170   : > { %v3123_v15 = vpop.f32.mrf.mxu0  ;;  %v3235_v17 = vpop.f32.mrf.mxu1 }
 0x171   : > { %v4428_v19 = vadd.f32 %v3123_v15, %v3122_v3  ;;  %v4430_v20 = vadd.f32 %v3235_v17, %v3234_v4 }
 0x172   : > { %v3125_v21 = vpop.f32.mrf.mxu0  ;;  %v3237_v26 = vpop.f32.mrf.mxu1  ;;  %1932 = vmatmul.mubr.bf16.gmra.mxu0 %v3741_v10  ;;  %2318 = vmatmul.mubr.bf16.gmra.mxu1 %v3744_v11 }
 0x174   : > { %v3126_v32 = vpop.f32.mrf.mxu0  ;;  %v3238_v33 = vpop.f32.mrf.mxu1 }
 0x175   : > { %v4434_v37 = vadd.f32 %v3126_v32, %v3125_v21  ;;  %v4436_v38 = vadd.f32 %v3238_v33, %v3237_v26 }
 0x176   : > { %v3128_v39 = vpop.f32.mrf.mxu0  ;;  %v3240_v40 = vpop.f32.mrf.mxu1 }
 0x178   : > { %v3129_v46 = vpop.f32.mrf.mxu0  ;;  %v3241_v47 = vpop.f32.mrf.mxu1 }
 0x179   : > { %v4440_v50 = vadd.f32 %v3129_v46, %v3128_v39  ;;  %v4442_v53 = vadd.f32 %v3241_v47, %v3240_v40 }
 0x17a   : > { %v3131_v55 = vpop.f32.mrf.mxu0  ;;  %v3243_v57 = vpop.f32.mrf.mxu1 }
 0x17c   : > { %v3132_v3 = vpop.f32.mrf.mxu0  ;;  %v3244_v4 = vpop.f32.mrf.mxu1 }
 0x17d   : > { %v4446_v10 = vadd.f32 %v3132_v3, %v3131_v55  ;;  %v4448_v11 = vadd.f32 %v3244_v4, %v3243_v57 }
 0x17e   : > { %v3134_v15 = vpop.f32.mrf.mxu0  ;;  %v3246_v17 = vpop.f32.mrf.mxu1 }
 0x180   : > { %v3135_v26 = vpop.f32.mrf.mxu0  ;;  %v3247_v32 = vpop.f32.mrf.mxu1 }
 0x181   : > { %v4452_v33 = vadd.f32 %v3135_v26, %v3134_v15  ;;  %v4454_v39 = vadd.f32 %v3247_v32, %v3246_v17 }
 0x182   : > { %v3137_v40 = vpop.f32.mrf.mxu0  ;;  %v3249_v46 = vpop.f32.mrf.mxu1 }
 0x184   : > { %v3138_v55 = vpop.f32.mrf.mxu0  ;;  %v3250_v3 = vpop.f32.mrf.mxu1 }
 0x185   : > { %v4458_v57 = vadd.f32 %v3138_v55, %v3137_v40  ;;  %v4460_v4 = vadd.f32 %v3250_v3, %v3249_v46 }
 0x186   : > { %v3140_v60 = vpop.f32.mrf.mxu0  ;;  %v3252_v44 = vpop.f32.mrf.mxu1 }
 0x188   : > { %v3141_v15 = vpop.f32.mrf.mxu0  ;;  %v3253_v26 = vpop.f32.mrf.mxu1 }
 0x189   : > { %v4464_v17 = vadd.f32 %v3141_v15, %v3140_v60  ;;  %v4466_v32 = vadd.f32 %v3253_v26, %v3252_v44 }
 0x18a   : > { %v3143_v28 = vpop.f32.mrf.mxu0  ;;  %v3255_v14 = vpop.f32.mrf.mxu1 }
 0x18c   : > { %v3144_v40 = vpop.f32.mrf.mxu0  ;;  %v3256_v55 = vpop.f32.mrf.mxu1 }
 0x18d   : > { %v4470_v46 = vadd.f32 %v3144_v40, %v3143_v28  ;;  %v4472_v3 = vadd.f32 %v3256_v55, %v3255_v14 }
 0x18e   : > { %v3146_v56 = vpop.f32.mrf.mxu0  ;;  %v3258_v43 = vpop.f32.mrf.mxu1 }
 0x190   : > { %v3147_v60 = vpop.f32.mrf.mxu0  ;;  %v3259_v15 = vpop.f32.mrf.mxu1 }
 0x191   : > { %v4476_v44 = vadd.f32 %v3147_v60, %v3146_v56  ;;  %v4478_v26 = vadd.f32 %v3259_v15, %v3258_v43 }
 0x192   : > { %v3149_v29 = vpop.f32.mrf.mxu0  ;;  %v3261_v16 = vpop.f32.mrf.mxu1 }
 0x194   : > { %v3150_v28 = vpop.f32.mrf.mxu0  ;;  %v3262_v40 = vpop.f32.mrf.mxu1 }
 0x195   : > { %v4482_v14 = vadd.f32 %v3150_v28, %v3149_v29  ;;  %v4484_v55 = vadd.f32 %v3262_v40, %v3261_v16 }
 0x196   : > { %v3152_v2 = vpop.f32.mrf.mxu0  ;;  %v3264_v54 = vpop.f32.mrf.mxu1 }
 0x197   : > { %4731 = vst [vmem:[#allocation3_spill] sm:$0xff] %v4484_v55 }
 0x198   : > { %v3153_v56 = vpop.f32.mrf.mxu0  ;;  %v3265_v60 = vpop.f32.mrf.mxu1 }
 0x199   : > { %v4488_v43 = vadd.f32 %v3153_v56, %v3152_v2  ;;  %v4490_v15 = vadd.f32 %v3265_v60, %v3264_v54 }
 0x19a   : > { %v3155_v45 = vpop.f32.mrf.mxu0  ;;  %v3267_v36 = vpop.f32.mrf.mxu1 }
 0x19b   : > { %4732 = vst [vmem:[#allocation4_spill] sm:$0xff] %v4488_v43  ;;  %4733 = vst [vmem:[#allocation5_spill] sm:$0xff] %v4490_v15 }
 0x19c   : > { %v3156_v29 = vpop.f32.mrf.mxu0  ;;  %v3268_v28 = vpop.f32.mrf.mxu1 }
 0x19d   : > { %v4494_v16 = vadd.f32 %v3156_v29, %v3155_v45  ;;  %v4496_v40 = vadd.f32 %v3268_v28, %v3267_v36 }
 0x19e   : > { %v3158_v27 = vpop.f32.mrf.mxu0  ;;  %v3270_v18 = vpop.f32.mrf.mxu1 }
 0x19f   : > { %4734 = vst [vmem:[#allocation6_spill] sm:$0xff] %v4494_v16  ;;  %4735 = vst [vmem:[#allocation7_spill] sm:$0xff] %v4496_v40 }
 0x1a0   : > { %v3159_v2 = vpop.f32.mrf.mxu0  ;;  %v3271_v56 = vpop.f32.mrf.mxu1 }
 0x1a1   : > { %v4500_v54 = vadd.f32 %v3159_v2, %v3158_v27  ;;  %v4502_v60 = vadd.f32 %v3271_v56, %v3270_v18 }
 0x1a2   : > { %v3161_v9 = vpop.f32.mrf.mxu0  ;;  %v3273_v0 = vpop.f32.mrf.mxu1 }
 0x1a3   : > { %4736 = vst [vmem:[#allocation8_spill] sm:$0xff] %v4500_v54  ;;  %4737 = vst [vmem:[#allocation9_spill] sm:$0xff] %v4502_v60 }
 0x1a4   : > { %v3162_v45 = vpop.f32.mrf.mxu0  ;;  %v3274_v29 = vpop.f32.mrf.mxu1 }
 0x1a5   : > { %v4506_v36 = vadd.f32 %v3162_v45, %v3161_v9  ;;  %v4508_v28 = vadd.f32 %v3274_v29, %v3273_v0 }
 0x1a6   : > { %v3164_v15 = vpop.f32.mrf.mxu0  ;;  %v3276_v43 = vpop.f32.mrf.mxu1 }
 0x1a7   : > { %4738 = vst [vmem:[#allocation10_spill] sm:$0xff] %v4506_v36  ;;  %4739 = vst [vmem:[#allocation11_spill] sm:$0xff] %v4508_v28 }
 0x1a8   : > { %v3165_v27 = vpop.f32.mrf.mxu0  ;;  %v3277_v2 = vpop.f32.mrf.mxu1 }
 0x1a9   : > { %v4512_v18 = vadd.f32 %v3165_v27, %v3164_v15  ;;  %v4514_v56 = vadd.f32 %v3277_v2, %v3276_v43 }
 0x1aa   : > { %v3167_v40 = vpop.f32.mrf.mxu0  ;;  %v3279_v16 = vpop.f32.mrf.mxu1 }
 0x1ab   : > { %4740 = vst [vmem:[#allocation12_spill] sm:$0xff] %v4512_v18  ;;  %4741 = vst [vmem:[#allocation13_spill] sm:$0xff] %v4514_v56 }
 0x1ac   : > { %v3168_v9 = vpop.f32.mrf.mxu0  ;;  %v3280_v45 = vpop.f32.mrf.mxu1 }
 0x1ad   : > { %v4518_v0 = vadd.f32 %v3168_v9, %v3167_v40  ;;  %v4520_v29 = vadd.f32 %v3280_v45, %v3279_v16 }
 0x1ae   : > { %v3170_v60 = vpop.f32.mrf.mxu0  ;;  %v3282_v54 = vpop.f32.mrf.mxu1 }
 0x1af   : > { %4742 = vst [vmem:[#allocation14_spill] sm:$0xff] %v4518_v0  ;;  %4743 = vst [vmem:[#allocation15_spill] sm:$0xff] %v4520_v29 }
 0x1b0   : > { %v3171_v15 = vpop.f32.mrf.mxu0  ;;  %v3283_v27 = vpop.f32.mrf.mxu1 }
 0x1b1   : > { %v4524_v43 = vadd.f32 %v3171_v15, %v3170_v60  ;;  %v4526_v2 = vadd.f32 %v3283_v27, %v3282_v54  ;;  %v4750_v60 = vmax.f32 %v4324_v58, %v4326_v59 }
 0x1b2   : > { %v3173_v28 = vpop.f32.mrf.mxu0  ;;  %v3285_v36 = vpop.f32.mrf.mxu1 }
 0x1b3   : > { %4744 = vst [vmem:[#allocation16_spill] sm:$0xff] %v4524_v43  ;;  %4745 = vst [vmem:[#allocation17_spill] sm:$0xff] %v4526_v2  ;;  %v4550_v2 = vld [vmem:[%s4710_s2] ss:$0 sm:$0xff] }
 0x1b4   : > { %v3174_v40 = vpop.f32.mrf.mxu0  ;;  %v3286_v16 = vpop.f32.mrf.mxu1 }
 0x1b5   : > { %v4530_v9 = vadd.f32 %v3174_v40, %v3173_v28  ;;  %v4532_v45 = vadd.f32 %v3286_v16, %v3285_v36 }
 0x1b6   : > { %v3176_v56 = vpop.f32.mrf.mxu0  ;;  %v3288_v21 = vpop.f32.mrf.mxu1 }
 0x1b7   : > { %4746 = vst [vmem:[#allocation18_spill] sm:$0xff] %v4530_v9  ;;  %4747 = vst [vmem:[#allocation19_spill] sm:$0xff] %v4532_v45 }
 0x1b8   : > { %v3177_v15 = vpop.f32.mrf.mxu0  ;;  %v3289_v54 = vpop.f32.mrf.mxu1 }
 0x1b9   : > { %v4536_v27 = vadd.f32 %v3177_v15, %v3176_v56  ;;  %v4538_v29 = vadd.f32 %v3289_v54, %v3288_v21 }
 0x1ba   : > { %v3307_v0 = vpop.f32.mrf.mxu0  ;;  %v3419_v47 = vpop.f32.mrf.mxu1 }
 0x1bb   : > { %4748 = vst [vmem:[#allocation20_spill] sm:$0xff] %v4536_v27  ;;  %4749 = vst [vmem:[#allocation21_spill] sm:$0xff] %v4538_v29 }
 0x1bc   : > { %v3308_v28 = vpop.f32.mrf.mxu0  ;;  %v3420_v40 = vpop.f32.mrf.mxu1 }
 0x1bd   : > { %v3309_v36 = vadd.f32 %v3308_v28, %v3307_v0  ;;  %v3421_v56 = vadd.f32 %v3420_v40, %v3419_v47  ;;  %v4751_v0 = vmax.f32 %v4334_v5, %v4336_v6 }
 0x1be   : > { %v3310_v16 = vpop.f32.mrf.mxu0  ;;  %v3422_v43 = vpop.f32.mrf.mxu1 }
 0x1bf   : > { %v1940_v45 = vmax.f32 %v4750_v60, %v3309_v36 }
 0x1c0   : > { %v3311_v21 = vpop.f32.mrf.mxu0  ;;  %v3423_v15 = vpop.f32.mrf.mxu1 }
 0x1c1   : > { %v2326_v54 = vmax.f32 %v1940_v45, %v3421_v56  ;;  %v3312_v9 = vadd.f32 %v3311_v21, %v3310_v16  ;;  %v3424_v58 = vadd.f32 %v3423_v15, %v3422_v43  ;;  %v4752_v21 = vmax.f32 %v4340_v12, %v4342_v13 }
 0x1c2   : > { %v3313_v29 = vpop.f32.mrf.mxu0  ;;  %v3425_v27 = vpop.f32.mrf.mxu1  ;;  %v4753_v12 = vmax.f32 %v4350_v23, %v4352_v24 }
 0x1c3   : > { %v1941_v28 = vmax.f32 %v4751_v0, %v3312_v9  ;;  %v2365_v60 = vadd.f32 %v4550_v2, %v2326_v54 }
 0x1c4   : > { %v3314_v59 = vpop.f32.mrf.mxu0  ;;  %v3426_v47 = vpop.f32.mrf.mxu1 }
 0x1c5   : > { %v2327_v40 = vmax.f32 %v1941_v28, %v3424_v58  ;;  %v3315_v45 = vadd.f32 %v3314_v59, %v3313_v29  ;;  %v3427_v55 = vadd.f32 %v3426_v47, %v3425_v27  ;;  %v2397_v9 = vmax.f32 %v2365_v60, 0.0 }
 0x1c6   : > { %v3316_v36 = vpop.f32.mrf.mxu0  ;;  %v3428_v16 = vpop.f32.mrf.mxu1 }
 0x1c7   : > { %v2366_v56 = vadd.f32 %v4550_v2, %v2327_v40  ;;  %v1942_v18 = vmax.f32 %v4752_v21, %v3315_v45 }
 0x1c8   : > { %v3317_v5 = vpop.f32.mrf.mxu0  ;;  %v3429_v6 = vpop.f32.mrf.mxu1 }
 0x1c9   : > { %v2398_v43 = vmax.f32 %v2366_v56, 0.0  ;;  %v2328_v15 = vmax.f32 %v1942_v18, %v3427_v55  ;;  %v3318_v0 = vadd.f32 %v3317_v5, %v3316_v36  ;;  %v3430_v27 = vadd.f32 %v3429_v6, %v3428_v16 }
 0x1ca   : > { %v3319_v29 = vpop.f32.mrf.mxu0  ;;  %v3431_v54 = vpop.f32.mrf.mxu1  ;;  %v4754_v36 = vmax.f32 %v4356_v30, %v4358_v31 }
 0x1cb   : > { %v2975_v28 = vpack.c.bf16 %v2398_v43, %v2397_v9  ;;  %v1943_v13 = vmax.f32 %v4753_v12, %v3318_v0  ;;  %v2367_v55 = vadd.f32 %v4550_v2, %v2328_v15 }
 0x1cc   : > { %v3320_v58 = vpop.f32.mrf.mxu0  ;;  %v3432_v59 = vpop.f32.mrf.mxu1 }
 0x1cd   : > { %2976 = vst [vmem:[%s4563_s23] sm:$0xff] %v2975_v28   ;;  %v2329_v18 = vmax.f32 %v1943_v13, %v3430_v27  ;;  %v3321_v47 = vadd.f32 %v3320_v58, %v3319_v29  ;;  %v3433_v21 = vadd.f32 %v3432_v59, %v3431_v54  ;;  %v2399_v16 = vmax.f32 %v2367_v55, 0.0 }
 0x1ce   : > { %v3322_v60 = vpop.f32.mrf.mxu0  ;;  %v3434_v40 = vpop.f32.mrf.mxu1  ;;  %v4755_v29 = vmax.f32 %v4366_v41, %v4368_v42 }
 0x1cf   : > { %v2368_v45 = vadd.f32 %v4550_v2, %v2329_v18  ;;  %v1944_v56 = vmax.f32 %v4754_v36, %v3321_v47  ;;  %v4756_v18 = vmax.f32 %v4372_v48, %v4374_v49 }
 0x1d0   : > { %v3323_v23 = vpop.f32.mrf.mxu0  ;;  %v3435_v24 = vpop.f32.mrf.mxu1 }
 0x1d1   : > { %v2400_v5 = vmax.f32 %v2368_v45, 0.0  ;;  %v2330_v6 = vmax.f32 %v1944_v56, %v3433_v21  ;;  %v3324_v9 = vadd.f32 %v3323_v23, %v3322_v60  ;;  %v3436_v12 = vadd.f32 %v3435_v24, %v3434_v40 }
 0x1d2   : > { %v3325_v43 = vpop.f32.mrf.mxu0  ;;  %v3437_v15 = vpop.f32.mrf.mxu1 }
 0x1d3   : > { %v2980_v0 = vpack.c.bf16 %v2400_v5, %v2399_v16  ;;  %v1945_v28 = vmax.f32 %v4755_v29, %v3324_v9  ;;  %v2369_v30 = vadd.f32 %v4550_v2, %v2330_v6  ;;  %v4757_v16 = vmax.f32 %v4382_v61, %v4384_v62 }
 0x1d4   : > { %v3326_v13 = vpop.f32.mrf.mxu0  ;;  %v3438_v27 = vpop.f32.mrf.mxu1 }
 0x1d5   : > { %3052 = vst [vmem:[%s4563_s23 + $0x8] sm:$0xff] %v2980_v0   ;;  %v2331_v31 = vmax.f32 %v1945_v28, %v3436_v12  ;;  %v3327_v54 = vadd.f32 %v3326_v13, %v3325_v43  ;;  %v3439_v60 = vadd.f32 %v3438_v27, %v3437_v15  ;;  %v2401_v40 = vmax.f32 %v2369_v30, 0.0 }
 0x1d6   : > { %v3328_v58 = vpop.f32.mrf.mxu0  ;;  %v3440_v59 = vpop.f32.mrf.mxu1  ;;  %v4758_v12 = vmax.f32 %v4388_v7, %v4390_v8 }
 0x1d7   : > { %v2370_v55 = vadd.f32 %v4550_v2, %v2331_v31  ;;  %v1946_v47 = vmax.f32 %v4756_v18, %v3327_v54 }
 0x1d8   : > { %v3329_v41 = vpop.f32.mrf.mxu0  ;;  %v3441_v42 = vpop.f32.mrf.mxu1 }
 0x1d9   : > { %v2402_v45 = vmax.f32 %v2370_v55, 0.0  ;;  %v2332_v36 = vmax.f32 %v1946_v47, %v3439_v60  ;;  %v3330_v56 = vadd.f32 %v3329_v41, %v3328_v58  ;;  %v3442_v6 = vadd.f32 %v3441_v42, %v3440_v59 }
 0x1da   : > { %v3331_v21 = vpop.f32.mrf.mxu0  ;;  %v3443_v23 = vpop.f32.mrf.mxu1  ;;  %v4759_v47 = vmax.f32 %v4398_v22, %v4400_v25 }
 0x1db   : > { %v2985_v24 = vpack.c.bf16 %v2402_v45, %v2401_v40  ;;  %v1947_v5 = vmax.f32 %v4757_v16, %v3330_v56  ;;  %v2371_v48 = vadd.f32 %v4550_v2, %v2332_v36 }
 0x1dc   : > { %v3332_v9 = vpop.f32.mrf.mxu0  ;;  %v3444_v43 = vpop.f32.mrf.mxu1 }
 0x1dd   : > { %3053 = vst [vmem:[%s4563_s23 + $0x10] sm:$0xff] %v2985_v24   ;;  %v2333_v49 = vmax.f32 %v1947_v5, %v3442_v6  ;;  %v3333_v15 = vadd.f32 %v3332_v9, %v3331_v21  ;;  %v3445_v27 = vadd.f32 %v3444_v43, %v3443_v23  ;;  %v2403_v30 = vmax.f32 %v2371_v48, 0.0 }
 0x1de   : > { %v3334_v0 = vpop.f32.mrf.mxu0  ;;  %v3446_v29 = vpop.f32.mrf.mxu1  ;;  %v4760_v23 = vmax.f32 %v4404_v34, %v4406_v35 }
 0x1df   : > { %v2372_v28 = vadd.f32 %v4550_v2, %v2333_v49  ;;  %v1948_v13 = vmax.f32 %v4758_v12, %v3333_v15 }
 0x1e0   : > { %v3335_v61 = vpop.f32.mrf.mxu0  ;;  %v3447_v62 = vpop.f32.mrf.mxu1 }
 0x1e1   : > { %v2404_v31 = vmax.f32 %v2372_v28, 0.0  ;;  %v2334_v54 = vmax.f32 %v1948_v13, %v3445_v27  ;;  %v3336_v58 = vadd.f32 %v3335_v61, %v3334_v0  ;;  %v3448_v41 = vadd.f32 %v3447_v62, %v3446_v29 }
 0x1e2   : > { %v3337_v59 = vpop.f32.mrf.mxu0  ;;  %v3449_v55 = vpop.f32.mrf.mxu1  ;;  %v4761_v0 = vmax.f32 %v4414_v51, %v4416_v52 }
 0x1e3   : > { %v2990_v18 = vpack.c.bf16 %v2404_v31, %v2403_v30  ;;  %v1949_v60 = vmax.f32 %v4759_v47, %v3336_v58  ;;  %v2373_v7 = vadd.f32 %v4550_v2, %v2334_v54  ;;  %v4762_v31 = vmax.f32 %v4420_v63, %v4422_v1 }
 0x1e4   : > { %v3338_v42 = vpop.f32.mrf.mxu0  ;;  %v3450_v40 = vpop.f32.mrf.mxu1 }
 0x1e5   : > { %3054 = vst [vmem:[%s4563_s23 + $0x18] sm:$0xff] %v2990_v18   ;;  %v2335_v8 = vmax.f32 %v1949_v60, %v3448_v41  ;;  %v3339_v45 = vadd.f32 %v3338_v42, %v3337_v59  ;;  %v3451_v16 = vadd.f32 %v3450_v40, %v3449_v55  ;;  %v2405_v5 = vmax.f32 %v2373_v7, 0.0 }
 0x1e6   : > { %v3340_v36 = vpop.f32.mrf.mxu0  ;;  %v3452_v56 = vpop.f32.mrf.mxu1  ;;  %v4763_v40 = vmax.f32 %v4428_v19, %v4430_v20 }
 0x1e7   : > { %v2374_v21 = vadd.f32 %v4550_v2, %v2335_v8  ;;  %v1950_v24 = vmax.f32 %v4760_v23, %v3339_v45 }
 0x1e8   : > { %v3341_v22 = vpop.f32.mrf.mxu0  ;;  %v3453_v25 = vpop.f32.mrf.mxu1 }
 0x1e9   : > { %v2406_v6 = vmax.f32 %v2374_v21, 0.0  ;;  %v2336_v9 = vmax.f32 %v1950_v24, %v3451_v16  ;;  %v3342_v43 = vadd.f32 %v3341_v22, %v3340_v36  ;;  %v3454_v28 = vadd.f32 %v3453_v25, %v3452_v56 }
 0x1ea   : > { %v3343_v48 = vpop.f32.mrf.mxu0  ;;  %v3455_v49 = vpop.f32.mrf.mxu1  ;;  %v4764_v16 = vmax.f32 %v4434_v37, %v4436_v38 }
 0x1eb   : > { %v2995_v15 = vpack.c.bf16 %v2406_v6, %v2405_v5  ;;  %v1951_v29 = vmax.f32 %v4761_v0, %v3342_v43  ;;  %v2375_v34 = vadd.f32 %v4550_v2, %v2336_v9  ;;  %v4765_v0 = vmax.f32 %v4440_v50, %v4442_v53 }
 0x1ec   : > { %v3344_v12 = vpop.f32.mrf.mxu0  ;;  %v3456_v13 = vpop.f32.mrf.mxu1 }
 0x1ed   : > { %3055 = vst [vmem:[%s4563_s23 + $0x20] sm:$0xff] %v2995_v15   ;;  %v2337_v35 = vmax.f32 %v1951_v29, %v3454_v28  ;;  %v3345_v27 = vadd.f32 %v3344_v12, %v3343_v48  ;;  %v3457_v58 = vadd.f32 %v3456_v13, %v3455_v49  ;;  %v2407_v59 = vmax.f32 %v2375_v34, 0.0 }
 0x1ee   : > { %v3346_v61 = vpop.f32.mrf.mxu0  ;;  %v3458_v62 = vpop.f32.mrf.mxu1 }
 0x1ef   : > { %v2376_v30 = vadd.f32 %v4550_v2, %v2337_v35  ;;  %v1952_v54 = vmax.f32 %v4762_v31, %v3345_v27 }
 0x1f0   : > { %v3347_v51 = vpop.f32.mrf.mxu0  ;;  %v3459_v52 = vpop.f32.mrf.mxu1 }
 0x1f1   : > { %v2408_v55 = vmax.f32 %v2376_v30, 0.0  ;;  %v2338_v18 = vmax.f32 %v1952_v54, %v3457_v58  ;;  %v3348_v47 = vadd.f32 %v3347_v51, %v3346_v61  ;;  %v3460_v8 = vadd.f32 %v3459_v52, %v3458_v62 }
 0x1f2   : > { %v3349_v60 = vpop.f32.mrf.mxu0  ;;  %v3461_v41 = vpop.f32.mrf.mxu1  ;;  %v4766_v62 = vmax.f32 %v4446_v10, %v4448_v11 }
 0x1f3   : > { %v3000_v42 = vpack.c.bf16 %v2408_v55, %v2407_v59  ;;  %v1953_v7 = vmax.f32 %v4763_v40, %v3348_v47  ;;  %v2377_v63 = vadd.f32 %v4550_v2, %v2338_v18  ;;  %v4767_v47 = vmax.f32 %v4452_v33, %v4454_v39 }
 0x1f4   : > { %v3350_v45 = vpop.f32.mrf.mxu0  ;;  %v3462_v36 = vpop.f32.mrf.mxu1 }
 0x1f5   : > { %3056 = vst [vmem:[%s4563_s23 + $0x28] sm:$0xff] %v3000_v42   ;;  %v2339_v1 = vmax.f32 %v1953_v7, %v3460_v8  ;;  %v3351_v56 = vadd.f32 %v3350_v45, %v3349_v60  ;;  %v3463_v25 = vadd.f32 %v3462_v36, %v3461_v41  ;;  %v2409_v5 = vmax.f32 %v2377_v63, 0.0 }
 0x1f6   : > { %v3352_v21 = vpop.f32.mrf.mxu0  ;;  %v3464_v23 = vpop.f32.mrf.mxu1  ;;  %v4768_v63 = vmax.f32 %v4458_v57, %v4460_v4 }
 0x1f7   : > { %v2378_v24 = vadd.f32 %v4550_v2, %v2339_v1  ;;  %v1954_v22 = vmax.f32 %v4764_v16, %v3351_v56 }
 0x1f8   : > { %v3353_v19 = vpop.f32.mrf.mxu0  ;;  %v3465_v20 = vpop.f32.mrf.mxu1 }
 0x1f9   : > { %v2410_v6 = vmax.f32 %v2378_v24, 0.0  ;;  %v2340_v9 = vmax.f32 %v1954_v22, %v3463_v25  ;;  %v3354_v43 = vadd.f32 %v3353_v19, %v3352_v21  ;;  %v3466_v28 = vadd.f32 %v3465_v20, %v3464_v23 }
 0x1fa   : > { %v3355_v48 = vpop.f32.mrf.mxu0  ;;  %v3467_v49 = vpop.f32.mrf.mxu1  ;;  %v4769_v20 = vmax.f32 %v4464_v17, %v4466_v32 }
 0x1fb   : > { %v3005_v15 = vpack.c.bf16 %v2410_v6, %v2409_v5  ;;  %v1955_v29 = vmax.f32 %v4765_v0, %v3354_v43  ;;  %v2379_v37 = vadd.f32 %v4550_v2, %v2340_v9 }
 0x1fc   : > { %v3356_v12 = vpop.f32.mrf.mxu0  ;;  %v3468_v13 = vpop.f32.mrf.mxu1 }
 0x1fd   : > { %3057 = vst [vmem:[%s4563_s23 + $0x30] sm:$0xff] %v3005_v15   ;;  %v2341_v38 = vmax.f32 %v1955_v29, %v3466_v28  ;;  %v3357_v34 = vadd.f32 %v3356_v12, %v3355_v48  ;;  %v3469_v31 = vadd.f32 %v3468_v13, %v3467_v49  ;;  %v2411_v54 = vmax.f32 %v2379_v37, 0.0 }
 0x1fe   : > { %v3358_v35 = vpop.f32.mrf.mxu0  ;;  %v3470_v27 = vpop.f32.mrf.mxu1  ;;  %v4770_v29 = vmax.f32 %v4470_v46, %v4472_v3 }
 0x1ff   : > { %v2380_v61 = vadd.f32 %v4550_v2, %v2341_v38  ;;  %v1956_v30 = vmax.f32 %v4766_v62, %v3357_v34  ;;  %v4771_v62 = vmax.f32 %v4476_v44, %v4478_v26 }
 0x200   : > { %v3359_v50 = vpop.f32.mrf.mxu0  ;;  %v3471_v53 = vpop.f32.mrf.mxu1 }
 0x201   : > { %v2412_v58 = vmax.f32 %v2380_v61, 0.0  ;;  %v2342_v51 = vmax.f32 %v1956_v30, %v3469_v31  ;;  %v3360_v52 = vadd.f32 %v3359_v50, %v3358_v35  ;;  %v3472_v41 = vadd.f32 %v3471_v53, %v3470_v27 }
 0x202   : > { %v3361_v59 = vpop.f32.mrf.mxu0  ;;  %v3473_v55 = vpop.f32.mrf.mxu1 }
 0x203   : > { %v3010_v18 = vpack.c.bf16 %v2412_v58, %v2411_v54  ;;  %v1957_v60 = vmax.f32 %v4767_v47, %v3360_v52  ;;  %v2381_v10 = vadd.f32 %v4550_v2, %v2342_v51 }
 0x204   : > { %v3362_v42 = vpop.f32.mrf.mxu0  ;;  %v3474_v40 = vpop.f32.mrf.mxu1 }
 0x205   : > { %3058 = vst [vmem:[%s4563_s23 + $0x38] sm:$0xff] %v3010_v18   ;;  %v2343_v11 = vmax.f32 %v1957_v60, %v3472_v41  ;;  %v3363_v7 = vadd.f32 %v3362_v42, %v3361_v59  ;;  %v3475_v56 = vadd.f32 %v3474_v40, %v3473_v55  ;;  %v2413_v21 = vmax.f32 %v2381_v10, 0.0  ;;  %v4772_v59 = vld [vmem:[#allocation3_spill] sm:$0xff] }
 0x206   : > { %v3364_v8 = vpop.f32.mrf.mxu0  ;;  %v3476_v45 = vpop.f32.mrf.mxu1  ;;  %v4773_v55 = vmax.f32 %v4482_v14, %v4772_v59 }
 0x207   : > { %v2382_v36 = vadd.f32 %v4550_v2, %v2343_v11  ;;  %v1958_v1 = vmax.f32 %v4768_v63, %v3363_v7 }
 0x208   : > { %v3365_v33 = vpop.f32.mrf.mxu0  ;;  %v3477_v39 = vpop.f32.mrf.mxu1 }
 0x209   : > { %v2414_v23 = vmax.f32 %v2382_v36, 0.0  ;;  %v2344_v24 = vmax.f32 %v1958_v1, %v3475_v56  ;;  %v3366_v16 = vadd.f32 %v3365_v33, %v3364_v8  ;;  %v3478_v6 = vadd.f32 %v3477_v39, %v3476_v45  ;;  %v4774_v8 = vld [vmem:[#allocation4_spill] sm:$0xff]  ;;  %v4775_v45 = vld [vmem:[#allocation5_spill] sm:$0xff] }
 0x20a   : > { %v3367_v22 = vpop.f32.mrf.mxu0  ;;  %v3479_v25 = vpop.f32.mrf.mxu1  ;;  %v4776_v36 = vmax.f32 %v4774_v8, %v4775_v45 }
 0x20b   : > { %v3015_v19 = vpack.c.bf16 %v2414_v23, %v2413_v21  ;;  %v1959_v5 = vmax.f32 %v4769_v20, %v3366_v16  ;;  %v2383_v57 = vadd.f32 %v4550_v2, %v2344_v24 }
 0x20c   : > { %v3368_v9 = vpop.f32.mrf.mxu0  ;;  %v3480_v43 = vpop.f32.mrf.mxu1 }
 0x20d   : > { %3059 = vst [vmem:[%s4563_s23 + $0x40] sm:$0xff] %v3015_v19   ;;  %v2345_v4 = vmax.f32 %v1959_v5, %v3478_v6  ;;  %v3369_v48 = vadd.f32 %v3368_v9, %v3367_v22  ;;  %v3481_v12 = vadd.f32 %v3480_v43, %v3479_v25  ;;  %v2415_v13 = vmax.f32 %v2383_v57, 0.0  ;;  %v4777_v22 = vld [vmem:[#allocation6_spill] sm:$0xff]  ;;  %v4778_v25 = vld [vmem:[#allocation7_spill] sm:$0xff] }
 0x20e   : > { %v3370_v49 = vpop.f32.mrf.mxu0  ;;  %v3482_v15 = vpop.f32.mrf.mxu1  ;;  %v4779_v19 = vmax.f32 %v4777_v22, %v4778_v25 }
 0x20f   : > { %v2384_v0 = vadd.f32 %v4550_v2, %v2345_v4  ;;  %v1960_v28 = vmax.f32 %v4770_v29, %v3369_v48  ;;  %v4780_v29 = vld [vmem:[#allocation8_spill] sm:$0xff] }
 0x210   : > { %v3371_v17 = vpop.f32.mrf.mxu0  ;;  %v3483_v32 = vpop.f32.mrf.mxu1 }
 0x211   : > { %v2416_v37 = vmax.f32 %v2384_v0, 0.0  ;;  %v2346_v38 = vmax.f32 %v1960_v28, %v3481_v12  ;;  %v3372_v34 = vadd.f32 %v3371_v17, %v3370_v49  ;;  %v3484_v31 = vadd.f32 %v3483_v32, %v3482_v15  ;;  %v4781_v28 = vld [vmem:[#allocation9_spill] sm:$0xff] }
 0x212   : > { %v3373_v35 = vpop.f32.mrf.mxu0  ;;  %v3485_v27 = vpop.f32.mrf.mxu1  ;;  %v4782_v12 = vmax.f32 %v4780_v29, %v4781_v28 }
 0x213   : > { %v3020_v61 = vpack.c.bf16 %v2416_v37, %v2415_v13  ;;  %v1961_v30 = vmax.f32 %v4771_v62, %v3372_v34  ;;  %v2385_v46 = vadd.f32 %v4550_v2, %v2346_v38 }
 0x214   : > { %v3374_v50 = vpop.f32.mrf.mxu0  ;;  %v3486_v53 = vpop.f32.mrf.mxu1 }
 0x215   : > { %3060 = vst [vmem:[%s4563_s23 + $0x48] sm:$0xff] %v3020_v61   ;;  %v2347_v3 = vmax.f32 %v1961_v30, %v3484_v31  ;;  %v3375_v54 = vadd.f32 %v3374_v50, %v3373_v35  ;;  %v3487_v47 = vadd.f32 %v3486_v53, %v3485_v27  ;;  %v2417_v60 = vmax.f32 %v2385_v46, 0.0  ;;  %v4783_v30 = vld [vmem:[#allocation10_spill] sm:$0xff]  ;;  %v4784_v31 = vld [vmem:[#allocation11_spill] sm:$0xff] }
 0x216   : > { %v3376_v58 = vpop.f32.mrf.mxu0  ;;  %v3488_v51 = vpop.f32.mrf.mxu1  ;;  %v4785_v50 = vmax.f32 %v4783_v30, %v4784_v31 }
 0x217   : > { %v2386_v52 = vadd.f32 %v4550_v2, %v2347_v3  ;;  %v1962_v18 = vmax.f32 %v4773_v55, %v3375_v54 }
 0x218   : > { %v3377_v44 = vpop.f32.mrf.mxu0  ;;  %v3489_v26 = vpop.f32.mrf.mxu1 }
 0x219   : > { %v2418_v41 = vmax.f32 %v2386_v52, 0.0  ;;  %v2348_v42 = vmax.f32 %v1962_v18, %v3487_v47  ;;  %v3378_v40 = vadd.f32 %v3377_v44, %v3376_v58  ;;  %v3490_v1 = vadd.f32 %v3489_v26, %v3488_v51  ;;  %v4786_v44 = vld [vmem:[#allocation12_spill] sm:$0xff]  ;;  %v4787_v26 = vld [vmem:[#allocation13_spill] sm:$0xff] }
 0x21a   : > { %v3379_v10 = vpop.f32.mrf.mxu0  ;;  %v3491_v11 = vpop.f32.mrf.mxu1 }
 0x21b   : > { %v3025_v7 = vpack.c.bf16 %v2418_v41, %v2417_v60  ;;  %v1963_v63 = vmax.f32 %v4776_v36, %v3378_v40  ;;  %v2387_v14 = vadd.f32 %v4550_v2, %v2348_v42  ;;  %v4788_v60 = vmax.f32 %v4786_v44, %v4787_v26 }
 0x21c   : > { %v3380_v56 = vpop.f32.mrf.mxu0  ;;  %v3492_v33 = vpop.f32.mrf.mxu1 }
 0x21d   : > { %3061 = vst [vmem:[%s4563_s23 + $0x50] sm:$0xff] %v3025_v7   ;;  %v2349_v39 = vmax.f32 %v1963_v63, %v3490_v1  ;;  %v3381_v21 = vadd.f32 %v3380_v56, %v3379_v10  ;;  %v3493_v5 = vadd.f32 %v3492_v33, %v3491_v11  ;;  %v2419_v43 = vmax.f32 %v2387_v14, 0.0  ;;  %v4789_v1 = vld [vmem:[#allocation14_spill] sm:$0xff]  ;;  %v4790_v56 = vld [vmem:[#allocation15_spill] sm:$0xff] }
 0x21e   : > { %v3382_v23 = vpop.f32.mrf.mxu0  ;;  %v3494_v24 = vpop.f32.mrf.mxu1  ;;  %v4791_v33 = vmax.f32 %v4789_v1, %v4790_v56 }
 0x21f   : > { %v2388_v16 = vadd.f32 %v4550_v2, %v2349_v39  ;;  %v1964_v20 = vmax.f32 %v4779_v19, %v3381_v21 }
 0x220   : > { %v3383_v6 = vpop.f32.mrf.mxu0  ;;  %v3495_v9 = vpop.f32.mrf.mxu1 }
 0x221   : > { %v2420_v57 = vmax.f32 %v2388_v16, 0.0  ;;  %v2350_v4 = vmax.f32 %v1964_v20, %v3493_v5  ;;  %v3384_v48 = vadd.f32 %v3383_v6, %v3382_v23  ;;  %v3496_v32 = vadd.f32 %v3495_v9, %v3494_v24  ;;  %v4792_v6 = vld [vmem:[#allocation16_spill] sm:$0xff]  ;;  %v4793_v9 = vld [vmem:[#allocation17_spill] sm:$0xff] }
 0x222   : > { %v3385_v49 = vpop.f32.mrf.mxu0  ;;  %v3497_v15 = vpop.f32.mrf.mxu1 }
 0x223   : > { %v3030_v0 = vpack.c.bf16 %v2420_v57, %v2419_v43  ;;  %v1965_v17 = vmax.f32 %v4782_v12, %v3384_v48  ;;  %v2389_v38 = vadd.f32 %v4550_v2, %v2350_v4  ;;  %v4794_v43 = vmax.f32 %v4792_v6, %v4793_v9 }
 0x224   : > { %v3386_v13 = vpop.f32.mrf.mxu0  ;;  %v3498_v37 = vpop.f32.mrf.mxu1 }
 0x225   : > { %3062 = vst [vmem:[%s4563_s23 + $0x58] sm:$0xff] %v3030_v0   ;;  %v2351_v34 = vmax.f32 %v1965_v17, %v3496_v32  ;;  %v3387_v35 = vadd.f32 %v3386_v13, %v3385_v49  ;;  %v3499_v46 = vadd.f32 %v3498_v37, %v3497_v15  ;;  %v2421_v58 = vmax.f32 %v2389_v38, 0.0  ;;  %v4795_v32 = vld [vmem:[#allocation18_spill] sm:$0xff]  ;;  %v4796_v13 = vld [vmem:[#allocation19_spill] sm:$0xff] }
 0x226   : > { %v3388_v27 = vpop.f32.mrf.mxu0  ;;  %v3500_v61 = vpop.f32.mrf.mxu1  ;;  %v4797_v37 = vmax.f32 %v4795_v32, %v4796_v13 }
 0x227   : > { %v2390_v62 = vadd.f32 %v4550_v2, %v2351_v34  ;;  %v1966_v53 = vmax.f32 %v4785_v50, %v3387_v35 }
 0x228   : > { %v3389_v3 = vpop.f32.mrf.mxu0  ;;  %v3501_v54 = vpop.f32.mrf.mxu1 }
 0x229   : > { %v2422_v51 = vmax.f32 %v2390_v62, 0.0  ;;  %v2352_v52 = vmax.f32 %v1966_v53, %v3499_v46  ;;  %v3390_v59 = vadd.f32 %v3389_v3, %v3388_v27  ;;  %v3502_v42 = vadd.f32 %v3501_v54, %v3500_v61  ;;  %v4798_v53 = vld [vmem:[#allocation20_spill] sm:$0xff]  ;;  %v4799_v46 = vld [vmem:[#allocation21_spill] sm:$0xff] }
 0x22a   : > { %v3391_v55 = vpop.f32.mrf.mxu0  ;;  %v3503_v18 = vpop.f32.mrf.mxu1  ;;  %v4800_v3 = vmax.f32 %v4798_v53, %v4799_v46 }
 0x22b   : > { %v3035_v47 = vpack.c.bf16 %v2422_v51, %v2421_v58  ;;  %v1967_v41 = vmax.f32 %v4788_v60, %v3390_v59  ;;  %v2391_v11 = vadd.f32 %v4550_v2, %v2352_v52 }
 0x22c   : > { %v3392_v40 = vpop.f32.mrf.mxu0  ;;  %v3504_v10 = vpop.f32.mrf.mxu1 }
 0x22d   : > { %3063 = vst [vmem:[%s4563_s23 + $0x60] sm:$0xff] %v3035_v47   ;;  %v2353_v7 = vmax.f32 %v1967_v41, %v3502_v42  ;;  %v3393_v8 = vadd.f32 %v3392_v40, %v3391_v55  ;;  %v3505_v39 = vadd.f32 %v3504_v10, %v3503_v18  ;;  %v2423_v24 = vmax.f32 %v2391_v11, 0.0 }
 0x22e   : > { %v3394_v45 = vpop.f32.mrf.mxu0  ;;  %v3506_v36 = vpop.f32.mrf.mxu1 }
 0x22f   : > { %v2392_v63 = vadd.f32 %v4550_v2, %v2353_v7  ;;  %v1968_v14 = vmax.f32 %v4791_v33, %v3393_v8 }
 0x230   : > { %v3395_v21 = vpop.f32.mrf.mxu0  ;;  %v3507_v23 = vpop.f32.mrf.mxu1 }
 0x231   : > { %v2424_v16 = vmax.f32 %v2392_v63, 0.0  ;;  %v2354_v22 = vmax.f32 %v1968_v14, %v3505_v39  ;;  %v3396_v25 = vadd.f32 %v3395_v21, %v3394_v45  ;;  %v3508_v4 = vadd.f32 %v3507_v23, %v3506_v36 }
 0x232   : > { %v3397_v19 = vpop.f32.mrf.mxu0  ;;  %v3509_v20 = vpop.f32.mrf.mxu1 }
 0x233   : > { %v3040_v5 = vpack.c.bf16 %v2424_v16, %v2423_v24  ;;  %v1969_v57 = vmax.f32 %v4794_v43, %v3396_v25  ;;  %v2393_v15 = vadd.f32 %v4550_v2, %v2354_v22 }
 0x234   : > { %v3398_v48 = vpop.f32.mrf.mxu0  ;;  %v3510_v49 = vpop.f32.mrf.mxu1 }
 0x235   : > { %3064 = vst [vmem:[%s4563_s23 + $0x68] sm:$0xff] %v3040_v5   ;;  %v2355_v0 = vmax.f32 %v1969_v57, %v3508_v4  ;;  %v3399_v29 = vadd.f32 %v3398_v48, %v3397_v19  ;;  %v3511_v34 = vadd.f32 %v3510_v49, %v3509_v20  ;;  %v2425_v61 = vmax.f32 %v2393_v15, 0.0 }
 0x236   : > { %v3400_v28 = vpop.f32.mrf.mxu0  ;;  %v3512_v12 = vpop.f32.mrf.mxu1 }
 0x237   : > { %v2394_v17 = vadd.f32 %v4550_v2, %v2355_v0  ;;  %v1970_v38 = vmax.f32 %v4797_v37, %v3399_v29 }
 0x238   : > { %v3401_v35 = vpop.f32.mrf.mxu0  ;;  %v3513_v27 = vpop.f32.mrf.mxu1 }
 0x239   : > { %v2426_v62 = vmax.f32 %v2394_v17, 0.0  ;;  %v2356_v30 = vmax.f32 %v1970_v38, %v3511_v34  ;;  %v3402_v31 = vadd.f32 %v3401_v35, %v3400_v28  ;;  %v3514_v58 = vadd.f32 %v3513_v27, %v3512_v12 }
 0x23b   : > { %v3045_v50 = vpack.c.bf16 %v2426_v62, %v2425_v61  ;;  %v1971_v54 = vmax.f32 %v4800_v3, %v3402_v31  ;;  %v2395_v51 = vadd.f32 %v4550_v2, %v2356_v30 }
 0x23d   : > { %3065 = vst [vmem:[%s4563_s23 + $0x70] sm:$0xff] %v3045_v50   ;;  %v2357_v52 = vmax.f32 %v1971_v54, %v3514_v58  ;;  %v2427_v55 = vmax.f32 %v2395_v51, 0.0 }
 0x23f   : > { %v2396_v59 = vadd.f32 %v4550_v2, %v2357_v52 }
 0x241   : > { %v2428_v18 = vmax.f32 %v2396_v59, 0.0 }
 0x243   : > { %v3050_v47 = vpack.c.bf16 %v2428_v18, %v2427_v55 }
 0x245   : > { %3066 = vst [vmem:[%s4563_s23 + $0x78] sm:$0xff] %v3050_v47  }
 0x246 PF: > { %p10_p9 = scmp.ge.s32.totalorder %s3808_s16, 6   ;;  %s4801_s12 = smov %s3765_s13 }
 0x247   : > { %s4802_s13 = smov %s3817_s19  ;;  %s4803_s14 = smov %s3808_s16 }
 0x248   :  { %12 = sbr.rel (!%p10_p9) target bundleno = 2 (0x2), region = 108 }

// kernel: tile.18
= control target key start
LH: loop header
LB: loop body
LE: loop exit
PB: predicated region body
PF: predicated region fallthrough
CT: control target
= control target key end

     0   :  { %s22_s0 = inlined_call_operand.vmem [shape: f32[32], index: 0, kind: input, shape index: {}]   ;;  %s23_s1 = inlined_call_operand.vmem [shape: f32[4,32], index: 1, kind: output, shape index: {}]  }
   0x1   :  { %v4_v0 = vld [vmem:[%s22_s0] ss:$0 sm:$0xff] }
   0x2   :  { %5 = vst [vmem:[%s23_s1] sm:$0xf] %v4_v0 }

// kernel: tile.19
= control target key start
LH: loop header
LB: loop body
LE: loop exit
PB: predicated region body
PF: predicated region fallthrough
CT: control target
= control target key end

     0   :  { %vm8_vm0 = vcmask 261120   ;;  %s40_s8 = smov 32   ;;  %s41_s9 = smov 64   ;;  %vm14_vm1 = vcmask 1048320   ;;  %vm20_vm2 = vcmask 785920   ;;  %vm26_vm3 = vcmask 523520   ;;  %s58_s0 = inlined_call_operand.vmem [shape: f32[4,32], index: 0, kind: input, shape index: {}]   ;;  %s59_s1 = inlined_call_operand.vmem [shape: f32[1,128], index: 1, kind: output, shape index: {}]  }
   0x1   :  { %v5_v0 = vld [vmem:[%s58_s0] sm:$0xf]  ;;  %s39_s0 = smov 96  }
   0x2   :  { %6 = vst [vmem:[#allocation1] sm:$0xf] %v5_v0 }
   0x9   :  { %v11_v1 = vld [vmem:[#allocation1 + $0x3] sm:$0x1]   ;;  %v23_v2 = vld [vmem:[#allocation1 + $0x1] sm:$0x1]   ;;  %v7_v3 = vld [vmem:[#allocation1] sm:$0x1]  }
   0xa   :  { %12 = vrot.lane.b32.xlu0 %v11_v1, %s39_s0  ;;  %24 = vrot.lane.b32.xlu1 %v23_v2, %s40_s8  ;;  %v17_v4 = vld [vmem:[#allocation1 + $0x2] sm:$0x1]   ;;  %9 = vst.msk [vmem:[#allocation0] sm:$0x1] %vm8_vm0, %v7_v3  }
   0xe   :  { %18 = vrot.lane.b32.xlu0 %v17_v4, %s41_s9 }
  0x7c   :  { %v13_v5 = vpop.permute.xlu0 %12   ;;  %v25_v6 = vpop.permute.xlu1 %24  }
  0x7d   :  { %15 = vst.msk [vmem:[#allocation0] sm:$0x1] %vm14_vm1, %v13_v5  }
  0x80   :  { %v19_v7 = vpop.permute.xlu0 %18  }
  0x81   :  { %21 = vst.msk [vmem:[#allocation0] sm:$0x1] %vm20_vm2, %v19_v7  }
  0x82   :  { %27 = vst.msk [vmem:[#allocation0] sm:$0x1] %vm26_vm3, %v25_v6  }
  0x89   :  { %v32_v8 = vld [vmem:[#allocation0] sm:$0x1] }
  0x8a   :  { %35 = vst [vmem:[%s59_s1] sm:$0x1] %v32_v8 }

// kernel: simple_cnn_forward.4
= control target key start
LH: loop header
LB: loop body
LE: loop exit
PB: predicated region body
PF: predicated region fallthrough
CT: control target
= control target key end

     0   :  { %s4836_s12 = smov 0   ;;  %s4838_s13 = smov 0   ;;  %s6362_s0 = inlined_call_operand.vmem [shape: bf16[4,512,576], index: 0, kind: input, shape index: {}]   ;;  %s6363_s1 = inlined_call_operand.vmem [shape: bf16[576,128], index: 1, kind: input, shape index: {}]   ;;  %s6364_s2 = inlined_call_operand.vmem [shape: f32[1,128], index: 2, kind: input, shape index: {}]   ;;  %s6365_s3 = inlined_call_operand.vmem [shape: f32[512,128], index: 3, kind: output, shape index: {}]  }
   0x1   :  { %s4840_s14 = smov 0  }
   0x2 LB: > { %s3300_s15 = sadd.s32 4294967295, %s4814_s14   ;;  %s4853_s16 = sadd.s32 1, %s4814_s14   ;;  %s4814_s14 = sphi %s4840_s14, %s6415_s14   ;;  %s4810_s13 = sphi %s4838_s13, %s6414_s13   ;;  %s4806_s12 = sphi %s4836_s12, %s6413_s12  }
   0x3   : > { %s17_s17 = ssub.s32 %s4814_s14, %s4853_s16  ;;  %s20_s18 = sadd.s32 1, %s4810_s13 }
   0x4   : > { %p18_p0 = scmp.eq.s32.totalorder %s17_s17, 0  ;;  %p27_p1 = scmp.ne.s32.totalorder %s4810_s13, %s4806_s12 }
   0x5   : > { %p28_p2 = scmp.eq.s32.totalorder %s4814_s14, 0  ;;  %p3303_p4 = scmp.ge.s32.totalorder %s4814_s14, 4 }
   0x6   : > { %s4862_s19 = scalar_select %p18_p0, %s4810_s13, %s20_s18  }
   0x7   : > { %p29_p3 = por %p28_p2, %p27_p1  ;;  %127 = sbr.rel (%p3303_p4) target bundleno = 123 (0x7b), region = 24 }
   0xc   : > { %130 = sbr.rel (!%p29_p3) target bundleno = 123 (0x7b), region = 28  ;;  %s132_s20 = sand.u32 (%p29_p3), 1, %s4810_s13  }
   0xd   : > { %s4470_s21 = smul.u32 (%p29_p3), 320, %s4814_s14 }
   0xe   : > { %s4469_s22 = smul.u32 (%p29_p3), 1280, %s132_s20 }
   0xf   : > { %s4870_s25 = scalar_lea.vmem (%p29_p3), %s6362_s0, %s4470_s21 }
  0x10   : > { %v153_v0 = vld [vmem:[%s4870_s25] sm:$0xff] (%p29_p3)  ;;  %v155_v1 = vld [vmem:[%s4870_s25 + $0x8] sm:$0xff] (%p29_p3)  ;;  %v157_v2 = vld [vmem:[%s4870_s25 + $0x14] sm:$0xff] (%p29_p3)  ;;  %s4875_s26 = scalar_lea.vmem (%p29_p3), [#allocation2], %s4469_s22 }
  0x11   : > { %154 = vst [vmem:[%s4875_s26] sm:$0xff] %v153_v0  ;;  %156 = vst [vmem:[%s4875_s26 + $0x8] sm:$0xff] %v155_v1  ;;  %v159_v3 = vld [vmem:[%s4870_s25 + $0x1c] sm:$0xff]  ;;  %v161_v4 = vld [vmem:[%s4870_s25 + $0x28] sm:$0xff] }
  0x12   : > { %158 = vst [vmem:[%s4875_s26 + $0x14] sm:$0xff] %v157_v2  ;;  %v163_v5 = vld [vmem:[%s4870_s25 + $0x30] sm:$0xff]  ;;  %160 = vst [vmem:[%s4875_s26 + $0x1c] sm:$0xff] %v159_v3  ;;  %v165_v6 = vld [vmem:[%s4870_s25 + $0x3c] sm:$0xff] }
  0x13   : > { %162 = vst [vmem:[%s4875_s26 + $0x28] sm:$0xff] %v161_v4  ;;  %164 = vst [vmem:[%s4875_s26 + $0x30] sm:$0xff] %v163_v5  ;;  %v167_v7 = vld [vmem:[%s4870_s25 + $0x44] sm:$0xff]  ;;  %v169_v8 = vld [vmem:[%s4870_s25 + $0x50] sm:$0xff] }
  0x14   : > { %166 = vst [vmem:[%s4875_s26 + $0x3c] sm:$0xff] %v165_v6  ;;  %168 = vst [vmem:[%s4875_s26 + $0x44] sm:$0xff] %v167_v7  ;;  %v171_v9 = vld [vmem:[%s4870_s25 + $0x58] sm:$0xff]  ;;  %v173_v10 = vld [vmem:[%s4870_s25 + $0x64] sm:$0xff] }
  0x15   : > { %170 = vst [vmem:[%s4875_s26 + $0x50] sm:$0xff] %v169_v8  ;;  %v175_v11 = vld [vmem:[%s4870_s25 + $0x6c] sm:$0xff]  ;;  %172 = vst [vmem:[%s4875_s26 + $0x58] sm:$0xff] %v171_v9  ;;  %v177_v12 = vld [vmem:[%s4870_s25 + $0x78] sm:$0xff] }
  0x16   : > { %174 = vst [vmem:[%s4875_s26 + $0x64] sm:$0xff] %v173_v10  ;;  %176 = vst [vmem:[%s4875_s26 + $0x6c] sm:$0xff] %v175_v11  ;;  %v179_v13 = vld [vmem:[%s4870_s25 + $0x80] sm:$0xff]  ;;  %v181_v14 = vld [vmem:[%s4870_s25 + $0x8c] sm:$0xff] }
  0x17   : > { %178 = vst [vmem:[%s4875_s26 + $0x78] sm:$0xff] %v177_v12  ;;  %180 = vst [vmem:[%s4875_s26 + $0x80] sm:$0xff] %v179_v13  ;;  %v183_v15 = vld [vmem:[%s4870_s25 + $0x94] sm:$0xff]  ;;  %v185_v16 = vld [vmem:[%s4870_s25 + $0xa0] sm:$0xff] }
  0x18   : > { %182 = vst [vmem:[%s4875_s26 + $0x8c] sm:$0xff] %v181_v14  ;;  %v187_v17 = vld [vmem:[%s4870_s25 + $0xa8] sm:$0xff]  ;;  %184 = vst [vmem:[%s4875_s26 + $0x94] sm:$0xff] %v183_v15  ;;  %v189_v18 = vld [vmem:[%s4870_s25 + $0xb4] sm:$0xff] }
  0x19   : > { %186 = vst [vmem:[%s4875_s26 + $0xa0] sm:$0xff] %v185_v16  ;;  %188 = vst [vmem:[%s4875_s26 + $0xa8] sm:$0xff] %v187_v17  ;;  %v191_v19 = vld [vmem:[%s4870_s25 + $0xbc] sm:$0xff]  ;;  %v193_v20 = vld [vmem:[%s4870_s25 + $0xc8] sm:$0xff] }
  0x1a   : > { %190 = vst [vmem:[%s4875_s26 + $0xb4] sm:$0xff] %v189_v18  ;;  %192 = vst [vmem:[%s4875_s26 + $0xbc] sm:$0xff] %v191_v19  ;;  %v195_v21 = vld [vmem:[%s4870_s25 + $0xd0] sm:$0xff]  ;;  %v197_v22 = vld [vmem:[%s4870_s25 + $0xdc] sm:$0xff] }
  0x1b   : > { %194 = vst [vmem:[%s4875_s26 + $0xc8] sm:$0xff] %v193_v20  ;;  %v199_v23 = vld [vmem:[%s4870_s25 + $0xe4] sm:$0xff]  ;;  %196 = vst [vmem:[%s4875_s26 + $0xd0] sm:$0xff] %v195_v21  ;;  %v201_v24 = vld [vmem:[%s4870_s25 + $0xf0] sm:$0xff] }
  0x1c   : > { %198 = vst [vmem:[%s4875_s26 + $0xdc] sm:$0xff] %v197_v22  ;;  %200 = vst [vmem:[%s4875_s26 + $0xe4] sm:$0xff] %v199_v23  ;;  %v203_v25 = vld [vmem:[%s4870_s25 + $0xf8] sm:$0xff]  ;;  %v205_v26 = vld [vmem:[%s4870_s25 + $0x104] sm:$0xff] }
  0x1d   : > { %202 = vst [vmem:[%s4875_s26 + $0xf0] sm:$0xff] %v201_v24  ;;  %204 = vst [vmem:[%s4875_s26 + $0xf8] sm:$0xff] %v203_v25  ;;  %v207_v27 = vld [vmem:[%s4870_s25 + $0x10c] sm:$0xff]  ;;  %v209_v28 = vld [vmem:[%s4870_s25 + $0x118] sm:$0xff] }
  0x1e   : > { %206 = vst [vmem:[%s4875_s26 + $0x104] sm:$0xff] %v205_v26  ;;  %v211_v29 = vld [vmem:[%s4870_s25 + $0x120] sm:$0xff]  ;;  %208 = vst [vmem:[%s4875_s26 + $0x10c] sm:$0xff] %v207_v27  ;;  %v213_v30 = vld [vmem:[%s4870_s25 + $0x12c] sm:$0xff] }
  0x1f   : > { %210 = vst [vmem:[%s4875_s26 + $0x118] sm:$0xff] %v209_v28  ;;  %212 = vst [vmem:[%s4875_s26 + $0x120] sm:$0xff] %v211_v29  ;;  %v215_v31 = vld [vmem:[%s4870_s25 + $0x134] sm:$0xff]  ;;  %v217_v32 = vld [vmem:[%s4870_s25 + $0x500] sm:$0xff] }
  0x20   : > { %214 = vst [vmem:[%s4875_s26 + $0x12c] sm:$0xff] %v213_v30  ;;  %216 = vst [vmem:[%s4875_s26 + $0x134] sm:$0xff] %v215_v31  ;;  %v219_v33 = vld [vmem:[%s4870_s25 + $0x508] sm:$0xff]  ;;  %v221_v34 = vld [vmem:[%s4870_s25 + $0x514] sm:$0xff] }
  0x21   : > { %218 = vst [vmem:[%s4875_s26 + $0x140] sm:$0xff] %v217_v32  ;;  %v223_v35 = vld [vmem:[%s4870_s25 + $0x51c] sm:$0xff]  ;;  %220 = vst [vmem:[%s4875_s26 + $0x148] sm:$0xff] %v219_v33  ;;  %v225_v36 = vld [vmem:[%s4870_s25 + $0x528] sm:$0xff] }
  0x22   : > { %222 = vst [vmem:[%s4875_s26 + $0x154] sm:$0xff] %v221_v34  ;;  %224 = vst [vmem:[%s4875_s26 + $0x15c] sm:$0xff] %v223_v35  ;;  %v227_v37 = vld [vmem:[%s4870_s25 + $0x530] sm:$0xff]  ;;  %v229_v38 = vld [vmem:[%s4870_s25 + $0x53c] sm:$0xff] }
  0x23   : > { %226 = vst [vmem:[%s4875_s26 + $0x168] sm:$0xff] %v225_v36  ;;  %228 = vst [vmem:[%s4875_s26 + $0x170] sm:$0xff] %v227_v37  ;;  %v231_v39 = vld [vmem:[%s4870_s25 + $0x544] sm:$0xff]  ;;  %v233_v40 = vld [vmem:[%s4870_s25 + $0x550] sm:$0xff] }
  0x24   : > { %230 = vst [vmem:[%s4875_s26 + $0x17c] sm:$0xff] %v229_v38  ;;  %v235_v41 = vld [vmem:[%s4870_s25 + $0x558] sm:$0xff]  ;;  %232 = vst [vmem:[%s4875_s26 + $0x184] sm:$0xff] %v231_v39  ;;  %v237_v42 = vld [vmem:[%s4870_s25 + $0x564] sm:$0xff] }
  0x25   : > { %234 = vst [vmem:[%s4875_s26 + $0x190] sm:$0xff] %v233_v40  ;;  %236 = vst [vmem:[%s4875_s26 + $0x198] sm:$0xff] %v235_v41  ;;  %v239_v43 = vld [vmem:[%s4870_s25 + $0x56c] sm:$0xff]  ;;  %v241_v44 = vld [vmem:[%s4870_s25 + $0x578] sm:$0xff] }
  0x26   : > { %238 = vst [vmem:[%s4875_s26 + $0x1a4] sm:$0xff] %v237_v42  ;;  %240 = vst [vmem:[%s4875_s26 + $0x1ac] sm:$0xff] %v239_v43  ;;  %v243_v45 = vld [vmem:[%s4870_s25 + $0x580] sm:$0xff]  ;;  %v245_v46 = vld [vmem:[%s4870_s25 + $0x58c] sm:$0xff] }
  0x27   : > { %242 = vst [vmem:[%s4875_s26 + $0x1b8] sm:$0xff] %v241_v44  ;;  %v247_v47 = vld [vmem:[%s4870_s25 + $0x594] sm:$0xff]  ;;  %244 = vst [vmem:[%s4875_s26 + $0x1c0] sm:$0xff] %v243_v45  ;;  %v249_v48 = vld [vmem:[%s4870_s25 + $0x5a0] sm:$0xff] }
  0x28   : > { %246 = vst [vmem:[%s4875_s26 + $0x1cc] sm:$0xff] %v245_v46  ;;  %248 = vst [vmem:[%s4875_s26 + $0x1d4] sm:$0xff] %v247_v47  ;;  %v251_v49 = vld [vmem:[%s4870_s25 + $0x5a8] sm:$0xff]  ;;  %v253_v50 = vld [vmem:[%s4870_s25 + $0x5b4] sm:$0xff] }
  0x29   : > { %250 = vst [vmem:[%s4875_s26 + $0x1e0] sm:$0xff] %v249_v48  ;;  %252 = vst [vmem:[%s4875_s26 + $0x1e8] sm:$0xff] %v251_v49  ;;  %v255_v51 = vld [vmem:[%s4870_s25 + $0x5bc] sm:$0xff]  ;;  %v257_v52 = vld [vmem:[%s4870_s25 + $0x5c8] sm:$0xff] }
  0x2a   : > { %254 = vst [vmem:[%s4875_s26 + $0x1f4] sm:$0xff] %v253_v50  ;;  %v259_v53 = vld [vmem:[%s4870_s25 + $0x5d0] sm:$0xff]  ;;  %256 = vst [vmem:[%s4875_s26 + $0x1fc] sm:$0xff] %v255_v51  ;;  %v261_v54 = vld [vmem:[%s4870_s25 + $0x5dc] sm:$0xff] }
  0x2b   : > { %258 = vst [vmem:[%s4875_s26 + $0x208] sm:$0xff] %v257_v52  ;;  %260 = vst [vmem:[%s4875_s26 + $0x210] sm:$0xff] %v259_v53  ;;  %v263_v55 = vld [vmem:[%s4870_s25 + $0x5e4] sm:$0xff]  ;;  %v265_v56 = vld [vmem:[%s4870_s25 + $0x5f0] sm:$0xff] }
  0x2c   : > { %262 = vst [vmem:[%s4875_s26 + $0x21c] sm:$0xff] %v261_v54  ;;  %264 = vst [vmem:[%s4875_s26 + $0x224] sm:$0xff] %v263_v55  ;;  %v267_v57 = vld [vmem:[%s4870_s25 + $0x5f8] sm:$0xff]  ;;  %v269_v58 = vld [vmem:[%s4870_s25 + $0x604] sm:$0xff] }
  0x2d   : > { %266 = vst [vmem:[%s4875_s26 + $0x230] sm:$0xff] %v265_v56  ;;  %v271_v59 = vld [vmem:[%s4870_s25 + $0x60c] sm:$0xff]  ;;  %268 = vst [vmem:[%s4875_s26 + $0x238] sm:$0xff] %v267_v57  ;;  %v273_v60 = vld [vmem:[%s4870_s25 + $0x618] sm:$0xff] }
  0x2e   : > { %270 = vst [vmem:[%s4875_s26 + $0x244] sm:$0xff] %v269_v58  ;;  %272 = vst [vmem:[%s4875_s26 + $0x24c] sm:$0xff] %v271_v59  ;;  %v275_v61 = vld [vmem:[%s4870_s25 + $0x620] sm:$0xff]  ;;  %v277_v62 = vld [vmem:[%s4870_s25 + $0x62c] sm:$0xff] }
  0x2f   : > { %274 = vst [vmem:[%s4875_s26 + $0x258] sm:$0xff] %v273_v60  ;;  %276 = vst [vmem:[%s4875_s26 + $0x260] sm:$0xff] %v275_v61  ;;  %v279_v63 = vld [vmem:[%s4870_s25 + $0x634] sm:$0xff]  ;;  %v281_v0 = vld [vmem:[%s4870_s25 + $0xa00] sm:$0xff] }
  0x30   : > { %278 = vst [vmem:[%s4875_s26 + $0x26c] sm:$0xff] %v277_v62  ;;  %v283_v1 = vld [vmem:[%s4870_s25 + $0xa08] sm:$0xff]  ;;  %280 = vst [vmem:[%s4875_s26 + $0x274] sm:$0xff] %v279_v63  ;;  %v285_v2 = vld [vmem:[%s4870_s25 + $0xa14] sm:$0xff] }
  0x31   : > { %282 = vst [vmem:[%s4875_s26 + $0x280] sm:$0xff] %v281_v0  ;;  %284 = vst [vmem:[%s4875_s26 + $0x288] sm:$0xff] %v283_v1  ;;  %v287_v3 = vld [vmem:[%s4870_s25 + $0xa1c] sm:$0xff]  ;;  %v289_v4 = vld [vmem:[%s4870_s25 + $0xa28] sm:$0xff] }
  0x32   : > { %286 = vst [vmem:[%s4875_s26 + $0x294] sm:$0xff] %v285_v2  ;;  %288 = vst [vmem:[%s4875_s26 + $0x29c] sm:$0xff] %v287_v3  ;;  %v291_v5 = vld [vmem:[%s4870_s25 + $0xa30] sm:$0xff]  ;;  %v293_v6 = vld [vmem:[%s4870_s25 + $0xa3c] sm:$0xff] }
  0x33   : > { %290 = vst [vmem:[%s4875_s26 + $0x2a8] sm:$0xff] %v289_v4  ;;  %v295_v7 = vld [vmem:[%s4870_s25 + $0xa44] sm:$0xff]  ;;  %292 = vst [vmem:[%s4875_s26 + $0x2b0] sm:$0xff] %v291_v5  ;;  %v297_v8 = vld [vmem:[%s4870_s25 + $0xa50] sm:$0xff] }
  0x34   : > { %294 = vst [vmem:[%s4875_s26 + $0x2bc] sm:$0xff] %v293_v6  ;;  %296 = vst [vmem:[%s4875_s26 + $0x2c4] sm:$0xff] %v295_v7  ;;  %v299_v9 = vld [vmem:[%s4870_s25 + $0xa58] sm:$0xff]  ;;  %v301_v10 = vld [vmem:[%s4870_s25 + $0xa64] sm:$0xff] }
  0x35   : > { %298 = vst [vmem:[%s4875_s26 + $0x2d0] sm:$0xff] %v297_v8  ;;  %300 = vst [vmem:[%s4875_s26 + $0x2d8] sm:$0xff] %v299_v9  ;;  %v303_v11 = vld [vmem:[%s4870_s25 + $0xa6c] sm:$0xff]  ;;  %v305_v12 = vld [vmem:[%s4870_s25 + $0xa78] sm:$0xff] }
  0x36   : > { %302 = vst [vmem:[%s4875_s26 + $0x2e4] sm:$0xff] %v301_v10  ;;  %v307_v13 = vld [vmem:[%s4870_s25 + $0xa80] sm:$0xff]  ;;  %304 = vst [vmem:[%s4875_s26 + $0x2ec] sm:$0xff] %v303_v11  ;;  %v309_v14 = vld [vmem:[%s4870_s25 + $0xa8c] sm:$0xff] }
  0x37   : > { %306 = vst [vmem:[%s4875_s26 + $0x2f8] sm:$0xff] %v305_v12  ;;  %308 = vst [vmem:[%s4875_s26 + $0x300] sm:$0xff] %v307_v13  ;;  %v311_v15 = vld [vmem:[%s4870_s25 + $0xa94] sm:$0xff]  ;;  %v313_v16 = vld [vmem:[%s4870_s25 + $0xaa0] sm:$0xff] }
  0x38   : > { %310 = vst [vmem:[%s4875_s26 + $0x30c] sm:$0xff] %v309_v14  ;;  %312 = vst [vmem:[%s4875_s26 + $0x314] sm:$0xff] %v311_v15  ;;  %v315_v17 = vld [vmem:[%s4870_s25 + $0xaa8] sm:$0xff]  ;;  %v317_v18 = vld [vmem:[%s4870_s25 + $0xab4] sm:$0xff] }
  0x39   : > { %314 = vst [vmem:[%s4875_s26 + $0x320] sm:$0xff] %v313_v16  ;;  %v319_v19 = vld [vmem:[%s4870_s25 + $0xabc] sm:$0xff]  ;;  %316 = vst [vmem:[%s4875_s26 + $0x328] sm:$0xff] %v315_v17  ;;  %v321_v20 = vld [vmem:[%s4870_s25 + $0xac8] sm:$0xff] }
  0x3a   : > { %318 = vst [vmem:[%s4875_s26 + $0x334] sm:$0xff] %v317_v18  ;;  %320 = vst [vmem:[%s4875_s26 + $0x33c] sm:$0xff] %v319_v19  ;;  %v323_v21 = vld [vmem:[%s4870_s25 + $0xad0] sm:$0xff]  ;;  %v325_v22 = vld [vmem:[%s4870_s25 + $0xadc] sm:$0xff] }
  0x3b   : > { %322 = vst [vmem:[%s4875_s26 + $0x348] sm:$0xff] %v321_v20  ;;  %324 = vst [vmem:[%s4875_s26 + $0x350] sm:$0xff] %v323_v21  ;;  %v327_v23 = vld [vmem:[%s4870_s25 + $0xae4] sm:$0xff]  ;;  %v329_v24 = vld [vmem:[%s4870_s25 + $0xaf0] sm:$0xff] }
  0x3c   : > { %326 = vst [vmem:[%s4875_s26 + $0x35c] sm:$0xff] %v325_v22  ;;  %v331_v25 = vld [vmem:[%s4870_s25 + $0xaf8] sm:$0xff]  ;;  %328 = vst [vmem:[%s4875_s26 + $0x364] sm:$0xff] %v327_v23  ;;  %v333_v26 = vld [vmem:[%s4870_s25 + $0xb04] sm:$0xff] }
  0x3d   : > { %330 = vst [vmem:[%s4875_s26 + $0x370] sm:$0xff] %v329_v24  ;;  %332 = vst [vmem:[%s4875_s26 + $0x378] sm:$0xff] %v331_v25  ;;  %v335_v27 = vld [vmem:[%s4870_s25 + $0xb0c] sm:$0xff]  ;;  %v337_v28 = vld [vmem:[%s4870_s25 + $0xb18] sm:$0xff] }
  0x3e   : > { %334 = vst [vmem:[%s4875_s26 + $0x384] sm:$0xff] %v333_v26  ;;  %336 = vst [vmem:[%s4875_s26 + $0x38c] sm:$0xff] %v335_v27  ;;  %v339_v29 = vld [vmem:[%s4870_s25 + $0xb20] sm:$0xff]  ;;  %v341_v30 = vld [vmem:[%s4870_s25 + $0xb2c] sm:$0xff] }
  0x3f   : > { %338 = vst [vmem:[%s4875_s26 + $0x398] sm:$0xff] %v337_v28  ;;  %v343_v31 = vld [vmem:[%s4870_s25 + $0xb34] sm:$0xff]  ;;  %340 = vst [vmem:[%s4875_s26 + $0x3a0] sm:$0xff] %v339_v29  ;;  %v345_v32 = vld [vmem:[%s4870_s25 + $0xf00] sm:$0xff] }
  0x40   : > { %342 = vst [vmem:[%s4875_s26 + $0x3ac] sm:$0xff] %v341_v30  ;;  %344 = vst [vmem:[%s4875_s26 + $0x3b4] sm:$0xff] %v343_v31  ;;  %v347_v33 = vld [vmem:[%s4870_s25 + $0xf08] sm:$0xff]  ;;  %v349_v34 = vld [vmem:[%s4870_s25 + $0xf14] sm:$0xff] }
  0x41   : > { %346 = vst [vmem:[%s4875_s26 + $0x3c0] sm:$0xff] %v345_v32  ;;  %348 = vst [vmem:[%s4875_s26 + $0x3c8] sm:$0xff] %v347_v33  ;;  %v351_v35 = vld [vmem:[%s4870_s25 + $0xf1c] sm:$0xff]  ;;  %v353_v36 = vld [vmem:[%s4870_s25 + $0xf28] sm:$0xff] }
  0x42   : > { %350 = vst [vmem:[%s4875_s26 + $0x3d4] sm:$0xff] %v349_v34  ;;  %v355_v37 = vld [vmem:[%s4870_s25 + $0xf30] sm:$0xff]  ;;  %352 = vst [vmem:[%s4875_s26 + $0x3dc] sm:$0xff] %v351_v35  ;;  %v357_v38 = vld [vmem:[%s4870_s25 + $0xf3c] sm:$0xff] }
  0x43   : > { %354 = vst [vmem:[%s4875_s26 + $0x3e8] sm:$0xff] %v353_v36  ;;  %356 = vst [vmem:[%s4875_s26 + $0x3f0] sm:$0xff] %v355_v37  ;;  %v359_v39 = vld [vmem:[%s4870_s25 + $0xf44] sm:$0xff]  ;;  %v361_v40 = vld [vmem:[%s4870_s25 + $0xf50] sm:$0xff] }
  0x44   : > { %358 = vst [vmem:[%s4875_s26 + $0x3fc] sm:$0xff] %v357_v38  ;;  %360 = vst [vmem:[%s4875_s26 + $0x404] sm:$0xff] %v359_v39  ;;  %v363_v41 = vld [vmem:[%s4870_s25 + $0xf58] sm:$0xff]  ;;  %v365_v42 = vld [vmem:[%s4870_s25 + $0xf64] sm:$0xff] }
  0x45   : > { %362 = vst [vmem:[%s4875_s26 + $0x410] sm:$0xff] %v361_v40  ;;  %v367_v43 = vld [vmem:[%s4870_s25 + $0xf6c] sm:$0xff]  ;;  %364 = vst [vmem:[%s4875_s26 + $0x418] sm:$0xff] %v363_v41  ;;  %v369_v44 = vld [vmem:[%s4870_s25 + $0xf78] sm:$0xff] }
  0x46   : > { %366 = vst [vmem:[%s4875_s26 + $0x424] sm:$0xff] %v365_v42  ;;  %368 = vst [vmem:[%s4875_s26 + $0x42c] sm:$0xff] %v367_v43  ;;  %v371_v45 = vld [vmem:[%s4870_s25 + $0xf80] sm:$0xff]  ;;  %v373_v46 = vld [vmem:[%s4870_s25 + $0xf8c] sm:$0xff] }
  0x47   : > { %370 = vst [vmem:[%s4875_s26 + $0x438] sm:$0xff] %v369_v44  ;;  %372 = vst [vmem:[%s4875_s26 + $0x440] sm:$0xff] %v371_v45  ;;  %v375_v47 = vld [vmem:[%s4870_s25 + $0xf94] sm:$0xff]  ;;  %v377_v48 = vld [vmem:[%s4870_s25 + $0xfa0] sm:$0xff] }
  0x48   : > { %374 = vst [vmem:[%s4875_s26 + $0x44c] sm:$0xff] %v373_v46  ;;  %v379_v49 = vld [vmem:[%s4870_s25 + $0xfa8] sm:$0xff]  ;;  %376 = vst [vmem:[%s4875_s26 + $0x454] sm:$0xff] %v375_v47  ;;  %v381_v50 = vld [vmem:[%s4870_s25 + $0xfb4] sm:$0xff] }
  0x49   : > { %378 = vst [vmem:[%s4875_s26 + $0x460] sm:$0xff] %v377_v48  ;;  %380 = vst [vmem:[%s4875_s26 + $0x468] sm:$0xff] %v379_v49  ;;  %v383_v51 = vld [vmem:[%s4870_s25 + $0xfbc] sm:$0xff]  ;;  %v385_v52 = vld [vmem:[%s4870_s25 + $0xfc8] sm:$0xff] }
  0x4a   : > { %382 = vst [vmem:[%s4875_s26 + $0x474] sm:$0xff] %v381_v50  ;;  %384 = vst [vmem:[%s4875_s26 + $0x47c] sm:$0xff] %v383_v51  ;;  %v387_v53 = vld [vmem:[%s4870_s25 + $0xfd0] sm:$0xff]  ;;  %v389_v54 = vld [vmem:[%s4870_s25 + $0xfdc] sm:$0xff] }
  0x4b   : > { %386 = vst [vmem:[%s4875_s26 + $0x488] sm:$0xff] %v385_v52  ;;  %v391_v55 = vld [vmem:[%s4870_s25 + $0xfe4] sm:$0xff]  ;;  %388 = vst [vmem:[%s4875_s26 + $0x490] sm:$0xff] %v387_v53  ;;  %v393_v56 = vld [vmem:[%s4870_s25 + $0xff0] sm:$0xff] }
  0x4c   : > { %390 = vst [vmem:[%s4875_s26 + $0x49c] sm:$0xff] %v389_v54  ;;  %392 = vst [vmem:[%s4875_s26 + $0x4a4] sm:$0xff] %v391_v55  ;;  %v395_v57 = vld [vmem:[%s4870_s25 + $0xff8] sm:$0xff]  ;;  %v397_v58 = vld [vmem:[%s4870_s25 + $0x1004] sm:$0xff] }
  0x4d   : > { %394 = vst [vmem:[%s4875_s26 + $0x4b0] sm:$0xff] %v393_v56  ;;  %396 = vst [vmem:[%s4875_s26 + $0x4b8] sm:$0xff] %v395_v57  ;;  %v399_v59 = vld [vmem:[%s4870_s25 + $0x100c] sm:$0xff]  ;;  %v401_v60 = vld [vmem:[%s4870_s25 + $0x1018] sm:$0xff] }
  0x4e   : > { %398 = vst [vmem:[%s4875_s26 + $0x4c4] sm:$0xff] %v397_v58  ;;  %v403_v61 = vld [vmem:[%s4870_s25 + $0x1020] sm:$0xff]  ;;  %400 = vst [vmem:[%s4875_s26 + $0x4cc] sm:$0xff] %v399_v59  ;;  %v405_v62 = vld [vmem:[%s4870_s25 + $0x102c] sm:$0xff] }
  0x4f   : > { %402 = vst [vmem:[%s4875_s26 + $0x4d8] sm:$0xff] %v401_v60  ;;  %404 = vst [vmem:[%s4875_s26 + $0x4e0] sm:$0xff] %v403_v61  ;;  %v407_v63 = vld [vmem:[%s4870_s25 + $0x1034] sm:$0xff]  ;;  %v3307_v0 = vld [vmem:[%s4870_s25 + $0x10] sm:$0xf] }
  0x50   : > { %406 = vst [vmem:[%s4875_s26 + $0x4ec] sm:$0xff] %v405_v62  ;;  %408 = vst [vmem:[%s4875_s26 + $0x4f4] sm:$0xff] %v407_v63  ;;  %v3309_v1 = vld [vmem:[%s4870_s25 + $0x24] sm:$0xf]  ;;  %v3311_v2 = vld [vmem:[%s4870_s25 + $0x38] sm:$0xf] }
  0x51   : > { %3308 = vst [vmem:[%s4875_s26 + $0x10] sm:$0xf] %v3307_v0  ;;  %v3313_v3 = vld [vmem:[%s4870_s25 + $0x4c] sm:$0xf]  ;;  %3310 = vst [vmem:[%s4875_s26 + $0x24] sm:$0xf] %v3309_v1 }
  0x52   : > { %3312 = vst [vmem:[%s4875_s26 + $0x38] sm:$0xf] %v3311_v2  ;;  %3314 = vst [vmem:[%s4875_s26 + $0x4c] sm:$0xf] %v3313_v3  ;;  %v3315_v4 = vld [vmem:[%s4870_s25 + $0x60] sm:$0xf] }
  0x53   : > { %v3317_v5 = vld [vmem:[%s4870_s25 + $0x74] sm:$0xf]  ;;  %v3319_v6 = vld [vmem:[%s4870_s25 + $0x88] sm:$0xf]  ;;  %3316 = vst [vmem:[%s4875_s26 + $0x60] sm:$0xf] %v3315_v4 }
  0x54   : > { %3318 = vst [vmem:[%s4875_s26 + $0x74] sm:$0xf] %v3317_v5  ;;  %3320 = vst [vmem:[%s4875_s26 + $0x88] sm:$0xf] %v3319_v6  ;;  %v3321_v7 = vld [vmem:[%s4870_s25 + $0x9c] sm:$0xf] }
  0x55   : > { %v3323_v8 = vld [vmem:[%s4870_s25 + $0xb0] sm:$0xf]  ;;  %v3325_v9 = vld [vmem:[%s4870_s25 + $0xc4] sm:$0xf]  ;;  %3322 = vst [vmem:[%s4875_s26 + $0x9c] sm:$0xf] %v3321_v7 }
  0x56   : > { %3324 = vst [vmem:[%s4875_s26 + $0xb0] sm:$0xf] %v3323_v8  ;;  %3326 = vst [vmem:[%s4875_s26 + $0xc4] sm:$0xf] %v3325_v9  ;;  %v3327_v10 = vld [vmem:[%s4870_s25 + $0xd8] sm:$0xf] }
  0x57   : > { %v3329_v11 = vld [vmem:[%s4870_s25 + $0xec] sm:$0xf]  ;;  %v3331_v12 = vld [vmem:[%s4870_s25 + $0x100] sm:$0xf]  ;;  %3328 = vst [vmem:[%s4875_s26 + $0xd8] sm:$0xf] %v3327_v10 }
  0x58   : > { %3330 = vst [vmem:[%s4875_s26 + $0xec] sm:$0xf] %v3329_v11  ;;  %3332 = vst [vmem:[%s4875_s26 + $0x100] sm:$0xf] %v3331_v12  ;;  %v3333_v13 = vld [vmem:[%s4870_s25 + $0x114] sm:$0xf] }
  0x59   : > { %v3335_v14 = vld [vmem:[%s4870_s25 + $0x128] sm:$0xf]  ;;  %v3337_v15 = vld [vmem:[%s4870_s25 + $0x13c] sm:$0xf]  ;;  %3334 = vst [vmem:[%s4875_s26 + $0x114] sm:$0xf] %v3333_v13 }
  0x5a   : > { %3336 = vst [vmem:[%s4875_s26 + $0x128] sm:$0xf] %v3335_v14  ;;  %3338 = vst [vmem:[%s4875_s26 + $0x13c] sm:$0xf] %v3337_v15  ;;  %v3339_v16 = vld [vmem:[%s4870_s25 + $0x510] sm:$0xf] }
  0x5b   : > { %v3341_v17 = vld [vmem:[%s4870_s25 + $0x524] sm:$0xf]  ;;  %v3343_v18 = vld [vmem:[%s4870_s25 + $0x538] sm:$0xf]  ;;  %3340 = vst [vmem:[%s4875_s26 + $0x150] sm:$0xf] %v3339_v16 }
  0x5c   : > { %3342 = vst [vmem:[%s4875_s26 + $0x164] sm:$0xf] %v3341_v17  ;;  %3344 = vst [vmem:[%s4875_s26 + $0x178] sm:$0xf] %v3343_v18  ;;  %v3345_v19 = vld [vmem:[%s4870_s25 + $0x54c] sm:$0xf] }
  0x5d   : > { %v3347_v20 = vld [vmem:[%s4870_s25 + $0x560] sm:$0xf]  ;;  %v3349_v21 = vld [vmem:[%s4870_s25 + $0x574] sm:$0xf]  ;;  %3346 = vst [vmem:[%s4875_s26 + $0x18c] sm:$0xf] %v3345_v19 }
  0x5e   : > { %3348 = vst [vmem:[%s4875_s26 + $0x1a0] sm:$0xf] %v3347_v20  ;;  %3350 = vst [vmem:[%s4875_s26 + $0x1b4] sm:$0xf] %v3349_v21  ;;  %v3351_v22 = vld [vmem:[%s4870_s25 + $0x588] sm:$0xf] }
  0x5f   : > { %v3353_v23 = vld [vmem:[%s4870_s25 + $0x59c] sm:$0xf]  ;;  %v3355_v24 = vld [vmem:[%s4870_s25 + $0x5b0] sm:$0xf]  ;;  %3352 = vst [vmem:[%s4875_s26 + $0x1c8] sm:$0xf] %v3351_v22 }
  0x60   : > { %3354 = vst [vmem:[%s4875_s26 + $0x1dc] sm:$0xf] %v3353_v23  ;;  %3356 = vst [vmem:[%s4875_s26 + $0x1f0] sm:$0xf] %v3355_v24  ;;  %v3357_v25 = vld [vmem:[%s4870_s25 + $0x5c4] sm:$0xf] }
  0x61   : > { %v3359_v26 = vld [vmem:[%s4870_s25 + $0x5d8] sm:$0xf]  ;;  %v3361_v27 = vld [vmem:[%s4870_s25 + $0x5ec] sm:$0xf]  ;;  %3358 = vst [vmem:[%s4875_s26 + $0x204] sm:$0xf] %v3357_v25 }
  0x62   : > { %3360 = vst [vmem:[%s4875_s26 + $0x218] sm:$0xf] %v3359_v26  ;;  %3362 = vst [vmem:[%s4875_s26 + $0x22c] sm:$0xf] %v3361_v27  ;;  %v3363_v28 = vld [vmem:[%s4870_s25 + $0x600] sm:$0xf] }
  0x63   : > { %v3365_v29 = vld [vmem:[%s4870_s25 + $0x614] sm:$0xf]  ;;  %v3367_v30 = vld [vmem:[%s4870_s25 + $0x628] sm:$0xf]  ;;  %3364 = vst [vmem:[%s4875_s26 + $0x240] sm:$0xf] %v3363_v28 }
  0x64   : > { %3366 = vst [vmem:[%s4875_s26 + $0x254] sm:$0xf] %v3365_v29  ;;  %3368 = vst [vmem:[%s4875_s26 + $0x268] sm:$0xf] %v3367_v30  ;;  %v3369_v31 = vld [vmem:[%s4870_s25 + $0x63c] sm:$0xf] }
  0x65   : > { %v3371_v32 = vld [vmem:[%s4870_s25 + $0xa10] sm:$0xf]  ;;  %v3373_v33 = vld [vmem:[%s4870_s25 + $0xa24] sm:$0xf]  ;;  %3370 = vst [vmem:[%s4875_s26 + $0x27c] sm:$0xf] %v3369_v31 }
  0x66   : > { %3372 = vst [vmem:[%s4875_s26 + $0x290] sm:$0xf] %v3371_v32  ;;  %3374 = vst [vmem:[%s4875_s26 + $0x2a4] sm:$0xf] %v3373_v33  ;;  %v3375_v34 = vld [vmem:[%s4870_s25 + $0xa38] sm:$0xf] }
  0x67   : > { %v3377_v35 = vld [vmem:[%s4870_s25 + $0xa4c] sm:$0xf]  ;;  %v3379_v36 = vld [vmem:[%s4870_s25 + $0xa60] sm:$0xf]  ;;  %3376 = vst [vmem:[%s4875_s26 + $0x2b8] sm:$0xf] %v3375_v34 }
  0x68   : > { %3378 = vst [vmem:[%s4875_s26 + $0x2cc] sm:$0xf] %v3377_v35  ;;  %3380 = vst [vmem:[%s4875_s26 + $0x2e0] sm:$0xf] %v3379_v36  ;;  %v3381_v37 = vld [vmem:[%s4870_s25 + $0xa74] sm:$0xf] }
  0x69   : > { %v3383_v38 = vld [vmem:[%s4870_s25 + $0xa88] sm:$0xf]  ;;  %v3385_v39 = vld [vmem:[%s4870_s25 + $0xa9c] sm:$0xf]  ;;  %3382 = vst [vmem:[%s4875_s26 + $0x2f4] sm:$0xf] %v3381_v37 }
  0x6a   : > { %3384 = vst [vmem:[%s4875_s26 + $0x308] sm:$0xf] %v3383_v38  ;;  %3386 = vst [vmem:[%s4875_s26 + $0x31c] sm:$0xf] %v3385_v39  ;;  %v3387_v40 = vld [vmem:[%s4870_s25 + $0xab0] sm:$0xf] }
  0x6b   : > { %v3389_v41 = vld [vmem:[%s4870_s25 + $0xac4] sm:$0xf]  ;;  %v3391_v42 = vld [vmem:[%s4870_s25 + $0xad8] sm:$0xf]  ;;  %3388 = vst [vmem:[%s4875_s26 + $0x330] sm:$0xf] %v3387_v40 }
  0x6c   : > { %3390 = vst [vmem:[%s4875_s26 + $0x344] sm:$0xf] %v3389_v41  ;;  %3392 = vst [vmem:[%s4875_s26 + $0x358] sm:$0xf] %v3391_v42  ;;  %v3393_v43 = vld [vmem:[%s4870_s25 + $0xaec] sm:$0xf] }
  0x6d   : > { %v3395_v44 = vld [vmem:[%s4870_s25 + $0xb00] sm:$0xf]  ;;  %v3397_v45 = vld [vmem:[%s4870_s25 + $0xb14] sm:$0xf]  ;;  %3394 = vst [vmem:[%s4875_s26 + $0x36c] sm:$0xf] %v3393_v43 }
  0x6e   : > { %3396 = vst [vmem:[%s4875_s26 + $0x380] sm:$0xf] %v3395_v44  ;;  %3398 = vst [vmem:[%s4875_s26 + $0x394] sm:$0xf] %v3397_v45  ;;  %v3399_v46 = vld [vmem:[%s4870_s25 + $0xb28] sm:$0xf] }
  0x6f   : > { %v3401_v47 = vld [vmem:[%s4870_s25 + $0xb3c] sm:$0xf]  ;;  %v3403_v48 = vld [vmem:[%s4870_s25 + $0xf10] sm:$0xf]  ;;  %3400 = vst [vmem:[%s4875_s26 + $0x3a8] sm:$0xf] %v3399_v46 }
  0x70   : > { %3402 = vst [vmem:[%s4875_s26 + $0x3bc] sm:$0xf] %v3401_v47  ;;  %3404 = vst [vmem:[%s4875_s26 + $0x3d0] sm:$0xf] %v3403_v48  ;;  %v3405_v49 = vld [vmem:[%s4870_s25 + $0xf24] sm:$0xf] }
  0x71   : > { %v3407_v50 = vld [vmem:[%s4870_s25 + $0xf38] sm:$0xf]  ;;  %v3409_v51 = vld [vmem:[%s4870_s25 + $0xf4c] sm:$0xf]  ;;  %3406 = vst [vmem:[%s4875_s26 + $0x3e4] sm:$0xf] %v3405_v49 }
  0x72   : > { %3408 = vst [vmem:[%s4875_s26 + $0x3f8] sm:$0xf] %v3407_v50  ;;  %3410 = vst [vmem:[%s4875_s26 + $0x40c] sm:$0xf] %v3409_v51  ;;  %v3411_v52 = vld [vmem:[%s4870_s25 + $0xf60] sm:$0xf] }
  0x73   : > { %v3413_v53 = vld [vmem:[%s4870_s25 + $0xf74] sm:$0xf]  ;;  %v3415_v54 = vld [vmem:[%s4870_s25 + $0xf88] sm:$0xf]  ;;  %3412 = vst [vmem:[%s4875_s26 + $0x420] sm:$0xf] %v3411_v52 }
  0x74   : > { %3414 = vst [vmem:[%s4875_s26 + $0x434] sm:$0xf] %v3413_v53  ;;  %3416 = vst [vmem:[%s4875_s26 + $0x448] sm:$0xf] %v3415_v54  ;;  %v3417_v55 = vld [vmem:[%s4870_s25 + $0xf9c] sm:$0xf] }
  0x75   : > { %v3419_v56 = vld [vmem:[%s4870_s25 + $0xfb0] sm:$0xf]  ;;  %v3421_v57 = vld [vmem:[%s4870_s25 + $0xfc4] sm:$0xf]  ;;  %3418 = vst [vmem:[%s4875_s26 + $0x45c] sm:$0xf] %v3417_v55 }
  0x76   : > { %3420 = vst [vmem:[%s4875_s26 + $0x470] sm:$0xf] %v3419_v56  ;;  %3422 = vst [vmem:[%s4875_s26 + $0x484] sm:$0xf] %v3421_v57  ;;  %v3423_v58 = vld [vmem:[%s4870_s25 + $0xfd8] sm:$0xf] }
  0x77   : > { %v3425_v59 = vld [vmem:[%s4870_s25 + $0xfec] sm:$0xf]  ;;  %v3427_v60 = vld [vmem:[%s4870_s25 + $0x1000] sm:$0xf]  ;;  %3424 = vst [vmem:[%s4875_s26 + $0x498] sm:$0xf] %v3423_v58 }
  0x78   : > { %3426 = vst [vmem:[%s4875_s26 + $0x4ac] sm:$0xf] %v3425_v59  ;;  %3428 = vst [vmem:[%s4875_s26 + $0x4c0] sm:$0xf] %v3427_v60  ;;  %v3429_v61 = vld [vmem:[%s4870_s25 + $0x1014] sm:$0xf] }
  0x79   : > { %v3431_v62 = vld [vmem:[%s4870_s25 + $0x1028] sm:$0xf]  ;;  %v3433_v63 = vld [vmem:[%s4870_s25 + $0x103c] sm:$0xf]  ;;  %3430 = vst [vmem:[%s4875_s26 + $0x4d4] sm:$0xf] %v3429_v61 }
  0x7a   : > { %3432 = vst [vmem:[%s4875_s26 + $0x4e8] sm:$0xf] %v3431_v62  ;;  %3434 = vst [vmem:[%s4875_s26 + $0x4fc] sm:$0xf] %v3433_v63 }
  0x7b PF: > { %p3435_p5 = scmp.ge.s32.totalorder %s4814_s14, 1  ;;  %p549_p6 = scmp.lt.s32.totalorder %s4814_s14, 5 }
  0x7d   : > { %p550_p7 = pnand %p3435_p5, %p549_p6 }
  0x7f   : > { %553 = sbr.rel (%p550_p7) target bundleno = 690 (0x2b2), region = 54 }
  0x84   : > { %v5263_v0 = vld [vmem:[%s6363_s1 + $0x78] sm:$0xff]   ;;  %v5286_v4 = vld [vmem:[%s6363_s1 + $0x70] sm:$0xff]   ;;  %v5310_v8 = vld [vmem:[%s6363_s1 + $0x68] sm:$0xff]   ;;  %s556_s4 = sand.u32 1, %s4806_s12   ;;  %vm1123_vm0 = vcmask 523264  }
  0x85   : > { %v5268_v1 = vld [vmem:[%s6363_s1 + $0xf8] sm:$0xff]   ;;  %3813 = vmatprep.subr.bf16.mxu0 %v5263_v0  ;;  %v5292_v5 = vld [vmem:[%s6363_s1 + $0xf0] sm:$0xff]   ;;  %v5316_v9 = vld [vmem:[%s6363_s1 + $0xe8] sm:$0xff]   ;;  %s4471_s12 = smul.u32 1280, %s556_s4 }
  0x86   : > { %v5274_v2 = vld [vmem:[%s6363_s1 + $0x38] sm:$0xff]   ;;  %3877 = vmatprep.subr.bf16.mxu1 %v5268_v1  ;;  %v5298_v6 = vld [vmem:[%s6363_s1 + $0x30] sm:$0xff]   ;;  %v5322_v10 = vld [vmem:[%s6363_s1 + $0x28] sm:$0xff]  }
  0x87   : > { %v5280_v3 = vld [vmem:[%s6363_s1 + $0xb8] sm:$0xff]   ;;  %3814 = vmatpush3.bf16.msra.mxu0 %v5274_v2  ;;  %v5304_v7 = vld [vmem:[%s6363_s1 + $0xb0] sm:$0xff]   ;;  %v5328_v11 = vld [vmem:[%s6363_s1 + $0xa8] sm:$0xff]   ;;  %s5452_s29 = scalar_lea.vmem [#allocation2], %s4471_s12 }
  0x88   : > { %3878 = vmatpush3.bf16.msra.mxu1 %v5280_v3  ;;  %3815 = vmatprep.subr.bf16.mxu0 %v5286_v4  ;;  %v5334_v12 = vld [vmem:[%s6363_s1 + $0x60] sm:$0xff]   ;;  %v5358_v16 = vld [vmem:[%s6363_s1 + $0x58] sm:$0xff]   ;;  %v5382_v20 = vld [vmem:[%s6363_s1 + $0x50] sm:$0xff]  }
  0x89   : > { %3879 = vmatprep.subr.bf16.mxu1 %v5292_v5  ;;  %v5340_v13 = vld [vmem:[%s6363_s1 + $0xe0] sm:$0xff]   ;;  %v5364_v17 = vld [vmem:[%s6363_s1 + $0xd8] sm:$0xff]   ;;  %v5388_v21 = vld [vmem:[%s6363_s1 + $0xd0] sm:$0xff]  }
  0x8a   : > { %v5346_v14 = vld [vmem:[%s6363_s1 + $0x20] sm:$0xff]   ;;  %v5370_v18 = vld [vmem:[%s6363_s1 + $0x18] sm:$0xff]   ;;  %v5394_v22 = vld [vmem:[%s6363_s1 + $0x10] sm:$0xff]  }
  0x8b   : > { %3816 = vmatpush3.bf16.msra.mxu0 %v5298_v6  ;;  %v5352_v15 = vld [vmem:[%s6363_s1 + $0xa0] sm:$0xff]   ;;  %v5376_v19 = vld [vmem:[%s6363_s1 + $0x98] sm:$0xff]   ;;  %v5401_v23 = vld [vmem:[%s6363_s1 + $0x90] sm:$0xff]  }
  0x8c   : > { %3880 = vmatpush3.bf16.msra.mxu1 %v5304_v7  ;;  %3817 = vmatprep.subr.bf16.mxu0 %v5310_v8  ;;  %v5407_v24 = vld [vmem:[%s6363_s1 + $0x48] sm:$0xff]   ;;  %v5431_v28 = vld [vmem:[%s6363_s1 + $0x40] sm:$0xff]   ;;  %v5463_v36 = vld [vmem:[%s6363_s1 + $0x118] sm:$0xff]  }
  0x8d   : > { %3881 = vmatprep.subr.bf16.mxu1 %v5316_v9  ;;  %v5413_v25 = vld [vmem:[%s6363_s1 + $0xc8] sm:$0xff]   ;;  %v5437_v29 = vld [vmem:[%s6363_s1 + $0xc0] sm:$0xff]   ;;  %v5477_v42 = vld [vmem:[%s6363_s1 + $0x110] sm:$0xff]  }
  0x8e   : > { %v5419_v26 = vld [vmem:[%s6363_s1 + $0x8] sm:$0xff]   ;;  %v5443_v30 = vld [vmem:[%s6363_s1] sm:$0xff]   ;;  %v4543_v43 = vld [vmem:[%s5452_s29 + $0x5c] ss:$20 sps:$4 sm:$0xff]  }
  0x8f   : > { %3818 = vmatpush3.bf16.msra.mxu0 %v5322_v10  ;;  %v5425_v27 = vld [vmem:[%s6363_s1 + $0x88] sm:$0xff]   ;;  %v5449_v31 = vld [vmem:[%s6363_s1 + $0x80] sm:$0xff]   ;;  %v4548_v47 = vld [vmem:[%s5452_s29 + $0x7c] ss:$20 sps:$4 sm:$0xff]  }
  0x90   : > { %3882 = vmatpush3.bf16.msra.mxu1 %v5328_v11  ;;  %3819 = vmatprep.subr.bf16.mxu0 %v5334_v12  ;;  %v4528_v32 = vld [vmem:[%s5452_s29] ss:$20 sps:$4 sm:$0xff]   ;;  %v4530_v33 = vld [vmem:[%s5452_s29 + $0x4] ss:$20 sps:$4 sm:$0xff]   ;;  %v4531_v34 = vld [vmem:[%s5452_s29 + $0x8] ss:$20 sps:$4 sm:$0xff]  }
  0x91   : > { %3883 = vmatprep.subr.bf16.mxu1 %v5340_v13  ;;  %v4533_v35 = vld [vmem:[%s5452_s29 + $0xc] ss:$20 sps:$4 sm:$0xff]   ;;  %1180 = vmatprep.mubr.bf16.mxu0 %v4530_v33  ;;  %v4537_v38 = vld [vmem:[%s5452_s29 + $0x34] ss:$20 sps:$4 sm:$0xff]   ;;  %v4540_v40 = vld [vmem:[%s5452_s29 + $0x30] ss:$20 sps:$4 sm:$0xff]  }
  0x92   : > { %1277 = vmatprep.mubr.bf16.mxu1 %v4533_v35  ;;  %v4535_v37 = vld [vmem:[%s5452_s29 + $0x2c] ss:$20 sps:$4 sm:$0xff]   ;;  %v4539_v39 = vld [vmem:[%s5452_s29 + $0x28] ss:$20 sps:$4 sm:$0xff]   ;;  %v4545_v44 = vld [vmem:[%s5452_s29 + $0x50] ss:$20 sps:$4 sm:$0xff]  }
  0x93   : > { %3820 = vmatpush3.bf16.msra.mxu0 %v5346_v14  ;;  %v4541_v41 = vld [vmem:[%s5452_s29 + $0x54] ss:$20 sps:$4 sm:$0xff]   ;;  %v4546_v45 = vld [vmem:[%s5452_s29 + $0x58] ss:$20 sps:$4 sm:$0xff]   ;;  %v5502_v49 = vld [vmem:[%s6363_s1 + $0x100] sm:$0xff]  }
  0x94   : > { %3884 = vmatpush3.bf16.msra.mxu1 %v5352_v15  ;;  %3821 = vmatprep.subr.bf16.mxu0 %v5358_v16  ;;  %v5491_v46 = vld [vmem:[%s6363_s1 + $0x108] sm:$0xff]   ;;  %v4550_v48 = vld [vmem:[%s5452_s29 + $0x84] ss:$20 sps:$4 sm:$0xff]   ;;  %v4553_v51 = vld [vmem:[%s5452_s29 + $0x80] ss:$20 sps:$4 sm:$0xff]  }
  0x95   : > { %3885 = vmatprep.subr.bf16.mxu1 %v5364_v17  ;;  %v4552_v50 = vld [vmem:[%s5452_s29 + $0x78] ss:$20 sps:$4 sm:$0xff]   ;;  %v4558_v54 = vld [vmem:[%s5452_s29 + $0xa0] ss:$20 sps:$4 sm:$0xff]   ;;  %v4559_v55 = vld [vmem:[%s5452_s29 + $0xa8] ss:$20 sps:$4 sm:$0xff]  }
  0x96   : > { %v4554_v52 = vld [vmem:[%s5452_s29 + $0xa4] ss:$20 sps:$4 sm:$0xff]   ;;  %v4556_v53 = vld [vmem:[%s5452_s29 + $0xac] ss:$20 sps:$4 sm:$0xff]   ;;  %v4563_v57 = vld [vmem:[%s5452_s29 + $0xd4] ss:$20 sps:$4 sm:$0xff]  }
  0x97   : > { %3822 = vmatpush3.bf16.msra.mxu0 %v5370_v18  ;;  %v4561_v56 = vld [vmem:[%s5452_s29 + $0xcc] ss:$20 sps:$4 sm:$0xff]   ;;  %v4565_v58 = vld [vmem:[%s5452_s29 + $0xc8] ss:$20 sps:$4 sm:$0xff]   ;;  %v4566_v59 = vld [vmem:[%s5452_s29 + $0xd0] ss:$20 sps:$4 sm:$0xff]  }
  0x98   : > { %3886 = vmatpush3.bf16.msra.mxu1 %v5376_v19  ;;  %3823 = vmatprep.subr.bf16.mxu0 %v5382_v20  ;;  %v4567_v60 = vld [vmem:[%s5452_s29 + $0xf4] ss:$20 sps:$4 sm:$0xff]   ;;  %v4569_v61 = vld [vmem:[%s5452_s29 + $0xfc] ss:$20 sps:$4 sm:$0xff]   ;;  %v4572_v63 = vld [vmem:[%s5452_s29 + $0xf8] ss:$20 sps:$4 sm:$0xff]  }
  0x99   : > { %3887 = vmatprep.subr.bf16.mxu1 %v5388_v21  ;;  %v4571_v62 = vld [vmem:[%s5452_s29 + $0xf0] ss:$20 sps:$4 sm:$0xff]   ;;  %v4579_v35 = vld [vmem:[%s5452_s29 + $0x120] ss:$20 sps:$4 sm:$0xff]  }
  0x9a   : > { %v4576_v33 = vld [vmem:[%s5452_s29 + $0x124] ss:$20 sps:$4 sm:$0xff]  }
  0x9b   : > { %3824 = vmatpush3.bf16.msra.mxu0 %v5394_v22 }
  0x9c   : > { %3888 = vmatpush3.bf16.msra.mxu1 %v5401_v23  ;;  %3825 = vmatprep.subr.bf16.mxu0 %v5407_v24 }
  0x9d   : > { %3889 = vmatprep.subr.bf16.mxu1 %v5413_v25 }
  0x9f   : > { %3826 = vmatpush3.bf16.msra.mxu0 %v5419_v26 }
  0xa0   : > { %3890 = vmatpush3.bf16.msra.mxu1 %v5425_v27  ;;  %3827 = vmatprep.subr.bf16.mxu0 %v5431_v28 }
  0xa1   : > { %3891 = vmatprep.subr.bf16.mxu1 %v5437_v29 }
  0xa3   : > { %3828 = vmatpush3.bf16.msra.mxu0 %v5443_v30 }
  0xa4   : > { %3892 = vmatpush3.bf16.msra.mxu1 %v5449_v31  ;;  %4373 = vmatprep.subr.bf16.mxu0 %v5463_v36 }
  0xa5   : > { %3953 = vmatprep.subr.bf16.mxu1 %v5263_v0 }
  0xa6   : > { %1181 = vmatmul.mubr.bf16.vlgmr.msra.gmra.mxu0 %v4528_v32  ;;  %v4574_v32 = vld [vmem:[%s5452_s29 + $0x11c] ss:$20 sps:$4 sm:$0xff]  }
  0xa7   : > { %1278 = vmatmul.mubr.bf16.vlgmr.msra.gmra.mxu1 %v4531_v34  ;;  %4374 = vmatpush3.bf16.msra.mxu0 %v5463_v36  ;;  %v4578_v34 = vld [vmem:[%s5452_s29 + $0x118] ss:$20 sps:$4 sm:$0xff]  }
  0xa8   : > { %3954 = vmatpush3.bf16.msra.mxu1 %v5274_v2  ;;  %1188 = vmatprep.mubr.bf16.mxu0 %v4535_v37  ;;  %v4580_v37 = vld [vmem:[%s5452_s29 + $0x10] ss:$20 sps:$4 sm:$0xff]  }
  0xa9   : > { %1285 = vmatprep.mubr.bf16.mxu1 %v4537_v38  ;;  %3955 = vmatprep.subr.bf16.mxu1 %v5286_v4  ;;  %v4583_v38 = vld [vmem:[%s5452_s29 + $0x144] ss:$20 sps:$4 sm:$0xff]  }
  0xaa   : > { %4375 = vmatprep.subr.bf16.mxu0 %v5477_v42 }
  0xab   : > { %4376 = vmatpush3.bf16.msra.mxu0 %v5477_v42 }
  0xac   : > { %3956 = vmatpush3.bf16.msra.mxu1 %v5298_v6  ;;  %4377 = vmatprep.subr.bf16.mxu0 %v5491_v46 }
  0xad   : > { %3957 = vmatprep.subr.bf16.mxu1 %v5310_v8 }
  0xae   : > { %1189 = vmatmul.mubr.bf16.gmra.mxu0 %v4539_v39  ;;  %v4584_v39 = vld [vmem:[%s5452_s29 + $0x38] ss:$20 sps:$4 sm:$0xff]  }
  0xaf   : > { %1286 = vmatmul.mubr.bf16.gmra.mxu1 %v4540_v40  ;;  %1196 = vmatprep.mubr.bf16.mxu0 %v4541_v41  ;;  %v4581_v40 = vld [vmem:[%s5452_s29 + $0x140] ss:$20 sps:$4 sm:$0xff]  }
  0xb0   : > { %1293 = vmatprep.mubr.bf16.mxu1 %v4543_v43  ;;  %3958 = vmatpush3.bf16.msra.mxu1 %v5322_v10  ;;  %v4585_v41 = vld [vmem:[%s5452_s29 + $0x60] ss:$20 sps:$4 sm:$0xff]  }
  0xb1   : > { %3959 = vmatprep.subr.bf16.mxu1 %v5334_v12  ;;  %4378 = vmatpush3.bf16.msra.mxu0 %v5491_v46  ;;  %v4586_v43 = vld [vmem:[%s5452_s29 + $0x16c] ss:$20 sps:$4 sm:$0xff]  }
  0xb2   : > { %4379 = vmatprep.subr.bf16.mxu0 %v5502_v49 }
  0xb4   : > { %3960 = vmatpush3.bf16.msra.mxu1 %v5346_v14 }
  0xb5   : > { %3961 = vmatprep.subr.bf16.mxu1 %v5358_v16  ;;  %4380 = vmatpush3.bf16.msra.mxu0 %v5502_v49 }
  0xb6   : > { %1197 = vmatmul.mubr.bf16.gmra.mxu0 %v4545_v44  ;;  %4017 = vmatprep.subr.bf16.mxu0 %v5268_v1  ;;  %v4588_v44 = vld [vmem:[%s5452_s29 + $0x88] ss:$20 sps:$4 sm:$0xff]  }
  0xb7   : > { %1294 = vmatmul.mubr.bf16.gmra.mxu1 %v4546_v45  ;;  %1204 = vmatprep.mubr.bf16.mxu0 %v4548_v47  ;;  %v4589_v45 = vld [vmem:[%s5452_s29 + $0x168] ss:$20 sps:$4 sm:$0xff]   ;;  %v4590_v47 = vld [vmem:[%s5452_s29 + $0xb0] ss:$20 sps:$4 sm:$0xff]  }
  0xb8   : > { %1301 = vmatprep.mubr.bf16.mxu1 %v4550_v48  ;;  %3962 = vmatpush3.bf16.msra.mxu1 %v5370_v18  ;;  %v4596_v48 = vld [vmem:[%s5452_s29 + $0x1bc] ss:$20 sps:$4 sm:$0xff]  }
  0xb9   : > { %3963 = vmatprep.subr.bf16.mxu1 %v5382_v20 }
  0xbc   : > { %3964 = vmatpush3.bf16.msra.mxu1 %v5394_v22 }
  0xbd   : > { %3965 = vmatprep.subr.bf16.mxu1 %v5407_v24 }
  0xbe   : > { %1205 = vmatmul.mubr.bf16.gmra.mxu0 %v4552_v50  ;;  %v4598_v50 = vld [vmem:[%s5452_s29 + $0x128] ss:$20 sps:$4 sm:$0xff]  }
  0xbf   : > { %1302 = vmatmul.mubr.bf16.gmra.mxu1 %v4553_v51  ;;  %1212 = vmatprep.mubr.bf16.mxu0 %v4554_v52  ;;  %v4599_v51 = vld [vmem:[%s5452_s29 + $0x1b8] ss:$20 sps:$4 sm:$0xff]  }
  0xc0   : > { %1309 = vmatprep.mubr.bf16.mxu1 %v4556_v53  ;;  %3966 = vmatpush3.bf16.msra.mxu1 %v5419_v26  ;;  %v4600_v52 = vld [vmem:[%s5452_s29 + $0x1e4] ss:$20 sps:$4 sm:$0xff]   ;;  %v4602_v53 = vld [vmem:[%s5452_s29 + $0x148] ss:$20 sps:$4 sm:$0xff]  }
  0xc1   : > { %3967 = vmatprep.subr.bf16.mxu1 %v5431_v28 }
  0xc4   : > { %3968 = vmatpush3.bf16.msra.mxu1 %v5443_v30 }
  0xc5   : > { %4397 = vmatprep.subr.bf16.mxu1 %v5463_v36 }
  0xc6   : > { %1213 = vmatmul.mubr.bf16.gmra.mxu0 %v4558_v54  ;;  %v4605_v54 = vld [vmem:[%s5452_s29 + $0x1e0] ss:$20 sps:$4 sm:$0xff]  }
  0xc7   : > { %1310 = vmatmul.mubr.bf16.gmra.mxu1 %v4559_v55  ;;  %1220 = vmatprep.mubr.bf16.mxu0 %v4561_v56  ;;  %v4606_v55 = vld [vmem:[%s5452_s29 + $0x20c] ss:$20 sps:$4 sm:$0xff]   ;;  %v4608_v56 = vld [vmem:[%s5452_s29 + $0x174] ss:$20 sps:$4 sm:$0xff]  }
  0xc8   : > { %1317 = vmatprep.mubr.bf16.mxu1 %v4563_v57  ;;  %v4611_v57 = vld [vmem:[%s5452_s29 + $0x170] ss:$20 sps:$4 sm:$0xff]  }
  0xce   : > { %1221 = vmatmul.mubr.bf16.gmra.mxu0 %v4565_v58  ;;  %v4610_v58 = vld [vmem:[%s5452_s29 + $0x208] ss:$20 sps:$4 sm:$0xff]  }
  0xcf   : > { %1318 = vmatmul.mubr.bf16.gmra.mxu1 %v4566_v59  ;;  %1228 = vmatprep.mubr.bf16.mxu0 %v4567_v60  ;;  %v4614_v59 = vld [vmem:[%s5452_s29 + $0x19c] ss:$20 sps:$4 sm:$0xff]   ;;  %v4620_v60 = vld [vmem:[%s5452_s29 + $0x1c4] ss:$20 sps:$4 sm:$0xff]  }
  0xd0   : > { %1325 = vmatprep.mubr.bf16.mxu1 %v4569_v61  ;;  %v4618_v61 = vld [vmem:[%s5452_s29 + $0x25c] ss:$20 sps:$4 sm:$0xff]  }
  0xd6   : > { %1229 = vmatmul.mubr.bf16.gmra.mxu0 %v4571_v62  ;;  %v5640_v62 = vld [vmem:[%s6363_s1 + $0xb0] sm:$0xff]  }
  0xd7   : > { %1326 = vmatmul.mubr.bf16.gmra.mxu1 %v4572_v63  ;;  %1236 = vmatprep.mubr.bf16.mxu0 %v4574_v32  ;;  %v4636_v63 = vld [vmem:[%s5452_s29 + $0x1f0] ss:$20 sps:$4 sm:$0xff]   ;;  %v5647_v32 = vld [vmem:[%s6363_s1 + $0xe8] sm:$0xff]  }
  0xd8   : > { %1333 = vmatprep.mubr.bf16.mxu1 %v4576_v33  ;;  %v4637_v33 = vld [vmem:[%s5452_s29 + $0x238] ss:$20 sps:$4 sm:$0xff]  }
  0xde   : > { %1237 = vmatmul.mubr.bf16.gmra.mxu0 %v4578_v34  ;;  %v4638_v34 = vld [vmem:[%s5452_s29 + $0x218] ss:$20 sps:$4 sm:$0xff]  }
  0xdf   : > { %1334 = vmatmul.mubr.bf16.gmra.mxu1 %v4579_v35  ;;  %4381 = vmatprep.mubr.msk.bf16.mxu0 %vm1123_vm0, %v4580_v37  ;;  %v4639_v35 = vld [vmem:[%s5452_s29 + $0x264] ss:$20 sps:$4 sm:$0xff]   ;;  %v4641_v37 = vld [vmem:[%s5452_s29 + $0x240] ss:$20 sps:$4 sm:$0xff]  }
  0xe0   : > { %1744 = vmatprep.mubr.bf16.mxu1 %v4583_v38  ;;  %v4646_v38 = vld [vmem:[%s5452_s29 + $0x284] ss:$20 sps:$4 sm:$0xff]  }
  0xe6   : > { %4382 = vmatmul.mubr.msk.bf16.vlgmr.msra.gmra.mxu0 %vm1123_vm0, %v4584_v39  ;;  %v4655_v39 = vld [vmem:[%s5452_s29 + $0x2b0] ss:$20 sps:$4 sm:$0xff]  }
  0xe7   : > { %1745 = vmatmul.mubr.bf16.vlgmr.msra.gmra.mxu1 %v4581_v40  ;;  %4018 = vmatpush3.bf16.msra.mxu0 %v5280_v3  ;;  %v4591_v3 = vld [vmem:[%s5452_s29 + $0x194] ss:$20 sps:$4 sm:$0xff]  }
  0xe8   : > { %4019 = vmatprep.subr.bf16.mxu0 %v5292_v5  ;;  %4398 = vmatpush3.bf16.msra.mxu1 %v5463_v36  ;;  %v4593_v5 = vld [vmem:[%s5452_s29 + $0xd8] ss:$20 sps:$4 sm:$0xff]   ;;  %v4656_v40 = vld [vmem:[%s5452_s29 + $0x2d4] ss:$20 sps:$4 sm:$0xff]  }
  0xe9   : > { %4385 = vmatprep.mubr.msk.bf16.mxu0 %vm1123_vm0, %v4585_v41  ;;  %1752 = vmatprep.mubr.bf16.mxu1 %v4586_v43  ;;  %v4763_v41 = vld [vmem:[%s6363_s1 + $0x30] sm:$0xff]  }
  0xea   : > { %4399 = vmatprep.subr.bf16.mxu1 %v5477_v42  ;;  %v4658_v43 = vld [vmem:[%s5452_s29 + $0x2dc] ss:$20 sps:$4 sm:$0xff]  }
  0xeb   : > { %4020 = vmatpush3.bf16.msra.mxu0 %v5304_v7  ;;  %v4594_v7 = vld [vmem:[%s5452_s29 + $0x190] ss:$20 sps:$4 sm:$0xff]  }
  0xec   : > { %4021 = vmatprep.subr.bf16.mxu0 %v5316_v9  ;;  %4400 = vmatpush3.bf16.msra.mxu1 %v5477_v42  ;;  %v4595_v9 = vld [vmem:[%s5452_s29 + $0x100] ss:$20 sps:$4 sm:$0xff]  }
  0xed   : > { %4401 = vmatprep.subr.bf16.mxu1 %v5491_v46 }
  0xee   : > { %4386 = vmatmul.mubr.msk.bf16.gmra.mxu0 %vm1123_vm0, %v4588_v44  ;;  %v4764_v44 = vld [vmem:[%s6363_s1 + $0x68] sm:$0xff]  }
  0xef   : > { %1753 = vmatmul.mubr.bf16.gmra.mxu1 %v4589_v45  ;;  %4022 = vmatpush3.bf16.msra.mxu0 %v5328_v11  ;;  %v4766_v45 = vld [vmem:[%s6363_s1 + $0x60] sm:$0xff]  }
  0xf0   : > { %4023 = vmatprep.subr.bf16.mxu0 %v5340_v13  ;;  %4389 = vmatprep.mubr.msk.bf16.mxu0 %vm1123_vm0, %v4590_v47  ;;  %v4660_v47 = vld [vmem:[%s5452_s29 + $0x2d0] ss:$20 sps:$4 sm:$0xff]  }
  0xf1   : > { %1760 = vmatprep.mubr.bf16.mxu1 %v4591_v3  ;;  %4402 = vmatpush3.bf16.msra.mxu1 %v5491_v46  ;;  %v4661_v3 = vld [vmem:[%s5452_s29 + $0x2d8] ss:$20 sps:$4 sm:$0xff]  }
  0xf2   : > { %4403 = vmatprep.subr.bf16.mxu1 %v5502_v49 }
  0xf3   : > { %4024 = vmatpush3.bf16.msra.mxu0 %v5352_v15 }
  0xf4   : > { %4025 = vmatprep.subr.bf16.mxu0 %v5364_v17 }
  0xf5   : > { %4404 = vmatpush3.bf16.msra.mxu1 %v5502_v49 }
  0xf6   : > { %4390 = vmatmul.mubr.msk.bf16.gmra.mxu0 %vm1123_vm0, %v4593_v5  ;;  %4157 = vmatprep.subr.bf16.mxu1 %v5268_v1  ;;  %v4604_v1 = vld [vmem:[%s5452_s29 + $0x14c] ss:$20 sps:$4 sm:$0xff]   ;;  %v4662_v5 = vld [vmem:[%s5452_s29 + $0x2fc] ss:$20 sps:$4 sm:$0xff]  }
  0xf7   : > { %1761 = vmatmul.mubr.bf16.gmra.mxu1 %v4594_v7  ;;  %4026 = vmatpush3.bf16.msra.mxu0 %v5376_v19  ;;  %v4664_v7 = vld [vmem:[%s5452_s29 + $0x304] ss:$20 sps:$4 sm:$0xff]  }
  0xf8   : > { %4027 = vmatprep.subr.bf16.mxu0 %v5388_v21  ;;  %4393 = vmatprep.mubr.msk.bf16.mxu0 %vm1123_vm0, %v4595_v9  ;;  %v4767_v9 = vld [vmem:[%s6363_s1 + $0x20] sm:$0xff]  }
  0xf9   : > { %1768 = vmatprep.mubr.bf16.mxu1 %v4596_v48  ;;  %v4768_v48 = vld [vmem:[%s6363_s1 + $0x58] sm:$0xff]  }
  0xfb   : > { %4028 = vmatpush3.bf16.msra.mxu0 %v5401_v23 }
  0xfc   : > { %4029 = vmatprep.subr.bf16.mxu0 %v5413_v25 }
  0xfe   : > { %4394 = vmatmul.mubr.msk.bf16.gmra.mxu0 %vm1123_vm0, %v4598_v50  ;;  %v4770_v50 = vld [vmem:[%s6363_s1 + $0x18] sm:$0xff]  }
  0xff   : > { %1769 = vmatmul.mubr.bf16.gmra.mxu1 %v4599_v51  ;;  %4030 = vmatpush3.bf16.msra.mxu0 %v5425_v27  ;;  %v4771_v51 = vld [vmem:[%s6363_s1 + $0x50] sm:$0xff]  }
 0x100   : > { %4031 = vmatprep.subr.bf16.mxu0 %v5437_v29  ;;  %1776 = vmatprep.mubr.bf16.mxu1 %v4600_v52  ;;  %v4667_v52 = vld [vmem:[%s5452_s29 + $0x300] ss:$20 sps:$4 sm:$0xff]  }
 0x101   : > { %1841 = vmatprep.mubr.bf16.mxu0 %v4604_v1  ;;  %v4668_v1 = vld [vmem:[%s5452_s29 + $0x324] ss:$20 sps:$4 sm:$0xff]  }
 0x103   : > { %4032 = vmatpush3.bf16.msra.mxu0 %v5449_v31 }
 0x104   : > { %4093 = vmatprep.subr.bf16.mxu0 %v5263_v0  ;;  %v4612_v0 = vld [vmem:[%s5452_s29 + $0x234] ss:$20 sps:$4 sm:$0xff]  }
 0x106   : > { %1842 = vmatmul.mubr.bf16.vlgmr.msra.gmra.mxu0 %v4602_v53  ;;  %v4670_v53 = vld [vmem:[%s5452_s29 + $0x32c] ss:$20 sps:$4 sm:$0xff]  }
 0x107   : > { %1777 = vmatmul.mubr.bf16.gmra.mxu1 %v4605_v54  ;;  %4094 = vmatpush3.bf16.msra.mxu0 %v5274_v2  ;;  %v4617_v2 = vld [vmem:[%s5452_s29 + $0x198] ss:$20 sps:$4 sm:$0xff]   ;;  %v4772_v54 = vld [vmem:[%s6363_s1 + $0x10] sm:$0xff]  }
 0x108   : > { %1784 = vmatprep.mubr.bf16.mxu1 %v4606_v55  ;;  %1849 = vmatprep.mubr.bf16.mxu0 %v4608_v56  ;;  %v4773_v55 = vld [vmem:[%s6363_s1 + $0x48] sm:$0xff]  }
 0x109   : > { %4095 = vmatprep.subr.bf16.mxu0 %v5286_v4  ;;  %v4616_v4 = vld [vmem:[%s5452_s29 + $0x230] ss:$20 sps:$4 sm:$0xff]   ;;  %v4774_v56 = vld [vmem:[%s6363_s1 + $0x8] sm:$0xff]  }
 0x10b   : > { %4096 = vmatpush3.bf16.msra.mxu0 %v5298_v6  ;;  %v4623_v6 = vld [vmem:[%s5452_s29 + $0x1c0] ss:$20 sps:$4 sm:$0xff]  }
 0x10c   : > { %4097 = vmatprep.subr.bf16.mxu0 %v5310_v8  ;;  %v4622_v8 = vld [vmem:[%s5452_s29 + $0x258] ss:$20 sps:$4 sm:$0xff]  }
 0x10e   : > { %1850 = vmatmul.mubr.bf16.gmra.mxu0 %v4611_v57  ;;  %v4775_v57 = vld [vmem:[%s6363_s1 + $0x40] sm:$0xff]  }
 0x10f   : > { %1785 = vmatmul.mubr.bf16.gmra.mxu1 %v4610_v58  ;;  %1857 = vmatprep.mubr.bf16.mxu0 %v4614_v59  ;;  %v4672_v58 = vld [vmem:[%s5452_s29 + $0x320] ss:$20 sps:$4 sm:$0xff]   ;;  %v4673_v59 = vld [vmem:[%s5452_s29 + $0x328] ss:$20 sps:$4 sm:$0xff]  }
 0x110   : > { %1792 = vmatprep.mubr.bf16.mxu1 %v4612_v0  ;;  %4098 = vmatpush3.bf16.msra.mxu0 %v5322_v10  ;;  %v4624_v10 = vld [vmem:[%s5452_s29 + $0x1ec] ss:$20 sps:$4 sm:$0xff]  }
 0x111   : > { %4099 = vmatprep.subr.bf16.mxu0 %v5334_v12  ;;  %v4626_v12 = vld [vmem:[%s5452_s29 + $0x150] ss:$20 sps:$4 sm:$0xff]   ;;  %v4674_v0 = vld [vmem:[%s5452_s29 + $0x34c] ss:$20 sps:$4 sm:$0xff]  }
 0x114   : > { %4100 = vmatpush3.bf16.msra.mxu0 %v5346_v14  ;;  %v4627_v14 = vld [vmem:[%s5452_s29 + $0x1e8] ss:$20 sps:$4 sm:$0xff]  }
 0x115   : > { %4101 = vmatprep.subr.bf16.mxu0 %v5358_v16  ;;  %v4628_v16 = vld [vmem:[%s5452_s29 + $0x178] ss:$20 sps:$4 sm:$0xff]  }
 0x116   : > { %1858 = vmatmul.mubr.bf16.gmra.mxu0 %v4617_v2  ;;  %v4676_v2 = vld [vmem:[%s5452_s29 + $0x354] ss:$20 sps:$4 sm:$0xff]  }
 0x117   : > { %1793 = vmatmul.mubr.bf16.gmra.mxu1 %v4616_v4  ;;  %1865 = vmatprep.mubr.bf16.mxu0 %v4620_v60  ;;  %v4776_v4 = vld [vmem:[%s6363_s1] sm:$0xff]  }
 0x118   : > { %1800 = vmatprep.mubr.bf16.mxu1 %v4618_v61  ;;  %4102 = vmatpush3.bf16.msra.mxu0 %v5370_v18  ;;  %v4629_v18 = vld [vmem:[%s5452_s29 + $0x214] ss:$20 sps:$4 sm:$0xff]  }
 0x119   : > { %4103 = vmatprep.subr.bf16.mxu0 %v5382_v20  ;;  %v4631_v20 = vld [vmem:[%s5452_s29 + $0x1a0] ss:$20 sps:$4 sm:$0xff]  }
 0x11c   : > { %4104 = vmatpush3.bf16.msra.mxu0 %v5394_v22  ;;  %v5624_v22 = vld [vmem:[%s6363_s1 + $0xb8] sm:$0xff]  }
 0x11d   : > { %4105 = vmatprep.subr.bf16.mxu0 %v5407_v24  ;;  %v5631_v24 = vld [vmem:[%s6363_s1 + $0xf0] sm:$0xff]  }
 0x11e   : > { %1866 = vmatmul.mubr.bf16.gmra.mxu0 %v4623_v6 }
 0x11f   : > { %1801 = vmatmul.mubr.bf16.gmra.mxu1 %v4622_v8  ;;  %1873 = vmatprep.mubr.bf16.mxu0 %v4624_v10 }
 0x120   : > { %4405 = vmatprep.mubr.msk.bf16.mxu1 %vm1123_vm0, %v4626_v12  ;;  %4106 = vmatpush3.bf16.msra.mxu0 %v5419_v26  ;;  %v4632_v26 = vld [vmem:[%s5452_s29 + $0x210] ss:$20 sps:$4 sm:$0xff]  }
 0x121   : > { %4107 = vmatprep.subr.bf16.mxu0 %v5431_v28  ;;  %v4633_v28 = vld [vmem:[%s5452_s29 + $0x1c8] ss:$20 sps:$4 sm:$0xff]  }
 0x124   : > { %4108 = vmatpush3.bf16.msra.mxu0 %v5443_v30  ;;  %v4634_v30 = vld [vmem:[%s5452_s29 + $0x23c] ss:$20 sps:$4 sm:$0xff]  }
 0x125   : > { %4421 = vmatprep.subr.bf16.mxu0 %v5463_v36 }
 0x126   : > { %1874 = vmatmul.mubr.bf16.gmra.mxu0 %v4627_v14 }
 0x127   : > { %4406 = vmatmul.mubr.msk.bf16.vlgmr.msra.gmra.mxu1 %vm1123_vm0, %v4628_v16  ;;  %1881 = vmatprep.mubr.bf16.mxu0 %v4629_v18  ;;  %v4678_v16 = vld [vmem:[%s5452_s29 + $0x348] ss:$20 sps:$4 sm:$0xff]  }
 0x128   : > { %4158 = vmatpush3.bf16.msra.mxu1 %v5624_v22  ;;  %4409 = vmatprep.mubr.msk.bf16.mxu1 %vm1123_vm0, %v4631_v20  ;;  %v4679_v20 = vld [vmem:[%s5452_s29 + $0x350] ss:$20 sps:$4 sm:$0xff]  }
 0x129   : > { %4159 = vmatprep.subr.bf16.mxu1 %v5631_v24 }
 0x12c   : > { %4160 = vmatpush3.bf16.msra.mxu1 %v5640_v62 }
 0x12d   : > { %4161 = vmatprep.subr.bf16.mxu1 %v5647_v32 }
 0x12e   : > { %1882 = vmatmul.mubr.bf16.gmra.mxu0 %v4632_v26  ;;  %v4680_v26 = vld [vmem:[%s5452_s29 + $0x374] ss:$20 sps:$4 sm:$0xff]  }
 0x12f   : > { %4410 = vmatmul.mubr.msk.bf16.gmra.mxu1 %vm1123_vm0, %v4633_v28  ;;  %1889 = vmatprep.mubr.bf16.mxu0 %v4634_v30  ;;  %v4682_v30 = vld [vmem:[%s5452_s29 + $0x37c] ss:$20 sps:$4 sm:$0xff]  }
 0x130   : > { %4162 = vmatpush3.bf16.msra.mxu1 %v5328_v11  ;;  %4413 = vmatprep.mubr.msk.bf16.mxu1 %vm1123_vm0, %v4636_v63  ;;  %v4642_v11 = vld [vmem:[%s5452_s29 + $0x260] ss:$20 sps:$4 sm:$0xff]  }
 0x131   : > { %4163 = vmatprep.subr.bf16.mxu1 %v5340_v13  ;;  %v4643_v13 = vld [vmem:[%s5452_s29 + $0x268] ss:$20 sps:$4 sm:$0xff]  }
 0x134   : > { %4164 = vmatpush3.bf16.msra.mxu1 %v5352_v15  ;;  %v4649_v15 = vld [vmem:[%s5452_s29 + $0x28c] ss:$20 sps:$4 sm:$0xff]  }
 0x135   : > { %4165 = vmatprep.subr.bf16.mxu1 %v5364_v17  ;;  %v4644_v17 = vld [vmem:[%s5452_s29 + $0x280] ss:$20 sps:$4 sm:$0xff]  }
 0x136   : > { %1890 = vmatmul.mubr.bf16.gmra.mxu0 %v4637_v33 }
 0x137   : > { %4414 = vmatmul.mubr.msk.bf16.gmra.mxu1 %vm1123_vm0, %v4638_v34  ;;  %1897 = vmatprep.mubr.bf16.mxu0 %v4639_v35 }
 0x138   : > { %4166 = vmatpush3.bf16.msra.mxu1 %v5376_v19  ;;  %4417 = vmatprep.mubr.msk.bf16.mxu1 %vm1123_vm0, %v4641_v37  ;;  %v4647_v19 = vld [vmem:[%s5452_s29 + $0x288] ss:$20 sps:$4 sm:$0xff]  }
 0x139   : > { %4167 = vmatprep.subr.bf16.mxu1 %v5388_v21  ;;  %v4650_v21 = vld [vmem:[%s5452_s29 + $0x2ac] ss:$20 sps:$4 sm:$0xff]  }
 0x13c   : > { %4168 = vmatpush3.bf16.msra.mxu1 %v5401_v23  ;;  %v4760_v23 = vld [vmem:[%s6363_s1 + $0x78] sm:$0xff]  }
 0x13d   : > { %4169 = vmatprep.subr.bf16.mxu1 %v5413_v25  ;;  %v4652_v25 = vld [vmem:[%s5452_s29 + $0x2b4] ss:$20 sps:$4 sm:$0xff]  }
 0x13e   : > { %1898 = vmatmul.mubr.bf16.gmra.mxu0 %v4642_v11 }
 0x13f   : > { %4418 = vmatmul.mubr.msk.bf16.gmra.mxu1 %vm1123_vm0, %v4643_v13  ;;  %2324 = vmatprep.mubr.bf16.mxu0 %v4646_v38 }
 0x140   : > { %4170 = vmatpush3.bf16.msra.mxu1 %v5425_v27  ;;  %2421 = vmatprep.mubr.bf16.mxu1 %v4649_v15  ;;  %v4761_v27 = vld [vmem:[%s6363_s1 + $0x38] sm:$0xff]  }
 0x141   : > { %4171 = vmatprep.subr.bf16.mxu1 %v5437_v29  ;;  %v4762_v29 = vld [vmem:[%s6363_s1 + $0x70] sm:$0xff]  }
 0x144   : > { %4172 = vmatpush3.bf16.msra.mxu1 %v5449_v31  ;;  %v4654_v31 = vld [vmem:[%s5452_s29 + $0x2a8] ss:$20 sps:$4 sm:$0xff]  }
 0x145   : > { %4233 = vmatprep.subr.bf16.mxu1 %v4760_v23 }
 0x146   : > { %2325 = vmatmul.mubr.bf16.vlgmr.msra.gmra.mxu0 %v4644_v17 }
 0x147   : > { %2422 = vmatmul.mubr.bf16.vlgmr.msra.gmra.mxu1 %v4647_v19  ;;  %4422 = vmatpush3.bf16.msra.mxu0 %v5463_v36 }
 0x148   : > { %4234 = vmatpush3.bf16.msra.mxu1 %v4761_v27  ;;  %2332 = vmatprep.mubr.bf16.mxu0 %v4650_v21  ;;  %v4684_v21 = vld [vmem:[%s5452_s29 + $0x370] ss:$20 sps:$4 sm:$0xff]  }
 0x149   : > { %2429 = vmatprep.mubr.bf16.mxu1 %v4652_v25  ;;  %4235 = vmatprep.subr.bf16.mxu1 %v4762_v29  ;;  %v4685_v25 = vld [vmem:[%s5452_s29 + $0x378] ss:$20 sps:$4 sm:$0xff]   ;;  %v4686_v27 = vld [vmem:[%s5452_s29 + $0x39c] ss:$20 sps:$4 sm:$0xff]  }
 0x14a   : > { %4423 = vmatprep.subr.bf16.mxu0 %v5477_v42 }
 0x14b   : > { %4424 = vmatpush3.bf16.msra.mxu0 %v5477_v42  ;;  %v4765_v42 = vld [vmem:[%s6363_s1 + $0x28] sm:$0xff]  }
 0x14c   : > { %4236 = vmatpush3.bf16.msra.mxu1 %v4763_v41  ;;  %4425 = vmatprep.subr.bf16.mxu0 %v5491_v46 }
 0x14d   : > { %4237 = vmatprep.subr.bf16.mxu1 %v4764_v44 }
 0x14e   : > { %2333 = vmatmul.mubr.bf16.gmra.mxu0 %v4654_v31  ;;  %v4688_v31 = vld [vmem:[%s5452_s29 + $0x3a4] ss:$20 sps:$4 sm:$0xff]  }
 0x14f   : > { %2430 = vmatmul.mubr.bf16.gmra.mxu1 %v4655_v39  ;;  %2340 = vmatprep.mubr.bf16.mxu0 %v4656_v40 }
 0x150   : > { %2437 = vmatprep.mubr.bf16.mxu1 %v4658_v43  ;;  %4238 = vmatpush3.bf16.msra.mxu1 %v4765_v42 }
 0x151   : > { %4239 = vmatprep.subr.bf16.mxu1 %v4766_v45  ;;  %4426 = vmatpush3.bf16.msra.mxu0 %v5491_v46  ;;  %v4769_v46 = vld [vmem:[%s6363_s1 + $0xf8] sm:$0xff]  }
 0x152   : > { %4427 = vmatprep.subr.bf16.mxu0 %v5502_v49 }
 0x154   : > { %4240 = vmatpush3.bf16.msra.mxu1 %v4767_v9 }
 0x155   : > { %4241 = vmatprep.subr.bf16.mxu1 %v4768_v48  ;;  %4428 = vmatpush3.bf16.msra.mxu0 %v5502_v49  ;;  %v4666_v49 = vld [vmem:[%s5452_s29 + $0x2f8] ss:$20 sps:$4 sm:$0xff]  }
 0x156   : > { %2341 = vmatmul.mubr.bf16.gmra.mxu0 %v4660_v47  ;;  %4297 = vmatprep.subr.bf16.mxu0 %v4769_v46  ;;  %v4690_v48 = vld [vmem:[%s5452_s29 + $0x398] ss:$20 sps:$4 sm:$0xff]  }
 0x157   : > { %2438 = vmatmul.mubr.bf16.gmra.mxu1 %v4661_v3  ;;  %2348 = vmatprep.mubr.bf16.mxu0 %v4662_v5 }
 0x158   : > { %2445 = vmatprep.mubr.bf16.mxu1 %v4664_v7  ;;  %4242 = vmatpush3.bf16.msra.mxu1 %v4770_v50  ;;  %v4691_v50 = vld [vmem:[%s5452_s29 + $0x3a0] ss:$20 sps:$4 sm:$0xff]  }
 0x159   : > { %4243 = vmatprep.subr.bf16.mxu1 %v4771_v51  ;;  %v4692_v51 = vld [vmem:[%s5452_s29 + $0x290] ss:$20 sps:$4 sm:$0xff]  }
 0x15c   : > { %4244 = vmatpush3.bf16.msra.mxu1 %v4772_v54 }
 0x15d   : > { %4245 = vmatprep.subr.bf16.mxu1 %v4773_v55 }
 0x15e   : > { %2349 = vmatmul.mubr.bf16.gmra.mxu0 %v4666_v49 }
 0x15f   : > { %2446 = vmatmul.mubr.bf16.gmra.mxu1 %v4667_v52  ;;  %2356 = vmatprep.mubr.bf16.mxu0 %v4668_v1  ;;  %v4695_v52 = vld [vmem:[%s5452_s29 + $0x3c4] ss:$20 sps:$4 sm:$0xff]  }
 0x160   : > { %2453 = vmatprep.mubr.bf16.mxu1 %v4670_v53  ;;  %4246 = vmatpush3.bf16.msra.mxu1 %v4774_v56 }
 0x161   : > { %4247 = vmatprep.subr.bf16.mxu1 %v4775_v57 }
 0x164   : > { %4248 = vmatpush3.bf16.msra.mxu1 %v4776_v4 }
 0x165   : > { %4445 = vmatprep.subr.bf16.mxu1 %v5463_v36 }
 0x166   : > { %v3829_v60 = vpop.f32.mrf.mxu0  ;;  %2357 = vmatmul.mubr.bf16.gmra.mxu0 %v4672_v58 }
 0x167   : > { %v3893_v61 = vpop.f32.mrf.mxu1  ;;  %2454 = vmatmul.mubr.bf16.gmra.mxu1 %v4673_v59  ;;  %2364 = vmatprep.mubr.bf16.mxu0 %v4674_v0 }
 0x168   : > { %v3830_v6 = vpop.f32.mrf.mxu0  ;;  %2461 = vmatprep.mubr.bf16.mxu1 %v4676_v2 }
 0x169   : > { %v3831_v8 = vadd.f32 %v3830_v6, %v3829_v60  ;;  %v3894_v10 = vpop.f32.mrf.mxu1 }
 0x16a   : > { %v3895_v12 = vadd.f32 %v3894_v10, %v3893_v61  ;;  %v3832_v14 = vpop.f32.mrf.mxu0  ;;  %v4696_v61 = vld [vmem:[%s5452_s29 + $0x2b8] ss:$20 sps:$4 sm:$0xff]  }
 0x16b   : > { %v3896_v18 = vpop.f32.mrf.mxu1 }
 0x16c   : > { %v3833_v28 = vpop.f32.mrf.mxu0  ;;  %v5757_v63 = vadd.f32 %v3895_v12, %v3831_v8  ;;  %v4693_v8 = vld [vmem:[%s5452_s29 + $0x3c0] ss:$20 sps:$4 sm:$0xff]  }
 0x16d   : > { %v3834_v36 = vadd.f32 %v3833_v28, %v3832_v14  ;;  %v3897_v33 = vpop.f32.mrf.mxu1 }
 0x16e   : > { %v3898_v34 = vadd.f32 %v3897_v33, %v3896_v18  ;;  %v3835_v35 = vpop.f32.mrf.mxu0  ;;  %2365 = vmatmul.mubr.bf16.gmra.mxu0 %v4678_v16  ;;  %v4697_v18 = vld [vmem:[%s5452_s29 + $0x2e0] ss:$20 sps:$4 sm:$0xff]   ;;  %v4777_v33 = vld [vmem:[%s6363_s1 + $0x118] sm:$0xff]  }
 0x16f   : > { %v3899_v37 = vpop.f32.mrf.mxu1  ;;  %2462 = vmatmul.mubr.bf16.gmra.mxu1 %v4679_v20  ;;  %2372 = vmatprep.mubr.bf16.mxu0 %v4680_v26  ;;  %v4700_v20 = vld [vmem:[%s5452_s29 + $0x3ec] ss:$20 sps:$4 sm:$0xff]  }
 0x170   : > { %v3836_v11 = vpop.f32.mrf.mxu0  ;;  %2469 = vmatprep.mubr.bf16.mxu1 %v4682_v30  ;;  %v5759_v13 = vadd.f32 %v3898_v34, %v3834_v36 }
 0x171   : > { %v3837_v38 = vadd.f32 %v3836_v11, %v3835_v35  ;;  %v3900_v15 = vpop.f32.mrf.mxu1 }
 0x172   : > { %v3901_v17 = vadd.f32 %v3900_v15, %v3899_v37  ;;  %v3838_v19 = vpop.f32.mrf.mxu0 }
 0x173   : > { %v3902_v23 = vpop.f32.mrf.mxu1 }
 0x174   : > { %v3839_v29 = vpop.f32.mrf.mxu0  ;;  %v5765_v39 = vadd.f32 %v3901_v17, %v3837_v38  ;;  %v4701_v38 = vld [vmem:[%s5452_s29 + $0x308] ss:$20 sps:$4 sm:$0xff]  }
 0x175   : > { %v3840_v40 = vadd.f32 %v3839_v29, %v3838_v19  ;;  %v3903_v41 = vpop.f32.mrf.mxu1  ;;  %v4698_v17 = vld [vmem:[%s5452_s29 + $0x3e8] ss:$20 sps:$4 sm:$0xff]  }
 0x176   : > { %v3904_v43 = vadd.f32 %v3903_v41, %v3902_v23  ;;  %v3841_v44 = vpop.f32.mrf.mxu0  ;;  %2373 = vmatmul.mubr.bf16.gmra.mxu0 %v4684_v21  ;;  %v4702_v21 = vld [vmem:[%s5452_s29 + $0x330] ss:$20 sps:$4 sm:$0xff]   ;;  %v4705_v29 = vld [vmem:[%s5452_s29 + $0x414] ss:$20 sps:$4 sm:$0xff]  }
 0x177   : > { %v3905_v42 = vpop.f32.mrf.mxu1  ;;  %2470 = vmatmul.mubr.bf16.gmra.mxu1 %v4685_v25  ;;  %2380 = vmatprep.mubr.bf16.mxu0 %v4686_v27 }
 0x178   : > { %v3842_v45 = vpop.f32.mrf.mxu0  ;;  %2477 = vmatprep.mubr.bf16.mxu1 %v4688_v31  ;;  %v5767_v47 = vadd.f32 %v3904_v43, %v3840_v40  ;;  %v4779_v31 = vld [vmem:[%s6363_s1 + $0x108] sm:$0xff]  }
 0x179   : > { %v3843_v3 = vadd.f32 %v3842_v45, %v3841_v44  ;;  %v3906_v5 = vpop.f32.mrf.mxu1  ;;  %v4781_v44 = vld [vmem:[%s6363_s1 + $0xe0] sm:$0xff]  }
 0x17a   : > { %v3907_v7 = vadd.f32 %v3906_v5, %v3905_v42  ;;  %v3844_v9 = vpop.f32.mrf.mxu0 }
 0x17b   : > { %v3908_v46 = vpop.f32.mrf.mxu1 }
 0x17c   : > { %v3845_v49 = vpop.f32.mrf.mxu0  ;;  %v5773_v1 = vadd.f32 %v3907_v7, %v3843_v3 }
 0x17d   : > { %v3846_v53 = vadd.f32 %v3845_v49, %v3844_v9  ;;  %v3909_v54 = vpop.f32.mrf.mxu1  ;;  %v4706_v9 = vld [vmem:[%s5452_s29 + $0x358] ss:$20 sps:$4 sm:$0xff]  }
 0x17e   : > { %v3910_v55 = vadd.f32 %v3909_v54, %v3908_v46  ;;  %v3847_v56 = vpop.f32.mrf.mxu0  ;;  %2381 = vmatmul.mubr.bf16.gmra.mxu0 %v4690_v48  ;;  %v4782_v48 = vld [vmem:[%s6363_s1 + $0x100] sm:$0xff]  }
 0x17f   : > { %v3911_v57 = vpop.f32.mrf.mxu1  ;;  %2478 = vmatmul.mubr.bf16.gmra.mxu1 %v4691_v50  ;;  %4429 = vmatprep.mubr.msk.bf16.mxu0 %vm1123_vm0, %v4692_v51  ;;  %v4783_v50 = vld [vmem:[%s6363_s1 + $0xa0] sm:$0xff]  }
 0x180   : > { %v3848_v58 = vpop.f32.mrf.mxu0  ;;  %2904 = vmatprep.mubr.bf16.mxu1 %v4695_v52  ;;  %v5776_v59 = vadd.f32 %v3910_v55, %v3846_v53  ;;  %v4703_v51 = vld [vmem:[%s5452_s29 + $0x410] ss:$20 sps:$4 sm:$0xff]   ;;  %v4784_v52 = vld [vmem:[%s6363_s1 + $0xd8] sm:$0xff]   ;;  %v4707_v53 = vld [vmem:[%s5452_s29 + $0x380] ss:$20 sps:$4 sm:$0xff]  }
 0x181   : > { %v3849_v0 = vadd.f32 %v3848_v58, %v3847_v56  ;;  %v3912_v2 = vpop.f32.mrf.mxu1 }
 0x182   : > { %v3913_v4 = vadd.f32 %v3912_v2, %v3911_v57  ;;  %v3850_v60 = vpop.f32.mrf.mxu0  ;;  %v4710_v57 = vld [vmem:[%s5452_s29 + $0x43c] ss:$20 sps:$4 sm:$0xff]  }
 0x183   : > { %v3914_v6 = vpop.f32.mrf.mxu1 }
 0x184   : > { %v3851_v10 = vpop.f32.mrf.mxu0  ;;  %v5780_v12 = vadd.f32 %v3913_v4, %v3849_v0  ;;  %v4785_v4 = vld [vmem:[%s6363_s1 + $0x98] sm:$0xff]  }
 0x185   : > { %v3852_v14 = vadd.f32 %v3851_v10, %v3850_v60  ;;  %v3915_v16 = vpop.f32.mrf.mxu1 }
 0x186   : > { %v3916_v26 = vadd.f32 %v3915_v16, %v3914_v6  ;;  %v3853_v28 = vpop.f32.mrf.mxu0  ;;  %4430 = vmatmul.mubr.msk.bf16.vlgmr.msra.gmra.mxu0 %vm1123_vm0, %v4696_v61  ;;  %v4786_v61 = vld [vmem:[%s6363_s1 + $0xd0] sm:$0xff]  }
 0x187   : > { %v3917_v30 = vpop.f32.mrf.mxu1  ;;  %2905 = vmatmul.mubr.bf16.vlgmr.msra.gmra.mxu1 %v4693_v8  ;;  %4298 = vmatpush3.bf16.msra.mxu0 %v5624_v22 }
 0x188   : > { %v3854_v36 = vpop.f32.mrf.mxu0  ;;  %4299 = vmatprep.subr.bf16.mxu0 %v5631_v24  ;;  %4446 = vmatpush3.bf16.msra.mxu1 %v4777_v33  ;;  %v5790_v34 = vadd.f32 %v3916_v26, %v3852_v14  ;;  %v4778_v24 = vld [vmem:[%s6363_s1 + $0x110] sm:$0xff]   ;;  %v4714_v33 = vld [vmem:[%s5452_s29 + $0x464] ss:$20 sps:$4 sm:$0xff]  }
 0x189   : > { %v3855_v35 = vadd.f32 %v3854_v36, %v3853_v28  ;;  %v3918_v37 = vpop.f32.mrf.mxu1  ;;  %4433 = vmatprep.mubr.msk.bf16.mxu0 %vm1123_vm0, %v4697_v18  ;;  %2912 = vmatprep.mubr.bf16.mxu1 %v4700_v20  ;;  %v4711_v18 = vld [vmem:[%s5452_s29 + $0x3a8] ss:$20 sps:$4 sm:$0xff]   ;;  %v4787_v26 = vld [vmem:[%s6363_s1 + $0x90] sm:$0xff]   ;;  %v4708_v28 = vld [vmem:[%s5452_s29 + $0x438] ss:$20 sps:$4 sm:$0xff]  }
 0x18a   : > { %v3919_v11 = vadd.f32 %v3918_v37, %v3917_v30  ;;  %v3856_v22 = vpop.f32.mrf.mxu0  ;;  %4447 = vmatprep.subr.bf16.mxu1 %v4778_v24  ;;  %v4788_v36 = vld [vmem:[%s6363_s1 + $0xc8] sm:$0xff]  }
 0x18b   : > { %v3920_v15 = vpop.f32.mrf.mxu1  ;;  %4300 = vmatpush3.bf16.msra.mxu0 %v5640_v62 }
 0x18c   : > { %v3857_v19 = vpop.f32.mrf.mxu0  ;;  %4301 = vmatprep.subr.bf16.mxu0 %v5647_v32  ;;  %4448 = vmatpush3.bf16.msra.mxu1 %v4778_v24  ;;  %v5801_v23 = vadd.f32 %v3919_v11, %v3855_v35  ;;  %v4780_v32 = vld [vmem:[%s6363_s1 + $0xa8] sm:$0xff]  }
 0x18d   : > { %v3858_v25 = vadd.f32 %v3857_v19, %v3856_v22  ;;  %v3921_v27 = vpop.f32.mrf.mxu1  ;;  %4449 = vmatprep.subr.bf16.mxu1 %v4779_v31  ;;  %v4717_v22 = vld [vmem:[%s5452_s29 + $0x3cc] ss:$20 sps:$4 sm:$0xff]  }
 0x18e   : > { %v3922_v40 = vadd.f32 %v3921_v27, %v3920_v15  ;;  %v3859_v41 = vpop.f32.mrf.mxu0  ;;  %4434 = vmatmul.mubr.msk.bf16.gmra.mxu0 %vm1123_vm0, %v4701_v38 }
 0x18f   : > { %v3923_v62 = vpop.f32.mrf.mxu1  ;;  %2913 = vmatmul.mubr.bf16.gmra.mxu1 %v4698_v17  ;;  %4302 = vmatpush3.bf16.msra.mxu0 %v4780_v32  ;;  %v4789_v17 = vld [vmem:[%s6363_s1 + $0x88] sm:$0xff]   ;;  %v4791_v32 = vld [vmem:[%s6363_s1 + $0x80] sm:$0xff]  }
 0x190   : > { %v3860_v43 = vpop.f32.mrf.mxu0  ;;  %4303 = vmatprep.subr.bf16.mxu0 %v4781_v44  ;;  %4437 = vmatprep.mubr.msk.bf16.mxu0 %vm1123_vm0, %v4702_v21  ;;  %v5815_v42 = vadd.f32 %v3922_v40, %v3858_v25  ;;  %v4790_v21 = vld [vmem:[%s6363_s1 + $0xc0] sm:$0xff]   ;;  %v4723_v44 = vld [vmem:[%s5452_s29 + $0x3f4] ss:$20 sps:$4 sm:$0xff]  }
 0x191   : > { %v3861_v45 = vadd.f32 %v3860_v43, %v3859_v41  ;;  %v3924_v3 = vpop.f32.mrf.mxu1  ;;  %2920 = vmatprep.mubr.bf16.mxu1 %v4705_v29  ;;  %4450 = vmatpush3.bf16.msra.mxu1 %v4779_v31  ;;  %v4715_v41 = vld [vmem:[%s5452_s29 + $0x3c8] ss:$20 sps:$4 sm:$0xff]   ;;  %v4712_v43 = vld [vmem:[%s5452_s29 + $0x460] ss:$20 sps:$4 sm:$0xff]  }
 0x192   : > { %v3925_v5 = vadd.f32 %v3924_v3, %v3923_v62  ;;  %v3862_v7 = vpop.f32.mrf.mxu0  ;;  %4451 = vmatprep.subr.bf16.mxu1 %v4782_v48  ;;  %v4720_v3 = vld [vmem:[%s5452_s29 + $0x48c] ss:$20 sps:$4 sm:$0xff]  }
 0x193   : > { %v3926_v46 = vpop.f32.mrf.mxu1  ;;  %4304 = vmatpush3.bf16.msra.mxu0 %v4783_v50 }
 0x194   : > { %v3863_v49 = vpop.f32.mrf.mxu0  ;;  %4305 = vmatprep.subr.bf16.mxu0 %v4784_v52  ;;  %v5829_v54 = vadd.f32 %v3925_v5, %v3861_v45 }
 0x195   : > { %v3864_v55 = vadd.f32 %v3863_v49, %v3862_v7  ;;  %v3927_v56 = vpop.f32.mrf.mxu1  ;;  %4452 = vmatpush3.bf16.msra.mxu1 %v4782_v48 }
 0x196   : > { %v3928_v58 = vadd.f32 %v3927_v56, %v3926_v46  ;;  %v3865_v0 = vpop.f32.mrf.mxu0  ;;  %4438 = vmatmul.mubr.msk.bf16.gmra.mxu0 %vm1123_vm0, %v4706_v9 }
 0x197   : > { %v3929_v2 = vpop.f32.mrf.mxu1  ;;  %2921 = vmatmul.mubr.bf16.gmra.mxu1 %v4703_v51  ;;  %4306 = vmatpush3.bf16.msra.mxu0 %v4785_v4  ;;  %v4729_v4 = vld [vmem:[%s5452_s29 + $0x41c] ss:$20 sps:$4 sm:$0xff]  }
 0x198   : > { %v3866_v60 = vpop.f32.mrf.mxu0  ;;  %4307 = vmatprep.subr.bf16.mxu0 %v4786_v61  ;;  %4441 = vmatprep.mubr.msk.bf16.mxu0 %vm1123_vm0, %v4707_v53  ;;  %v5840_v6 = vadd.f32 %v3928_v58, %v3864_v55  ;;  %v4721_v58 = vld [vmem:[%s5452_s29 + $0x3f0] ss:$20 sps:$4 sm:$0xff]   ;;  %v4726_v61 = vld [vmem:[%s5452_s29 + $0x4b4] ss:$20 sps:$4 sm:$0xff]  }
 0x199   : > { %v3867_v8 = vadd.f32 %v3866_v60, %v3865_v0  ;;  %v3930_v10 = vpop.f32.mrf.mxu1  ;;  %2928 = vmatprep.mubr.bf16.mxu1 %v4710_v57 }
 0x19a   : > { %v3931_v14 = vadd.f32 %v3930_v10, %v3929_v2  ;;  %v3868_v16 = vpop.f32.mrf.mxu0  ;;  %v4718_v2 = vld [vmem:[%s5452_s29 + $0x488] ss:$20 sps:$4 sm:$0xff]  }
 0x19b   : > { %v3932_v20 = vpop.f32.mrf.mxu1  ;;  %4308 = vmatpush3.bf16.msra.mxu0 %v4787_v26 }
 0x19c   : > { %v3869_v30 = vpop.f32.mrf.mxu0  ;;  %4309 = vmatprep.subr.bf16.mxu0 %v4788_v36  ;;  %v5851_v35 = vadd.f32 %v3931_v14, %v3867_v8 }
 0x19d   : > { %v3870_v37 = vadd.f32 %v3869_v30, %v3868_v16  ;;  %v3933_v11 = vpop.f32.mrf.mxu1  ;;  %v4727_v30 = vld [vmem:[%s5452_s29 + $0x418] ss:$20 sps:$4 sm:$0xff]  }
 0x19e   : > { %v3934_v38 = vadd.f32 %v3933_v11, %v3932_v20  ;;  %v3871_v24 = vpop.f32.mrf.mxu0  ;;  %4442 = vmatmul.mubr.msk.bf16.gmra.mxu0 %vm1123_vm0, %v4711_v18 }
 0x19f   : > { %v3935_v15 = vpop.f32.mrf.mxu1  ;;  %2929 = vmatmul.mubr.bf16.gmra.mxu1 %v4708_v28  ;;  %4310 = vmatpush3.bf16.msra.mxu0 %v4789_v17 }
 0x1a0   : > { %v3872_v19 = vpop.f32.mrf.mxu0  ;;  %4311 = vmatprep.subr.bf16.mxu0 %v4790_v21  ;;  %2936 = vmatprep.mubr.bf16.mxu1 %v4714_v33  ;;  %v5861_v25 = vadd.f32 %v3934_v38, %v3870_v37  ;;  %v4735_v37 = vld [vmem:[%s5452_s29 + $0x444] ss:$20 sps:$4 sm:$0xff]  }
 0x1a1   : > { %v3873_v27 = vadd.f32 %v3872_v19, %v3871_v24  ;;  %v3936_v29 = vpop.f32.mrf.mxu1  ;;  %3001 = vmatprep.mubr.bf16.mxu0 %v4717_v22  ;;  %v4732_v22 = vld [vmem:[%s5452_s29 + $0x4dc] ss:$20 sps:$4 sm:$0xff]  }
 0x1a2   : > { %v3937_v31 = vadd.f32 %v3936_v29, %v3935_v15  ;;  %v3874_v40 = vpop.f32.mrf.mxu0 }
 0x1a3   : > { %v3938_v62 = vpop.f32.mrf.mxu1  ;;  %4312 = vmatpush3.bf16.msra.mxu0 %v4791_v32 }
 0x1a4   : > { %v3875_v45 = vpop.f32.mrf.mxu0  ;;  %v5870_v5 = vadd.f32 %v3937_v31, %v3873_v27  ;;  %v4733_v31 = vld [vmem:[%s5452_s29 + $0x440] ss:$20 sps:$4 sm:$0xff]  }
 0x1a5   : > { %v3876_v7 = vadd.f32 %v3875_v45, %v3874_v40  ;;  %v3939_v9 = vpop.f32.mrf.mxu1 }
 0x1a6   : > { %v3940_v48 = vadd.f32 %v3939_v9, %v3938_v62  ;;  %v4383_v46 = vpop.f32.mrf.mxu0  ;;  %3002 = vmatmul.mubr.bf16.vlgmr.msra.gmra.mxu0 %v4715_v41  ;;  %v4738_v62 = vld [vmem:[%s5452_s29 + $0x46c] ss:$20 sps:$4 sm:$0xff]  }
 0x1a7   : > { %v5873_v50 = vadd.f32 %v4383_v46, %v5765_v39  ;;  %v3969_v51 = vpop.f32.mrf.mxu1  ;;  %2937 = vmatmul.mubr.bf16.gmra.mxu1 %v4712_v43  ;;  %3009 = vmatprep.mubr.bf16.mxu0 %v4723_v44  ;;  %v4739_v43 = vld [vmem:[%s5452_s29 + $0x3d0] ss:$20 sps:$4 sm:$0xff]  }
 0x1a8   : > { %v1376_v49 = vpop.f32.mrf.mxu0  ;;  %2944 = vmatprep.mubr.bf16.mxu1 %v4720_v3  ;;  %v5875_v52 = vadd.f32 %v3940_v48, %v3876_v7 }
 0x1a9   : > { %v5878_v53 = vadd.f32 %v1376_v49, %v5757_v63  ;;  %v3970_v55 = vpop.f32.mrf.mxu1  ;;  %v4736_v49 = vld [vmem:[%s5452_s29 + $0x468] ss:$20 sps:$4 sm:$0xff]  }
 0x1aa   : > { %v5880_v56 = vadd.f32 %v3970_v55, %v3969_v51  ;;  %v4384_v57 = vpop.f32.mrf.mxu0 }
 0x1ab   : > { %v5884_v0 = vadd.f32 %v4384_v57, %v5767_v47  ;;  %v3972_v39 = vpop.f32.mrf.mxu1  ;;  %v4740_v57 = vld [vmem:[%s5452_s29 + $0x3f8] ss:$20 sps:$4 sm:$0xff]  }
 0x1ac   : > { %v1379_v60 = vpop.f32.mrf.mxu0 }
 0x1ad   : > { %v5890_v8 = vadd.f32 %v1379_v60, %v5759_v13  ;;  %v3973_v10 = vpop.f32.mrf.mxu1 }
 0x1ae   : > { %v5892_v63 = vadd.f32 %v3973_v10, %v3972_v39  ;;  %v4387_v14 = vpop.f32.mrf.mxu0  ;;  %3010 = vmatmul.mubr.bf16.gmra.mxu0 %v4721_v58  ;;  %v4743_v58 = vld [vmem:[%s5452_s29 + $0x494] ss:$20 sps:$4 sm:$0xff]  }
 0x1af   : > { %v5895_v16 = vadd.f32 %v4387_v14, %v5780_v12  ;;  %v3975_v47 = vpop.f32.mrf.mxu1  ;;  %2945 = vmatmul.mubr.bf16.gmra.mxu1 %v4718_v2  ;;  %3017 = vmatprep.mubr.bf16.mxu0 %v4729_v4  ;;  %v4724_v12 = vld [vmem:[%s5452_s29 + $0x4b0] ss:$20 sps:$4 sm:$0xff]   ;;  %v4744_v2 = vld [vmem:[%s5452_s29 + $0x420] ss:$20 sps:$4 sm:$0xff]  }
 0x1b0   : > { %v1392_v18 = vpop.f32.mrf.mxu0  ;;  %2952 = vmatprep.mubr.bf16.mxu1 %v4726_v61 }
 0x1b1   : > { %v5898_v20 = vadd.f32 %v1392_v18, %v5773_v1  ;;  %v3976_v13 = vpop.f32.mrf.mxu1 }
 0x1b2   : > { %v5900_v26 = vadd.f32 %v3976_v13, %v3975_v47  ;;  %v4388_v28 = vpop.f32.mrf.mxu0  ;;  %v4741_v13 = vld [vmem:[%s5452_s29 + $0x490] ss:$20 sps:$4 sm:$0xff]  }
 0x1b3   : > { %v5904_v36 = vadd.f32 %v4388_v28, %v5790_v34  ;;  %v3978_v33 = vpop.f32.mrf.mxu1 }
 0x1b4   : > { %v1395_v11 = vpop.f32.mrf.mxu0 }
 0x1b5   : > { %v5910_v38 = vadd.f32 %v1395_v11, %v5776_v59  ;;  %v3979_v24 = vpop.f32.mrf.mxu1  ;;  %v4749_v11 = vld [vmem:[%s5452_s29 + $0x470] ss:$20 sps:$4 sm:$0xff]  }
 0x1b6   : > { %v5912_v1 = vadd.f32 %v3979_v24, %v3978_v33  ;;  %v4391_v15 = vpop.f32.mrf.mxu0  ;;  %3018 = vmatmul.mubr.bf16.gmra.mxu0 %v4727_v30  ;;  %v4745_v30 = vld [vmem:[%s5452_s29 + $0x448] ss:$20 sps:$4 sm:$0xff]  }
 0x1b7   : > { %v5915_v17 = vadd.f32 %v4391_v15, %v5829_v54  ;;  %v3981_v34 = vpop.f32.mrf.mxu1  ;;  %2953 = vmatmul.mubr.bf16.gmra.mxu1 %v4724_v12  ;;  %3025 = vmatprep.mubr.bf16.mxu0 %v4735_v37  ;;  %v4730_v54 = vld [vmem:[%s5452_s29 + $0x4d8] ss:$20 sps:$4 sm:$0xff]   ;;  %v4748_v33 = vld [vmem:[%s5452_s29 + $0x4bc] ss:$20 sps:$4 sm:$0xff]  }
 0x1b8   : > { %v1408_v19 = vpop.f32.mrf.mxu0  ;;  %2960 = vmatprep.mubr.bf16.mxu1 %v4732_v22 }
 0x1b9   : > { %v5918_v21 = vadd.f32 %v1408_v19, %v5801_v23  ;;  %v3982_v59 = vpop.f32.mrf.mxu1 }
 0x1ba   : > { %v5920_v27 = vadd.f32 %v3982_v59, %v3981_v34  ;;  %v4392_v29 = vpop.f32.mrf.mxu0 }
 0x1bb   : > { %v5924_v40 = vadd.f32 %v4392_v29, %v5840_v6  ;;  %v3984_v41 = vpop.f32.mrf.mxu1 }
 0x1bc   : > { %v1411_v32 = vpop.f32.mrf.mxu0 }
 0x1bd   : > { %v5930_v44 = vadd.f32 %v1411_v32, %v5815_v42  ;;  %v3985_v45 = vpop.f32.mrf.mxu1 }
 0x1be   : > { %v5932_v23 = vadd.f32 %v3985_v45, %v3984_v41  ;;  %v4395_v3 = vpop.f32.mrf.mxu0  ;;  %3026 = vmatmul.mubr.bf16.gmra.mxu0 %v4733_v31  ;;  %v4753_v45 = vld [vmem:[%s5452_s29 + $0x4e4] ss:$20 sps:$4 sm:$0xff]  }
 0x1bf   : > { %v5935_v7 = vadd.f32 %v4395_v3, %v5870_v5  ;;  %v3987_v6 = vpop.f32.mrf.mxu1  ;;  %2961 = vmatmul.mubr.bf16.gmra.mxu1 %v4730_v54  ;;  %3033 = vmatprep.mubr.bf16.mxu0 %v4738_v62  ;;  %v4746_v62 = vld [vmem:[%s5452_s29 + $0x4b8] ss:$20 sps:$4 sm:$0xff]  }
 0x1c0   : > { %v1424_v9 = vpop.f32.mrf.mxu0  ;;  %4453 = vmatprep.mubr.msk.bf16.mxu1 %vm1123_vm0, %v4739_v43  ;;  %v4750_v43 = vld [vmem:[%s5452_s29 + $0x498] ss:$20 sps:$4 sm:$0xff]  }
 0x1c1   : > { %v5939_v42 = vadd.f32 %v1424_v9, %v5851_v35  ;;  %v3988_v48 = vpop.f32.mrf.mxu1  ;;  %v4754_v9 = vld [vmem:[%s5452_s29 + $0x4c0] ss:$20 sps:$4 sm:$0xff]  }
 0x1c2   : > { %v5941_v46 = vadd.f32 %v3988_v48, %v3987_v6  ;;  %v4396_v51 = vpop.f32.mrf.mxu0 }
 0x1c3   : > { %v5945_v55 = vadd.f32 %v4396_v51, %v5875_v52  ;;  %v3990_v5 = vpop.f32.mrf.mxu1 }
 0x1c4   : > { %v1427_v39 = vpop.f32.mrf.mxu0 }
 0x1c5   : > { %v5951_v4 = vadd.f32 %v1427_v39, %v5861_v25  ;;  %v3991_v35 = vpop.f32.mrf.mxu1 }
 0x1c6   : > { %v5953_v60 = vadd.f32 %v3991_v35, %v3990_v5  ;;  %v4033_v61 = vpop.f32.mrf.mxu0  ;;  %3034 = vmatmul.mubr.bf16.gmra.mxu0 %v4736_v49 }
 0x1c7   : > { %6369 = vst [vmem:[#allocation3_spill] sm:$0xff] %v5951_v4  ;;  %v3993_v10 = vpop.f32.mrf.mxu1  ;;  %4454 = vmatmul.mubr.msk.bf16.vlgmr.msra.gmra.mxu1 %vm1123_vm0, %v4740_v57  ;;  %3041 = vmatprep.mubr.bf16.mxu0 %v4743_v58 }
 0x1c8   : > { %v4034_v52 = vpop.f32.mrf.mxu0  ;;  %4457 = vmatprep.mubr.msk.bf16.mxu1 %vm1123_vm0, %v4744_v2 }
 0x1c9   : > { %v3994_v14 = vpop.f32.mrf.mxu1  ;;  %v4035_v47 = vadd.f32 %v4034_v52, %v4033_v61  ;;  %v4751_v61 = vld [vmem:[%s5452_s29 + $0x4e0] ss:$20 sps:$4 sm:$0xff]   ;;  %v4755_v52 = vld [vmem:[%s5452_s29 + $0x4e8] ss:$20 sps:$4 sm:$0xff]   ;;  %s3436_s29 = sshll.u32 %s3300_s15, 4 }
 0x1ca   : > { %v5957_v18 = vadd.f32 %v3994_v14, %v3993_v10  ;;  %v4036_v25 = vpop.f32.mrf.mxu0  ;;  %p581_p8 = scmp.lt.s32.totalorder %s3436_s29, 63 }
 0x1cb   : > { %v3996_v28 = vpop.f32.mrf.mxu1  ;;  %v5963_v12 = vadd.f32 %v4035_v47, %v5880_v56 }
 0x1cc   : > { %v4037_v37 = vpop.f32.mrf.mxu0  ;;  %s6417_s29 = smov (!%p581_p8, %s3436_s29), 63 }
 0x1cd   : > { %v3997_v22 = vpop.f32.mrf.mxu1  ;;  %v4038_v24 = vadd.f32 %v4037_v37, %v4036_v25  ;;  %s3437_s25 = sshll.u32 %s6417_s29, 3 }
 0x1ce   : > { %v5966_v15 = vadd.f32 %v3997_v22, %v3996_v28  ;;  %v4039_v34 = vpop.f32.mrf.mxu0  ;;  %3042 = vmatmul.mubr.bf16.gmra.mxu0 %v4741_v13  ;;  %s6285_s28 = scalar_lea.vmem %s6365_s3, %s3437_s25 }
 0x1cf   : > { %v3999_v19 = vpop.f32.mrf.mxu1  ;;  %4458 = vmatmul.mubr.msk.bf16.gmra.mxu1 %vm1123_vm0, %v4745_v30  ;;  %3049 = vmatprep.mubr.bf16.mxu0 %v4748_v33  ;;  %v5970_v59 = vadd.f32 %v4038_v24, %v5892_v63 }
 0x1d0   : > { %v4040_v56 = vpop.f32.mrf.mxu0  ;;  %4461 = vmatprep.mubr.msk.bf16.mxu1 %vm1123_vm0, %v4749_v11 }
 0x1d1   : > { %v4000_v29 = vpop.f32.mrf.mxu1  ;;  %v4041_v31 = vadd.f32 %v4040_v56, %v4039_v34 }
 0x1d2   : > { %v5973_v41 = vadd.f32 %v4000_v29, %v3999_v19  ;;  %v4042_v54 = vpop.f32.mrf.mxu0 }
 0x1d3   : > { %v4002_v32 = vpop.f32.mrf.mxu1  ;;  %v1852_v3 = vadd.f32 %v4041_v31, %v5900_v26 }
 0x1d4   : > { %v4043_v6 = vpop.f32.mrf.mxu0 }
 0x1d5   : > { %v4003_v48 = vpop.f32.mrf.mxu1  ;;  %v4044_v63 = vadd.f32 %v4043_v6, %v4042_v54 }
 0x1d6   : > { %v5980_v51 = vadd.f32 %v4003_v48, %v4002_v32  ;;  %v4045_v49 = vpop.f32.mrf.mxu0  ;;  %3050 = vmatmul.mubr.bf16.gmra.mxu0 %v4746_v62 }
 0x1d7   : > { %v4005_v5 = vpop.f32.mrf.mxu1  ;;  %4462 = vmatmul.mubr.msk.bf16.gmra.mxu1 %vm1123_vm0, %v4750_v43  ;;  %3057 = vmatprep.mubr.bf16.mxu0 %v4753_v45  ;;  %v1855_v57 = vadd.f32 %v4044_v63, %v5912_v1 }
 0x1d8   : > { %v4046_v58 = vpop.f32.mrf.mxu0  ;;  %4465 = vmatprep.mubr.msk.bf16.mxu1 %vm1123_vm0, %v4754_v9 }
 0x1d9   : > { %v4006_v26 = vpop.f32.mrf.mxu1  ;;  %v4047_v39 = vadd.f32 %v4046_v58, %v4045_v49 }
 0x1da   : > { %v5985_v2 = vadd.f32 %v4006_v26, %v4005_v5  ;;  %v4048_v35 = vpop.f32.mrf.mxu0 }
 0x1db   : > { %v4008_v10 = vpop.f32.mrf.mxu1  ;;  %v1860_v14 = vadd.f32 %v4047_v39, %v5920_v27 }
 0x1dc   : > { %v4049_v47 = vpop.f32.mrf.mxu0 }
 0x1dd   : > { %v4009_v25 = vpop.f32.mrf.mxu1  ;;  %v4050_v13 = vadd.f32 %v4049_v47, %v4048_v35 }
 0x1de   : > { %v5990_v28 = vadd.f32 %v4009_v25, %v4008_v10  ;;  %v4051_v30 = vpop.f32.mrf.mxu0  ;;  %3058 = vmatmul.mubr.bf16.gmra.mxu0 %v4751_v61 }
 0x1df   : > { %v4011_v1 = vpop.f32.mrf.mxu1  ;;  %4466 = vmatmul.mubr.msk.bf16.gmra.mxu1 %vm1123_vm0, %v4755_v52  ;;  %v1863_v33 = vadd.f32 %v4050_v13, %v5932_v23 }
 0x1e0   : > { %v4052_v37 = vpop.f32.mrf.mxu0 }
 0x1e1   : > { %v4012_v11 = vpop.f32.mrf.mxu1  ;;  %v4053_v22 = vadd.f32 %v4052_v37, %v4051_v30 }
 0x1e2   : > { %v5994_v24 = vadd.f32 %v4012_v11, %v4011_v1  ;;  %v4054_v34 = vpop.f32.mrf.mxu0 }
 0x1e3   : > { %v4014_v19 = vpop.f32.mrf.mxu1  ;;  %v1868_v27 = vadd.f32 %v4053_v22, %v5941_v46 }
 0x1e4   : > { %v4055_v56 = vpop.f32.mrf.mxu0 }
 0x1e5   : > { %v4015_v29 = vpop.f32.mrf.mxu1  ;;  %v4056_v31 = vadd.f32 %v4055_v56, %v4054_v34 }
 0x1e6   : > { %v5997_v54 = vadd.f32 %v4015_v29, %v4014_v19  ;;  %v4057_v62 = vpop.f32.mrf.mxu0 }
 0x1e7   : > { %v4407_v32 = vpop.f32.mrf.mxu1  ;;  %v1871_v43 = vadd.f32 %v4056_v31, %v5953_v60 }
 0x1e8   : > { %v6000_v45 = vadd.f32 %v4407_v32, %v1852_v3  ;;  %v4058_v23 = vpop.f32.mrf.mxu0 }
 0x1e9   : > { %v4059_v6 = vadd.f32 %v4058_v23, %v4057_v62  ;;  %v1940_v9 = vpop.f32.mrf.mxu1 }
 0x1ea   : > { %v6005_v63 = vadd.f32 %v1940_v9, %v5963_v12  ;;  %v4060_v46 = vpop.f32.mrf.mxu0 }
 0x1eb   : > { %v4408_v49 = vpop.f32.mrf.mxu1  ;;  %v1876_v5 = vadd.f32 %v4059_v6, %v5957_v18 }
 0x1ec   : > { %v6010_v26 = vadd.f32 %v4408_v49, %v1855_v57  ;;  %v4061_v60 = vpop.f32.mrf.mxu0 }
 0x1ed   : > { %v4062_v3 = vadd.f32 %v4061_v60, %v4060_v46  ;;  %v1943_v39 = vpop.f32.mrf.mxu1 }
 0x1ee   : > { %v6015_v61 = vadd.f32 %v1943_v39, %v5970_v59  ;;  %v4063_v12 = vpop.f32.mrf.mxu0 }
 0x1ef   : > { %v4411_v10 = vpop.f32.mrf.mxu1  ;;  %v1879_v52 = vadd.f32 %v4062_v3, %v5966_v15 }
 0x1f0   : > { %v6020_v47 = vadd.f32 %v4411_v10, %v1868_v27  ;;  %v4064_v57 = vpop.f32.mrf.mxu0 }
 0x1f1   : > { %v4065_v25 = vadd.f32 %v4064_v57, %v4063_v12  ;;  %v1956_v13 = vpop.f32.mrf.mxu1 }
 0x1f2   : > { %v6024_v1 = vadd.f32 %v1956_v13, %v1860_v14  ;;  %v4066_v37 = vpop.f32.mrf.mxu0 }
 0x1f3   : > { %v4412_v59 = vpop.f32.mrf.mxu1  ;;  %v1884_v11 = vadd.f32 %v4065_v25, %v5973_v41 }
 0x1f4   : > { %v6029_v22 = vadd.f32 %v4412_v59, %v1871_v43  ;;  %v4067_v34 = vpop.f32.mrf.mxu0 }
 0x1f5   : > { %v4068_v19 = vadd.f32 %v4067_v34, %v4066_v37  ;;  %v1959_v27 = vpop.f32.mrf.mxu1 }
 0x1f6   : > { %v6033_v29 = vadd.f32 %v1959_v27, %v1863_v33  ;;  %v4069_v31 = vpop.f32.mrf.mxu0 }
 0x1f7   : > { %v4415_v14 = vpop.f32.mrf.mxu1  ;;  %v1887_v62 = vadd.f32 %v4068_v19, %v5980_v51 }
 0x1f8   : > { %v6038_v32 = vadd.f32 %v4415_v14, %v1884_v11  ;;  %v4070_v23 = vpop.f32.mrf.mxu0 }
 0x1f9   : > { %v4071_v43 = vadd.f32 %v4070_v23, %v4069_v31  ;;  %v1972_v6 = vpop.f32.mrf.mxu1 }
 0x1fa   : > { %v6042_v46 = vadd.f32 %v1972_v6, %v1876_v5  ;;  %v4072_v49 = vpop.f32.mrf.mxu0 }
 0x1fb   : > { %v4416_v33 = vpop.f32.mrf.mxu1  ;;  %v1892_v60 = vadd.f32 %v4071_v43, %v5985_v2 }
 0x1fc   : > { %v6047_v3 = vadd.f32 %v4416_v33, %v1887_v62  ;;  %v4073_v39 = vpop.f32.mrf.mxu0 }
 0x1fd   : > { %v4074_v12 = vadd.f32 %v4073_v39, %v4072_v49  ;;  %v1975_v10 = vpop.f32.mrf.mxu1 }
 0x1fe   : > { %v6051_v25 = vadd.f32 %v1975_v10, %v1879_v52  ;;  %v4075_v13 = vpop.f32.mrf.mxu0 }
 0x1ff   : > { %v4419_v5 = vpop.f32.mrf.mxu1  ;;  %v1895_v37 = vadd.f32 %v4074_v12, %v5990_v28 }
 0x200   : > { %v4076_v59 = vpop.f32.mrf.mxu0 }
 0x201   : > { %v4077_v11 = vadd.f32 %v4076_v59, %v4075_v13  ;;  %v1988_v34 = vpop.f32.mrf.mxu1 }
 0x202   : > { %v6056_v19 = vadd.f32 %v1988_v34, %v1892_v60  ;;  %v4078_v27 = vpop.f32.mrf.mxu0 }
 0x203   : > { %v1900_v31 = vadd.f32 %v4077_v11, %v5994_v24  ;;  %v4420_v14 = vpop.f32.mrf.mxu1 }
 0x204   : > { %v4079_v62 = vpop.f32.mrf.mxu0 }
 0x205   : > { %v6061_v23 = vadd.f32 %v4419_v5, %v1900_v31  ;;  %v4080_v43 = vadd.f32 %v4079_v62, %v4078_v27  ;;  %v1991_v28 = vpop.f32.mrf.mxu1 }
 0x206   : > { %v6063_v6 = vadd.f32 %v1991_v28, %v1895_v37  ;;  %v4109_v49 = vpop.f32.mrf.mxu0 }
 0x207   : > { %v1903_v33 = vadd.f32 %v4080_v43, %v5997_v54  ;;  %v4173_v39 = vpop.f32.mrf.mxu1 }
 0x208   : > { %6370 = vst [vmem:[#allocation4_spill] sm:$0xff] %v6063_v6  ;;  %v4110_v12 = vpop.f32.mrf.mxu0 }
 0x209   : > { %v6070_v10 = vadd.f32 %v4420_v14, %v1903_v33  ;;  %v4111_v13 = vadd.f32 %v4110_v12, %v4109_v49  ;;  %v4174_v5 = vpop.f32.mrf.mxu1 }
 0x20a   : > { %v4175_v59 = vadd.f32 %v4174_v5, %v4173_v39  ;;  %v4112_v11 = vpop.f32.mrf.mxu0 }
 0x20b   : > { %6371 = vst [vmem:[#allocation5_spill] sm:$0xff] %v6070_v10  ;;  %v4176_v34 = vpop.f32.mrf.mxu1 }
 0x20c   : > { %v4113_v27 = vpop.f32.mrf.mxu0  ;;  %v6074_v54 = vadd.f32 %v4175_v59, %v4111_v13 }
 0x20d   : > { %v4114_v31 = vadd.f32 %v4113_v27, %v4112_v11  ;;  %v4177_v62 = vpop.f32.mrf.mxu1 }
 0x20e   : > { %v4178_v43 = vadd.f32 %v4177_v62, %v4176_v34  ;;  %v4115_v28 = vpop.f32.mrf.mxu0 }
 0x20f   : > { %v4179_v52 = vpop.f32.mrf.mxu1 }
 0x210   : > { %v4116_v24 = vpop.f32.mrf.mxu0  ;;  %v6076_v60 = vadd.f32 %v4178_v43, %v4114_v31 }
 0x211   : > { %v4117_v14 = vadd.f32 %v4116_v24, %v4115_v28  ;;  %v4180_v49 = vpop.f32.mrf.mxu1 }
 0x212   : > { %v4181_v33 = vadd.f32 %v4180_v49, %v4179_v52  ;;  %v4118_v39 = vpop.f32.mrf.mxu0 }
 0x213   : > { %v4182_v12 = vpop.f32.mrf.mxu1 }
 0x214   : > { %v4119_v5 = vpop.f32.mrf.mxu0  ;;  %v6078_v2 = vadd.f32 %v4181_v33, %v4117_v14 }
 0x215   : > { %v4120_v37 = vadd.f32 %v4119_v5, %v4118_v39  ;;  %v4183_v57 = vpop.f32.mrf.mxu1 }
 0x216   : > { %v4184_v13 = vadd.f32 %v4183_v57, %v4182_v12  ;;  %v4121_v59 = vpop.f32.mrf.mxu0 }
 0x217   : > { %v4185_v11 = vpop.f32.mrf.mxu1 }
 0x218   : > { %v4122_v27 = vpop.f32.mrf.mxu0  ;;  %v6080_v34 = vadd.f32 %v4184_v13, %v4120_v37 }
 0x219   : > { %v4123_v62 = vadd.f32 %v4122_v27, %v4121_v59  ;;  %v4186_v51 = vpop.f32.mrf.mxu1 }
 0x21a   : > { %v4187_v31 = vadd.f32 %v4186_v51, %v4185_v11  ;;  %v4124_v43 = vpop.f32.mrf.mxu0 }
 0x21b   : > { %v4188_v24 = vpop.f32.mrf.mxu1 }
 0x21c   : > { %v4125_v28 = vpop.f32.mrf.mxu0  ;;  %v6082_v52 = vadd.f32 %v4187_v31, %v4123_v62 }
 0x21d   : > { %v4126_v49 = vadd.f32 %v4125_v28, %v4124_v43  ;;  %v4189_v9 = vpop.f32.mrf.mxu1 }
 0x21e   : > { %v4190_v14 = vadd.f32 %v4189_v9, %v4188_v24  ;;  %v4127_v33 = vpop.f32.mrf.mxu0 }
 0x21f   : > { %v4191_v39 = vpop.f32.mrf.mxu1 }
 0x220   : > { %v4128_v5 = vpop.f32.mrf.mxu0  ;;  %v6084_v57 = vadd.f32 %v4190_v14, %v4126_v49 }
 0x221   : > { %v4129_v12 = vadd.f32 %v4128_v5, %v4127_v33  ;;  %v4192_v41 = vpop.f32.mrf.mxu1 }
 0x222   : > { %v4193_v37 = vadd.f32 %v4192_v41, %v4191_v39  ;;  %v4130_v13 = vpop.f32.mrf.mxu0 }
 0x223   : > { %v4194_v59 = vpop.f32.mrf.mxu1 }
 0x224   : > { %v4131_v27 = vpop.f32.mrf.mxu0  ;;  %v6086_v51 = vadd.f32 %v4193_v37, %v4129_v12 }
 0x225   : > { %v4132_v11 = vadd.f32 %v4131_v27, %v4130_v13  ;;  %v4195_v56 = vpop.f32.mrf.mxu1 }
 0x226   : > { %v4196_v62 = vadd.f32 %v4195_v56, %v4194_v59  ;;  %v4133_v31 = vpop.f32.mrf.mxu0 }
 0x227   : > { %v4197_v43 = vpop.f32.mrf.mxu1 }
 0x228   : > { %v4134_v28 = vpop.f32.mrf.mxu0  ;;  %v6088_v9 = vadd.f32 %v4196_v62, %v4132_v11 }
 0x229   : > { %v4135_v24 = vadd.f32 %v4134_v28, %v4133_v31  ;;  %v4198_v15 = vpop.f32.mrf.mxu1 }
 0x22a   : > { %v4199_v49 = vadd.f32 %v4198_v15, %v4197_v43  ;;  %v4136_v14 = vpop.f32.mrf.mxu0 }
 0x22b   : > { %v4200_v33 = vpop.f32.mrf.mxu1 }
 0x22c   : > { %v4137_v5 = vpop.f32.mrf.mxu0  ;;  %v6090_v41 = vadd.f32 %v4199_v49, %v4135_v24 }
 0x22d   : > { %v4138_v39 = vadd.f32 %v4137_v5, %v4136_v14  ;;  %v4201_v30 = vpop.f32.mrf.mxu1 }
 0x22e   : > { %v4202_v12 = vadd.f32 %v4201_v30, %v4200_v33  ;;  %v4139_v37 = vpop.f32.mrf.mxu0 }
 0x22f   : > { %v4203_v13 = vpop.f32.mrf.mxu1 }
 0x230   : > { %v4140_v27 = vpop.f32.mrf.mxu0  ;;  %v6092_v56 = vadd.f32 %v4202_v12, %v4138_v39 }
 0x231   : > { %v4141_v59 = vadd.f32 %v4140_v27, %v4139_v37  ;;  %v4204_v18 = vpop.f32.mrf.mxu1 }
 0x232   : > { %v4205_v11 = vadd.f32 %v4204_v18, %v4203_v13  ;;  %v4142_v62 = vpop.f32.mrf.mxu0 }
 0x233   : > { %v4206_v31 = vpop.f32.mrf.mxu1 }
 0x234   : > { %v4143_v28 = vpop.f32.mrf.mxu0  ;;  %v6094_v15 = vadd.f32 %v4205_v11, %v4141_v59 }
 0x235   : > { %v4144_v43 = vadd.f32 %v4143_v28, %v4142_v62  ;;  %v4207_v35 = vpop.f32.mrf.mxu1 }
 0x236   : > { %v4208_v24 = vadd.f32 %v4207_v35, %v4206_v31  ;;  %v4145_v49 = vpop.f32.mrf.mxu0 }
 0x237   : > { %v4209_v14 = vpop.f32.mrf.mxu1 }
 0x238   : > { %v4146_v5 = vpop.f32.mrf.mxu0  ;;  %v6096_v30 = vadd.f32 %v4208_v24, %v4144_v43 }
 0x239   : > { %v4147_v33 = vadd.f32 %v4146_v5, %v4145_v49  ;;  %v4210_v58 = vpop.f32.mrf.mxu1 }
 0x23a   : > { %v4211_v39 = vadd.f32 %v4210_v58, %v4209_v14  ;;  %v4148_v12 = vpop.f32.mrf.mxu0 }
 0x23b   : > { %v4212_v37 = vpop.f32.mrf.mxu1 }
 0x23c   : > { %v4149_v27 = vpop.f32.mrf.mxu0  ;;  %v6098_v18 = vadd.f32 %v4211_v39, %v4147_v33 }
 0x23d   : > { %v4150_v13 = vadd.f32 %v4149_v27, %v4148_v12  ;;  %v4213_v48 = vpop.f32.mrf.mxu1  ;;  %v6372_v27 = vmax.f32 %v5873_v50, %v6000_v45  ;;  %v6374_v50 = vmax.f32 %v5884_v0, %v6010_v26  ;;  %v6376_v0 = vmax.f32 %v5895_v16, %v6020_v47 }
 0x23e   : > { %v4214_v59 = vadd.f32 %v4213_v48, %v4212_v37  ;;  %v4151_v11 = vpop.f32.mrf.mxu0  ;;  %v6378_v16 = vmax.f32 %v5904_v36, %v6029_v22  ;;  %v6380_v36 = vmax.f32 %v5915_v17, %v6038_v32  ;;  %v6382_v17 = vmax.f32 %v5924_v40, %v6047_v3 }
 0x23f   : > { %v4215_v62 = vpop.f32.mrf.mxu1 }
 0x240   : > { %v4152_v28 = vpop.f32.mrf.mxu0  ;;  %v6100_v35 = vadd.f32 %v4214_v59, %v4150_v13 }
 0x241   : > { %v4153_v31 = vadd.f32 %v4152_v28, %v4151_v11  ;;  %v4216_v6 = vpop.f32.mrf.mxu1 }
 0x242   : > { %v4217_v43 = vadd.f32 %v4216_v6, %v4215_v62  ;;  %v4154_v24 = vpop.f32.mrf.mxu0 }
 0x243   : > { %v4218_v49 = vpop.f32.mrf.mxu1 }
 0x244   : > { %v4155_v5 = vpop.f32.mrf.mxu0  ;;  %v2480_v58 = vadd.f32 %v4217_v43, %v4153_v31 }
 0x245   : > { %v4156_v14 = vadd.f32 %v4155_v5, %v4154_v24  ;;  %v4219_v4 = vpop.f32.mrf.mxu1 }
 0x246   : > { %v4220_v10 = vadd.f32 %v4219_v4, %v4218_v49  ;;  %v4431_v33 = vpop.f32.mrf.mxu0  ;;  %v6373_v4 = vmax.f32 %v5878_v53, %v6005_v63  ;;  %v6375_v53 = vmax.f32 %v5890_v8, %v6015_v61  ;;  %v6377_v8 = vmax.f32 %v5898_v20, %v6024_v1 }
 0x247   : > { %v2529_v39 = vadd.f32 %v4431_v33, %v6078_v2  ;;  %v6103_v12 = vpop.f32.mrf.mxu1  ;;  %v6379_v20 = vmax.f32 %v5910_v38, %v6033_v29  ;;  %v6381_v38 = vmax.f32 %v5918_v21, %v6042_v46  ;;  %v6384_v21 = vmax.f32 %v5930_v44, %v6051_v25 }
 0x248   : > { %v2520_v48 = vpop.f32.mrf.mxu0  ;;  %v2483_v37 = vadd.f32 %v4220_v10, %v4156_v14 }
 0x249   : > { %v6108_v13 = vmax.f32 %v6372_v27, %v2529_v39  ;;  %v2521_v6 = vadd.f32 %v2520_v48, %v6074_v54  ;;  %v6111_v59 = vpop.f32.mrf.mxu1 }
 0x24a   : > { %v4432_v11 = vpop.f32.mrf.mxu0 }
 0x24b   : > { %v6116_v62 = vmax.f32 %v6373_v4, %v2521_v6  ;;  %v2532_v2 = vadd.f32 %v4432_v11, %v6080_v34  ;;  %v6119_v28 = vpop.f32.mrf.mxu1 }
 0x24c   : > { %v2523_v10 = vpop.f32.mrf.mxu0 }
 0x24d   : > { %v6124_v45 = vmax.f32 %v6374_v50, %v2532_v2  ;;  %v2524_v54 = vadd.f32 %v2523_v10, %v6076_v60  ;;  %v6127_v31 = vpop.f32.mrf.mxu1 }
 0x24e   : > { %v4435_v43 = vpop.f32.mrf.mxu0 }
 0x24f   : > { %v6132_v63 = vmax.f32 %v6375_v53, %v2524_v54  ;;  %v2545_v34 = vadd.f32 %v4435_v43, %v6086_v51  ;;  %v6135_v24 = vpop.f32.mrf.mxu1 }
 0x250   : > { %v2536_v49 = vpop.f32.mrf.mxu0 }
 0x251   : > { %v6140_v26 = vmax.f32 %v6376_v0, %v2545_v34  ;;  %v2537_v60 = vadd.f32 %v2536_v49, %v6082_v52  ;;  %v6143_v5 = vpop.f32.mrf.mxu1  ;;  %v6386_v49 = vmax.f32 %v5935_v7, %v6061_v23 }
 0x252   : > { %v4436_v14 = vpop.f32.mrf.mxu0 }
 0x253   : > { %v6148_v61 = vmax.f32 %v6377_v8, %v2537_v60  ;;  %v2548_v51 = vadd.f32 %v4436_v14, %v6088_v9  ;;  %v6151_v33 = vpop.f32.mrf.mxu1  ;;  %v6388_v60 = vmax.f32 %v5939_v42, %v6056_v19  ;;  %v6390_v8 = vld [vmem:[#allocation5_spill] sm:$0xff] }
 0x254   : > { %v2539_v39 = vpop.f32.mrf.mxu0 }
 0x255   : > { %v6156_v47 = vmax.f32 %v6378_v16, %v2548_v51  ;;  %v2540_v52 = vadd.f32 %v2539_v39, %v6084_v57  ;;  %v6159_v48 = vpop.f32.mrf.mxu1  ;;  %v6391_v51 = vmax.f32 %v5945_v55, %v6390_v8  ;;  %v6393_v16 = vld [vmem:[#allocation3_spill] sm:$0xff] }
 0x256   : > { %v4439_v27 = vpop.f32.mrf.mxu0 }
 0x257   : > { %v6164_v1 = vmax.f32 %v6379_v20, %v2540_v52  ;;  %v2561_v9 = vadd.f32 %v4439_v27, %v6094_v15  ;;  %v6167_v6 = vpop.f32.mrf.mxu1  ;;  %v6394_v52 = vld [vmem:[#allocation4_spill] sm:$0xff] }
 0x258   : > { %v2552_v11 = vpop.f32.mrf.mxu0  ;;  %v6395_v27 = vmax.f32 %v6393_v16, %v6394_v52 }
 0x259   : > { %v6172_v22 = vmax.f32 %v6380_v36, %v2561_v9  ;;  %v2553_v57 = vadd.f32 %v2552_v11, %v6090_v41  ;;  %v6175_v4 = vpop.f32.mrf.mxu1 }
 0x25a   : > { %v4440_v2 = vpop.f32.mrf.mxu0 }
 0x25b   : > { %v6180_v29 = vmax.f32 %v6381_v38, %v2553_v57  ;;  %v2564_v15 = vadd.f32 %v4440_v2, %v6096_v30  ;;  %v6183_v10 = vpop.f32.mrf.mxu1 }
 0x25c   : > { %v2555_v50 = vpop.f32.mrf.mxu0 }
 0x25d   : > { %v6188_v32 = vmax.f32 %v6382_v17, %v2564_v15  ;;  %v2556_v41 = vadd.f32 %v2555_v50, %v6092_v56  ;;  %v6191_v54 = vpop.f32.mrf.mxu1 }
 0x25e   : > { %v4443_v43 = vpop.f32.mrf.mxu0 }
 0x25f   : > { %6383 = vst [vmem:[#allocation6_spill] sm:$0xff] %v6188_v32  ;;  %v6196_v46 = vmax.f32 %v6384_v21, %v2556_v41  ;;  %v2577_v53 = vadd.f32 %v4443_v43, %v2480_v58  ;;  %v6198_v30 = vpop.f32.mrf.mxu1 }
 0x260   : > { %v2568_v34 = vpop.f32.mrf.mxu0 }
 0x261   : > { %6385 = vst [vmem:[#allocation7_spill] sm:$0xff] %v6196_v46  ;;  %v6203_v40 = vmax.f32 %v6386_v49, %v2577_v53  ;;  %v2569_v3 = vadd.f32 %v2568_v34, %v6098_v18  ;;  %v6206_v56 = vpop.f32.mrf.mxu1 }
 0x262   : > { %v4444_v0 = vpop.f32.mrf.mxu0 }
 0x263   : > { %6387 = vst [vmem:[#allocation8_spill] sm:$0xff] %v6203_v40  ;;  %v6211_v44 = vmax.f32 %v6388_v60, %v2569_v3  ;;  %v2580_v25 = vadd.f32 %v4444_v0, %v2483_v37  ;;  %v6213_v58 = vpop.f32.mrf.mxu1 }
 0x264   : > { %v2571_v14 = vpop.f32.mrf.mxu0 }
 0x265   : > { %6389 = vst [vmem:[#allocation9_spill] sm:$0xff] %v6211_v44  ;;  %v6218_v7 = vmax.f32 %v6391_v51, %v2580_v25  ;;  %v2572_v23 = vadd.f32 %v2571_v14, %v6100_v35  ;;  %v6221_v18 = vpop.f32.mrf.mxu1  ;;  %v4251_v44 = vadd.f32 %v6111_v59, %v6103_v12  ;;  %v4254_v12 = vadd.f32 %v6127_v31, %v6119_v28 }
 0x266   : > { %v4313_v39 = vpop.f32.mrf.mxu0  ;;  %v4263_v28 = vadd.f32 %v6175_v4, %v6167_v6  ;;  %v4272_v6 = vadd.f32 %v6221_v18, %v6213_v58 }
 0x267   : > { %6392 = vst [vmem:[#allocation5_spill] sm:$0xff] %v6218_v7  ;;  %v6226_v42 = vmax.f32 %v6395_v27, %v2572_v23  ;;  %v6228_v19 = vpop.f32.mrf.mxu1  ;;  %v4257_v27 = vadd.f32 %v6143_v5, %v6135_v24  ;;  %v6271_v5 = vld [vmem:[%s6364_s2] ss:$0 sm:$0xff] }
 0x268   : > { %v4314_v37 = vpop.f32.mrf.mxu0 }
 0x269   : > { %6396 = vst [vmem:[#allocation3_spill] sm:$0xff] %v6226_v42  ;;  %v6230_v20 = vpop.f32.mrf.mxu1  ;;  %v4315_v7 = vadd.f32 %v4314_v37, %v4313_v39 }
 0x26a   : > { %v4316_v9 = vpop.f32.mrf.mxu0 }
 0x26b   : > { %v6232_v11 = vpop.f32.mrf.mxu1  ;;  %v3004_v32 = vadd.f32 %v4315_v7, %v4251_v44 }
 0x26c   : > { %v4317_v55 = vpop.f32.mrf.mxu0 }
 0x26d   : > { %v6234_v36 = vpop.f32.mrf.mxu1 }
 0x26e   : > { %v4319_v35 = vpop.f32.mrf.mxu0 }
 0x26f   : > { %v6236_v57 = vpop.f32.mrf.mxu1 }
 0x270   : > { %v4320_v2 = vpop.f32.mrf.mxu0 }
 0x271   : > { %v6238_v38 = vpop.f32.mrf.mxu1  ;;  %v4321_v23 = vadd.f32 %v4320_v2, %v4319_v35  ;;  %v4260_v35 = vadd.f32 %v6159_v48, %v6151_v33  ;;  %v4318_v2 = vadd.f32 %v4317_v55, %v4316_v9  ;;  %v4269_v48 = vadd.f32 %v6206_v56, %v6198_v30 }
 0x272   : > { %v4322_v15 = vpop.f32.mrf.mxu0 }
 0x273   : > { %v6240_v50 = vpop.f32.mrf.mxu1 }
 0x274   : > { %v4323_v17 = vpop.f32.mrf.mxu0 }
 0x275   : > { %v6242_v41 = vpop.f32.mrf.mxu1 }
 0x276   : > { %v4325_v43 = vpop.f32.mrf.mxu0 }
 0x277   : > { %v6244_v21 = vpop.f32.mrf.mxu1 }
 0x278   : > { %v4326_v53 = vpop.f32.mrf.mxu0 }
 0x279   : > { %v6246_v34 = vpop.f32.mrf.mxu1  ;;  %v4327_v44 = vadd.f32 %v4326_v53, %v4325_v43 }
 0x27a   : > { %v4328_v49 = vpop.f32.mrf.mxu0 }
 0x27b   : > { %v6248_v3 = vpop.f32.mrf.mxu1 }
 0x27c   : > { %6397 = vst [vmem:[#allocation4_spill] sm:$0xff] %v6248_v3  ;;  %v4329_v0 = vpop.f32.mrf.mxu0 }
 0x27d   : > { %v6250_v60 = vpop.f32.mrf.mxu1  ;;  %v4330_v4 = vadd.f32 %v4329_v0, %v4328_v49 }
 0x27e   : > { %6398 = vst [vmem:[#allocation10_spill] sm:$0xff] %v6250_v60  ;;  %v4331_v25 = vpop.f32.mrf.mxu0  ;;  %v4324_v60 = vadd.f32 %v4323_v17, %v4322_v15 }
 0x27f   : > { %v6252_v14 = vpop.f32.mrf.mxu1 }
 0x280   : > { %6399 = vst [vmem:[#allocation11_spill] sm:$0xff] %v6252_v14  ;;  %v4332_v8 = vpop.f32.mrf.mxu0  ;;  %v3012_v14 = vadd.f32 %v4321_v23, %v4257_v27  ;;  %v3015_v33 = vadd.f32 %v4324_v60, %v4260_v35  ;;  %v3020_v60 = vadd.f32 %v4327_v44, %v4263_v28 }
 0x281   : > { %v6256_v51 = vpop.f32.mrf.mxu1  ;;  %v4333_v24 = vadd.f32 %v4332_v8, %v4331_v25 }
 0x282   : > { %6400 = vst [vmem:[#allocation12_spill] sm:$0xff] %v6256_v51  ;;  %v4334_v16 = vpop.f32.mrf.mxu0 }
 0x283   : > { %v6258_v52 = vpop.f32.mrf.mxu1 }
 0x284   : > { %6401 = vst [vmem:[#allocation13_spill] sm:$0xff] %v6258_v52  ;;  %v4335_v42 = vpop.f32.mrf.mxu0 }
 0x285   : > { %v6262_v40 = vpop.f32.mrf.mxu1  ;;  %v4336_v31 = vadd.f32 %v4335_v42, %v4334_v16 }
 0x286   : > { %v4337_v3 = vpop.f32.mrf.mxu0 }
 0x287   : > { %v4455_v51 = vpop.f32.mrf.mxu1 }
 0x288   : > { %v3109_v52 = vadd.f32 %v4455_v51, %v3012_v14  ;;  %v4338_v46 = vpop.f32.mrf.mxu0  ;;  %v3007_v14 = vadd.f32 %v4318_v2, %v4254_v12  ;;  %v3031_v2 = vadd.f32 %v4336_v31, %v4272_v6 }
 0x289   : > { %v3100_v39 = vpop.f32.mrf.mxu1 }
 0x28a   : > { %v3165_v59 = vmax.f32 %v6108_v13, %v3109_v52  ;;  %v3101_v37 = vadd.f32 %v3100_v39, %v3004_v32  ;;  %v4340_v15 = vpop.f32.mrf.mxu0  ;;  %v3028_v32 = vadd.f32 %v4333_v24, %v4269_v48  ;;  %v4339_v39 = vadd.f32 %v4338_v46, %v4337_v3 }
 0x28b   : > { %v4456_v7 = vpop.f32.mrf.mxu1 }
 0x28c   : > { %v3188_v9 = vadd.f32 %v6271_v5, %v3165_v59  ;;  %v3163_v55 = vmax.f32 %v6116_v62, %v3101_v37  ;;  %v3112_v17 = vadd.f32 %v4456_v7, %v3015_v33  ;;  %v4341_v25 = vpop.f32.mrf.mxu0 }
 0x28d   : > { %v3103_v13 = vpop.f32.mrf.mxu1 }
 0x28e   : > { %v3204_v30 = vmax.f32 %v3188_v9, 0.0  ;;  %v3186_v56 = vadd.f32 %v6271_v5, %v3163_v55  ;;  %v3166_v62 = vmax.f32 %v6124_v45, %v3112_v17  ;;  %v3104_v43 = vadd.f32 %v3103_v13, %v3007_v14  ;;  %v4343_v53 = vpop.f32.mrf.mxu0 }
 0x28f   : > { %v4459_v42 = vpop.f32.mrf.mxu1  ;;  %v4266_v45 = vadd.f32 %v6191_v54, %v6183_v10  ;;  %v4342_v17 = vadd.f32 %v4341_v25, %v4340_v15 }
 0x290   : > { %3220 = vst [vmem:[%s6285_s28 + $0x10] sm:$0xff] %v3204_v30  ;;  %v3202_v8 = vmax.f32 %v3186_v56, 0.0  ;;  %v3189_v51 = vadd.f32 %v6271_v5, %v3166_v62  ;;  %v3164_v23 = vmax.f32 %v6132_v63, %v3104_v43  ;;  %v3125_v16 = vadd.f32 %v4459_v42, %v3028_v32  ;;  %v4344_v52 = vpop.f32.mrf.mxu0 }
 0x291   : > { %v4345_v27 = vadd.f32 %v4344_v52, %v4343_v53  ;;  %v3116_v35 = vpop.f32.mrf.mxu1  ;;  %v4281_v63 = vadd.f32 %v6238_v38, %v6236_v57  ;;  %v3023_v59 = vadd.f32 %v4330_v4, %v4266_v45 }
 0x292   : > { %3218 = vst [vmem:[%s6285_s28] sm:$0xff] %v3202_v8  ;;  %v3205_v58 = vmax.f32 %v3189_v51, 0.0  ;;  %v3187_v18 = vadd.f32 %v6271_v5, %v3164_v23  ;;  %v3169_v49 = vmax.f32 %v6140_v26, %v3125_v16  ;;  %v3117_v0 = vadd.f32 %v3116_v35, %v3020_v60  ;;  %v4346_v24 = vpop.f32.mrf.mxu0  ;;  %v6402_v23 = vld [vmem:[#allocation6_spill] sm:$0xff] }
 0x293   : > { %v4460_v12 = vpop.f32.mrf.mxu1  ;;  %v4275_v26 = vadd.f32 %v6230_v20, %v6228_v19  ;;  %v3044_v9 = vadd.f32 %v4345_v27, %v4281_v63  ;;  %v4287_v60 = vadd.f32 %v6246_v34, %v6244_v21 }
 0x294   : > { %3221 = vst [vmem:[%s6285_s28 + $0x18] sm:$0xff] %v3205_v58  ;;  %v3203_v10 = vmax.f32 %v3187_v18, 0.0  ;;  %v3192_v54 = vadd.f32 %v6271_v5, %v3169_v49  ;;  %v3167_v37 = vmax.f32 %v6148_v61, %v3117_v0  ;;  %v3128_v33 = vadd.f32 %v4460_v12, %v3031_v2  ;;  %v4347_v48 = vpop.f32.mrf.mxu0  ;;  %v6403_v18 = vld [vmem:[#allocation7_spill] sm:$0xff]  ;;  %v6405_v0 = vld [vmem:[#allocation12_spill] sm:$0xff] }
 0x295   : > { %v4348_v44 = vadd.f32 %v4347_v48, %v4346_v24  ;;  %v3119_v7 = vpop.f32.mrf.mxu1  ;;  %v4284_v61 = vadd.f32 %v6242_v41, %v6240_v50  ;;  %v3036_v28 = vadd.f32 %v4339_v39, %v4275_v26  ;;  %v6404_v49 = vld [vmem:[#allocation11_spill] sm:$0xff]  ;;  %v6406_v12 = vld [vmem:[#allocation4_spill] sm:$0xff] }
 0x296   : > { %3219 = vst [vmem:[%s6285_s28 + $0x8] sm:$0xff] %v3203_v10  ;;  %v3208_v57 = vmax.f32 %v3192_v54, 0.0  ;;  %v3190_v46 = vadd.f32 %v6271_v5, %v3167_v37  ;;  %v3170_v38 = vmax.f32 %v6156_v47, %v3128_v33  ;;  %v3120_v3 = vadd.f32 %v3119_v7, %v3023_v59  ;;  %v4349_v55 = vpop.f32.mrf.mxu0  ;;  %v6407_v59 = vld [vmem:[#allocation10_spill] sm:$0xff] }
 0x297   : > { %v4463_v14 = vpop.f32.mrf.mxu1  ;;  %v4278_v47 = vadd.f32 %v6234_v36, %v6232_v11  ;;  %v3047_v56 = vadd.f32 %v4348_v44, %v4284_v61  ;;  %v4293_v24 = vadd.f32 %v6405_v0, %v6404_v49  ;;  %v4290_v10 = vadd.f32 %v6407_v59, %v6406_v12 }
 0x298   : > { %3224 = vst [vmem:[%s6285_s28 + $0x30] sm:$0xff] %v3208_v57  ;;  %v3206_v19 = vmax.f32 %v3190_v46, 0.0  ;;  %v3193_v20 = vadd.f32 %v6271_v5, %v3170_v38  ;;  %v3168_v31 = vmax.f32 %v6164_v1, %v3120_v3  ;;  %v3141_v13 = vadd.f32 %v4463_v14, %v3044_v9  ;;  %v4350_v32 = vpop.f32.mrf.mxu0  ;;  %v6408_v9 = vld [vmem:[#allocation9_spill] sm:$0xff] }
 0x299   : > { %v3132_v30 = vpop.f32.mrf.mxu1  ;;  %v4351_v43 = vadd.f32 %v4350_v32, %v4349_v55  ;;  %v3039_v6 = vadd.f32 %v4342_v17, %v4278_v47  ;;  %v6409_v3 = vld [vmem:[#allocation13_spill] sm:$0xff]  ;;  %v6411_v47 = vld [vmem:[#allocation3_spill] sm:$0xff] }
 0x29a   : > { %3222 = vst [vmem:[%s6285_s28 + $0x20] sm:$0xff] %v3206_v19  ;;  %v3209_v62 = vmax.f32 %v3193_v20, 0.0  ;;  %v3191_v50 = vadd.f32 %v6271_v5, %v3168_v31  ;;  %v3173_v41 = vmax.f32 %v6172_v22, %v3141_v13  ;;  %v3133_v15 = vadd.f32 %v3132_v30, %v3036_v28  ;;  %v4352_v25 = vpop.f32.mrf.mxu0  ;;  %v6410_v20 = vld [vmem:[#allocation8_spill] sm:$0xff] }
 0x29b   : > { %v4464_v53 = vpop.f32.mrf.mxu1  ;;  %v3052_v35 = vadd.f32 %v4351_v43, %v4287_v60  ;;  %v4296_v55 = vadd.f32 %v6262_v40, %v6409_v3 }
 0x29c   : > { %3225 = vst [vmem:[%s6285_s28 + $0x38] sm:$0xff] %v3209_v62  ;;  %v3207_v1 = vmax.f32 %v3191_v50, 0.0  ;;  %v3196_v4 = vadd.f32 %v6271_v5, %v3173_v41  ;;  %v3171_v11 = vmax.f32 %v6180_v29, %v3133_v15  ;;  %v3144_v36 = vadd.f32 %v4464_v53, %v3047_v56  ;;  %v4353_v42 = vpop.f32.mrf.mxu0  ;;  %v6412_v41 = vld [vmem:[#allocation5_spill] sm:$0xff] }
 0x29d   : > { %v3135_v8 = vpop.f32.mrf.mxu1  ;;  %v4354_v58 = vadd.f32 %v4353_v42, %v4352_v25 }
 0x29e   : > { %3223 = vst [vmem:[%s6285_s28 + $0x28] sm:$0xff] %v3207_v1  ;;  %v3212_v22 = vmax.f32 %v3196_v4, 0.0  ;;  %v3194_v51 = vadd.f32 %v6271_v5, %v3171_v11  ;;  %v3174_v16 = vmax.f32 %v6402_v23, %v3144_v36  ;;  %v3136_v52 = vadd.f32 %v3135_v8, %v3039_v6  ;;  %v4355_v45 = vpop.f32.mrf.mxu0 }
 0x29f   : > { %v4467_v27 = vpop.f32.mrf.mxu1  ;;  %v3055_v38 = vadd.f32 %v4354_v58, %v4290_v10 }
 0x2a0   : > { %3228 = vst [vmem:[%s6285_s28 + $0x50] sm:$0xff] %v3212_v22  ;;  %v3210_v2 = vmax.f32 %v3194_v51, 0.0  ;;  %v3197_v29 = vadd.f32 %v6271_v5, %v3174_v16  ;;  %v3172_v21 = vmax.f32 %v6403_v18, %v3136_v52  ;;  %v4356_v34 = vpop.f32.mrf.mxu0 }
 0x2a1   : > { %v4357_v63 = vadd.f32 %v4356_v34, %v4355_v45  ;;  %v3148_v39 = vpop.f32.mrf.mxu1 }
 0x2a2   : > { %3226 = vst [vmem:[%s6285_s28 + $0x40] sm:$0xff] %v3210_v2  ;;  %v3213_v54 = vmax.f32 %v3197_v29, 0.0  ;;  %v3195_v37 = vadd.f32 %v6271_v5, %v3172_v21  ;;  %v3149_v33 = vadd.f32 %v3148_v39, %v3052_v35  ;;  %v4358_v48 = vpop.f32.mrf.mxu0 }
 0x2a3   : > { %v3060_v26 = vadd.f32 %v4357_v63, %v4293_v24  ;;  %v4468_v44 = vpop.f32.mrf.mxu1 }
 0x2a4   : > { %3229 = vst [vmem:[%s6285_s28 + $0x58] sm:$0xff] %v3213_v54  ;;  %v3211_v7 = vmax.f32 %v3195_v37, 0.0  ;;  %v3175_v57 = vmax.f32 %v6408_v9, %v3149_v33  ;;  %v4359_v46 = vpop.f32.mrf.mxu0 }
 0x2a5   : > { %v3157_v61 = vadd.f32 %v4467_v27, %v3060_v26  ;;  %v4360_v17 = vadd.f32 %v4359_v46, %v4358_v48  ;;  %v3151_v14 = vpop.f32.mrf.mxu1 }
 0x2a6   : > { %3227 = vst [vmem:[%s6285_s28 + $0x48] sm:$0xff] %v3211_v7  ;;  %v3198_v28 = vadd.f32 %v6271_v5, %v3175_v57  ;;  %v3152_v19 = vadd.f32 %v3151_v14, %v3055_v38 }
 0x2a7   : > { %v3177_v31 = vmax.f32 %v6410_v20, %v3157_v61  ;;  %v3063_v13 = vadd.f32 %v4360_v17, %v4296_v55 }
 0x2a8   : > { %v3214_v32 = vmax.f32 %v3198_v28, 0.0  ;;  %v3176_v30 = vmax.f32 %v6411_v47, %v3152_v19 }
 0x2a9   : > { %v3200_v56 = vadd.f32 %v6271_v5, %v3177_v31  ;;  %v3160_v62 = vadd.f32 %v4468_v44, %v3063_v13 }
 0x2aa   : > { %3230 = vst [vmem:[%s6285_s28 + $0x60] sm:$0xff] %v3214_v32  ;;  %v3199_v40 = vadd.f32 %v6271_v5, %v3176_v30 }
 0x2ab   : > { %v3216_v50 = vmax.f32 %v3200_v56, 0.0  ;;  %v3178_v15 = vmax.f32 %v6412_v41, %v3160_v62 }
 0x2ac   : > { %v3215_v25 = vmax.f32 %v3199_v40, 0.0 }
 0x2ad   : > { %3232 = vst [vmem:[%s6285_s28 + $0x70] sm:$0xff] %v3216_v50  ;;  %v3201_v43 = vadd.f32 %v6271_v5, %v3178_v15 }
 0x2ae   : > { %3231 = vst [vmem:[%s6285_s28 + $0x68] sm:$0xff] %v3215_v25 }
 0x2af   : > { %v3217_v53 = vmax.f32 %v3201_v43, 0.0 }
 0x2b1   : > { %3233 = vst [vmem:[%s6285_s28 + $0x78] sm:$0xff] %v3217_v53 }
 0x2b2 PF: > { %p10_p9 = scmp.ge.s32.totalorder %s4853_s16, 6   ;;  %s6413_s12 = smov %s4810_s13 }
 0x2b3   : > { %s6414_s13 = smov %s4862_s19  ;;  %s6415_s14 = smov %s4853_s16 }
 0x2b4   :  { %12 = sbr.rel (!%p10_p9) target bundleno = 2 (0x2), region = 102 }

// kernel: simple_cnn_forward.5
= control target key start
LH: loop header
LB: loop body
LE: loop exit
PB: predicated region body
PF: predicated region fallthrough
CT: control target
= control target key end

     0   :  { %8 = vsyncpa [#allocation3], 0  ;;  %v174_v0 = vlaneseq  ;;  %v8771_v2 = vmov 1983009808   ;;  %vm3822_vm0 = vcmask 1041408   ;;  %vm8593_vm1 = vcmask 7168   ;;  %s12834_s0 = inlined_call_operand.vmem [shape: f32[2,32768], index: 0, kind: input, shape index: {}]   ;;  %s12835_s1 = inlined_call_operand.vmem [shape: f32[2,32768], index: 1, kind: input, shape index: {}]   ;;  %s12836_s2 = inlined_call_operand.vmem [shape: f32[1,2], index: 2, kind: input, shape index: {}]   ;;  %s12837_s3 = inlined_call_operand.hbm [shape: f32[2,2], index: 3, kind: output, shape index: {}]  }
   0x1   :  { %v1201_v3 = vunpack.c.l.s4 %v8771_v2  ;;  %v8802_v8 = vld [vmem:[%s12835_s1] ss:$2 sm:$0xff]  ;;  %v8817_v14 = vld [vmem:[%s12835_s1 + $0x10] ss:$2 sm:$0xff]  ;;  %s8772_s18 = smov [#allocation2]   ;;  %vm8603_vm2 = vcmask 9216  }
   0x2   :  { %v175_v1 = vshrl.u32 %v174_v0, 7  ;;  %v8830_v19 = vld [vmem:[%s12835_s1 + $0x20] ss:$2 sm:$0xff]  ;;  %v8851_v28 = vld [vmem:[%s12835_s1 + $0x30] ss:$2 sm:$0xff]  ;;  %s8611_s19 = sshll.u32 %s8772_s18, 4  ;;  %s8612_s19 = int_to_ptr.vmem [resolvable:$true] %s8611_s19 }
   0x3   :  { %v1202_v7 = vunpack.c.0.s8 %v1201_v3  ;;  %v8872_v37 = vld [vmem:[%s12835_s1 + $0x40] ss:$2 sm:$0xff]  ;;  %v8893_v46 = vld [vmem:[%s12835_s1 + $0x50] ss:$2 sm:$0xff]  ;;  %s8749_s20 = scalar_lea.vmem %s8612_s19, 32  ;;  %p8754_p1 = scmp.lt.s32.totalorder %s8612_s19, %s8612_s19 }
   0x4   :  { %v8793_v4 = vsub.s32 0, %v175_v1  ;;  %v8795_v5 = vsub.s32 1, %v175_v1  ;;  %v8797_v6 = vsub.s32 2, %v175_v1  ;;  %v8804_v9 = vsub.s32 3, %v175_v1  ;;  %v8914_v55 = vld [vmem:[%s12835_s1 + $0x60] ss:$2 sm:$0xff]  ;;  %p8750_p0 = scmp.ne.s32.totalorder %s8612_s19, %s8749_s20  ;;  %p8755_p2 = scmp.lt.s32.totalorder %s8749_s20, %s8749_s20 }
   0x5   :  { %v8806_v10 = vsub.s32 4, %v175_v1  ;;  %v8808_v11 = vsub.s32 5, %v175_v1  ;;  %v8810_v12 = vsub.s32 6, %v175_v1  ;;  %v8812_v13 = vsub.s32 7, %v175_v1  ;;  %v8935_v0 = vld [vmem:[%s12835_s1 + $0x70] ss:$2 sm:$0xff] }
   0x6   :  { %v177_v15 = vrot.slane %v8802_v8, %v8793_v4  ;;  %v181_v16 = vrot.slane %v8802_v8, %v8795_v5  ;;  %v185_v17 = vrot.slane %v8802_v8, %v8797_v6  ;;  %v8825_v18 = vsub.s32 %v1202_v7, %v175_v1  ;;  %v8956_v2 = vld [vmem:[%s12835_s1 + $0x80] ss:$2 sm:$0xff]  ;;  %v8977_v63 = vld [vmem:[%s12835_s1 + $0x90] ss:$2 sm:$0xff]  ;;  %p8756_p3 = por %p8755_p2, %p8754_p1 }
   0x7   :  { %v189_v20 = vrot.slane %v8802_v8, %v8804_v9  ;;  %v193_v21 = vrot.slane %v8802_v8, %v8806_v10  ;;  %v197_v22 = vrot.slane %v8802_v8, %v8808_v11  ;;  %v201_v23 = vrot.slane %v8802_v8, %v8810_v12  ;;  %v8998_v1 = vld [vmem:[%s12835_s1 + $0xa0] ss:$2 sm:$0xff]  ;;  %v9019_v7 = vld [vmem:[%s12835_s1 + $0xb0] ss:$2 sm:$0xff] }
   0x8   :  { %v205_v24 = vrot.slane %v8802_v8, %v8812_v13  ;;  %v209_v25 = vrot.slane %v8817_v14, %v8793_v4  ;;  %v213_v26 = vrot.slane %v8817_v14, %v8795_v5  ;;  %v217_v27 = vrot.slane %v8817_v14, %v8797_v6  ;;  %v9040_v62 = vld [vmem:[%s12835_s1 + $0xc0] ss:$2 sm:$0xff]  ;;  %v9061_v59 = vld [vmem:[%s12835_s1 + $0xd0] ss:$2 sm:$0xff]  ;;  %p8757_p4 = pnand %p8756_p3, %p8750_p0 }
   0x9   :  { %v221_v29 = vrot.slane %v8817_v14, %v8804_v9  ;;  %v225_v30 = vrot.slane %v8817_v14, %v8806_v10  ;;  %v229_v31 = vrot.slane %v8817_v14, %v8808_v11  ;;  %v233_v32 = vrot.slane %v8817_v14, %v8810_v12  ;;  %v9082_v60 = vld [vmem:[%s12835_s1 + $0xe0] ss:$2 sm:$0xff]  ;;  %v9103_v57 = vld [vmem:[%s12835_s1 + $0xf0] ss:$2 sm:$0xff] }
   0xa   :  { %v237_v33 = vrot.slane %v8817_v14, %v8812_v13  ;;  %v241_v34 = vrot.slane %v8830_v19, %v8793_v4  ;;  %v245_v35 = vrot.slane %v8830_v19, %v8795_v5  ;;  %v249_v36 = vrot.slane %v8830_v19, %v8797_v6  ;;  %v9124_v58 = vld [vmem:[%s12835_s1 + $0x100] ss:$2 sm:$0xff]  ;;  %v9161_v54 = vld [vmem:[%s12835_s1 + $0x110] ss:$2 sm:$0xff] }
   0xb   :  { %v253_v38 = vrot.slane %v8830_v19, %v8804_v9  ;;  %v257_v39 = vrot.slane %v8830_v19, %v8806_v10  ;;  %v261_v40 = vrot.slane %v8830_v19, %v8808_v11  ;;  %v265_v41 = vrot.slane %v8830_v19, %v8810_v12  ;;  %v9188_v53 = vld [vmem:[%s12835_s1 + $0x120] ss:$2 sm:$0xff] }
   0xc   :  { %v269_v42 = vrot.slane %v8830_v19, %v8812_v13  ;;  %v273_v43 = vrot.slane %v8851_v28, %v8793_v4  ;;  %v277_v44 = vrot.slane %v8851_v28, %v8795_v5  ;;  %v281_v45 = vrot.slane %v8851_v28, %v8797_v6 }
   0xd   :  { %v285_v47 = vrot.slane %v8851_v28, %v8804_v9  ;;  %v1198_v61 = vcombine.low %v177_v15, %v181_v16  ;;  %v1199_v56 = vcombine.low %v185_v17, %v189_v20  ;;  %v1215_v15 = vcombine.low %v193_v21, %v197_v22  ;;  %v9217_v21 = vld [vmem:[%s12835_s1 + $0x130] ss:$2 sm:$0xff]  ;;  %v16_v22 = vld [vmem:[%s12834_s0 + $0x8] sm:$0xff] }
   0xe   :  { %v1216_v17 = vcombine.low %v201_v23, %v205_v24 }
   0xf   :  { %v1206_v52 = vrot.slane %v1198_v61, %v8825_v18  ;;  %v1213_v50 = vrot.slane %v1199_v56, %v8825_v18  ;;  %v15_v61 = vld [vmem:[%s12834_s0] sm:$0xff]  ;;  %v1223_v23 = vrot.slane %v1215_v15, %v8825_v18 }
  0x10   :  { %v1230_v16 = vrot.slane %v1216_v17, %v8825_v18 }
  0x11   :  { %v1214_v24 = vcombine.low %v1206_v52, %v1213_v50  ;;  %v9239_v50 = vld [vmem:[%s12835_s1 + $0x140] ss:$2 sm:$0xff]  ;;  %v9272_v52 = vld [vmem:[%s12835_s1 + $0x150] ss:$2 sm:$0xff] }
  0x12   :  { %v1231_v15 = vcombine.low %v1223_v23, %v1230_v16  ;;  %v9307_v23 = vld [vmem:[%s12835_s1 + $0x160] ss:$2 sm:$0xff] }
  0x13   :  { %v2350_v3 = vmul.f32 %v1214_v24, %v15_v61  ;;  %v1232_v61 = vcombine.low %v209_v25, %v213_v26  ;;  %v1233_v24 = vcombine.low %v217_v27, %v221_v29  ;;  %v17_v27 = vld [vmem:[%s12834_s0 + $0x10] sm:$0xff] }
  0x14   :  { %v2351_v17 = vmul.f32 %v1231_v15, %v16_v22 }
  0x15   :  { %v2478_v20 = vcombine.high %v2350_v3, %v2350_v3  ;;  %v2485_v16 = vrot.slane %v2350_v3, %v8825_v18  ;;  %v1240_v56 = vrot.slane %v1232_v61, %v8825_v18  ;;  %v1247_v3 = vrot.slane %v1233_v24, %v8825_v18  ;;  %v9337_v24 = vld [vmem:[%s12835_s1 + $0x170] ss:$2 sm:$0xff] }
  0x16   :  { %v1249_v61 = vcombine.low %v225_v30, %v229_v31  ;;  %v2495_v26 = vcombine.high %v2351_v17, %v2351_v17  ;;  %v2502_v25 = vrot.slane %v2351_v17, %v8825_v18 }
  0x17   :  { %v2492_v8 = vrot.slane %v2478_v20, %v8825_v18  ;;  %v2493_v15 = vcombine.high %v2485_v16, %v2485_v16  ;;  %v1250_v20 = vcombine.low %v233_v32, %v237_v33  ;;  %v1248_v22 = vcombine.low %v1240_v56, %v1247_v3 }
  0x18   :  { %v3823_v33 = vsel %vm3822_vm0, %v2485_v16, 0.0  ;;  %v1257_v17 = vrot.slane %v1249_v61, %v8825_v18  ;;  %v2509_v31 = vrot.slane %v2495_v26, %v8825_v18  ;;  %v2510_v49 = vcombine.high %v2502_v25, %v2502_v25 }
  0x19   :  { %v2494_v51 = vcombine.high %v2492_v8, %v2492_v8  ;;  %v3824_v56 = vsel %vm3822_vm0, %v2493_v15, 0.0  ;;  %v1264_v3 = vrot.slane %v1250_v20, %v8825_v18  ;;  %v3826_v30 = vsel %vm3822_vm0, %v2492_v8, 0.0  ;;  %v9385_v8 = vld [vmem:[%s12835_s1 + $0x180] ss:$2 sm:$0xff] }
  0x1a   :  { %v3825_v29 = vadd.f32 %v3824_v56, %v3823_v33  ;;  %v2352_v48 = vmul.f32 %v1248_v22, %v17_v27  ;;  %v3830_v22 = vsel %vm3822_vm0, %v2502_v25, 0.0  ;;  %v2511_v56 = vcombine.high %v2509_v31, %v2509_v31 }
  0x1b   :  { %v3828_v14 = vsel %vm3822_vm0, %v2494_v51, 0.0  ;;  %v1265_v20 = vcombine.low %v1257_v17, %v1264_v3  ;;  %v3832_v17 = vsel %vm3822_vm0, %v2510_v49, 0.0  ;;  %v18_v3 = vld [vmem:[%s12834_s0 + $0x18] sm:$0xff] }
  0x1c   :  { %v3827_v15 = vadd.f32 %v3826_v30, %v3825_v29  ;;  %v1266_v29 = vcombine.low %v241_v34, %v245_v35  ;;  %v1267_v30 = vcombine.low %v249_v36, %v253_v38  ;;  %v2512_v51 = vcombine.high %v2352_v48, %v2352_v48 }
  0x1d   :  { %v2519_v25 = vrot.slane %v2352_v48, %v8825_v18  ;;  %v9420_v48 = vld [vmem:[%s12835_s1 + $0x190] ss:$2 sm:$0xff]  ;;  %v3834_v34 = vsel %vm3822_vm0, %v2509_v31, 0.0  ;;  %v2353_v27 = vmul.f32 %v1265_v20, %v18_v3  ;;  %v3836_v26 = vsel %vm3822_vm0, %v2511_v56, 0.0  ;;  %v9451_v56 = vld [vmem:[%s12835_s1 + $0x1a0] ss:$2 sm:$0xff] }
  0x1e   :  { %v3829_v33 = vadd.f32 %v3828_v14, %v3827_v15  ;;  %v2526_v61 = vrot.slane %v2512_v51, %v8825_v18  ;;  %v1283_v3 = vcombine.low %v257_v39, %v261_v40 }
  0x1f   :  { %v2527_v49 = vcombine.high %v2519_v25, %v2519_v25  ;;  %v2536_v51 = vrot.slane %v2353_v27, %v8825_v18 }
  0x20   :  { %v3831_v38 = vadd.f32 %v3830_v22, %v3829_v33  ;;  %v1274_v22 = vrot.slane %v1266_v29, %v8825_v18  ;;  %v1281_v33 = vrot.slane %v1267_v30, %v8825_v18  ;;  %v3838_v30 = vsel %vm3822_vm0, %v2519_v25, 0.0 }
  0x21   :  { %v1284_v25 = vcombine.low %v265_v41, %v269_v42  ;;  %v2544_v39 = vcombine.high %v2536_v51, %v2536_v51 }
  0x22   :  { %v3833_v35 = vadd.f32 %v3832_v17, %v3831_v38  ;;  %v1282_v17 = vcombine.low %v1274_v22, %v1281_v33  ;;  %v2529_v38 = vcombine.high %v2353_v27, %v2353_v27  ;;  %v3840_v22 = vsel %vm3822_vm0, %v2527_v49, 0.0  ;;  %v19_v33 = vld [vmem:[%s12834_s0 + $0x20] sm:$0xff] }
  0x23   :  { %v3842_v49 = vsel %vm3822_vm0, %v2526_v61, 0.0 }
  0x24   :  { %v3835_v15 = vadd.f32 %v3834_v34, %v3833_v35  ;;  %v2528_v35 = vcombine.high %v2526_v61, %v2526_v61  ;;  %v2354_v19 = vmul.f32 %v1282_v17, %v19_v33  ;;  %v1301_v33 = vcombine.low %v281_v45, %v285_v47 }
  0x26   :  { %v3837_v34 = vadd.f32 %v3836_v26, %v3835_v15  ;;  %v9486_v15 = vld [vmem:[%s12835_s1 + $0x1b0] ss:$2 sm:$0xff]  ;;  %v2543_v26 = vrot.slane %v2529_v38, %v8825_v18  ;;  %v3844_v27 = vsel %vm3822_vm0, %v2528_v35, 0.0  ;;  %v3846_v35 = vsel %vm3822_vm0, %v2536_v51, 0.0  ;;  %v9522_v51 = vld [vmem:[%s12835_s1 + $0x1c0] ss:$2 sm:$0xff] }
  0x28   :  { %v3839_v41 = vadd.f32 %v3838_v30, %v3837_v34  ;;  %v1291_v30 = vrot.slane %v1283_v3, %v8825_v18  ;;  %v1298_v34 = vrot.slane %v1284_v25, %v8825_v18  ;;  %v3850_v17 = vsel %vm3822_vm0, %v2543_v26, 0.0 }
  0x29   :  { %v1315_v25 = vrot.slane %v1301_v33, %v8825_v18 }
  0x2a   :  { %v3841_v42 = vadd.f32 %v3840_v22, %v3839_v41  ;;  %v1299_v38 = vcombine.low %v1291_v30, %v1298_v34  ;;  %v1300_v22 = vcombine.low %v273_v43, %v277_v44  ;;  %v2553_v30 = vrot.slane %v2354_v19, %v8825_v18  ;;  %v20_v43 = vld [vmem:[%s12834_s0 + $0x28] sm:$0xff] }
  0x2b   :  { %v3848_v34 = vsel %vm3822_vm0, %v2544_v39, 0.0 }
  0x2c   :  { %v3843_v20 = vadd.f32 %v3842_v49, %v3841_v42  ;;  %v2545_v42 = vcombine.high %v2543_v26, %v2543_v26  ;;  %v2546_v49 = vcombine.high %v2354_v19, %v2354_v19  ;;  %v1308_v45 = vrot.slane %v1300_v22, %v8825_v18  ;;  %v9557_v22 = vld [vmem:[%s12835_s1 + $0x1d0] ss:$2 sm:$0xff] }
  0x2d   :  { %12844 = vst [vmem:[#allocation5_spill] sm:$0xff] %v9557_v22 }
  0x2e   :  { %v3845_v41 = vadd.f32 %v3844_v27, %v3843_v20  ;;  %v2561_v27 = vcombine.high %v2553_v30, %v2553_v30  ;;  %v3852_v40 = vsel %vm3822_vm0, %v2545_v42, 0.0 }
  0x30   :  { %v3847_v20 = vadd.f32 %v3846_v35, %v3845_v41  ;;  %v2355_v35 = vmul.f32 %v1299_v38, %v20_v43  ;;  %v2560_v41 = vrot.slane %v2546_v49, %v8825_v18  ;;  %v3854_v49 = vsel %vm3822_vm0, %v2553_v30, 0.0 }
  0x31   :  { %v12846_v43 = vrot.slane %v8851_v28, %v8806_v10  ;;  %v12848_v38 = vrot.slane %v8851_v28, %v8810_v12 }
  0x32   :  { %v3849_v47 = vadd.f32 %v3848_v34, %v3847_v20  ;;  %v1316_v34 = vcombine.low %v1308_v45, %v1315_v25  ;;  %v12847_v20 = vrot.slane %v8851_v28, %v8812_v13  ;;  %v2562_v44 = vcombine.high %v2560_v41, %v2560_v41  ;;  %v21_v45 = vld [vmem:[%s12834_s0 + $0x30] sm:$0xff] }
  0x33   :  { %v2563_v42 = vcombine.high %v2355_v35, %v2355_v35  ;;  %v2570_v30 = vrot.slane %v2355_v35, %v8825_v18  ;;  %v3856_v25 = vsel %vm3822_vm0, %v2561_v27, 0.0 }
  0x34   :  { %v3851_v19 = vadd.f32 %v3850_v17, %v3849_v47  ;;  %v12845_v17 = vrot.slane %v8851_v28, %v8808_v11  ;;  %v1318_v33 = vcombine.low %v12848_v38, %v12847_v20  ;;  %v3858_v20 = vsel %vm3822_vm0, %v2560_v41, 0.0 }
  0x35   :  { %v2577_v39 = vrot.slane %v2563_v42, %v8825_v18  ;;  %v2578_v27 = vcombine.high %v2570_v30, %v2570_v30  ;;  %v3860_v3 = vsel %vm3822_vm0, %v2562_v44, 0.0  ;;  %v3862_v44 = vsel %vm3822_vm0, %v2570_v30, 0.0 }
  0x36   :  { %v1317_v47 = vcombine.low %v12846_v43, %v12845_v17  ;;  %v3853_v26 = vadd.f32 %v3852_v40, %v3851_v19  ;;  %v9592_v19 = vld [vmem:[%s12835_s1 + $0x1e0] ss:$2 sm:$0xff]  ;;  %v2356_v17 = vmul.f32 %v1316_v34, %v21_v45  ;;  %v12851_v45 = vrot.slane %v8872_v37, %v8795_v5 }
  0x37   :  { %12849 = vst [vmem:[#allocation6_spill] sm:$0xff] %v9592_v19  ;;  %v12854_v34 = vrot.slane %v8872_v37, %v8797_v6  ;;  %v2579_v38 = vcombine.high %v2577_v39, %v2577_v39 }
  0x38   :  { %v3855_v40 = vadd.f32 %v3854_v49, %v3853_v26  ;;  %v1325_v26 = vrot.slane %v1317_v47, %v8825_v18  ;;  %v1332_v49 = vrot.slane %v1318_v33, %v8825_v18  ;;  %v9623_v47 = vld [vmem:[%s12835_s1 + $0x1f0] ss:$2 sm:$0xff]  ;;  %v2580_v33 = vcombine.high %v2356_v17, %v2356_v17 }
  0x39   :  { %12850 = vst [vmem:[#allocation7_spill] sm:$0xff] %v9623_v47  ;;  %v2587_v35 = vrot.slane %v2356_v17, %v8825_v18  ;;  %v3868_v61 = vsel %vm3822_vm0, %v2579_v38, 0.0 }
  0x3a   :  { %v3857_v28 = vadd.f32 %v3856_v25, %v3855_v40  ;;  %v1333_v25 = vcombine.low %v1325_v26, %v1332_v49  ;;  %v3864_v26 = vsel %vm3822_vm0, %v2578_v27, 0.0  ;;  %v22_v49 = vld [vmem:[%s12834_s0 + $0x38] sm:$0xff] }
  0x3c   :  { %v3859_v43 = vadd.f32 %v3858_v20, %v3857_v28  ;;  %v12852_v28 = vrot.slane %v8872_v37, %v8793_v4  ;;  %v12853_v20 = vrot.slane %v8872_v37, %v8804_v9 }
  0x3e   :  { %v1334_v40 = vcombine.low %v12852_v28, %v12851_v45  ;;  %v1335_v30 = vcombine.low %v12854_v34, %v12853_v20  ;;  %v3861_v42 = vadd.f32 %v3860_v3, %v3859_v43  ;;  %v3866_v20 = vsel %vm3822_vm0, %v2577_v39, 0.0 }
  0x3f   :  { %v2595_v43 = vcombine.high %v2587_v35, %v2587_v35  ;;  %v12855_v39 = vrot.slane %v8872_v37, %v8808_v11  ;;  %v12856_v45 = vrot.slane %v8872_v37, %v8806_v10 }
  0x40   :  { %v3863_v3 = vadd.f32 %v3862_v44, %v3861_v42  ;;  %v1342_v28 = vrot.slane %v1334_v40, %v8825_v18  ;;  %v1349_v41 = vrot.slane %v1335_v30, %v8825_v18  ;;  %v2357_v42 = vmul.f32 %v1333_v25, %v22_v49 }
  0x41   :  { %v2594_v44 = vrot.slane %v2580_v33, %v8825_v18  ;;  %v1351_v27 = vcombine.low %v12856_v45, %v12855_v39  ;;  %v12857_v40 = vrot.slane %v8872_v37, %v8812_v13  ;;  %v12858_v25 = vrot.slane %v8872_v37, %v8810_v12 }
  0x42   :  { %v3865_v34 = vadd.f32 %v3864_v26, %v3863_v3  ;;  %v12859_v26 = vrot.slane %v8893_v46, %v8795_v5  ;;  %v12860_v49 = vrot.slane %v8893_v46, %v8793_v4  ;;  %v12861_v45 = vrot.slane %v8893_v46, %v8804_v9 }
  0x43   :  { %v1352_v33 = vcombine.low %v12858_v25, %v12857_v40  ;;  %v12862_v39 = vrot.slane %v8893_v46, %v8797_v6  ;;  %v3870_v37 = vsel %vm3822_vm0, %v2587_v35, 0.0  ;;  %v12864_v40 = vrot.slane %v8893_v46, %v8806_v10 }
  0x44   :  { %v3867_v30 = vadd.f32 %v3866_v20, %v3865_v34  ;;  %v1368_v3 = vcombine.low %v12860_v49, %v12859_v26  ;;  %v1350_v34 = vcombine.low %v1342_v28, %v1349_v41  ;;  %v12863_v20 = vrot.slane %v8893_v46, %v8808_v11  ;;  %v23_v28 = vld [vmem:[%s12834_s0 + $0x40] sm:$0xff] }
  0x45   :  { %v1369_v17 = vcombine.low %v12862_v39, %v12861_v45  ;;  %v12865_v26 = vrot.slane %v8893_v46, %v8812_v13  ;;  %v12866_v49 = vrot.slane %v8893_v46, %v8810_v12  ;;  %v2596_v31 = vcombine.high %v2594_v44, %v2594_v44 }
  0x46   :  { %v1385_v25 = vcombine.low %v12864_v40, %v12863_v20  ;;  %v3869_v29 = vadd.f32 %v3868_v61, %v3867_v30  ;;  %v2597_v45 = vcombine.high %v2357_v42, %v2357_v42  ;;  %v2604_v35 = vrot.slane %v2357_v42, %v8825_v18 }
  0x47   :  { %v1386_v38 = vcombine.low %v12866_v49, %v12865_v26  ;;  %v3872_v41 = vsel %vm3822_vm0, %v2595_v43, 0.0  ;;  %v1359_v20 = vrot.slane %v1351_v27, %v8825_v18  ;;  %v1366_v40 = vrot.slane %v1352_v33, %v8825_v18 }
  0x48   :  { %v3871_v46 = vadd.f32 %v3870_v37, %v3869_v29  ;;  %v1376_v61 = vrot.slane %v1368_v3, %v8825_v18  ;;  %v1383_v30 = vrot.slane %v1369_v17, %v8825_v18  ;;  %v12867_v42 = vrot.slane %v8914_v55, %v8795_v5 }
  0x49   :  { %v12868_v43 = vrot.slane %v8914_v55, %v8793_v4  ;;  %v3874_v49 = vsel %vm3822_vm0, %v2594_v44, 0.0  ;;  %v1393_v39 = vrot.slane %v1385_v25, %v8825_v18  ;;  %v1400_v27 = vrot.slane %v1386_v38, %v8825_v18 }
  0x4a   :  { %v12869_v29 = vrot.slane %v8914_v55, %v8804_v9  ;;  %v12870_v33 = vrot.slane %v8914_v55, %v8797_v6  ;;  %v3873_v3 = vadd.f32 %v3872_v41, %v3871_v46  ;;  %v2358_v37 = vmul.f32 %v1350_v34, %v23_v28 }
  0x4b   :  { %v1402_v26 = vcombine.low %v12868_v43, %v12867_v42  ;;  %v2611_v36 = vrot.slane %v2597_v45, %v8825_v18  ;;  %v2612_v14 = vcombine.high %v2604_v35, %v2604_v35  ;;  %v3876_v42 = vsel %vm3822_vm0, %v2596_v31, 0.0 }
  0x4c   :  { %v1403_v17 = vcombine.low %v12870_v33, %v12869_v29  ;;  %v12871_v25 = vrot.slane %v8914_v55, %v8808_v11  ;;  %v12872_v43 = vrot.slane %v8914_v55, %v8806_v10  ;;  %v3875_v41 = vadd.f32 %v3874_v49, %v3873_v3 }
  0x4d   :  { %v1367_v34 = vcombine.low %v1359_v20, %v1366_v40  ;;  %v1384_v28 = vcombine.low %v1376_v61, %v1383_v30  ;;  %v12873_v45 = vrot.slane %v8914_v55, %v8812_v13  ;;  %v12874_v31 = vrot.slane %v8914_v55, %v8810_v12  ;;  %v24_v55 = vld [vmem:[%s12834_s0 + $0x48] sm:$0xff] }
  0x4e   :  { %v1419_v29 = vcombine.low %v12872_v43, %v12871_v25  ;;  %v3878_v33 = vsel %vm3822_vm0, %v2604_v35, 0.0  ;;  %v9747_v44 = vcombine.low %v1393_v39, %v1400_v27  ;;  %v1410_v38 = vrot.slane %v1402_v26, %v8825_v18 }
  0x4f   :  { %v1420_v46 = vcombine.low %v12874_v31, %v12873_v45  ;;  %v1417_v32 = vrot.slane %v1403_v17, %v8825_v18  ;;  %v3877_v16 = vadd.f32 %v3876_v42, %v3875_v41  ;;  %v2613_v25 = vcombine.high %v2611_v36, %v2611_v36 }
  0x50   :  { %v2614_v49 = vcombine.high %v2358_v37, %v2358_v37  ;;  %v2621_v20 = vrot.slane %v2358_v37, %v8825_v18  ;;  %v3880_v40 = vsel %vm3822_vm0, %v2612_v14, 0.0  ;;  %v1427_v61 = vrot.slane %v1419_v29, %v8825_v18 }
  0x51   :  { %v12875_v35 = vrot.slane %v8935_v0, %v8795_v5  ;;  %v12876_v39 = vrot.slane %v8935_v0, %v8793_v4  ;;  %v12877_v26 = vrot.slane %v8935_v0, %v8804_v9  ;;  %v12878_v27 = vrot.slane %v8935_v0, %v8797_v6 }
  0x52   :  { %v3879_v17 = vadd.f32 %v3878_v33, %v3877_v16  ;;  %v1434_v3 = vrot.slane %v1420_v46, %v8825_v18  ;;  %v12879_v37 = vrot.slane %v8935_v0, %v8808_v11  ;;  %v12880_v42 = vrot.slane %v8935_v0, %v8806_v10 }
  0x53   :  { %v1436_v30 = vcombine.low %v12876_v39, %v12875_v35  ;;  %v1437_v14 = vcombine.low %v12878_v27, %v12877_v26  ;;  %v12881_v29 = vrot.slane %v8935_v0, %v8812_v13  ;;  %v12882_v41 = vrot.slane %v8935_v0, %v8810_v12 }
  0x54   :  { %v1453_v43 = vcombine.low %v12880_v42, %v12879_v37  ;;  %v3882_v31 = vsel %vm3822_vm0, %v2611_v36, 0.0  ;;  %v9783_v35 = vcombine.low %v1410_v38, %v1417_v32  ;;  %v12883_v16 = vrot.slane %v8956_v2, %v8795_v5 }
  0x55   :  { %v1454_v45 = vcombine.low %v12882_v41, %v12881_v29  ;;  %v12884_v46 = vrot.slane %v8956_v2, %v8793_v4  ;;  %v12885_v39 = vrot.slane %v8956_v2, %v8804_v9  ;;  %v12886_v26 = vrot.slane %v8956_v2, %v8797_v6 }
  0x56   :  { %v3881_v0 = vadd.f32 %v3880_v40, %v3879_v17  ;;  %v2359_v37 = vmul.f32 %v1367_v34, %v24_v55  ;;  %v2628_v36 = vrot.slane %v2614_v49, %v8825_v18  ;;  %v2629_v32 = vcombine.high %v2621_v20, %v2621_v20 }
  0x57   :  { %v1470_v33 = vcombine.low %v12884_v46, %v12883_v16  ;;  %v1471_v27 = vcombine.low %v12886_v26, %v12885_v39  ;;  %v3884_v38 = vsel %vm3822_vm0, %v2613_v25, 0.0  ;;  %v1444_v42 = vrot.slane %v1436_v30, %v8825_v18 }
  0x58   :  { %v1451_v29 = vrot.slane %v1437_v14, %v8825_v18  ;;  %v12887_v41 = vrot.slane %v8956_v2, %v8808_v11  ;;  %v12888_v16 = vrot.slane %v8956_v2, %v8806_v10  ;;  %v3883_v47 = vadd.f32 %v3882_v31, %v3881_v0 }
  0x59   :  { %v9807_v39 = vcombine.low %v1427_v61, %v1434_v3  ;;  %v1461_v34 = vrot.slane %v1453_v43, %v8825_v18  ;;  %v12889_v49 = vrot.slane %v8956_v2, %v8812_v13  ;;  %v12890_v25 = vrot.slane %v8956_v2, %v8810_v12  ;;  %v25_v2 = vld [vmem:[%s12834_s0 + $0x50] sm:$0xff] }
  0x5a   :  { %v1487_v46 = vcombine.low %v12888_v16, %v12887_v41  ;;  %v3886_v55 = vsel %vm3822_vm0, %v2621_v20, 0.0  ;;  %v1468_v30 = vrot.slane %v1454_v45, %v8825_v18  ;;  %v1478_v14 = vrot.slane %v1470_v33, %v8825_v18 }
  0x5b   :  { %v1488_v40 = vcombine.low %v12890_v25, %v12889_v49  ;;  %v1485_v17 = vrot.slane %v1471_v27, %v8825_v18  ;;  %v3885_v31 = vadd.f32 %v3884_v38, %v3883_v47  ;;  %v2630_v61 = vcombine.high %v2628_v36, %v2628_v36 }
  0x5c   :  { %v2631_v3 = vcombine.high %v2359_v37, %v2359_v37  ;;  %v2638_v43 = vrot.slane %v2359_v37, %v8825_v18  ;;  %v3888_v26 = vsel %vm3822_vm0, %v2629_v32, 0.0  ;;  %v1495_v0 = vrot.slane %v1487_v46, %v8825_v18 }
  0x5d   :  { %v12891_v20 = vrot.slane %v8977_v63, %v8795_v5  ;;  %v12892_v45 = vrot.slane %v8977_v63, %v8793_v4  ;;  %v12893_v47 = vrot.slane %v8977_v63, %v8804_v9  ;;  %v12894_v27 = vrot.slane %v8977_v63, %v8797_v6 }
  0x5e   :  { %v3887_v32 = vadd.f32 %v3886_v55, %v3885_v31  ;;  %v1502_v38 = vrot.slane %v1488_v40, %v8825_v18  ;;  %v12895_v41 = vrot.slane %v8977_v63, %v8808_v11  ;;  %v12896_v16 = vrot.slane %v8977_v63, %v8806_v10 }
  0x5f   :  { %v1504_v33 = vcombine.low %v12892_v45, %v12891_v20  ;;  %v1505_v37 = vcombine.low %v12894_v27, %v12893_v47  ;;  %v12897_v49 = vrot.slane %v8977_v63, %v8812_v13  ;;  %v12898_v25 = vrot.slane %v8977_v63, %v8810_v12 }
  0x60   :  { %v1521_v46 = vcombine.low %v12896_v16, %v12895_v41  ;;  %v3890_v45 = vsel %vm3822_vm0, %v2628_v36, 0.0  ;;  %v9852_v47 = vcombine.low %v1444_v42, %v1451_v29  ;;  %v9854_v55 = vcombine.low %v1461_v34, %v1468_v30 }
  0x61   :  { %v1522_v20 = vcombine.low %v12898_v25, %v12897_v49  ;;  %v9856_v40 = vcombine.low %v1478_v14, %v1485_v17  ;;  %v3889_v31 = vadd.f32 %v3888_v26, %v3887_v32  ;;  %v2360_v27 = vmul.f32 %v1384_v28, %v25_v2 }
  0x62   :  { %v2645_v19 = vrot.slane %v2631_v3, %v8825_v18  ;;  %v2646_v41 = vcombine.high %v2638_v43, %v2638_v43  ;;  %v3892_v16 = vsel %vm3822_vm0, %v2630_v61, 0.0  ;;  %v1512_v22 = vrot.slane %v1504_v33, %v8825_v18 }
  0x63   :  { %v1519_v63 = vrot.slane %v1505_v37, %v8825_v18  ;;  %v12899_v36 = vrot.slane %v8998_v1, %v8795_v5  ;;  %v12900_v42 = vrot.slane %v8998_v1, %v8793_v4  ;;  %v3891_v34 = vadd.f32 %v3890_v45, %v3889_v31  ;;  %v26_v45 = vld [vmem:[%s12834_s0 + $0x58] sm:$0xff] }
  0x64   :  { %v9868_v30 = vcombine.low %v1495_v0, %v1502_v38  ;;  %v1529_v28 = vrot.slane %v1521_v46, %v8825_v18  ;;  %v1536_v14 = vrot.slane %v1522_v20, %v8825_v18  ;;  %v3894_v17 = vsel %vm3822_vm0, %v2638_v43, 0.0 }
  0x65   :  { %v1538_v29 = vcombine.low %v12900_v42, %v12899_v36  ;;  %v12901_v61 = vrot.slane %v8998_v1, %v8804_v9  ;;  %v12902_v3 = vrot.slane %v8998_v1, %v8797_v6  ;;  %v12903_v2 = vrot.slane %v8998_v1, %v8808_v11 }
  0x66   :  { %v12904_v0 = vrot.slane %v8998_v1, %v8806_v10  ;;  %v12905_v37 = vrot.slane %v8998_v1, %v8812_v13  ;;  %v12906_v43 = vrot.slane %v8998_v1, %v8810_v12  ;;  %v3893_v38 = vadd.f32 %v3892_v16, %v3891_v34 }
  0x67   :  { %v1539_v26 = vcombine.low %v12902_v3, %v12901_v61  ;;  %v2647_v46 = vcombine.high %v2645_v19, %v2645_v19  ;;  %v2648_v49 = vcombine.high %v2360_v27, %v2360_v27  ;;  %v2655_v25 = vrot.slane %v2360_v27, %v8825_v18 }
  0x68   :  { %v1555_v33 = vcombine.low %v12904_v0, %v12903_v2  ;;  %v1556_v32 = vcombine.low %v12906_v43, %v12905_v37  ;;  %v3896_v20 = vsel %vm3822_vm0, %v2646_v41, 0.0  ;;  %v9896_v31 = vcombine.low %v1512_v22, %v1519_v63 }
  0x69   :  { %v12907_v36 = vrot.slane %v9019_v7, %v8795_v5  ;;  %v12908_v1 = vrot.slane %v9019_v7, %v8793_v4  ;;  %v12909_v16 = vrot.slane %v9019_v7, %v8804_v9  ;;  %v12910_v27 = vrot.slane %v9019_v7, %v8797_v6 }
  0x6a   :  { %v3895_v34 = vadd.f32 %v3894_v17, %v3893_v38  ;;  %v1546_v61 = vrot.slane %v1538_v29, %v8825_v18  ;;  %v12911_v22 = vrot.slane %v9019_v7, %v8808_v11  ;;  %v12912_v63 = vrot.slane %v9019_v7, %v8806_v10 }
  0x6b   :  { %v1572_v42 = vcombine.low %v12908_v1, %v12907_v36  ;;  %v1573_v41 = vcombine.low %v12910_v27, %v12909_v16  ;;  %v12913_v2 = vrot.slane %v9019_v7, %v8812_v13  ;;  %v12914_v0 = vrot.slane %v9019_v7, %v8810_v12 }
  0x6c   :  { %v1589_v3 = vcombine.low %v12912_v63, %v12911_v22  ;;  %v3898_v43 = vsel %vm3822_vm0, %v2645_v19, 0.0  ;;  %v1553_v17 = vrot.slane %v1539_v26, %v8825_v18  ;;  %v1563_v29 = vrot.slane %v1555_v33, %v8825_v18 }
  0x6d   :  { %v1590_v37 = vcombine.low %v12914_v0, %v12913_v2  ;;  %v1570_v38 = vrot.slane %v1556_v32, %v8825_v18  ;;  %v3897_v36 = vadd.f32 %v3896_v20, %v3895_v34  ;;  %v2361_v1 = vmul.f32 %v9747_v44, %v26_v45 }
  0x6e   :  { %v2662_v16 = vrot.slane %v2648_v49, %v8825_v18  ;;  %v2663_v27 = vcombine.high %v2655_v25, %v2655_v25  ;;  %v3900_v22 = vsel %vm3822_vm0, %v2647_v46, 0.0  ;;  %v1580_v63 = vrot.slane %v1572_v42, %v8825_v18 }
  0x6f   :  { %v1587_v7 = vrot.slane %v1573_v41, %v8825_v18  ;;  %v12915_v19 = vrot.slane %v9040_v62, %v8795_v5  ;;  %v12916_v26 = vrot.slane %v9040_v62, %v8793_v4  ;;  %v3899_v32 = vadd.f32 %v3898_v43, %v3897_v36 }
  0x70   :  { %v1597_v20 = vrot.slane %v1589_v3, %v8825_v18  ;;  %v1604_v44 = vrot.slane %v1590_v37, %v8825_v18  ;;  %v12917_v49 = vrot.slane %v9040_v62, %v8804_v9  ;;  %v12918_v46 = vrot.slane %v9040_v62, %v8797_v6 }
  0x71   :  { %v1606_v33 = vcombine.low %v12916_v26, %v12915_v19  ;;  %v3902_v42 = vsel %vm3822_vm0, %v2655_v25, 0.0  ;;  %v9947_v41 = vcombine.low %v1529_v28, %v1536_v14  ;;  %v9949_v34 = vcombine.low %v1546_v61, %v1553_v17  ;;  %v27_v28 = vld [vmem:[%s12834_s0 + $0x60] sm:$0xff] }
  0x72   :  { %v1607_v45 = vcombine.low %v12918_v46, %v12917_v49  ;;  %v12919_v2 = vrot.slane %v9040_v62, %v8808_v11  ;;  %v12920_v3 = vrot.slane %v9040_v62, %v8806_v10  ;;  %v3901_v37 = vadd.f32 %v3900_v22, %v3899_v32 }
  0x73   :  { %v2664_v43 = vcombine.high %v2662_v16, %v2662_v16  ;;  %v2665_v36 = vcombine.high %v2361_v1, %v2361_v1  ;;  %v2672_v19 = vrot.slane %v2361_v1, %v8825_v18  ;;  %v3904_v26 = vsel %vm3822_vm0, %v2663_v27, 0.0 }
  0x74   :  { %v1623_v0 = vcombine.low %v12920_v3, %v12919_v2  ;;  %v9962_v14 = vcombine.low %v1563_v29, %v1570_v38  ;;  %v9964_v25 = vcombine.low %v1580_v63, %v1587_v7  ;;  %v12921_v61 = vrot.slane %v9040_v62, %v8812_v13 }
  0x75   :  { %v12922_v17 = vrot.slane %v9040_v62, %v8810_v12  ;;  %v3903_v32 = vadd.f32 %v3902_v42, %v3901_v37  ;;  %v9972_v49 = vcombine.low %v1597_v20, %v1604_v44  ;;  %v1614_v1 = vrot.slane %v1606_v33, %v8825_v18 }
  0x76   :  { %v1621_v27 = vrot.slane %v1607_v45, %v8825_v18  ;;  %v3906_v46 = vsel %vm3822_vm0, %v2662_v16, 0.0  ;;  %v1631_v29 = vrot.slane %v1623_v0, %v8825_v18  ;;  %v12923_v38 = vrot.slane %v9061_v59, %v8795_v5 }
  0x77   :  { %v1624_v22 = vcombine.low %v12922_v17, %v12921_v61  ;;  %v12924_v63 = vrot.slane %v9061_v59, %v8793_v4  ;;  %v12925_v62 = vrot.slane %v9061_v59, %v8804_v9  ;;  %v12926_v20 = vrot.slane %v9061_v59, %v8797_v6 }
  0x78   :  { %v3905_v44 = vadd.f32 %v3904_v26, %v3903_v32  ;;  %v2362_v45 = vmul.f32 %v9783_v35, %v27_v28  ;;  %v2679_v16 = vrot.slane %v2665_v36, %v8825_v18  ;;  %v2680_v42 = vcombine.high %v2672_v19, %v2672_v19 }
  0x79   :  { %v1640_v7 = vcombine.low %v12924_v63, %v12923_v38  ;;  %v1641_v33 = vcombine.low %v12926_v20, %v12925_v62  ;;  %v3908_v2 = vsel %vm3822_vm0, %v2664_v43, 0.0  ;;  %v1638_v3 = vrot.slane %v1624_v22, %v8825_v18 }
  0x7a   :  { %v12927_v0 = vrot.slane %v9061_v59, %v8808_v11  ;;  %v12928_v37 = vrot.slane %v9061_v59, %v8806_v10  ;;  %v12929_v17 = vrot.slane %v9061_v59, %v8812_v13  ;;  %v12930_v35 = vrot.slane %v9061_v59, %v8810_v12 }
  0x7b   :  { %v3907_v36 = vadd.f32 %v3906_v46, %v3905_v44  ;;  %v10006_v28 = vcombine.low %v1614_v1, %v1621_v27  ;;  %v12931_v43 = vrot.slane %v9082_v60, %v8795_v5  ;;  %v12932_v22 = vrot.slane %v9082_v60, %v8793_v4 }
  0x7c   :  { %v1657_v61 = vcombine.low %v12928_v37, %v12927_v0  ;;  %v1658_v26 = vcombine.low %v12930_v35, %v12929_v17  ;;  %v12933_v38 = vrot.slane %v9082_v60, %v8804_v9  ;;  %v12934_v63 = vrot.slane %v9082_v60, %v8797_v6 }
  0x7d   :  { %v1674_v32 = vcombine.low %v12932_v22, %v12931_v43  ;;  %v3910_v59 = vsel %vm3822_vm0, %v2672_v19, 0.0  ;;  %v1648_v46 = vrot.slane %v1640_v7, %v8825_v18  ;;  %v1655_v1 = vrot.slane %v1641_v33, %v8825_v18  ;;  %v28_v19 = vld [vmem:[%s12834_s0 + $0x68] sm:$0xff] }
  0x7e   :  { %v1675_v62 = vcombine.low %v12934_v63, %v12933_v38  ;;  %v12935_v27 = vrot.slane %v9082_v60, %v8808_v11  ;;  %v12936_v20 = vrot.slane %v9082_v60, %v8806_v10  ;;  %v3909_v0 = vadd.f32 %v3908_v2, %v3907_v36 }
  0x7f   :  { %v2681_v37 = vcombine.high %v2679_v16, %v2679_v16  ;;  %v2682_v17 = vcombine.high %v2362_v45, %v2362_v45  ;;  %v2689_v35 = vrot.slane %v2362_v45, %v8825_v18  ;;  %v3912_v43 = vsel %vm3822_vm0, %v2680_v42, 0.0 }
  0x80   :  { %v1691_v44 = vcombine.low %v12936_v20, %v12935_v27  ;;  %v10034_v7 = vcombine.low %v1631_v29, %v1638_v3  ;;  %v1665_v33 = vrot.slane %v1657_v61, %v8825_v18  ;;  %v12937_v22 = vrot.slane %v9082_v60, %v8812_v13 }
  0x81   :  { %v12938_v2 = vrot.slane %v9082_v60, %v8810_v12  ;;  %v3911_v38 = vadd.f32 %v3910_v59, %v3909_v0  ;;  %v1672_v45 = vrot.slane %v1658_v26, %v8825_v18  ;;  %v1682_v42 = vrot.slane %v1674_v32, %v8825_v18 }
  0x82   :  { %v1689_v63 = vrot.slane %v1675_v62, %v8825_v18  ;;  %v3914_v27 = vsel %vm3822_vm0, %v2679_v16, 0.0  ;;  %v1699_v29 = vrot.slane %v1691_v44, %v8825_v18  ;;  %v12939_v3 = vrot.slane %v9103_v57, %v8795_v5 }
  0x83   :  { %v1692_v36 = vcombine.low %v12938_v2, %v12937_v22  ;;  %v12940_v61 = vrot.slane %v9103_v57, %v8793_v4  ;;  %v12941_v60 = vrot.slane %v9103_v57, %v8804_v9  ;;  %v12942_v26 = vrot.slane %v9103_v57, %v8797_v6 }
  0x84   :  { %v3913_v59 = vadd.f32 %v3912_v43, %v3911_v38  ;;  %v2363_v62 = vmul.f32 %v9807_v39, %v28_v19  ;;  %v2696_v16 = vrot.slane %v2682_v17, %v8825_v18  ;;  %v2697_v44 = vcombine.high %v2689_v35, %v2689_v35 }
  0x85   :  { %v1708_v20 = vcombine.low %v12940_v61, %v12939_v3  ;;  %v1709_v32 = vcombine.low %v12942_v26, %v12941_v60  ;;  %v3916_v0 = vsel %vm3822_vm0, %v2681_v37, 0.0  ;;  %v1706_v22 = vrot.slane %v1692_v36, %v8825_v18 }
  0x86   :  { %v12943_v2 = vrot.slane %v9103_v57, %v8808_v11  ;;  %v12944_v3 = vrot.slane %v9103_v57, %v8806_v10  ;;  %v12945_v60 = vrot.slane %v9103_v57, %v8812_v13  ;;  %v12946_v39 = vrot.slane %v9103_v57, %v8810_v12 }
  0x87   :  { %v3915_v17 = vadd.f32 %v3914_v27, %v3913_v59  ;;  %v10076_v19 = vcombine.low %v1648_v46, %v1655_v1  ;;  %v10078_v37 = vcombine.low %v1665_v33, %v1672_v45  ;;  %v10080_v36 = vcombine.low %v1682_v42, %v1689_v63 }
  0x88   :  { %v1725_v61 = vcombine.low %v12944_v3, %v12943_v2  ;;  %v1726_v43 = vcombine.low %v12946_v39, %v12945_v60  ;;  %v3918_v38 = vsel %vm3822_vm0, %v2689_v35, 0.0  ;;  %v1716_v26 = vrot.slane %v1708_v20, %v8825_v18  ;;  %v29_v35 = vld [vmem:[%s12834_s0 + $0x70] sm:$0xff] }
  0x89   :  { %12947 = vst [vmem:[#allocation8_spill] sm:$0xff] %v10080_v36  ;;  %v1723_v2 = vrot.slane %v1709_v32, %v8825_v18  ;;  %v12948_v3 = vrot.slane %v9124_v58, %v8795_v5  ;;  %v12949_v57 = vrot.slane %v9124_v58, %v8793_v4  ;;  %v3917_v27 = vadd.f32 %v3916_v0, %v3915_v17 }
  0x8a   :  { %v2698_v46 = vcombine.high %v2696_v16, %v2696_v16  ;;  %v2699_v1 = vcombine.high %v2363_v62, %v2363_v62  ;;  %v2706_v33 = vrot.slane %v2363_v62, %v8825_v18  ;;  %v3920_v45 = vsel %vm3822_vm0, %v2697_v44, 0.0 }
  0x8b   :  { %v1742_v60 = vcombine.low %v12949_v57, %v12948_v3  ;;  %v10096_v42 = vcombine.low %v1699_v29, %v1706_v22  ;;  %v1733_v63 = vrot.slane %v1725_v61, %v8825_v18  ;;  %v1740_v20 = vrot.slane %v1726_v43, %v8825_v18 }
  0x8c   :  { %v3919_v32 = vadd.f32 %v3918_v38, %v3917_v27  ;;  %v12951_v59 = vrot.slane %v9124_v58, %v8804_v9  ;;  %v12952_v0 = vrot.slane %v9124_v58, %v8797_v6  ;;  %v12953_v44 = vrot.slane %v9124_v58, %v8808_v11 }
  0x8d   :  { %12950 = vst [vmem:[#allocation9_spill] sm:$0xff] %v10096_v42  ;;  %v12954_v39 = vrot.slane %v9124_v58, %v8806_v10  ;;  %v12955_v22 = vrot.slane %v9124_v58, %v8812_v13  ;;  %v12956_v61 = vrot.slane %v9124_v58, %v8810_v12  ;;  %v3922_v17 = vsel %vm3822_vm0, %v2696_v16, 0.0 }
  0x8e   :  { %v1743_v62 = vcombine.low %v12952_v0, %v12951_v59  ;;  %v10119_v38 = vcombine.low %v1716_v26, %v1723_v2  ;;  %v12958_v3 = vrot.slane %v9161_v54, %v8795_v5  ;;  %v12959_v57 = vrot.slane %v9161_v54, %v8793_v4 }
  0x8f   :  { %v1759_v29 = vcombine.low %v12954_v39, %v12953_v44  ;;  %v1760_v43 = vcombine.low %v12956_v61, %v12955_v22  ;;  %v12960_v59 = vrot.slane %v9161_v54, %v8804_v9  ;;  %v12961_v0 = vrot.slane %v9161_v54, %v8797_v6 }
  0x90   :  { %12957 = vst [vmem:[#allocation10_spill] sm:$0xff] %v10119_v38  ;;  %v1776_v27 = vcombine.low %v12959_v57, %v12958_v3  ;;  %v3921_v58 = vadd.f32 %v3920_v45, %v3919_v32  ;;  %v2364_v39 = vmul.f32 %v9852_v47, %v29_v35  ;;  %v2713_v16 = vrot.slane %v2699_v1, %v8825_v18 }
  0x91   :  { %v1777_v44 = vcombine.low %v12961_v0, %v12960_v59  ;;  %v2714_v26 = vcombine.high %v2706_v33, %v2706_v33  ;;  %v3924_v2 = vsel %vm3822_vm0, %v2698_v46, 0.0  ;;  %v1750_v22 = vrot.slane %v1742_v60, %v8825_v18 }
  0x92   :  { %v12962_v61 = vrot.slane %v9161_v54, %v8808_v11  ;;  %v12963_v3 = vrot.slane %v9161_v54, %v8806_v10  ;;  %v12964_v59 = vrot.slane %v9161_v54, %v8812_v13  ;;  %v12965_v47 = vrot.slane %v9161_v54, %v8810_v12 }
  0x93   :  { %v3923_v1 = vadd.f32 %v3922_v17, %v3921_v58  ;;  %v1757_v35 = vrot.slane %v1743_v62, %v8825_v18  ;;  %v1767_v46 = vrot.slane %v1759_v29, %v8825_v18  ;;  %v1774_v60 = vrot.slane %v1760_v43, %v8825_v18 }
  0x94   :  { %v1793_v57 = vcombine.low %v12963_v3, %v12962_v61  ;;  %v1794_v45 = vcombine.low %v12965_v47, %v12964_v59  ;;  %v3926_v32 = vsel %vm3822_vm0, %v2706_v33, 0.0  ;;  %v1784_v0 = vrot.slane %v1776_v27, %v8825_v18  ;;  %v30_v33 = vld [vmem:[%s12834_s0 + $0x78] sm:$0xff] }
  0x95   :  { %v1791_v61 = vrot.slane %v1777_v44, %v8825_v18  ;;  %v12966_v3 = vrot.slane %v9188_v53, %v8795_v5  ;;  %v12967_v54 = vrot.slane %v9188_v53, %v8793_v4  ;;  %v3925_v17 = vadd.f32 %v3924_v2, %v3923_v1 }
  0x96   :  { %v2715_v58 = vcombine.high %v2713_v16, %v2713_v16  ;;  %v2716_v62 = vcombine.high %v2364_v39, %v2364_v39  ;;  %v2723_v29 = vrot.slane %v2364_v39, %v8825_v18  ;;  %v3928_v43 = vsel %vm3822_vm0, %v2714_v26, 0.0 }
  0x97   :  { %v1810_v59 = vcombine.low %v12967_v54, %v12966_v3  ;;  %v1801_v27 = vrot.slane %v1793_v57, %v8825_v18  ;;  %v1808_v44 = vrot.slane %v1794_v45, %v8825_v18  ;;  %v12968_v47 = vrot.slane %v9188_v53, %v8804_v9 }
  0x98   :  { %v12969_v2 = vrot.slane %v9188_v53, %v8797_v6  ;;  %v3927_v3 = vadd.f32 %v3926_v32, %v3925_v17  ;;  %v10174_v54 = vcombine.low %v1733_v63, %v1740_v20  ;;  %v10176_v39 = vcombine.low %v1750_v22, %v1757_v35 }
  0x99   :  { %v10178_v26 = vcombine.low %v1767_v46, %v1774_v60  ;;  %v3930_v38 = vsel %vm3822_vm0, %v2713_v16, 0.0  ;;  %v10181_v42 = vcombine.low %v1784_v0, %v1791_v61  ;;  %v12970_v57 = vrot.slane %v9188_v53, %v8808_v11 }
  0x9a   :  { %v1811_v1 = vcombine.low %v12969_v2, %v12968_v47  ;;  %v12971_v45 = vrot.slane %v9188_v53, %v8806_v10  ;;  %v12972_v32 = vrot.slane %v9188_v53, %v8812_v13  ;;  %v12973_v63 = vrot.slane %v9188_v53, %v8810_v12 }
  0x9b   :  { %v3929_v22 = vadd.f32 %v3928_v43, %v3927_v3  ;;  %v2365_v35 = vmul.f32 %v9854_v55, %v30_v33  ;;  %v2730_v16 = vrot.slane %v2716_v62, %v8825_v18  ;;  %v2731_v46 = vcombine.high %v2723_v29, %v2723_v29 }
  0x9c   :  { %v1827_v36 = vcombine.low %v12971_v45, %v12970_v57  ;;  %v1828_v20 = vcombine.low %v12973_v63, %v12972_v32  ;;  %v3932_v60 = vsel %vm3822_vm0, %v2715_v58, 0.0  ;;  %v10198_v0 = vcombine.low %v1801_v27, %v1808_v44 }
  0x9d   :  { %v1818_v61 = vrot.slane %v1810_v59, %v8825_v18  ;;  %v1825_v17 = vrot.slane %v1811_v1, %v8825_v18  ;;  %v3931_v47 = vadd.f32 %v3930_v38, %v3929_v22  ;;  %v12974_v2 = vrot.slane %v9217_v21, %v8795_v5 }
  0x9e   :  { %v12975_v53 = vrot.slane %v9217_v21, %v8793_v4  ;;  %v12976_v55 = vrot.slane %v9217_v21, %v8804_v9  ;;  %v12977_v58 = vrot.slane %v9217_v21, %v8797_v6  ;;  %v12978_v59 = vrot.slane %v9217_v21, %v8808_v11 }
  0x9f   :  { %v12979_v38 = vrot.slane %v9217_v21, %v8806_v10  ;;  %v3934_v27 = vsel %vm3822_vm0, %v2723_v29, 0.0  ;;  %v1835_v44 = vrot.slane %v1827_v36, %v8825_v18  ;;  %v1842_v1 = vrot.slane %v1828_v20, %v8825_v18  ;;  %v31_v36 = vld [vmem:[%s12834_s0 + $0x80] sm:$0xff] }
  0xa0   :  { %v1844_v43 = vcombine.low %v12975_v53, %v12974_v2  ;;  %v1845_v62 = vcombine.low %v12977_v58, %v12976_v55  ;;  %v12980_v3 = vrot.slane %v9217_v21, %v8812_v13  ;;  %v12981_v57 = vrot.slane %v9217_v21, %v8810_v12 }
  0xa1   :  { %v1861_v33 = vcombine.low %v12979_v38, %v12978_v59  ;;  %v3933_v32 = vadd.f32 %v3932_v60, %v3931_v47  ;;  %v2732_v63 = vcombine.high %v2730_v16, %v2730_v16  ;;  %v2733_v22 = vcombine.high %v2365_v35, %v2365_v35 }
  0xa2   :  { %v1862_v45 = vcombine.low %v12981_v57, %v12980_v3  ;;  %v2740_v2 = vrot.slane %v2365_v35, %v8825_v18  ;;  %v3936_v53 = vsel %vm3822_vm0, %v2731_v46, 0.0  ;;  %v10234_v29 = vcombine.low %v1818_v61, %v1825_v17 }
  0xa3   :  { %v12983_v20 = vrot.slane %v9239_v50, %v8795_v5  ;;  %v12984_v21 = vrot.slane %v9239_v50, %v8793_v4  ;;  %v12985_v60 = vrot.slane %v9239_v50, %v8804_v9  ;;  %v12986_v35 = vrot.slane %v9239_v50, %v8797_v6 }
  0xa4   :  { %12982 = vst [vmem:[#allocation11_spill] sm:$0xff] %v10234_v29  ;;  %v3935_v47 = vadd.f32 %v3934_v27, %v3933_v32  ;;  %v1852_v58 = vrot.slane %v1844_v43, %v8825_v18  ;;  %v1859_v61 = vrot.slane %v1845_v62, %v8825_v18  ;;  %v1869_v17 = vrot.slane %v1861_v33, %v8825_v18 }
  0xa5   :  { %v1878_v55 = vcombine.low %v12984_v21, %v12983_v20  ;;  %v1879_v46 = vcombine.low %v12986_v35, %v12985_v60  ;;  %v3938_v59 = vsel %vm3822_vm0, %v2730_v16, 0.0  ;;  %v1876_v38 = vrot.slane %v1862_v45, %v8825_v18 }
  0xa6   :  { %v12987_v3 = vrot.slane %v9239_v50, %v8808_v11  ;;  %v12988_v57 = vrot.slane %v9239_v50, %v8806_v10  ;;  %v12989_v27 = vrot.slane %v9239_v50, %v8812_v13  ;;  %v12990_v43 = vrot.slane %v9239_v50, %v8810_v12 }
  0xa7   :  { %v3937_v32 = vadd.f32 %v3936_v53, %v3935_v47  ;;  %v2366_v33 = vmul.f32 %v9856_v40, %v31_v36  ;;  %v2747_v16 = vrot.slane %v2733_v22, %v8825_v18  ;;  %v2748_v45 = vcombine.high %v2740_v2, %v2740_v2 }
  0xa8   :  { %v1895_v20 = vcombine.low %v12988_v57, %v12987_v3  ;;  %v1896_v62 = vcombine.low %v12990_v43, %v12989_v27  ;;  %v3940_v21 = vsel %vm3822_vm0, %v2732_v63, 0.0  ;;  %v10268_v60 = vcombine.low %v1835_v44, %v1842_v1  ;;  %v32_v43 = vld [vmem:[%s12834_s0 + $0x88] sm:$0xff] }
  0xa9   :  { %v1886_v35 = vrot.slane %v1878_v55, %v8825_v18  ;;  %v1893_v3 = vrot.slane %v1879_v46, %v8825_v18  ;;  %v3939_v57 = vadd.f32 %v3938_v59, %v3937_v32  ;;  %v10272_v29 = vcombine.low %v1852_v58, %v1859_v61 }
  0xaa   :  { %v12991_v50 = vrot.slane %v9272_v52, %v8795_v5  ;;  %v12992_v40 = vrot.slane %v9272_v52, %v8793_v4  ;;  %v12993_v22 = vrot.slane %v9272_v52, %v8804_v9  ;;  %v12994_v44 = vrot.slane %v9272_v52, %v8797_v6 }
  0xab   :  { %v3942_v63 = vsel %vm3822_vm0, %v2740_v2, 0.0  ;;  %v10287_v36 = vcombine.low %v1869_v17, %v1876_v38  ;;  %v1903_v55 = vrot.slane %v1895_v20, %v8825_v18  ;;  %v1910_v46 = vrot.slane %v1896_v62, %v8825_v18 }
  0xac   :  { %v1912_v53 = vcombine.low %v12992_v40, %v12991_v50  ;;  %v1913_v1 = vcombine.low %v12994_v44, %v12993_v22  ;;  %v3941_v47 = vadd.f32 %v3940_v21, %v3939_v57  ;;  %v2749_v58 = vcombine.high %v2747_v16, %v2747_v16 }
  0xad   :  { %v2750_v61 = vcombine.high %v2366_v33, %v2366_v33  ;;  %v2757_v59 = vrot.slane %v2366_v33, %v8825_v18  ;;  %v3944_v27 = vsel %vm3822_vm0, %v2748_v45, 0.0  ;;  %v10296_v32 = vcombine.low %v1886_v35, %v1893_v3 }
  0xae   :  { %v12996_v2 = vrot.slane %v9272_v52, %v8808_v11  ;;  %v12997_v17 = vrot.slane %v9272_v52, %v8806_v10  ;;  %v12998_v20 = vrot.slane %v9272_v52, %v8812_v13  ;;  %v12999_v62 = vrot.slane %v9272_v52, %v8810_v12 }
  0xaf   :  { %12995 = vst [vmem:[#allocation12_spill] sm:$0xff] %v10296_v32  ;;  %v3943_v45 = vadd.f32 %v3942_v63, %v3941_v47  ;;  %v1920_v21 = vrot.slane %v1912_v53, %v8825_v18  ;;  %v1927_v35 = vrot.slane %v1913_v1, %v8825_v18  ;;  %v13000_v3 = vrot.slane %v9307_v23, %v8795_v5 }
  0xb0   :  { %v1929_v38 = vcombine.low %v12997_v17, %v12996_v2  ;;  %v1930_v33 = vcombine.low %v12999_v62, %v12998_v20  ;;  %v13001_v57 = vrot.slane %v9307_v23, %v8793_v4  ;;  %v3946_v40 = vsel %vm3822_vm0, %v2747_v16, 0.0 }
  0xb1   :  { %v13002_v22 = vrot.slane %v9307_v23, %v8804_v9  ;;  %v13003_v52 = vrot.slane %v9307_v23, %v8797_v6  ;;  %v13004_v53 = vrot.slane %v9307_v23, %v8808_v11  ;;  %v13005_v1 = vrot.slane %v9307_v23, %v8806_v10 }
  0xb2   :  { %v1946_v50 = vcombine.low %v13001_v57, %v13000_v3  ;;  %v13006_v47 = vrot.slane %v9307_v23, %v8812_v13  ;;  %v13007_v16 = vrot.slane %v9307_v23, %v8810_v12  ;;  %v3945_v17 = vadd.f32 %v3944_v27, %v3943_v45 }
  0xb3   :  { %v1947_v44 = vcombine.low %v13003_v52, %v13002_v22  ;;  %v1963_v63 = vcombine.low %v13005_v1, %v13004_v53  ;;  %v2367_v20 = vmul.f32 %v9868_v30, %v32_v43  ;;  %v2764_v62 = vrot.slane %v2750_v61, %v8825_v18 }
  0xb4   :  { %v1964_v2 = vcombine.low %v13007_v16, %v13006_v47  ;;  %v2765_v3 = vcombine.high %v2757_v59, %v2757_v59  ;;  %v3948_v57 = vsel %vm3822_vm0, %v2749_v58, 0.0  ;;  %v10340_v22 = vcombine.low %v1903_v55, %v1910_v46 }
  0xb5   :  { %v1937_v52 = vrot.slane %v1929_v38, %v8825_v18  ;;  %v1944_v53 = vrot.slane %v1930_v33, %v8825_v18  ;;  %v3947_v1 = vadd.f32 %v3946_v40, %v3945_v17  ;;  %v1954_v32 = vrot.slane %v1946_v50, %v8825_v18  ;;  %v33_v17 = vld [vmem:[%s12834_s0 + $0x90] sm:$0xff] }
  0xb6   :  { %v13008_v23 = vrot.slane %v9337_v24, %v8795_v5  ;;  %v13009_v30 = vrot.slane %v9337_v24, %v8793_v4  ;;  %v13010_v61 = vrot.slane %v9337_v24, %v8804_v9  ;;  %v13011_v55 = vrot.slane %v9337_v24, %v8797_v6 }
  0xb7   :  { %v3950_v58 = vsel %vm3822_vm0, %v2757_v59, 0.0  ;;  %v1961_v43 = vrot.slane %v1947_v44, %v8825_v18  ;;  %v1971_v38 = vrot.slane %v1963_v63, %v8825_v18  ;;  %v1978_v33 = vrot.slane %v1964_v2, %v8825_v18 }
  0xb8   :  { %v1980_v27 = vcombine.low %v13009_v30, %v13008_v23  ;;  %v1981_v46 = vcombine.low %v13011_v55, %v13010_v61  ;;  %v3949_v45 = vadd.f32 %v3948_v57, %v3947_v1  ;;  %v2766_v50 = vcombine.high %v2764_v62, %v2764_v62 }
  0xb9   :  { %v2767_v40 = vcombine.high %v2367_v20, %v2367_v20  ;;  %v2774_v47 = vrot.slane %v2367_v20, %v8825_v18  ;;  %v3952_v16 = vsel %vm3822_vm0, %v2765_v3, 0.0  ;;  %v10366_v23 = vcombine.low %v1920_v21, %v1927_v35 }
  0xba   :  { %v13012_v59 = vrot.slane %v9337_v24, %v8808_v11  ;;  %v13013_v44 = vrot.slane %v9337_v24, %v8806_v10  ;;  %v13014_v2 = vrot.slane %v9337_v24, %v8812_v13  ;;  %v13015_v20 = vrot.slane %v9337_v24, %v8810_v12 }
  0xbb   :  { %v3951_v57 = vadd.f32 %v3950_v58, %v3949_v45  ;;  %v10380_v1 = vcombine.low %v1937_v52, %v1944_v53  ;;  %v1988_v21 = vrot.slane %v1980_v27, %v8825_v18  ;;  %v1995_v35 = vrot.slane %v1981_v46, %v8825_v18 }
  0xbc   :  { %v1997_v63 = vcombine.low %v13013_v44, %v13012_v59  ;;  %v1998_v3 = vcombine.low %v13015_v20, %v13014_v2  ;;  %v3954_v30 = vsel %vm3822_vm0, %v2764_v62, 0.0  ;;  %v10385_v61 = vcombine.low %v1954_v32, %v1961_v43 }
  0xbd   :  { %v10387_v55 = vcombine.low %v1971_v38, %v1978_v33  ;;  %v13016_v59 = vrot.slane %v9385_v8, %v8795_v5  ;;  %v13017_v24 = vrot.slane %v9385_v8, %v8793_v4  ;;  %v3953_v58 = vadd.f32 %v3952_v16, %v3951_v57 }
  0xbe   :  { %v2368_v52 = vmul.f32 %v9896_v31, %v33_v17  ;;  %v2781_v53 = vrot.slane %v2767_v40, %v8825_v18  ;;  %v2782_v27 = vcombine.high %v2774_v47, %v2774_v47  ;;  %v3956_v46 = vsel %vm3822_vm0, %v2766_v50, 0.0 }
  0xbf   :  { %v2014_v44 = vcombine.low %v13017_v24, %v13016_v59  ;;  %v2005_v32 = vrot.slane %v1997_v63, %v8825_v18  ;;  %v2012_v62 = vrot.slane %v1998_v3, %v8825_v18  ;;  %v13018_v43 = vrot.slane %v9385_v8, %v8804_v9 }
  0xc0   :  { %v13019_v38 = vrot.slane %v9385_v8, %v8797_v6  ;;  %v3955_v45 = vadd.f32 %v3954_v30, %v3953_v58  ;;  %v10406_v16 = vcombine.low %v1988_v21, %v1995_v35  ;;  %v13021_v31 = vrot.slane %v9385_v8, %v8808_v11 }
  0xc1   :  { %v13022_v50 = vrot.slane %v9385_v8, %v8806_v10  ;;  %v13023_v17 = vrot.slane %v9385_v8, %v8812_v13  ;;  %v13024_v63 = vrot.slane %v9385_v8, %v8810_v12  ;;  %v3958_v20 = vsel %vm3822_vm0, %v2774_v47, 0.0 }
  0xc2   :  { %v2015_v33 = vcombine.low %v13019_v38, %v13018_v43  ;;  %13020 = vst [vmem:[#allocation13_spill] sm:$0xff] %v10406_v16  ;;  %v2022_v3 = vrot.slane %v2014_v44, %v8825_v18  ;;  %v13025_v57 = vrot.slane %v9420_v48, %v8795_v5  ;;  %v13026_v21 = vrot.slane %v9420_v48, %v8793_v4  ;;  %v34_v38 = vld [vmem:[%s12834_s0 + $0x98] sm:$0xff] }
  0xc3   :  { %v2031_v40 = vcombine.low %v13022_v50, %v13021_v31  ;;  %v2032_v2 = vcombine.low %v13024_v63, %v13023_v17  ;;  %v13027_v30 = vrot.slane %v9420_v48, %v8804_v9  ;;  %v13028_v59 = vrot.slane %v9420_v48, %v8797_v6 }
  0xc4   :  { %v2048_v35 = vcombine.low %v13026_v21, %v13025_v57  ;;  %v3957_v8 = vadd.f32 %v3956_v46, %v3955_v45  ;;  %v2783_v58 = vcombine.high %v2781_v53, %v2781_v53  ;;  %v2784_v43 = vcombine.high %v2368_v52, %v2368_v52 }
  0xc5   :  { %v2049_v24 = vcombine.low %v13028_v59, %v13027_v30  ;;  %v2791_v47 = vrot.slane %v2368_v52, %v8825_v18  ;;  %v3960_v44 = vsel %vm3822_vm0, %v2782_v27, 0.0  ;;  %v10439_v31 = vcombine.low %v2005_v32, %v2012_v62 }
  0xc6   :  { %v13030_v50 = vrot.slane %v9420_v48, %v8808_v11  ;;  %v13031_v17 = vrot.slane %v9420_v48, %v8806_v10  ;;  %v13032_v46 = vrot.slane %v9420_v48, %v8812_v13  ;;  %v13033_v52 = vrot.slane %v9420_v48, %v8810_v12 }
  0xc7   :  { %13029 = vst [vmem:[#allocation14_spill] sm:$0xff] %v10439_v31  ;;  %v3959_v45 = vadd.f32 %v3958_v20, %v3957_v8  ;;  %v2029_v57 = vrot.slane %v2015_v33, %v8825_v18  ;;  %v2039_v32 = vrot.slane %v2031_v40, %v8825_v18  ;;  %v2046_v62 = vrot.slane %v2032_v2, %v8825_v18 }
  0xc8   :  { %v2065_v63 = vcombine.low %v13031_v17, %v13030_v50  ;;  %v2066_v27 = vcombine.low %v13033_v52, %v13032_v46  ;;  %v3962_v21 = vsel %vm3822_vm0, %v2781_v53, 0.0  ;;  %v2056_v30 = vrot.slane %v2048_v35, %v8825_v18 }
  0xc9   :  { %v2063_v59 = vrot.slane %v2049_v24, %v8825_v18  ;;  %v13034_v50 = vrot.slane %v9451_v56, %v8795_v5  ;;  %v13035_v48 = vrot.slane %v9451_v56, %v8793_v4  ;;  %v3961_v20 = vadd.f32 %v3960_v44, %v3959_v45 }
  0xca   :  { %v2369_v33 = vmul.f32 %v9947_v41, %v34_v38  ;;  %v2798_v40 = vrot.slane %v2784_v43, %v8825_v18  ;;  %v2799_v8 = vcombine.high %v2791_v47, %v2791_v47  ;;  %v3964_v2 = vsel %vm3822_vm0, %v2783_v58, 0.0 }
  0xcb   :  { %v2082_v17 = vcombine.low %v13035_v48, %v13034_v50  ;;  %v2073_v53 = vrot.slane %v2065_v63, %v8825_v18  ;;  %v2080_v35 = vrot.slane %v2066_v27, %v8825_v18  ;;  %v13036_v24 = vrot.slane %v9451_v56, %v8804_v9 }
  0xcc   :  { %v13037_v46 = vrot.slane %v9451_v56, %v8797_v6  ;;  %v3963_v50 = vadd.f32 %v3962_v21, %v3961_v20  ;;  %v10476_v44 = vcombine.low %v2022_v3, %v2029_v57  ;;  %v10478_v41 = vcombine.low %v2039_v32, %v2046_v62  ;;  %v10499_v62 = vld [vmem:[%s12835_s1 + $0x1] ss:$2 sm:$0xff] }
  0xcd   :  { %v13040_v43 = vrot.slane %v9451_v56, %v8808_v11  ;;  %v13041_v58 = vrot.slane %v9451_v56, %v8806_v10  ;;  %v3966_v63 = vsel %vm3822_vm0, %v2791_v47, 0.0  ;;  %v10487_v27 = vcombine.low %v2056_v30, %v2063_v59  ;;  %v35_v59 = vld [vmem:[%s12834_s0 + $0xa0] sm:$0xff] }
  0xce   :  { %v2083_v52 = vcombine.low %v13037_v46, %v13036_v24  ;;  %13038 = vst [vmem:[#allocation15_spill] sm:$0xff] %v10476_v44  ;;  %13039 = vst [vmem:[#allocation16_spill] sm:$0xff] %v10478_v41  ;;  %v2090_v45 = vrot.slane %v2082_v17, %v8825_v18  ;;  %v13043_v21 = vrot.slane %v9451_v56, %v8812_v13  ;;  %v3968_v30 = vsel %vm3822_vm0, %v2799_v8, 0.0 }
  0xcf   :  { %v2099_v38 = vcombine.low %v13041_v58, %v13040_v43  ;;  %13042 = vst [vmem:[#allocation17_spill] sm:$0xff] %v10487_v27  ;;  %v13044_v3 = vrot.slane %v9451_v56, %v8810_v12  ;;  %v3965_v32 = vadd.f32 %v3964_v2, %v3963_v50  ;;  %v2800_v48 = vcombine.high %v2798_v40, %v2798_v40 }
  0xd0   :  { %v2801_v20 = vcombine.high %v2369_v33, %v2369_v33  ;;  %v2808_v47 = vrot.slane %v2369_v33, %v8825_v18  ;;  %v10506_v17 = vcombine.low %v2073_v53, %v2080_v35  ;;  %v2097_v56 = vrot.slane %v2083_v52, %v8825_v18 }
  0xd1   :  { %v2100_v57 = vcombine.low %v13044_v3, %v13043_v21  ;;  %v13046_v2 = vrot.slane %v9486_v15, %v8795_v5  ;;  %v13047_v24 = vrot.slane %v9486_v15, %v8793_v4  ;;  %v3967_v50 = vadd.f32 %v3966_v63, %v3965_v32 }
  0xd2   :  { %13045 = vst [vmem:[#allocation18_spill] sm:$0xff] %v10506_v17  ;;  %v2107_v33 = vrot.slane %v2099_v38, %v8825_v18  ;;  %v13048_v8 = vrot.slane %v9486_v15, %v8804_v9  ;;  %v13049_v43 = vrot.slane %v9486_v15, %v8797_v6  ;;  %v3970_v35 = vsel %vm3822_vm0, %v2798_v40, 0.0 }
  0xd3   :  { %v2116_v46 = vcombine.low %v13047_v24, %v13046_v2  ;;  %v4435_v52 = vrot.slane %v10499_v62, %v8793_v4  ;;  %v3969_v58 = vadd.f32 %v3968_v30, %v3967_v50  ;;  %v4439_v21 = vrot.slane %v10499_v62, %v8795_v5 }
  0xd4   :  { %v2117_v53 = vcombine.low %v13049_v43, %v13048_v8  ;;  %v4443_v63 = vrot.slane %v10499_v62, %v8797_v6  ;;  %v4447_v38 = vrot.slane %v10499_v62, %v8804_v9  ;;  %v2370_v3 = vmul.f32 %v9949_v34, %v35_v59 }
  0xd5   :  { %v2815_v32 = vrot.slane %v2801_v20, %v8825_v18  ;;  %v2816_v2 = vcombine.high %v2808_v47, %v2808_v47  ;;  %v3972_v40 = vsel %vm3822_vm0, %v2800_v48, 0.0  ;;  %v2114_v24 = vrot.slane %v2100_v57, %v8825_v18 }
  0xd6   :  { %v13050_v30 = vrot.slane %v9486_v15, %v8808_v11  ;;  %v13051_v50 = vrot.slane %v9486_v15, %v8806_v10  ;;  %v13052_v43 = vrot.slane %v9486_v15, %v8812_v13  ;;  %v13053_v34 = vrot.slane %v9486_v15, %v8810_v12 }
  0xd7   :  { %v3971_v20 = vadd.f32 %v3970_v35, %v3969_v58  ;;  %v2124_v17 = vrot.slane %v2116_v46, %v8825_v18  ;;  %v2131_v48 = vrot.slane %v2117_v53, %v8825_v18  ;;  %v13054_v57 = vrot.slane %v9522_v51, %v8795_v5  ;;  %v36_v46 = vld [vmem:[%s12834_s0 + $0xa8] sm:$0xff] }
  0xd8   :  { %v2133_v8 = vcombine.low %v13051_v50, %v13050_v30  ;;  %v2134_v59 = vcombine.low %v13053_v34, %v13052_v43  ;;  %v13055_v27 = vrot.slane %v9522_v51, %v8793_v4  ;;  %v3974_v30 = vsel %vm3822_vm0, %v2808_v47, 0.0 }
  0xd9   :  { %v10556_v50 = vcombine.low %v2090_v45, %v2097_v56  ;;  %v3973_v44 = vadd.f32 %v3972_v40, %v3971_v20  ;;  %v5456_v31 = vcombine.low %v4435_v52, %v4439_v21  ;;  %v5457_v15 = vcombine.low %v4443_v63, %v4447_v38 }
  0xda   :  { %v2150_v41 = vcombine.low %v13055_v27, %v13054_v57  ;;  %v2817_v35 = vcombine.high %v2815_v32, %v2815_v32  ;;  %v2818_v53 = vcombine.high %v2370_v3, %v2370_v3  ;;  %v2825_v58 = vrot.slane %v2370_v3, %v8825_v18 }
  0xdb   :  { %13056 = vst [vmem:[#allocation19_spill] sm:$0xff] %v10556_v50  ;;  %v3976_v43 = vsel %vm3822_vm0, %v2816_v2, 0.0  ;;  %v10563_v34 = vcombine.low %v2107_v33, %v2114_v24  ;;  %v2141_v27 = vrot.slane %v2133_v8, %v8825_v18  ;;  %v2148_v45 = vrot.slane %v2134_v59, %v8825_v18 }
  0xdc   :  { %v3975_v47 = vadd.f32 %v3974_v30, %v3973_v44  ;;  %v10567_v56 = vcombine.low %v2124_v17, %v2131_v48  ;;  %v13059_v52 = vrot.slane %v9522_v51, %v8804_v9  ;;  %v13060_v21 = vrot.slane %v9522_v51, %v8797_v6 }
  0xdd   :  { %13057 = vst [vmem:[#allocation20_spill] sm:$0xff] %v10563_v34  ;;  %v2158_v38 = vrot.slane %v2150_v41, %v8825_v18  ;;  %v3978_v3 = vsel %vm3822_vm0, %v2815_v32, 0.0  ;;  %v2371_v33 = vmul.f32 %v9962_v14, %v36_v46  ;;  %v5464_v40 = vrot.slane %v5456_v31, %v8825_v18 }
  0xde   :  { %13058 = vst [vmem:[#allocation21_spill] sm:$0xff] %v10567_v56  ;;  %v2151_v63 = vcombine.low %v13060_v21, %v13059_v52  ;;  %v3977_v2 = vadd.f32 %v3976_v43, %v3975_v47  ;;  %v5471_v44 = vrot.slane %v5457_v15, %v8825_v18  ;;  %v2832_v17 = vrot.slane %v2818_v53, %v8825_v18  ;;  %v13066_v43 = vld [vmem:[#allocation5_spill] sm:$0xff] }
  0xdf   :  { %v2833_v24 = vcombine.high %v2825_v58, %v2825_v58  ;;  %v3980_v8 = vsel %vm3822_vm0, %v2817_v35, 0.0  ;;  %v4451_v59 = vrot.slane %v10499_v62, %v8806_v10  ;;  %v4455_v41 = vrot.slane %v10499_v62, %v8808_v11 }
  0xe0   :  { %v3979_v20 = vadd.f32 %v3978_v3, %v3977_v2  ;;  %v4459_v14 = vrot.slane %v10499_v62, %v8810_v12  ;;  %v4463_v31 = vrot.slane %v10499_v62, %v8812_v13  ;;  %v10590_v32 = vcombine.low %v2141_v27, %v2148_v45 }
  0xe1   :  { %v13062_v48 = vrot.slane %v9522_v51, %v8808_v11  ;;  %v13063_v57 = vrot.slane %v9522_v51, %v8806_v10  ;;  %v13064_v15 = vrot.slane %v9522_v51, %v8812_v13  ;;  %v13065_v46 = vrot.slane %v9522_v51, %v8810_v12  ;;  %v37_v51 = vld [vmem:[%s12834_s0 + $0xb0] sm:$0xff] }
  0xe2   :  { %13061 = vst [vmem:[#allocation22_spill] sm:$0xff] %v10590_v32  ;;  %v3982_v62 = vsel %vm3822_vm0, %v2825_v58, 0.0  ;;  %v2165_v53 = vrot.slane %v2151_v63, %v8825_v18  ;;  %v13067_v27 = vrot.slane %v13066_v43, %v8795_v5  ;;  %v13068_v45 = vrot.slane %v13066_v43, %v8793_v4 }
  0xe3   :  { %v10598_v30 = vcombine.low %v13063_v57, %v13062_v48  ;;  %v10606_v35 = vcombine.low %v13065_v46, %v13064_v15  ;;  %v3981_v52 = vadd.f32 %v3980_v8, %v3979_v20  ;;  %v5472_v21 = vcombine.low %v5464_v40, %v5471_v44 }
  0xe4   :  { %v10616_v47 = vcombine.low %v13068_v45, %v13067_v27  ;;  %v2834_v3 = vcombine.high %v2832_v17, %v2832_v17  ;;  %v2835_v2 = vcombine.high %v2371_v33, %v2371_v33  ;;  %v2842_v58 = vrot.slane %v2371_v33, %v8825_v18 }
  0xe5   :  { %v3984_v63 = vsel %vm3822_vm0, %v2833_v24, 0.0  ;;  %v13069_v48 = vrot.slane %v13066_v43, %v8804_v9  ;;  %v13070_v57 = vrot.slane %v13066_v43, %v8797_v6  ;;  %v3983_v8 = vadd.f32 %v3982_v62, %v3981_v52 }
  0xe6   :  { %v5473_v40 = vcombine.low %v4451_v59, %v4455_v41  ;;  %v5474_v44 = vcombine.low %v4459_v14, %v4463_v31  ;;  %v13071_v33 = vrot.slane %v13066_v43, %v8808_v11  ;;  %v13072_v24 = vrot.slane %v13066_v43, %v8806_v10  ;;  %v38_v59 = vld [vmem:[%s12834_s0 + $0xb8] sm:$0xff] }
  0xe7   :  { %v10629_v15 = vcombine.low %v13070_v57, %v13069_v48  ;;  %v3986_v45 = vsel %vm3822_vm0, %v2832_v17, 0.0  ;;  %v13073_v41 = vrot.slane %v13066_v43, %v8812_v13  ;;  %v13074_v14 = vrot.slane %v13066_v43, %v8810_v12  ;;  %v10659_v48 = vld [vmem:[%s12835_s1 + $0x11] ss:$2 sm:$0xff]  ;;  %v8685_v17 = vld [vmem:[%s12834_s0] sm:$0xff] }
  0xe8   :  { %v10641_v27 = vcombine.low %v13072_v24, %v13071_v33  ;;  %v2372_v62 = vmul.f32 %v9964_v25, %v37_v51  ;;  %v3985_v52 = vadd.f32 %v3984_v63, %v3983_v8  ;;  %v6608_v57 = vmul.f32 %v8685_v17, %v5472_v21 }
  0xe9   :  { %v10653_v31 = vcombine.low %v13074_v14, %v13073_v41  ;;  %v10664_v33 = vcombine.low %v2158_v38, %v2165_v53  ;;  %v2849_v24 = vrot.slane %v2835_v2, %v8825_v18  ;;  %v2850_v43 = vcombine.high %v2842_v58, %v2842_v58  ;;  %v39_v53 = vld [vmem:[%s12834_s0 + $0xc0] sm:$0xff] }
  0xea   :  { %v3988_v41 = vsel %vm3822_vm0, %v2834_v3, 0.0  ;;  %v2852_v14 = vcombine.high %v2372_v62, %v2372_v62  ;;  %v3987_v25 = vadd.f32 %v3986_v45, %v3985_v52  ;;  %v5481_v51 = vrot.slane %v5473_v40, %v8825_v18 }
  0xeb   :  { %13075 = vst [vmem:[#allocation5_spill] sm:$0xff] %v10664_v33  ;;  %v5488_v63 = vrot.slane %v5474_v44, %v8825_v18  ;;  %v2373_v8 = vmul.f32 %v9972_v49, %v38_v59  ;;  %v3990_v20 = vsel %vm3822_vm0, %v2842_v58, 0.0  ;;  %v4467_v21 = vrot.slane %v10659_v48, %v8793_v4 }
  0xec   :  { %v4471_v38 = vrot.slane %v10659_v48, %v8795_v5  ;;  %v3989_v3 = vadd.f32 %v3988_v41, %v3987_v25  ;;  %v4475_v2 = vrot.slane %v10659_v48, %v8797_v6  ;;  %v4479_v40 = vrot.slane %v10659_v48, %v8804_v9 }
  0xed   :  { %v6743_v49 = vrot.slane %v6608_v57, %v8825_v18  ;;  %v2851_v58 = vcombine.high %v2849_v24, %v2849_v24  ;;  %v2859_v44 = vrot.slane %v2372_v62, %v8825_v18  ;;  %v3992_v45 = vsel %vm3822_vm0, %v2850_v43, 0.0 }
  0xee   :  { %v6736_v59 = vcombine.high %v6608_v57, %v6608_v57  ;;  %v2866_v17 = vrot.slane %v2852_v14, %v8825_v18  ;;  %v3991_v41 = vadd.f32 %v3990_v20, %v3989_v3  ;;  %v5489_v25 = vcombine.low %v5481_v51, %v5488_v63 }
  0xef   :  { %v10692_v33 = vmul.f32 %v10006_v28, %v39_v53  ;;  %v3994_v32 = vsel %vm3822_vm0, %v2849_v24, 0.0  ;;  %v5490_v56 = vcombine.low %v4467_v21, %v4471_v38  ;;  %v2869_v62 = vcombine.high %v2373_v8, %v2373_v8  ;;  %v8686_v24 = vld [vmem:[%s12834_s0 + $0x8] sm:$0xff] }
  0xf0   :  { %v3993_v34 = vadd.f32 %v3992_v45, %v3991_v41  ;;  %v5491_v43 = vcombine.low %v4475_v2, %v4479_v40  ;;  %v6751_v57 = vcombine.high %v6743_v49, %v6743_v49  ;;  %v2867_v50 = vcombine.high %v2859_v44, %v2859_v44 }
  0xf1   :  { %v2876_v52 = vrot.slane %v2373_v8, %v8825_v18  ;;  %v3996_v14 = vsel %vm3822_vm0, %v2851_v58, 0.0  ;;  %v6750_v20 = vrot.slane %v6736_v59, %v8825_v18  ;;  %v2868_v51 = vcombine.high %v2866_v17, %v2866_v17 }
  0xf2   :  { %v3995_v63 = vadd.f32 %v3994_v32, %v3993_v34  ;;  %v4483_v28 = vrot.slane %v10659_v48, %v8806_v10  ;;  %v6609_v21 = vmul.f32 %v8686_v24, %v5489_v25  ;;  %v3998_v38 = vsel %vm3822_vm0, %v2859_v44, 0.0 }
  0xf3   :  { %v4487_v53 = vrot.slane %v10659_v48, %v8808_v11  ;;  %v4491_v8 = vrot.slane %v10659_v48, %v8810_v12  ;;  %v5498_v3 = vrot.slane %v5490_v56, %v8825_v18  ;;  %v5505_v34 = vrot.slane %v5491_v43, %v8825_v18 }
  0xf4   :  { %v3997_v2 = vadd.f32 %v3996_v14, %v3995_v63  ;;  %v8080_v32 = vsel %vm3822_vm0, %v6743_v49, 0.0  ;;  %v8081_v40 = vsel %vm3822_vm0, %v6751_v57, 0.0  ;;  %v4000_v58 = vsel %vm3822_vm0, %v2867_v50, 0.0  ;;  %v13079_v50 = vld [vmem:[#allocation6_spill] sm:$0xff] }
  0xf5   :  { %v4495_v44 = vrot.slane %v10659_v48, %v8812_v13  ;;  %v6752_v45 = vcombine.high %v6750_v20, %v6750_v20  ;;  %v8082_v59 = vadd.f32 %v8081_v40, %v8080_v32  ;;  %v6753_v25 = vcombine.high %v6609_v21, %v6609_v21  ;;  %v40_v32 = vld [vmem:[%s12834_s0 + $0xc8] sm:$0xff] }
  0xf6   :  { %v3999_v41 = vadd.f32 %v3998_v38, %v3997_v2  ;;  %v6760_v24 = vrot.slane %v6609_v21, %v8825_v18  ;;  %v8083_v56 = vsel %vm3822_vm0, %v6750_v20, 0.0  ;;  %v13076_v43 = vrot.slane %v10606_v35, %v8825_v18 }
  0xf7   :  { %v13077_v49 = vrot.slane %v10598_v30, %v8825_v18  ;;  %v13080_v14 = vrot.slane %v13079_v50, %v8795_v5  ;;  %v13081_v48 = vrot.slane %v13079_v50, %v8793_v4  ;;  %v2886_v21 = vcombine.high %v10692_v33, %v10692_v33 }
  0xf8   :  { %v4002_v20 = vsel %vm3822_vm0, %v2866_v17, 0.0  ;;  %v2883_v35 = vrot.slane %v2869_v62, %v8825_v18  ;;  %v2884_v38 = vcombine.high %v2876_v52, %v2876_v52  ;;  %v4001_v2 = vadd.f32 %v4000_v58, %v3999_v41 }
  0xf9   :  { %v10723_v57 = vcombine.low %v13077_v49, %v13076_v43  ;;  %v10731_v63 = vcombine.low %v13081_v48, %v13080_v14  ;;  %v5506_v30 = vcombine.low %v5498_v3, %v5505_v34  ;;  %v4004_v40 = vsel %vm3822_vm0, %v2868_v51, 0.0 }
  0xfa   :  { %v5507_v43 = vcombine.low %v4483_v28, %v4487_v53  ;;  %v8084_v49 = vadd.f32 %v8083_v56, %v8082_v59  ;;  %v8085_v14 = vsel %vm3822_vm0, %v6752_v45, 0.0  ;;  %v4003_v48 = vadd.f32 %v4002_v20, %v4001_v2 }
  0xfb   :  { %13078 = vst [vmem:[#allocation23_spill] sm:$0xff] %v10723_v57  ;;  %v5508_v46 = vcombine.low %v4491_v8, %v4495_v44  ;;  %v6767_v57 = vrot.slane %v6753_v25, %v8825_v18  ;;  %v6768_v17 = vcombine.high %v6760_v24, %v6760_v24  ;;  %v2893_v62 = vrot.slane %v10692_v33, %v8825_v18  ;;  %v10753_v8 = vld [vmem:[%s12835_s1 + $0x21] ss:$2 sm:$0xff]  ;;  %v8687_v33 = vld [vmem:[%s12834_s0 + $0x10] sm:$0xff] }
  0xfc   :  { %v4006_v3 = vsel %vm3822_vm0, %v2876_v52, 0.0  ;;  %v8086_v34 = vadd.f32 %v8085_v14, %v8084_v49  ;;  %v8087_v58 = vsel %vm3822_vm0, %v6760_v24, 0.0  ;;  %v2375_v28 = vmul.f32 %v10034_v7, %v40_v32 }
  0xfd   :  { %v4005_v53 = vadd.f32 %v4004_v40, %v4003_v48  ;;  %v6610_v44 = vmul.f32 %v8687_v33, %v5506_v30  ;;  %v2885_v52 = vcombine.high %v2883_v35, %v2883_v35  ;;  %v4008_v45 = vsel %vm3822_vm0, %v2884_v38, 0.0  ;;  %v41_v38 = vld [vmem:[%s12834_s0 + $0xd0] sm:$0xff] }
  0xfe   :  { %v5515_v59 = vrot.slane %v5507_v43, %v8825_v18  ;;  %v8088_v41 = vadd.f32 %v8087_v58, %v8086_v34  ;;  %v5522_v7 = vrot.slane %v5508_v46, %v8825_v18  ;;  %v6769_v24 = vcombine.high %v6767_v57, %v6767_v57 }
  0xff   :  { %v4007_v25 = vadd.f32 %v4006_v3, %v4005_v53  ;;  %v8089_v56 = vsel %vm3822_vm0, %v6768_v17, 0.0  ;;  %v2900_v20 = vrot.slane %v2886_v21, %v8825_v18  ;;  %v2901_v2 = vcombine.high %v2893_v62, %v2893_v62 }
 0x100   :  { %v4010_v32 = vsel %vm3822_vm0, %v2883_v35, 0.0  ;;  %v4499_v30 = vrot.slane %v10753_v8, %v8793_v4  ;;  %v4503_v43 = vrot.slane %v10753_v8, %v8795_v5  ;;  %v6777_v46 = vrot.slane %v6610_v44, %v8825_v18 }
 0x101   :  { %v4009_v40 = vadd.f32 %v4008_v45, %v4007_v25  ;;  %v8091_v49 = vsel %vm3822_vm0, %v6767_v57, 0.0  ;;  %v4012_v21 = vsel %vm3822_vm0, %v2885_v52, 0.0  ;;  %v4507_v35 = vrot.slane %v10753_v8, %v8797_v6  ;;  %v42_v52 = vld [vmem:[%s12834_s0 + $0xd8] sm:$0xff] }
 0x102   :  { %v4511_v14 = vrot.slane %v10753_v8, %v8804_v9  ;;  %v8090_v48 = vadd.f32 %v8089_v56, %v8088_v41  ;;  %v5523_v3 = vcombine.low %v5515_v59, %v5522_v7  ;;  %v6770_v34 = vcombine.high %v6610_v44, %v6610_v44 }
 0x103   :  { %v4011_v17 = vadd.f32 %v4010_v32, %v4009_v40  ;;  %v8093_v58 = vsel %vm3822_vm0, %v6769_v24, 0.0  ;;  %v2376_v53 = vmul.f32 %v10076_v19, %v41_v38  ;;  %v2903_v33 = vcombine.high %v2375_v28, %v2375_v28  ;;  %v8688_v19 = vld [vmem:[%s12834_s0 + $0x18] sm:$0xff] }
 0x104   :  { %v4014_v45 = vsel %vm3822_vm0, %v2893_v62, 0.0  ;;  %v8092_v57 = vadd.f32 %v8091_v49, %v8090_v48  ;;  %v2902_v25 = vcombine.high %v2900_v20, %v2900_v20  ;;  %v2910_v51 = vrot.slane %v2375_v28, %v8825_v18 }
 0x105   :  { %v4013_v16 = vadd.f32 %v4012_v21, %v4011_v17  ;;  %v6785_v41 = vcombine.high %v6777_v46, %v6777_v46  ;;  %v4016_v59 = vsel %vm3822_vm0, %v2901_v2, 0.0  ;;  %v5524_v44 = vcombine.low %v4499_v30, %v4503_v43 }
 0x106   :  { %v5525_v7 = vcombine.low %v4507_v35, %v4511_v14  ;;  %v8094_v24 = vadd.f32 %v8093_v58, %v8092_v57  ;;  %v6611_v62 = vmul.f32 %v8688_v19, %v5523_v3  ;;  %v6784_v32 = vrot.slane %v6770_v34, %v8825_v18 }
 0x107   :  { %v4015_v56 = vadd.f32 %v4014_v45, %v4013_v16  ;;  %v8095_v38 = vsel %vm3822_vm0, %v6777_v46, 0.0  ;;  %v10792_v40 = vmul.f32 %v10078_v37, %v42_v52  ;;  %v2917_v28 = vrot.slane %v2903_v33, %v8825_v18 }
 0x108   :  { %v2920_v49 = vcombine.high %v2376_v53, %v2376_v53  ;;  %v4018_v2 = vsel %vm3822_vm0, %v2900_v20, 0.0  ;;  %v2918_v30 = vcombine.high %v2910_v51, %v2910_v51  ;;  %v2927_v16 = vrot.slane %v2376_v53, %v8825_v18 }
 0x109   :  { %v4017_v43 = vadd.f32 %v4016_v59, %v4015_v56  ;;  %v8097_v21 = vsel %vm3822_vm0, %v6785_v41, 0.0  ;;  %v4020_v35 = vsel %vm3822_vm0, %v2902_v25, 0.0  ;;  %v5532_v14 = vrot.slane %v5524_v44, %v8825_v18 }
 0x10a   :  { %v5539_v46 = vrot.slane %v5525_v7, %v8825_v18  ;;  %v8096_v48 = vadd.f32 %v8095_v38, %v8094_v24  ;;  %v6786_v17 = vcombine.high %v6784_v32, %v6784_v32  ;;  %v6794_v3 = vrot.slane %v6611_v62, %v8825_v18 }
 0x10b   :  { %v4019_v37 = vadd.f32 %v4018_v2, %v4017_v43  ;;  %v8099_v34 = vsel %vm3822_vm0, %v6784_v32, 0.0  ;;  %v4022_v20 = vsel %vm3822_vm0, %v2910_v51, 0.0  ;;  %v4515_v58 = vrot.slane %v10753_v8, %v8806_v10 }
 0x10c   :  { %v4519_v53 = vrot.slane %v10753_v8, %v8808_v11  ;;  %v8098_v33 = vadd.f32 %v8097_v21, %v8096_v48  ;;  %v4523_v57 = vrot.slane %v10753_v8, %v8810_v12  ;;  %v4527_v52 = vrot.slane %v10753_v8, %v8812_v13 }
 0x10d   :  { %v4021_v45 = vadd.f32 %v4020_v35, %v4019_v37  ;;  %v6787_v25 = vcombine.high %v6611_v62, %v6611_v62  ;;  %v2919_v41 = vcombine.high %v2917_v28, %v2917_v28  ;;  %v2934_v59 = vrot.slane %v2920_v49, %v8825_v18  ;;  %v10823_v49 = vld [vmem:[%s12835_s1 + $0x31] ss:$2 sm:$0xff] }
 0x10e   :  { %v4024_v51 = vsel %vm3822_vm0, %v2918_v30, 0.0  ;;  %v8100_v44 = vadd.f32 %v8099_v34, %v8098_v33  ;;  %v5540_v24 = vcombine.low %v5532_v14, %v5539_v46  ;;  %v6802_v56 = vcombine.high %v6794_v3, %v6794_v3  ;;  %v43_v33 = vld [vmem:[%s12834_s0 + $0xe0] sm:$0xff] }
 0x10f   :  { %v4023_v7 = vadd.f32 %v4022_v20, %v4021_v45  ;;  %v8101_v19 = vsel %vm3822_vm0, %v6786_v17, 0.0  ;;  %v2216_v32 = vrot.slane %v10653_v31, %v8825_v18  ;;  %v2937_v38 = vcombine.high %v10792_v40, %v10792_v40  ;;  %v8689_v17 = vld [vmem:[%s12834_s0 + $0x20] sm:$0xff] }
 0x110   :  { %v4026_v8 = vsel %vm3822_vm0, %v2917_v28, 0.0  ;;  %v5541_v62 = vcombine.low %v4515_v58, %v4519_v53  ;;  %v5542_v30 = vcombine.low %v4523_v57, %v4527_v52  ;;  %v6801_v43 = vrot.slane %v6787_v25, %v8825_v18 }
 0x111   :  { %v4025_v2 = vadd.f32 %v4024_v51, %v4023_v7  ;;  %v8103_v21 = vsel %vm3822_vm0, %v6794_v3, 0.0  ;;  %v2935_v35 = vcombine.high %v2927_v16, %v2927_v16  ;;  %v2944_v14 = vrot.slane %v10792_v40, %v8825_v18 }
 0x112   :  { %v4028_v46 = vsel %vm3822_vm0, %v2919_v41, 0.0  ;;  %v8102_v48 = vadd.f32 %v8101_v19, %v8100_v44  ;;  %v2936_v28 = vcombine.high %v2934_v59, %v2934_v59  ;;  %v6612_v34 = vmul.f32 %v8689_v17, %v5540_v24 }
 0x113   :  { %v4027_v37 = vadd.f32 %v4026_v8, %v4025_v2  ;;  %v8105_v20 = vsel %vm3822_vm0, %v6802_v56, 0.0  ;;  %v4030_v58 = vsel %vm3822_vm0, %v2927_v16, 0.0  ;;  %v4531_v3 = vrot.slane %v10823_v49, %v8793_v4 }
 0x114   :  { %v4535_v40 = vrot.slane %v10823_v49, %v8795_v5  ;;  %v8104_v53 = vadd.f32 %v8103_v21, %v8102_v48  ;;  %v5549_v57 = vrot.slane %v5541_v62, %v8825_v18  ;;  %v5556_v52 = vrot.slane %v5542_v30, %v8825_v18  ;;  %v13084_v30 = vld [vmem:[#allocation8_spill] sm:$0xff] }
 0x115   :  { %v4029_v45 = vadd.f32 %v4028_v46, %v4027_v37  ;;  %v6803_v25 = vcombine.high %v6801_v43, %v6801_v43  ;;  %v4032_v41 = vsel %vm3822_vm0, %v2935_v35, 0.0  ;;  %v4539_v16 = vrot.slane %v10823_v49, %v8797_v6 }
 0x116   :  { %v4543_v51 = vrot.slane %v10823_v49, %v8804_v9  ;;  %v8106_v44 = vadd.f32 %v8105_v20, %v8104_v53  ;;  %v6804_v24 = vcombine.high %v6612_v34, %v6612_v34  ;;  %v6811_v56 = vrot.slane %v6612_v34, %v8825_v18 }
 0x117   :  { %v4031_v7 = vadd.f32 %v4030_v58, %v4029_v45  ;;  %v8107_v19 = vsel %vm3822_vm0, %v6801_v43, 0.0  ;;  %v13082_v8 = vrot.slane %v13079_v50, %v8804_v9  ;;  %v13083_v62 = vrot.slane %v13079_v50, %v8797_v6  ;;  %v44_v43 = vld [vmem:[%s12834_s0 + $0xe8] sm:$0xff] }
 0x118   :  { %v2378_v21 = vmul.f32 %v13084_v30, %v43_v33  ;;  %v2951_v35 = vrot.slane %v2937_v38, %v8825_v18  ;;  %v4034_v46 = vsel %vm3822_vm0, %v2934_v59, 0.0  ;;  %v2952_v48 = vcombine.high %v2944_v14, %v2944_v14 }
 0x119   :  { %v10857_v2 = vcombine.low %v13083_v62, %v13082_v8  ;;  %v4033_v37 = vadd.f32 %v4032_v41, %v4031_v7  ;;  %v5557_v17 = vcombine.low %v5549_v57, %v5556_v52  ;;  %v8109_v34 = vsel %vm3822_vm0, %v6803_v25, 0.0 }
 0x11a   :  { %v4036_v20 = vsel %vm3822_vm0, %v2936_v28, 0.0  ;;  %v5558_v58 = vcombine.low %v4531_v3, %v4535_v40  ;;  %v5559_v53 = vcombine.low %v4539_v16, %v4543_v51  ;;  %v8108_v45 = vadd.f32 %v8107_v19, %v8106_v44  ;;  %v13087_v40 = vld [vmem:[#allocation9_spill] sm:$0xff] }
 0x11b   :  { %v4035_v8 = vadd.f32 %v4034_v46, %v4033_v37  ;;  %v6818_v33 = vrot.slane %v6804_v24, %v8825_v18  ;;  %v6819_v38 = vcombine.high %v6811_v56, %v6811_v56  ;;  %v8111_v59 = vsel %vm3822_vm0, %v6811_v56, 0.0  ;;  %v8690_v44 = vld [vmem:[%s12834_s0 + $0x28] sm:$0xff] }
 0x11c   :  { %v2954_v62 = vcombine.high %v2378_v21, %v2378_v21  ;;  %v2961_v57 = vrot.slane %v2378_v21, %v8825_v18  ;;  %v4038_v52 = vsel %vm3822_vm0, %v2944_v14, 0.0  ;;  %v8110_v25 = vadd.f32 %v8109_v34, %v8108_v45 }
 0x11d   :  { %v13085_v41 = vrot.slane %v10629_v15, %v8825_v18  ;;  %v13086_v28 = vrot.slane %v10616_v47, %v8825_v18  ;;  %v2379_v16 = vmul.f32 %v13087_v40, %v44_v43  ;;  %v4037_v51 = vadd.f32 %v4036_v20, %v4035_v8 }
 0x11e   :  { %v6613_v7 = vmul.f32 %v8690_v44, %v5557_v17  ;;  %v2953_v24 = vcombine.high %v2951_v35, %v2951_v35  ;;  %v4040_v14 = vsel %vm3822_vm0, %v2952_v48, 0.0  ;;  %v5566_v56 = vrot.slane %v5558_v58, %v8825_v18  ;;  %v45_v48 = vld [vmem:[%s12834_s0 + $0xf0] sm:$0xff]  ;;  %v46_v44 = vld [vmem:[%s12834_s0 + $0xf8] sm:$0xff] }
 0x11f   :  { %v10877_v3 = vcombine.low %v13086_v28, %v13085_v41  ;;  %v8112_v19 = vadd.f32 %v8111_v59, %v8110_v25  ;;  %v4039_v15 = vadd.f32 %v4038_v52, %v4037_v51  ;;  %v5573_v30 = vrot.slane %v5559_v53, %v8825_v18  ;;  %v13088_v41 = vld [vmem:[#allocation10_spill] sm:$0xff] }
 0x120   :  { %v6820_v47 = vcombine.high %v6818_v33, %v6818_v33  ;;  %v8113_v21 = vsel %vm3822_vm0, %v6819_v38, 0.0  ;;  %v2968_v46 = vrot.slane %v2954_v62, %v8825_v18  ;;  %v2969_v37 = vcombine.high %v2961_v57, %v2961_v57 }
 0x121   :  { %v4042_v34 = vsel %vm3822_vm0, %v2951_v35, 0.0  ;;  %v4547_v17 = vrot.slane %v10823_v49, %v8806_v10  ;;  %v4041_v43 = vadd.f32 %v4040_v14, %v4039_v15  ;;  %v4551_v20 = vrot.slane %v10823_v49, %v8808_v11 }
 0x122   :  { %v6828_v58 = vrot.slane %v6613_v7, %v8825_v18  ;;  %v8115_v53 = vsel %vm3822_vm0, %v6818_v33, 0.0  ;;  %v4044_v45 = vsel %vm3822_vm0, %v2953_v24, 0.0  ;;  %v4555_v35 = vrot.slane %v10823_v49, %v8810_v12 }
 0x123   :  { %v4559_v8 = vrot.slane %v10823_v49, %v8812_v13  ;;  %v8114_v38 = vadd.f32 %v8113_v21, %v8112_v19  ;;  %v4043_v59 = vadd.f32 %v4042_v34, %v4041_v43  ;;  %v5574_v62 = vcombine.low %v5566_v56, %v5573_v30 }
 0x124   :  { %v6821_v52 = vcombine.high %v6613_v7, %v6613_v7  ;;  %v8117_v25 = vsel %vm3822_vm0, %v6820_v47, 0.0  ;;  %v2380_v28 = vmul.f32 %v13088_v41, %v45_v48  ;;  %v2971_v40 = vcombine.high %v2379_v16, %v2379_v16 }
 0x125   :  { %v4046_v51 = vsel %vm3822_vm0, %v2961_v57, 0.0  ;;  %v8116_v33 = vadd.f32 %v8115_v53, %v8114_v38  ;;  %v2970_v24 = vcombine.high %v2968_v46, %v2968_v46  ;;  %v2978_v14 = vrot.slane %v2379_v16, %v8825_v18  ;;  %v8691_v57 = vld [vmem:[%s12834_s0 + $0x30] sm:$0xff] }
 0x126   :  { %v4045_v49 = vadd.f32 %v4044_v45, %v4043_v59  ;;  %v6836_v19 = vcombine.high %v6828_v58, %v6828_v58  ;;  %v4048_v56 = vsel %vm3822_vm0, %v2969_v37, 0.0  ;;  %v5575_v7 = vcombine.low %v4547_v17, %v4551_v20 }
 0x127   :  { %v5576_v15 = vcombine.low %v4555_v35, %v4559_v8  ;;  %v8118_v30 = vadd.f32 %v8117_v25, %v8116_v33  ;;  %v6614_v21 = vmul.f32 %v8691_v57, %v5574_v62  ;;  %v6835_v34 = vrot.slane %v6821_v52, %v8825_v18  ;;  %v10925_v35 = vld [vmem:[%s12835_s1 + $0x41] ss:$2 sm:$0xff] }
 0x128   :  { %v4047_v47 = vadd.f32 %v4046_v51, %v4045_v49  ;;  %v8119_v48 = vsel %vm3822_vm0, %v6828_v58, 0.0  ;;  %v10917_v43 = vmul.f32 %v10174_v54, %v46_v44  ;;  %v2985_v16 = vrot.slane %v2971_v40, %v8825_v18 }
 0x129   :  { %v2988_v53 = vcombine.high %v2380_v28, %v2380_v28  ;;  %v4050_v37 = vsel %vm3822_vm0, %v2968_v46, 0.0  ;;  %v2986_v17 = vcombine.high %v2978_v14, %v2978_v14  ;;  %v2995_v20 = vrot.slane %v2380_v28, %v8825_v18 }
 0x12a   :  { %v4049_v45 = vadd.f32 %v4048_v56, %v4047_v47  ;;  %v8121_v8 = vsel %vm3822_vm0, %v6836_v19, 0.0  ;;  %v4052_v58 = vsel %vm3822_vm0, %v2970_v24, 0.0  ;;  %v5583_v54 = vrot.slane %v5575_v7, %v8825_v18 }
 0x12b   :  { %v5590_v38 = vrot.slane %v5576_v15, %v8825_v18  ;;  %v8120_v59 = vadd.f32 %v8119_v48, %v8118_v30  ;;  %v6837_v46 = vcombine.high %v6835_v34, %v6835_v34  ;;  %v6845_v52 = vrot.slane %v6614_v21, %v8825_v18 }
 0x12c   :  { %v4051_v62 = vadd.f32 %v4050_v37, %v4049_v45  ;;  %v8123_v25 = vsel %vm3822_vm0, %v6835_v34, 0.0  ;;  %v4054_v41 = vsel %vm3822_vm0, %v2978_v14, 0.0  ;;  %v4563_v28 = vrot.slane %v10925_v35, %v8793_v4 }
 0x12d   :  { %v4567_v40 = vrot.slane %v10925_v35, %v8795_v5  ;;  %v8122_v51 = vadd.f32 %v8121_v8, %v8120_v59  ;;  %v4571_v44 = vrot.slane %v10925_v35, %v8797_v6  ;;  %v4575_v24 = vrot.slane %v10925_v35, %v8804_v9 }
 0x12e   :  { %v4053_v33 = vadd.f32 %v4052_v58, %v4051_v62  ;;  %v6838_v49 = vcombine.high %v6614_v21, %v6614_v21  ;;  %v2987_v19 = vcombine.high %v2985_v16, %v2985_v16  ;;  %v3002_v56 = vrot.slane %v2988_v53, %v8825_v18 }
 0x12f   :  { %v4056_v14 = vsel %vm3822_vm0, %v2986_v17, 0.0  ;;  %v8124_v7 = vadd.f32 %v8123_v25, %v8122_v51  ;;  %v5591_v30 = vcombine.low %v5583_v54, %v5590_v38  ;;  %v6853_v47 = vcombine.high %v6845_v52, %v6845_v52  ;;  %v47_v51 = vld [vmem:[%s12834_s0 + $0x100] sm:$0xff] }
 0x130   :  { %v4055_v15 = vadd.f32 %v4054_v41, %v4053_v33  ;;  %v8125_v57 = vsel %vm3822_vm0, %v6837_v46, 0.0  ;;  %v2226_v34 = vrot.slane %v10731_v63, %v8825_v18  ;;  %v3005_v48 = vcombine.high %v10917_v43, %v10917_v43  ;;  %v8699_v63 = vld [vmem:[%s12834_s0 + $0x70] sm:$0xff] }
 0x131   :  { %v4058_v37 = vsel %vm3822_vm0, %v2985_v16, 0.0  ;;  %v5592_v21 = vcombine.low %v4563_v28, %v4567_v40  ;;  %v5593_v8 = vcombine.low %v4571_v44, %v4575_v24  ;;  %v6852_v53 = vrot.slane %v6838_v49, %v8825_v18  ;;  %v8692_v16 = vld [vmem:[%s12834_s0 + $0x38] sm:$0xff] }
 0x132   :  { %v4057_v45 = vadd.f32 %v4056_v14, %v4055_v15  ;;  %v8127_v17 = vsel %vm3822_vm0, %v6845_v52, 0.0  ;;  %v3003_v58 = vcombine.high %v2995_v20, %v2995_v20  ;;  %v3012_v54 = vrot.slane %v10917_v43, %v8825_v18 }
 0x133   :  { %v4060_v38 = vsel %vm3822_vm0, %v2987_v19, 0.0  ;;  %v8126_v59 = vadd.f32 %v8125_v57, %v8124_v7  ;;  %v3004_v62 = vcombine.high %v3002_v56, %v3002_v56  ;;  %v6615_v25 = vmul.f32 %v8692_v16, %v5591_v30 }
 0x134   :  { %v4059_v46 = vadd.f32 %v4058_v37, %v4057_v45  ;;  %v8129_v41 = vsel %vm3822_vm0, %v6853_v47, 0.0  ;;  %v4062_v28 = vsel %vm3822_vm0, %v2995_v20, 0.0  ;;  %v4579_v52 = vrot.slane %v10925_v35, %v8806_v10 }
 0x135   :  { %v4583_v43 = vrot.slane %v10925_v35, %v8808_v11  ;;  %v8128_v40 = vadd.f32 %v8127_v17, %v8126_v59  ;;  %v5600_v44 = vrot.slane %v5592_v21, %v8825_v18  ;;  %v5607_v24 = vrot.slane %v5593_v8, %v8825_v18 }
 0x136   :  { %v4061_v33 = vadd.f32 %v4060_v38, %v4059_v46  ;;  %v6854_v49 = vcombine.high %v6852_v53, %v6852_v53  ;;  %v4064_v19 = vsel %vm3822_vm0, %v3003_v58, 0.0  ;;  %v4587_v20 = vrot.slane %v10925_v35, %v8810_v12 }
 0x137   :  { %v4591_v14 = vrot.slane %v10925_v35, %v8812_v13  ;;  %v8130_v7 = vadd.f32 %v8129_v41, %v8128_v40  ;;  %v6855_v30 = vcombine.high %v6615_v25, %v6615_v25  ;;  %v6862_v47 = vrot.slane %v6615_v25, %v8825_v18 }
 0x138   :  { %v4063_v15 = vadd.f32 %v4062_v28, %v4061_v33  ;;  %v8131_v57 = vsel %vm3822_vm0, %v6852_v53, 0.0  ;;  %v13089_v37 = vrot.slane %v13079_v50, %v8808_v11  ;;  %v13090_v21 = vrot.slane %v13079_v50, %v8806_v10  ;;  %v48_v53 = vld [vmem:[%s12834_s0 + $0x108] sm:$0xff] }
 0x139   :  { %v2382_v8 = vmul.f32 %v10176_v39, %v47_v51  ;;  %v3019_v17 = vrot.slane %v3005_v48, %v8825_v18  ;;  %v4066_v35 = vsel %vm3822_vm0, %v3002_v56, 0.0  ;;  %v3020_v58 = vcombine.high %v3012_v54, %v3012_v54 }
 0x13a   :  { %v10982_v45 = vcombine.low %v13090_v21, %v13089_v37  ;;  %v4065_v38 = vadd.f32 %v4064_v19, %v4063_v15  ;;  %v5608_v59 = vcombine.low %v5600_v44, %v5607_v24  ;;  %v8133_v46 = vsel %vm3822_vm0, %v6854_v49, 0.0 }
 0x13b   :  { %v4068_v16 = vsel %vm3822_vm0, %v3004_v62, 0.0  ;;  %v5609_v25 = vcombine.low %v4579_v52, %v4583_v43  ;;  %v5610_v41 = vcombine.low %v4587_v20, %v4591_v14  ;;  %v8132_v28 = vadd.f32 %v8131_v57, %v8130_v7  ;;  %v11008_v20 = vld [vmem:[%s12835_s1 + $0x51] ss:$2 sm:$0xff] }
 0x13c   :  { %v4067_v40 = vadd.f32 %v4066_v35, %v4065_v38  ;;  %v6869_v39 = vrot.slane %v6855_v30, %v8825_v18  ;;  %v6870_v48 = vcombine.high %v6862_v47, %v6862_v47  ;;  %v8135_v56 = vsel %vm3822_vm0, %v6862_v47, 0.0 }
 0x13d   :  { %v3022_v51 = vcombine.high %v2382_v8, %v2382_v8  ;;  %v3029_v33 = vrot.slane %v2382_v8, %v8825_v18  ;;  %v4070_v44 = vsel %vm3822_vm0, %v3012_v54, 0.0  ;;  %v8134_v24 = vadd.f32 %v8133_v46, %v8132_v28  ;;  %v8693_v54 = vld [vmem:[%s12834_s0 + $0x40] sm:$0xff] }
 0x13e   :  { %v13091_v49 = vrot.slane %v13079_v50, %v8812_v13  ;;  %v13092_v62 = vrot.slane %v13079_v50, %v8810_v12  ;;  %v2383_v43 = vmul.f32 %v10178_v26, %v48_v53  ;;  %v4069_v19 = vadd.f32 %v4068_v16, %v4067_v40 }
 0x13f   :  { %v6616_v14 = vmul.f32 %v8693_v54, %v5608_v59  ;;  %v3021_v7 = vcombine.high %v3019_v17, %v3019_v17  ;;  %v4072_v15 = vsel %vm3822_vm0, %v3020_v58, 0.0  ;;  %v5617_v50 = vrot.slane %v5609_v25, %v8825_v18  ;;  %v49_v58 = vld [vmem:[%s12834_s0 + $0x110] sm:$0xff] }
 0x140   :  { %v11002_v52 = vcombine.low %v13092_v62, %v13091_v49  ;;  %v8136_v30 = vadd.f32 %v8135_v56, %v8134_v24  ;;  %v4071_v47 = vadd.f32 %v4070_v44, %v4069_v19  ;;  %v5624_v26 = vrot.slane %v5610_v41, %v8825_v18  ;;  %v50_v62 = vld [vmem:[%s12834_s0 + $0x118] sm:$0xff] }
 0x141   :  { %v6871_v57 = vcombine.high %v6869_v39, %v6869_v39  ;;  %v8137_v37 = vsel %vm3822_vm0, %v6870_v48, 0.0  ;;  %v3036_v21 = vrot.slane %v3022_v51, %v8825_v18  ;;  %v3037_v8 = vcombine.high %v3029_v33, %v3029_v33 }
 0x142   :  { %v4074_v35 = vsel %vm3822_vm0, %v3019_v17, 0.0  ;;  %v4595_v38 = vrot.slane %v11008_v20, %v8793_v4  ;;  %v4073_v59 = vadd.f32 %v4072_v15, %v4071_v47  ;;  %v4599_v46 = vrot.slane %v11008_v20, %v8795_v5 }
 0x143   :  { %v6879_v53 = vrot.slane %v6616_v14, %v8825_v18  ;;  %v8139_v16 = vsel %vm3822_vm0, %v6869_v39, 0.0  ;;  %v4076_v25 = vsel %vm3822_vm0, %v3021_v7, 0.0  ;;  %v4603_v17 = vrot.slane %v11008_v20, %v8797_v6 }
 0x144   :  { %v4607_v41 = vrot.slane %v11008_v20, %v8804_v9  ;;  %v8138_v28 = vadd.f32 %v8137_v37, %v8136_v30  ;;  %v4075_v40 = vadd.f32 %v4074_v35, %v4073_v59  ;;  %v5625_v48 = vcombine.low %v5617_v50, %v5624_v26 }
 0x145   :  { %v6872_v56 = vcombine.high %v6616_v14, %v6616_v14  ;;  %v8141_v51 = vsel %vm3822_vm0, %v6871_v57, 0.0  ;;  %v2384_v44 = vmul.f32 %v10181_v42, %v49_v58  ;;  %v3039_v24 = vcombine.high %v2383_v43, %v2383_v43  ;;  %v8694_v42 = vld [vmem:[%s12834_s0 + $0x48] sm:$0xff] }
 0x146   :  { %v4078_v49 = vsel %vm3822_vm0, %v3029_v33, 0.0  ;;  %v8140_v39 = vadd.f32 %v8139_v16, %v8138_v28  ;;  %v3038_v19 = vcombine.high %v3036_v21, %v3036_v21  ;;  %v3046_v54 = vrot.slane %v2383_v43, %v8825_v18 }
 0x147   :  { %v4077_v7 = vadd.f32 %v4076_v25, %v4075_v40  ;;  %v6887_v15 = vcombine.high %v6879_v53, %v6879_v53  ;;  %v4080_v50 = vsel %vm3822_vm0, %v3037_v8, 0.0  ;;  %v5626_v14 = vcombine.low %v4595_v38, %v4599_v46 }
 0x148   :  { %v5627_v30 = vcombine.low %v4603_v17, %v4607_v41  ;;  %v8142_v47 = vadd.f32 %v8141_v51, %v8140_v39  ;;  %v6617_v33 = vmul.f32 %v8694_v42, %v5625_v48  ;;  %v6886_v57 = vrot.slane %v6872_v56, %v8825_v18 }
 0x149   :  { %v4079_v26 = vadd.f32 %v4078_v49, %v4077_v7  ;;  %v8143_v37 = vsel %vm3822_vm0, %v6879_v53, 0.0  ;;  %v11047_v35 = vmul.f32 %v10198_v0, %v50_v62  ;;  %v3053_v43 = vrot.slane %v3039_v24, %v8825_v18 }
 0x14a   :  { %v3056_v58 = vcombine.high %v2384_v44, %v2384_v44  ;;  %v4082_v8 = vsel %vm3822_vm0, %v3036_v21, 0.0  ;;  %v3054_v38 = vcombine.high %v3046_v54, %v3046_v54  ;;  %v3063_v59 = vrot.slane %v2384_v44, %v8825_v18 }
 0x14b   :  { %v4081_v46 = vadd.f32 %v4080_v50, %v4079_v26  ;;  %v8145_v16 = vsel %vm3822_vm0, %v6887_v15, 0.0  ;;  %v4084_v25 = vsel %vm3822_vm0, %v3038_v19, 0.0  ;;  %v5634_v17 = vrot.slane %v5626_v14, %v8825_v18 }
 0x14c   :  { %v5641_v53 = vrot.slane %v5627_v30, %v8825_v18  ;;  %v8144_v41 = vadd.f32 %v8143_v37, %v8142_v47  ;;  %v6888_v28 = vcombine.high %v6886_v57, %v6886_v57  ;;  %v6896_v40 = vrot.slane %v6617_v33, %v8825_v18 }
 0x14d   :  { %v4083_v0 = vadd.f32 %v4082_v8, %v4081_v46  ;;  %v8147_v48 = vsel %vm3822_vm0, %v6886_v57, 0.0  ;;  %v4086_v21 = vsel %vm3822_vm0, %v3046_v54, 0.0  ;;  %v4611_v56 = vrot.slane %v11008_v20, %v8806_v10 }
 0x14e   :  { %v4615_v51 = vrot.slane %v11008_v20, %v8808_v11  ;;  %v8146_v44 = vadd.f32 %v8145_v16, %v8144_v41  ;;  %v4619_v49 = vrot.slane %v11008_v20, %v8810_v12  ;;  %v4623_v39 = vrot.slane %v11008_v20, %v8812_v13 }
 0x14f   :  { %v4085_v24 = vadd.f32 %v4084_v25, %v4083_v0  ;;  %v6889_v62 = vcombine.high %v6617_v33, %v6617_v33  ;;  %v3055_v19 = vcombine.high %v3053_v43, %v3053_v43  ;;  %v3070_v7 = vrot.slane %v3056_v58, %v8825_v18  ;;  %v11084_v58 = vld [vmem:[%s12835_s1 + $0x61] ss:$2 sm:$0xff] }
 0x150   :  { %v4088_v54 = vsel %vm3822_vm0, %v3054_v38, 0.0  ;;  %v8148_v15 = vadd.f32 %v8147_v48, %v8146_v44  ;;  %v5642_v14 = vcombine.low %v5634_v17, %v5641_v53  ;;  %v6904_v30 = vcombine.high %v6896_v40, %v6896_v40  ;;  %v8695_v17 = vld [vmem:[%s12834_s0 + $0x50] sm:$0xff]  ;;  %v51_v48 = vld [vmem:[%s12834_s0 + $0x120] sm:$0xff] }
 0x151   :  { %v4087_v50 = vadd.f32 %v4086_v21, %v4085_v24  ;;  %v8149_v47 = vsel %vm3822_vm0, %v6888_v28, 0.0  ;;  %v13093_v26 = vrot.slane %v10641_v27, %v8825_v18  ;;  %v3073_v20 = vcombine.high %v11047_v35, %v11047_v35 }
 0x152   :  { %v4090_v33 = vsel %vm3822_vm0, %v3053_v43, 0.0  ;;  %v5643_v57 = vcombine.low %v4611_v56, %v4615_v51  ;;  %v5644_v8 = vcombine.low %v4619_v49, %v4623_v39  ;;  %v6903_v31 = vrot.slane %v6889_v62, %v8825_v18 }
 0x153   :  { %v11076_v42 = vcombine.low %v13093_v26, %v2216_v32  ;;  %v4089_v37 = vadd.f32 %v4088_v54, %v4087_v50  ;;  %v8151_v38 = vsel %vm3822_vm0, %v6896_v40, 0.0  ;;  %v3071_v27 = vcombine.high %v3063_v59, %v3063_v59 }
 0x154   :  { %v3080_v32 = vrot.slane %v11047_v35, %v8825_v18  ;;  %v4092_v46 = vsel %vm3822_vm0, %v3055_v19, 0.0  ;;  %v8150_v16 = vadd.f32 %v8149_v47, %v8148_v15  ;;  %v3072_v43 = vcombine.high %v3070_v7, %v3070_v7 }
 0x155   :  { %v4091_v25 = vadd.f32 %v4090_v33, %v4089_v37  ;;  %v6618_v53 = vmul.f32 %v8695_v17, %v5642_v14  ;;  %v8153_v41 = vsel %vm3822_vm0, %v6904_v30, 0.0  ;;  %v4094_v0 = vsel %vm3822_vm0, %v3063_v59, 0.0  ;;  %v13094_v14 = vld [vmem:[#allocation11_spill] sm:$0xff] }
 0x156   :  { %v4627_v28 = vrot.slane %v11084_v58, %v8793_v4  ;;  %v4631_v35 = vrot.slane %v11084_v58, %v8795_v5  ;;  %v8152_v40 = vadd.f32 %v8151_v38, %v8150_v16  ;;  %v5651_v56 = vrot.slane %v5643_v57, %v8825_v18  ;;  %v52_v38 = vld [vmem:[%s12834_s0 + $0x128] sm:$0xff] }
 0x157   :  { %v4093_v21 = vadd.f32 %v4092_v46, %v4091_v25  ;;  %v5658_v51 = vrot.slane %v5644_v8, %v8825_v18  ;;  %v6905_v44 = vcombine.high %v6903_v31, %v6903_v31  ;;  %v4096_v24 = vsel %vm3822_vm0, %v3071_v27, 0.0 }
 0x158   :  { %v4635_v59 = vrot.slane %v11084_v58, %v8797_v6  ;;  %v4639_v49 = vrot.slane %v11084_v58, %v8804_v9  ;;  %v8154_v39 = vadd.f32 %v8153_v41, %v8152_v40  ;;  %v6906_v19 = vcombine.high %v6618_v53, %v6618_v53 }
 0x159   :  { %v4095_v62 = vadd.f32 %v4094_v0, %v4093_v21  ;;  %v6913_v54 = vrot.slane %v6618_v53, %v8825_v18  ;;  %v8155_v15 = vsel %vm3822_vm0, %v6903_v31, 0.0  ;;  %v2233_v50 = vrot.slane %v10857_v2, %v8825_v18 }
 0x15a   :  { %v2386_v30 = vmul.f32 %v13094_v14, %v51_v48  ;;  %v3087_v47 = vrot.slane %v3073_v20, %v8825_v18  ;;  %v4098_v26 = vsel %vm3822_vm0, %v3070_v7, 0.0  ;;  %v3088_v33 = vcombine.high %v3080_v32, %v3080_v32  ;;  %v13095_v48 = vld [vmem:[#allocation7_spill] sm:$0xff] }
 0x15b   :  { %v4097_v57 = vadd.f32 %v4096_v24, %v4095_v62  ;;  %v5659_v37 = vcombine.low %v5651_v56, %v5658_v51  ;;  %v8157_v8 = vsel %vm3822_vm0, %v6905_v44, 0.0  ;;  %v4100_v31 = vsel %vm3822_vm0, %v3072_v43, 0.0  ;;  %v8696_v51 = vld [vmem:[%s12834_s0 + $0x58] sm:$0xff] }
 0x15c   :  { %v5660_v27 = vcombine.low %v4627_v28, %v4631_v35  ;;  %v5661_v46 = vcombine.low %v4635_v59, %v4639_v49  ;;  %v8156_v16 = vadd.f32 %v8155_v15, %v8154_v39  ;;  %v6920_v17 = vrot.slane %v6906_v19, %v8825_v18 }
 0x15d   :  { %v4099_v25 = vadd.f32 %v4098_v26, %v4097_v57  ;;  %v6921_v20 = vcombine.high %v6913_v54, %v6913_v54  ;;  %v8159_v7 = vsel %vm3822_vm0, %v6913_v54, 0.0  ;;  %v3090_v53 = vcombine.high %v2386_v30, %v2386_v30  ;;  %v53_v26 = vld [vmem:[%s12834_s0 + $0x130] sm:$0xff] }
 0x15e   :  { %v3097_v41 = vrot.slane %v2386_v30, %v8825_v18  ;;  %v4102_v0 = vsel %vm3822_vm0, %v3080_v32, 0.0  ;;  %v8158_v40 = vadd.f32 %v8157_v8, %v8156_v16  ;;  %v13096_v21 = vrot.slane %v13095_v48, %v8795_v5 }
 0x15f   :  { %v13097_v43 = vrot.slane %v13095_v48, %v8793_v4  ;;  %v2387_v35 = vmul.f32 %v10268_v60, %v52_v38  ;;  %v4101_v56 = vadd.f32 %v4100_v31, %v4099_v25  ;;  %v6619_v44 = vmul.f32 %v8696_v51, %v5659_v37 }
 0x160   :  { %v3089_v24 = vcombine.high %v3087_v47, %v3087_v47  ;;  %v4104_v32 = vsel %vm3822_vm0, %v3088_v33, 0.0  ;;  %v5668_v59 = vrot.slane %v5660_v27, %v8825_v18  ;;  %v8160_v49 = vadd.f32 %v8159_v7, %v8158_v40 }
 0x161   :  { %v11132_v28 = vcombine.low %v13097_v43, %v13096_v21  ;;  %v4103_v39 = vadd.f32 %v4102_v0, %v4101_v56  ;;  %v5675_v62 = vrot.slane %v5661_v46, %v8825_v18  ;;  %v6922_v19 = vcombine.high %v6920_v17, %v6920_v17 }
 0x162   :  { %v8161_v54 = vsel %vm3822_vm0, %v6921_v20, 0.0  ;;  %v3104_v60 = vrot.slane %v3090_v53, %v8825_v18  ;;  %v3105_v15 = vcombine.high %v3097_v41, %v3097_v41  ;;  %v4106_v14 = vsel %vm3822_vm0, %v3087_v47, 0.0 }
 0x163   :  { %v4643_v30 = vrot.slane %v11084_v58, %v8806_v10  ;;  %v4105_v33 = vadd.f32 %v4104_v32, %v4103_v39  ;;  %v4647_v57 = vrot.slane %v11084_v58, %v8808_v11  ;;  %v6930_v37 = vrot.slane %v6619_v44, %v8825_v18 }
 0x164   :  { %v8163_v8 = vsel %vm3822_vm0, %v6920_v17, 0.0  ;;  %v4108_v38 = vsel %vm3822_vm0, %v3089_v24, 0.0  ;;  %v4651_v47 = vrot.slane %v11084_v58, %v8810_v12  ;;  %v4655_v31 = vrot.slane %v11084_v58, %v8812_v13 }
 0x165   :  { %v8162_v27 = vadd.f32 %v8161_v54, %v8160_v49  ;;  %v4107_v46 = vadd.f32 %v4106_v14, %v4105_v33  ;;  %v5676_v16 = vcombine.low %v5668_v59, %v5675_v62  ;;  %v6923_v25 = vcombine.high %v6619_v44, %v6619_v44  ;;  %v8697_v44 = vld [vmem:[%s12834_s0 + $0x60] sm:$0xff]  ;;  %v11183_v33 = vld [vmem:[%s12835_s1 + $0x71] ss:$2 sm:$0xff] }
 0x166   :  { %v8165_v20 = vsel %vm3822_vm0, %v6922_v19, 0.0  ;;  %v2388_v7 = vmul.f32 %v10272_v29, %v53_v26  ;;  %v3107_v53 = vcombine.high %v2387_v35, %v2387_v35  ;;  %v4110_v0 = vsel %vm3822_vm0, %v3097_v41, 0.0 }
 0x167   :  { %v8164_v17 = vadd.f32 %v8163_v8, %v8162_v27  ;;  %v3106_v40 = vcombine.high %v3104_v60, %v3104_v60  ;;  %v3114_v21 = vrot.slane %v2387_v35, %v8825_v18  ;;  %v4109_v43 = vadd.f32 %v4108_v38, %v4107_v46 }
 0x168   :  { %v6938_v56 = vcombine.high %v6930_v37, %v6930_v37  ;;  %v4112_v51 = vsel %vm3822_vm0, %v3105_v15, 0.0  ;;  %v5677_v58 = vcombine.low %v4643_v30, %v4647_v57  ;;  %v5678_v24 = vcombine.low %v4651_v47, %v4655_v31 }
 0x169   :  { %v8166_v32 = vadd.f32 %v8165_v20, %v8164_v17  ;;  %v4111_v59 = vadd.f32 %v4110_v0, %v4109_v43  ;;  %v6620_v29 = vmul.f32 %v8697_v44, %v5676_v16  ;;  %v6937_v49 = vrot.slane %v6923_v25, %v8825_v18  ;;  %v54_v0 = vld [vmem:[%s12834_s0 + $0x138] sm:$0xff] }
 0x16a   :  { %v8167_v41 = vsel %vm3822_vm0, %v6930_v37, 0.0  ;;  %v2243_v35 = vrot.slane %v10982_v45, %v8825_v18  ;;  %v13098_v39 = vrot.slane %v13095_v48, %v8804_v9  ;;  %v13099_v62 = vrot.slane %v13095_v48, %v8797_v6 }
 0x16b   :  { %v3121_v54 = vrot.slane %v3107_v53, %v8825_v18  ;;  %v4114_v15 = vsel %vm3822_vm0, %v3104_v60, 0.0  ;;  %v3122_v14 = vcombine.high %v3114_v21, %v3114_v21  ;;  %v3124_v30 = vcombine.high %v2388_v7, %v2388_v7 }
 0x16c   :  { %v11176_v19 = vcombine.low %v13099_v62, %v13098_v39  ;;  %v4113_v26 = vadd.f32 %v4112_v51, %v4111_v59  ;;  %v8169_v57 = vsel %vm3822_vm0, %v6938_v56, 0.0  ;;  %v4116_v37 = vsel %vm3822_vm0, %v3106_v40, 0.0 }
 0x16d   :  { %v5685_v8 = vrot.slane %v5677_v58, %v8825_v18  ;;  %v5692_v38 = vrot.slane %v5678_v24, %v8825_v18  ;;  %v8168_v47 = vadd.f32 %v8167_v41, %v8166_v32  ;;  %v6939_v27 = vcombine.high %v6937_v49, %v6937_v49 }
 0x16e   :  { %v4115_v31 = vadd.f32 %v4114_v15, %v4113_v26  ;;  %v6947_v60 = vrot.slane %v6620_v29, %v8825_v18  ;;  %v8171_v46 = vsel %vm3822_vm0, %v6937_v49, 0.0  ;;  %v4118_v16 = vsel %vm3822_vm0, %v3114_v21, 0.0 }
 0x16f   :  { %v4659_v25 = vrot.slane %v11183_v33, %v8793_v4  ;;  %v4663_v20 = vrot.slane %v11183_v33, %v8795_v5  ;;  %v8170_v53 = vadd.f32 %v8169_v57, %v8168_v47  ;;  %v4667_v40 = vrot.slane %v11183_v33, %v8797_v6  ;;  %v55_v47 = vld [vmem:[%s12834_s0 + $0x140] sm:$0xff] }
 0x170   :  { %v4117_v17 = vadd.f32 %v4116_v37, %v4115_v31  ;;  %v4671_v43 = vrot.slane %v11183_v33, %v8804_v9  ;;  %v6940_v56 = vcombine.high %v6620_v29, %v6620_v29  ;;  %v3123_v21 = vcombine.high %v3121_v54, %v3121_v54 }
 0x171   :  { %v3131_v51 = vrot.slane %v2388_v7, %v8825_v18  ;;  %v4120_v58 = vsel %vm3822_vm0, %v3122_v14, 0.0  ;;  %v8172_v24 = vadd.f32 %v8171_v46, %v8170_v53  ;;  %v5693_v59 = vcombine.low %v5685_v8, %v5692_v38 }
 0x172   :  { %v4119_v32 = vadd.f32 %v4118_v16, %v4117_v17  ;;  %v6955_v44 = vcombine.high %v6947_v60, %v6947_v60  ;;  %v8173_v49 = vsel %vm3822_vm0, %v6939_v27, 0.0  ;;  %v2250_v41 = vrot.slane %v11002_v52, %v8825_v18 }
 0x173   :  { %v2389_v39 = vmul.f32 %v10287_v36, %v54_v0  ;;  %v4122_v62 = vsel %vm3822_vm0, %v3121_v54, 0.0  ;;  %v5694_v15 = vcombine.low %v4659_v25, %v4663_v20  ;;  %v5695_v26 = vcombine.low %v4667_v40, %v4671_v43 }
 0x174   :  { %v4121_v29 = vadd.f32 %v4120_v58, %v4119_v32  ;;  %v6954_v7 = vrot.slane %v6940_v56, %v8825_v18  ;;  %v8175_v14 = vsel %vm3822_vm0, %v6947_v60, 0.0  ;;  %v3138_v57 = vrot.slane %v3124_v30, %v8825_v18  ;;  %v8698_v30 = vld [vmem:[%s12834_s0 + $0x68] sm:$0xff]  ;;  %v13102_v56 = vld [vmem:[#allocation12_spill] sm:$0xff] }
 0x175   :  { %v3139_v37 = vcombine.high %v3131_v51, %v3131_v51  ;;  %v4124_v8 = vsel %vm3822_vm0, %v3123_v21, 0.0  ;;  %v8174_v38 = vadd.f32 %v8173_v49, %v8172_v24  ;;  %v13100_v36 = vrot.slane %v13095_v48, %v8808_v11 }
 0x176   :  { %v13101_v54 = vrot.slane %v13095_v48, %v8806_v10  ;;  %v4123_v27 = vadd.f32 %v4122_v62, %v4121_v29  ;;  %v6621_v60 = vmul.f32 %v8698_v30, %v5693_v59  ;;  %v8177_v46 = vsel %vm3822_vm0, %v6955_v44, 0.0 }
 0x177   :  { %v3141_v16 = vcombine.high %v2389_v39, %v2389_v39  ;;  %v3148_v25 = vrot.slane %v2389_v39, %v8825_v18  ;;  %v4126_v20 = vsel %vm3822_vm0, %v3131_v51, 0.0  ;;  %v8176_v53 = vadd.f32 %v8175_v14, %v8174_v38 }
 0x178   :  { %v11223_v31 = vcombine.low %v13101_v54, %v13100_v36  ;;  %v4125_v0 = vadd.f32 %v4124_v8, %v4123_v27  ;;  %v5702_v17 = vrot.slane %v5694_v15, %v8825_v18  ;;  %v5709_v40 = vrot.slane %v5695_v26, %v8825_v18 }
 0x179   :  { %v6956_v43 = vcombine.high %v6954_v7, %v6954_v7  ;;  %v2390_v21 = vmul.f32 %v13102_v56, %v55_v47  ;;  %v3140_v58 = vcombine.high %v3138_v57, %v3138_v57  ;;  %v4128_v24 = vsel %vm3822_vm0, %v3139_v37, 0.0 }
 0x17a   :  { %v8178_v32 = vadd.f32 %v8177_v46, %v8176_v53  ;;  %v4127_v59 = vadd.f32 %v4126_v20, %v4125_v0  ;;  %v6957_v44 = vcombine.high %v6621_v60, %v6621_v60  ;;  %v6964_v49 = vrot.slane %v6621_v60, %v8825_v18 }
 0x17b   :  { %v8179_v39 = vsel %vm3822_vm0, %v6954_v7, 0.0  ;;  %v3155_v51 = vrot.slane %v3141_v16, %v8825_v18  ;;  %v3156_v62 = vcombine.high %v3148_v25, %v3148_v25  ;;  %v4130_v15 = vsel %vm3822_vm0, %v3138_v57, 0.0 }
 0x17c   :  { %v4675_v29 = vrot.slane %v11183_v33, %v8806_v10  ;;  %v4129_v26 = vadd.f32 %v4128_v24, %v4127_v59  ;;  %v4679_v14 = vrot.slane %v11183_v33, %v8808_v11  ;;  %v5710_v37 = vcombine.low %v5702_v17, %v5709_v40 }
 0x17d   :  { %v8181_v8 = vsel %vm3822_vm0, %v6956_v43, 0.0  ;;  %v4132_v38 = vsel %vm3822_vm0, %v3140_v58, 0.0  ;;  %v4683_v7 = vrot.slane %v11183_v33, %v8810_v12  ;;  %v4687_v47 = vrot.slane %v11183_v33, %v8812_v13 }
 0x17e   :  { %v8180_v36 = vadd.f32 %v8179_v39, %v8178_v32  ;;  %v4131_v57 = vadd.f32 %v4130_v15, %v4129_v26  ;;  %v6971_v54 = vrot.slane %v6957_v44, %v8825_v18  ;;  %v6972_v27 = vcombine.high %v6964_v49, %v6964_v49 }
 0x17f   :  { %v8183_v30 = vsel %vm3822_vm0, %v6964_v49, 0.0  ;;  %v11257_v60 = vcombine.low %v2226_v34, %v2233_v50  ;;  %v13103_v46 = vrot.slane %v13095_v48, %v8812_v13  ;;  %v13104_v33 = vrot.slane %v13095_v48, %v8810_v12  ;;  %v56_v34 = vld [vmem:[%s12834_s0 + $0x148] sm:$0xff] }
 0x180   :  { %v4134_v20 = vsel %vm3822_vm0, %v3148_v25, 0.0  ;;  %v8182_v53 = vadd.f32 %v8181_v8, %v8180_v36  ;;  %v3158_v0 = vcombine.high %v2390_v21, %v2390_v21  ;;  %v3165_v17 = vrot.slane %v2390_v21, %v8825_v18  ;;  %v57_v36 = vld [vmem:[%s12834_s0 + $0x150] sm:$0xff] }
 0x181   :  { %v2270_v16 = vcombine.low %v13104_v33, %v13103_v46  ;;  %v4133_v40 = vadd.f32 %v4132_v38, %v4131_v57  ;;  %v6622_v2 = vmul.f32 %v8699_v63, %v5710_v37  ;;  %v3157_v50 = vcombine.high %v3155_v51, %v3155_v51 }
 0x182   :  { %v4136_v48 = vsel %vm3822_vm0, %v3156_v62, 0.0  ;;  %v5711_v43 = vcombine.low %v4675_v29, %v4679_v14  ;;  %v8184_v56 = vadd.f32 %v8183_v30, %v8182_v53  ;;  %v5712_v58 = vcombine.low %v4683_v7, %v4687_v47 }
 0x183   :  { %v4135_v25 = vadd.f32 %v4134_v20, %v4133_v40  ;;  %v6973_v24 = vcombine.high %v6971_v54, %v6971_v54  ;;  %v8185_v21 = vsel %vm3822_vm0, %v6972_v27, 0.0  ;;  %v2260_v32 = vrot.slane %v11132_v28, %v8825_v18 }
 0x184   :  { %v2267_v59 = vrot.slane %v11176_v19, %v8825_v18  ;;  %v2277_v44 = vrot.slane %v11223_v31, %v8825_v18  ;;  %v4138_v49 = vsel %vm3822_vm0, %v3155_v51, 0.0  ;;  %v2391_v39 = vmul.f32 %v10340_v22, %v56_v34 }
 0x185   :  { %v4137_v62 = vadd.f32 %v4136_v48, %v4135_v25  ;;  %v6981_v15 = vrot.slane %v6622_v2, %v8825_v18  ;;  %v8187_v29 = vsel %vm3822_vm0, %v6971_v54, 0.0  ;;  %v3172_v26 = vrot.slane %v3158_v0, %v8825_v18 }
 0x186   :  { %v3173_v14 = vcombine.high %v3165_v17, %v3165_v17  ;;  %v4140_v28 = vsel %vm3822_vm0, %v3157_v50, 0.0  ;;  %v8186_v37 = vadd.f32 %v8185_v21, %v8184_v56  ;;  %v5719_v19 = vrot.slane %v5711_v43, %v8825_v18  ;;  %v58_v43 = vld [vmem:[%s12834_s0 + $0x158] sm:$0xff]  ;;  %v59_v56 = vld [vmem:[%s12834_s0 + $0x160] sm:$0xff] }
 0x187   :  { %v4139_v8 = vadd.f32 %v4138_v49, %v4137_v62  ;;  %v5726_v31 = vrot.slane %v5712_v58, %v8825_v18  ;;  %v8189_v51 = vsel %vm3822_vm0, %v6973_v24, 0.0  ;;  %v2284_v22 = vrot.slane %v2270_v16, %v8825_v18  ;;  %v8700_v49 = vld [vmem:[%s12834_s0 + $0x78] sm:$0xff] }
 0x188   :  { %v4142_v38 = vsel %vm3822_vm0, %v3165_v17, 0.0  ;;  %v6974_v7 = vcombine.high %v6622_v2, %v6622_v2  ;;  %v8188_v47 = vadd.f32 %v8187_v29, %v8186_v37  ;;  %v3175_v57 = vcombine.high %v2391_v39, %v2391_v39  ;;  %v11310_v17 = vld [vmem:[%s12835_s1 + $0x81] ss:$2 sm:$0xff] }
 0x189   :  { %v3182_v54 = vrot.slane %v2391_v39, %v8825_v18  ;;  %v4141_v27 = vadd.f32 %v4140_v28, %v4139_v8  ;;  %v6989_v30 = vcombine.high %v6981_v15, %v6981_v15  ;;  %v11302_v46 = vcombine.low %v2243_v35, %v2250_v41 }
 0x18a   :  { %v3174_v33 = vcombine.high %v3172_v26, %v3172_v26  ;;  %v4144_v16 = vsel %vm3822_vm0, %v3173_v14, 0.0  ;;  %v8190_v20 = vadd.f32 %v8189_v51, %v8188_v47  ;;  %v11305_v53 = vcombine.low %v2260_v32, %v2267_v59  ;;  %v61_v14 = vld [vmem:[%s12834_s0 + $0x170] sm:$0xff]  ;;  %v63_v51 = vld [vmem:[%s12834_s0 + $0x180] sm:$0xff] }
 0x18b   :  { %v4143_v0 = vadd.f32 %v4142_v38, %v4141_v27  ;;  %v5727_v40 = vcombine.low %v5719_v19, %v5726_v31  ;;  %v8191_v52 = vsel %vm3822_vm0, %v6981_v15, 0.0  ;;  %v11313_v63 = vcombine.low %v2277_v44, %v2284_v22  ;;  %v62_v31 = vld [vmem:[%s12834_s0 + $0x178] sm:$0xff]  ;;  %v64_v22 = vld [vmem:[%s12834_s0 + $0x188] sm:$0xff] }
 0x18c   :  { %v2392_v45 = vmul.f32 %v10366_v23, %v57_v36  ;;  %v4146_v35 = vsel %vm3822_vm0, %v3172_v26, 0.0  ;;  %v6988_v41 = vrot.slane %v6974_v7, %v8825_v18  ;;  %v3189_v2 = vrot.slane %v3175_v57, %v8825_v18  ;;  %v60_v23 = vld [vmem:[%s12834_s0 + $0x168] sm:$0xff]  ;;  %v65_v7 = vld [vmem:[%s12834_s0 + $0x190] sm:$0xff] }
 0x18d   :  { %v3190_v34 = vcombine.high %v3182_v54, %v3182_v54  ;;  %v4145_v50 = vadd.f32 %v4144_v16, %v4143_v0  ;;  %v8193_v48 = vsel %vm3822_vm0, %v6989_v30, 0.0  ;;  %v4148_v25 = vsel %vm3822_vm0, %v3174_v33, 0.0  ;;  %v13105_v27 = vld [vmem:[#allocation13_spill] sm:$0xff]  ;;  %v13106_v0 = vld [vmem:[#allocation14_spill] sm:$0xff] }
 0x18e   :  { %v4691_v58 = vrot.slane %v11310_v17, %v8793_v4  ;;  %v4695_v24 = vrot.slane %v11310_v17, %v8795_v5  ;;  %v8192_v21 = vadd.f32 %v8191_v52, %v8190_v20  ;;  %v4699_v59 = vrot.slane %v11310_v17, %v8797_v6  ;;  %v13107_v52 = vld [vmem:[#allocation15_spill] sm:$0xff] }
 0x18f   :  { %v4147_v32 = vadd.f32 %v4146_v35, %v4145_v50  ;;  %v4703_v44 = vrot.slane %v11310_v17, %v8804_v9  ;;  %v11341_v39 = vmul.f32 %v8700_v49, %v5727_v40  ;;  %v4150_v62 = vsel %vm3822_vm0, %v3182_v54, 0.0  ;;  %v13108_v35 = vld [vmem:[#allocation16_spill] sm:$0xff] }
 0x190   :  { %v6990_v15 = vcombine.high %v6988_v41, %v6988_v41  ;;  %v8194_v29 = vadd.f32 %v8193_v48, %v8192_v21  ;;  %v8195_v26 = vsel %vm3822_vm0, %v6988_v41, 0.0  ;;  %v2393_v28 = vmul.f32 %v10380_v1, %v58_v43  ;;  %v66_v50 = vld [vmem:[%s12834_s0 + $0x198] sm:$0xff]  ;;  %v13109_v48 = vld [vmem:[#allocation17_spill] sm:$0xff] }
 0x191   :  { %v11350_v37 = vmul.f32 %v10385_v61, %v59_v56  ;;  %v11353_v8 = vmul.f32 %v10387_v55, %v60_v23  ;;  %v4149_v19 = vadd.f32 %v4148_v25, %v4147_v32  ;;  %v3191_v1 = vcombine.high %v3189_v2, %v3189_v2  ;;  %v70_v49 = vld [vmem:[%s12834_s0 + $0x1b8] sm:$0xff] }
 0x192   :  { %v3192_v38 = vcombine.high %v2392_v45, %v2392_v45  ;;  %v3199_v61 = vrot.slane %v2392_v45, %v8825_v18  ;;  %v4152_v55 = vsel %vm3822_vm0, %v3190_v34, 0.0  ;;  %v5728_v36 = vcombine.low %v4691_v58, %v4695_v24  ;;  %v68_v58 = vld [vmem:[%s12834_s0 + $0x1a8] sm:$0xff] }
 0x193   :  { %v4151_v47 = vadd.f32 %v4150_v62, %v4149_v19  ;;  %v5729_v57 = vcombine.low %v4699_v59, %v4703_v44  ;;  %v8196_v54 = vadd.f32 %v8195_v26, %v8194_v29  ;;  %v11370_v30 = vmul.f32 %v13105_v27, %v61_v14  ;;  %v69_v44 = vld [vmem:[%s12834_s0 + $0x1b0] sm:$0xff] }
 0x194   :  { %v4154_v33 = vsel %vm3822_vm0, %v3189_v2, 0.0  ;;  %v6998_v16 = vrot.slane %v11341_v39, %v8825_v18  ;;  %v8197_v20 = vsel %vm3822_vm0, %v6990_v15, 0.0  ;;  %v11377_v40 = vmul.f32 %v13106_v0, %v62_v31  ;;  %v67_v2 = vld [vmem:[%s12834_s0 + $0x1a0] sm:$0xff]  ;;  %v13110_v14 = vld [vmem:[#allocation18_spill] sm:$0xff]  ;;  %v13111_v31 = vld [vmem:[#allocation19_spill] sm:$0xff] }
 0x195   :  { %v11380_v45 = vmul.f32 %v13107_v52, %v63_v51  ;;  %v11383_v41 = vmul.f32 %v13108_v35, %v64_v22  ;;  %v4153_v34 = vadd.f32 %v4152_v55, %v4151_v47  ;;  %v11392_v43 = vmul.f32 %v13109_v48, %v65_v7  ;;  %v13114_v27 = vld [vmem:[#allocation22_spill] sm:$0xff] }
 0x196   :  { %v3206_v56 = vrot.slane %v3192_v38, %v8825_v18  ;;  %v3207_v23 = vcombine.high %v3199_v61, %v3199_v61  ;;  %v4156_v25 = vsel %vm3822_vm0, %v3191_v1, 0.0  ;;  %v5736_v21 = vrot.slane %v5728_v36, %v8825_v18  ;;  %v71_v38 = vld [vmem:[%s12834_s0 + $0x1c0] sm:$0xff] }
 0x197   :  { %v4155_v24 = vadd.f32 %v4154_v33, %v4153_v34  ;;  %v5743_v32 = vrot.slane %v5729_v57, %v8825_v18  ;;  %v8198_v59 = vadd.f32 %v8197_v20, %v8196_v54  ;;  %v4158_v62 = vsel %vm3822_vm0, %v3199_v61, 0.0  ;;  %v72_v61 = vld [vmem:[%s12834_s0 + $0x1c8] sm:$0xff] }
 0x198   :  { %v6991_v15 = vcombine.high %v11341_v39, %v11341_v39  ;;  %v7006_v29 = vcombine.high %v6998_v16, %v6998_v16  ;;  %v8199_v26 = vsel %vm3822_vm0, %v6998_v16, 0.0  ;;  %v11412_v19 = vmul.f32 %v13110_v14, %v66_v50  ;;  %v13112_v39 = vld [vmem:[#allocation20_spill] sm:$0xff]  ;;  %v13113_v57 = vld [vmem:[#allocation21_spill] sm:$0xff] }
 0x199   :  { %v11415_v51 = vmul.f32 %v13111_v31, %v67_v2  ;;  %v3209_v22 = vcombine.high %v2393_v28, %v2393_v28  ;;  %v4157_v1 = vadd.f32 %v4156_v25, %v4155_v24  ;;  %v11424_v55 = vmul.f32 %v13112_v39, %v68_v58  ;;  %v13115_v50 = vld [vmem:[#allocation5_spill] sm:$0xff]  ;;  %v73_v58 = vld [vmem:[%s12834_s0 + $0x1d0] sm:$0xff] }
 0x19a   :  { %v3208_v7 = vcombine.high %v3206_v56, %v3206_v56  ;;  %v3216_v47 = vrot.slane %v2393_v28, %v8825_v18  ;;  %v4160_v36 = vsel %vm3822_vm0, %v3207_v23, 0.0  ;;  %v11429_v54 = vmul.f32 %v13113_v57, %v69_v44  ;;  %v13116_v28 = vld [vmem:[#allocation23_spill] sm:$0xff] }
 0x19b   :  { %v11432_v33 = vmul.f32 %v13114_v27, %v70_v49  ;;  %v4159_v16 = vadd.f32 %v4158_v62, %v4157_v1  ;;  %v8200_v20 = vadd.f32 %v8199_v26, %v8198_v59  ;;  %v4162_v0 = vsel %vm3822_vm0, %v3206_v56, 0.0  ;;  %v74_v56 = vld [vmem:[%s12834_s0 + $0x1d8] sm:$0xff]  ;;  %v8701_v26 = vld [vmem:[%s12834_s0 + $0x80] sm:$0xff] }
 0x19c   :  { %v5744_v52 = vcombine.low %v5736_v21, %v5743_v32  ;;  %v7005_v35 = vrot.slane %v6991_v15, %v8825_v18  ;;  %v8201_v34 = vsel %vm3822_vm0, %v7006_v29, 0.0  ;;  %v11438_v2 = vmul.f32 %v13115_v50, %v71_v38  ;;  %v75_v1 = vld [vmem:[%s12834_s0 + $0x1e0] sm:$0xff] }
 0x19d   :  { %v11441_v48 = vmul.f32 %v13116_v28, %v72_v61  ;;  %v3223_v23 = vrot.slane %v3209_v22, %v8825_v18  ;;  %v4161_v25 = vadd.f32 %v4160_v36, %v4159_v16  ;;  %v3224_v24 = vcombine.high %v3216_v47, %v3216_v47 }
 0x19e   :  { %v4164_v21 = vsel %vm3822_vm0, %v3208_v7, 0.0  ;;  %v4707_v32 = vrot.slane %v11310_v17, %v8806_v10  ;;  %v4711_v59 = vrot.slane %v11310_v17, %v8808_v11  ;;  %v4715_v49 = vrot.slane %v11310_v17, %v8810_v12  ;;  %v76_v7 = vld [vmem:[%s12834_s0 + $0x1e8] sm:$0xff] }
 0x19f   :  { %v4163_v44 = vadd.f32 %v4162_v0, %v4161_v25  ;;  %v4719_v62 = vrot.slane %v11310_v17, %v8812_v13  ;;  %v8202_v15 = vadd.f32 %v8201_v34, %v8200_v20  ;;  %v4166_v29 = vsel %vm3822_vm0, %v3216_v47, 0.0 }
 0x1a0   :  { %v6624_v14 = vmul.f32 %v8701_v26, %v5744_v52  ;;  %v7007_v31 = vcombine.high %v7005_v35, %v7005_v35  ;;  %v8203_v22 = vsel %vm3822_vm0, %v7005_v35, 0.0  ;;  %v11468_v38 = vmul.f32 %v10877_v3, %v73_v58 }
 0x1a1   :  { %v11471_v17 = vmul.f32 %v11076_v42, %v74_v56  ;;  %v3226_v61 = vcombine.high %v11350_v37, %v11350_v37  ;;  %v4165_v39 = vadd.f32 %v4164_v21, %v4163_v44  ;;  %v3225_v47 = vcombine.high %v3223_v23, %v3223_v23 }
 0x1a2   :  { %v3233_v36 = vrot.slane %v11350_v37, %v8825_v18  ;;  %v3243_v57 = vcombine.high %v11353_v8, %v11353_v8  ;;  %v4168_v3 = vsel %vm3822_vm0, %v3224_v24, 0.0  ;;  %v5745_v42 = vcombine.low %v4707_v32, %v4711_v59 }
 0x1a3   :  { %v4167_v27 = vadd.f32 %v4166_v29, %v4165_v39  ;;  %v5746_v16 = vcombine.low %v4715_v49, %v4719_v62  ;;  %v8204_v20 = vadd.f32 %v8203_v22, %v8202_v15  ;;  %v11484_v0 = vmul.f32 %v11257_v60, %v75_v1  ;;  %v77_v60 = vld [vmem:[%s12834_s0 + $0x1f0] sm:$0xff] }
 0x1a4   :  { %v4170_v52 = vsel %vm3822_vm0, %v3223_v23, 0.0  ;;  %v7015_v35 = vrot.slane %v6624_v14, %v8825_v18  ;;  %v8205_v34 = vsel %vm3822_vm0, %v7007_v31, 0.0  ;;  %v11490_v37 = vmul.f32 %v11302_v46, %v76_v7  ;;  %v78_v23 = vld [vmem:[%s12834_s0 + $0x1f8] sm:$0xff] }
 0x1a5   :  { %v3240_v50 = vrot.slane %v3226_v61, %v8825_v18  ;;  %v3250_v28 = vrot.slane %v11353_v8, %v8825_v18  ;;  %v4169_v25 = vadd.f32 %v4168_v3, %v4167_v27  ;;  %v3241_v58 = vcombine.high %v3233_v36, %v3233_v36 }
 0x1a6   :  { %v11502_v56 = vrot.slane %v3243_v57, %v8825_v18  ;;  %v3260_v46 = vcombine.high %v11370_v30, %v11370_v30  ;;  %v4172_v24 = vsel %vm3822_vm0, %v3225_v47, 0.0  ;;  %v5753_v8 = vrot.slane %v5745_v42, %v8825_v18 }
 0x1a7   :  { %v4171_v21 = vadd.f32 %v4170_v52, %v4169_v25  ;;  %v5760_v32 = vrot.slane %v5746_v16, %v8825_v18  ;;  %v8206_v59 = vadd.f32 %v8205_v34, %v8204_v20  ;;  %v4174_v44 = vsel %vm3822_vm0, %v3233_v36, 0.0 }
 0x1a8   :  { %v7008_v49 = vcombine.high %v6624_v14, %v6624_v14  ;;  %v7023_v62 = vcombine.high %v7015_v35, %v7015_v35  ;;  %v8207_v15 = vsel %vm3822_vm0, %v7015_v35, 0.0  ;;  %v11512_v29 = vmul.f32 %v11305_v53, %v77_v60 }
 0x1a9   :  { %v11515_v26 = vmul.f32 %v11313_v63, %v78_v23  ;;  %v11519_v31 = vrot.slane %v11370_v30, %v8825_v18  ;;  %v4173_v22 = vadd.f32 %v4172_v24, %v4171_v21  ;;  %v3242_v1 = vcombine.high %v3240_v50, %v3240_v50  ;;  %v11532_v30 = vld [vmem:[%s12835_s1 + $0x91] ss:$2 sm:$0xff]  ;;  %v8702_v24 = vld [vmem:[%s12834_s0 + $0x88] sm:$0xff] }
 0x1aa   :  { %v3258_v61 = vcombine.high %v3250_v28, %v3250_v28  ;;  %v3277_v39 = vcombine.high %v11377_v40, %v11377_v40  ;;  %v4176_v14 = vsel %vm3822_vm0, %v3241_v58, 0.0  ;;  %v3259_v7 = vcombine.high %v11502_v56, %v11502_v56 }
 0x1ab   :  { %v11527_v53 = vrot.slane %v3260_v46, %v8825_v18  ;;  %v4175_v63 = vadd.f32 %v4174_v44, %v4173_v22  ;;  %v8208_v47 = vadd.f32 %v8207_v15, %v8206_v59  ;;  %v4178_v36 = vsel %vm3822_vm0, %v3240_v50, 0.0 }
 0x1ac   :  { %v5761_v57 = vcombine.low %v5753_v8, %v5760_v32  ;;  %v7022_v3 = vrot.slane %v7008_v49, %v8825_v18  ;;  %v8209_v27 = vsel %vm3822_vm0, %v7023_v62, 0.0  ;;  %v3275_v42 = vcombine.high %v11519_v31, %v11519_v31 }
 0x1ad   :  { %v11541_v16 = vrot.slane %v11377_v40, %v8825_v18  ;;  %v3294_v20 = vcombine.high %v11380_v45, %v11380_v45  ;;  %v4177_v52 = vadd.f32 %v4176_v14, %v4175_v63  ;;  %v11546_v35 = vrot.slane %v3277_v39, %v8825_v18 }
 0x1ae   :  { %v4180_v34 = vsel %vm3822_vm0, %v3242_v1, 0.0  ;;  %v4723_v50 = vrot.slane %v11532_v30, %v8793_v4  ;;  %v4727_v25 = vrot.slane %v11532_v30, %v8795_v5  ;;  %v4731_v40 = vrot.slane %v11532_v30, %v8797_v6 }
 0x1af   :  { %v4179_v60 = vadd.f32 %v4178_v36, %v4177_v52  ;;  %v4735_v23 = vrot.slane %v11532_v30, %v8804_v9  ;;  %v8210_v58 = vadd.f32 %v8209_v27, %v8208_v47  ;;  %v4182_v46 = vsel %vm3822_vm0, %v3250_v28, 0.0 }
 0x1b0   :  { %v6625_v21 = vmul.f32 %v8702_v24, %v5761_v57  ;;  %v7024_v8 = vcombine.high %v7022_v3, %v7022_v3  ;;  %v8211_v32 = vsel %vm3822_vm0, %v7022_v3, 0.0  ;;  %v3276_v59 = vcombine.high %v11527_v53, %v11527_v53 }
 0x1b1   :  { %v11566_v44 = vrot.slane %v11380_v45, %v8825_v18  ;;  %v3311_v49 = vcombine.high %v11383_v41, %v11383_v41  ;;  %v4181_v62 = vadd.f32 %v4180_v34, %v4179_v60  ;;  %v3292_v28 = vcombine.high %v11541_v16, %v11541_v16 }
 0x1b2   :  { %v11573_v15 = vrot.slane %v3294_v20, %v8825_v18  ;;  %v11577_v22 = vrot.slane %v11383_v41, %v8825_v18  ;;  %v4184_v1 = vsel %vm3822_vm0, %v3258_v61, 0.0  ;;  %v5762_v14 = vcombine.low %v4723_v50, %v4727_v25 }
 0x1b3   :  { %v4183_v39 = vadd.f32 %v4182_v46, %v4181_v62  ;;  %v5763_v45 = vcombine.low %v4731_v40, %v4735_v23  ;;  %v8212_v63 = vadd.f32 %v8211_v32, %v8210_v58  ;;  %v3293_v47 = vcombine.high %v11546_v35, %v11546_v35 }
 0x1b4   :  { %v4186_v36 = vsel %vm3822_vm0, %v11502_v56, 0.0  ;;  %v7032_v57 = vrot.slane %v6625_v21, %v8825_v18  ;;  %v8213_v3 = vsel %vm3822_vm0, %v7024_v8, 0.0  ;;  %v3309_v41 = vcombine.high %v11566_v44, %v11566_v44 }
 0x1b5   :  { %v11589_v27 = vrot.slane %v3311_v49, %v8825_v18  ;;  %v3328_v61 = vcombine.high %v11392_v43, %v11392_v43  ;;  %v4185_v20 = vadd.f32 %v4184_v1, %v4183_v39  ;;  %v3310_v52 = vcombine.high %v11573_v15, %v11573_v15 }
 0x1b6   :  { %v11597_v56 = vrot.slane %v11392_v43, %v8825_v18  ;;  %v3345_v34 = vcombine.high %v11412_v19, %v11412_v19  ;;  %v4188_v50 = vsel %vm3822_vm0, %v3259_v7, 0.0  ;;  %v5770_v60 = vrot.slane %v5762_v14, %v8825_v18 }
 0x1b7   :  { %v4187_v25 = vadd.f32 %v4186_v36, %v4185_v20  ;;  %v5777_v40 = vrot.slane %v5763_v45, %v8825_v18  ;;  %v8214_v23 = vadd.f32 %v8213_v3, %v8212_v63  ;;  %v4190_v58 = vsel %vm3822_vm0, %v11519_v31, 0.0 }
 0x1b8   :  { %v7025_v46 = vcombine.high %v6625_v21, %v6625_v21  ;;  %v7040_v24 = vcombine.high %v7032_v57, %v7032_v57  ;;  %v8215_v8 = vsel %vm3822_vm0, %v7032_v57, 0.0  ;;  %v3326_v43 = vcombine.high %v11577_v22, %v11577_v22 }
 0x1b9   :  { %v11610_v32 = vrot.slane %v3328_v61, %v8825_v18  ;;  %v3362_v7 = vcombine.high %v11415_v51, %v11415_v51  ;;  %v4189_v49 = vadd.f32 %v4188_v50, %v4187_v25  ;;  %v3327_v62 = vcombine.high %v11589_v27, %v11589_v27 }
 0x1ba   :  { %v3343_v31 = vcombine.high %v11597_v56, %v11597_v56  ;;  %v11620_v21 = vrot.slane %v11412_v19, %v8825_v18  ;;  %v4192_v1 = vsel %vm3822_vm0, %v3275_v42, 0.0  ;;  %v11624_v39 = vrot.slane %v3345_v34, %v8825_v18 }
 0x1bb   :  { %v11628_v14 = vrot.slane %v11415_v51, %v8825_v18  ;;  %v4191_v45 = vadd.f32 %v4190_v58, %v4189_v49  ;;  %v8216_v63 = vadd.f32 %v8215_v8, %v8214_v23  ;;  %v4194_v36 = vsel %vm3822_vm0, %v11527_v53, 0.0 }
 0x1bc   :  { %v5778_v57 = vcombine.low %v5770_v60, %v5777_v40  ;;  %v7039_v3 = vrot.slane %v7025_v46, %v8825_v18  ;;  %v8217_v19 = vsel %vm3822_vm0, %v7040_v24, 0.0  ;;  %v3344_v42 = vcombine.high %v11610_v32, %v11610_v32 }
 0x1bd   :  { %v11637_v61 = vrot.slane %v3362_v7, %v8825_v18  ;;  %v3379_v51 = vcombine.high %v11424_v55, %v11424_v55  ;;  %v4193_v20 = vadd.f32 %v4192_v1, %v4191_v45  ;;  %v11643_v34 = vrot.slane %v11424_v55, %v8825_v18 }
 0x1be   :  { %v4196_v53 = vsel %vm3822_vm0, %v3276_v59, 0.0  ;;  %v4739_v50 = vrot.slane %v11532_v30, %v8806_v10  ;;  %v4743_v25 = vrot.slane %v11532_v30, %v8808_v11  ;;  %v4747_v40 = vrot.slane %v11532_v30, %v8810_v12  ;;  %v8703_v59 = vld [vmem:[%s12834_s0 + $0x90] sm:$0xff] }
 0x1bf   :  { %v4195_v60 = vadd.f32 %v4194_v36, %v4193_v20  ;;  %v4751_v23 = vrot.slane %v11532_v30, %v8812_v13  ;;  %v8218_v58 = vadd.f32 %v8217_v19, %v8216_v63  ;;  %v4198_v55 = vsel %vm3822_vm0, %v11541_v16, 0.0 }
 0x1c0   :  { %v6626_v46 = vmul.f32 %v8703_v59, %v5778_v57  ;;  %v7041_v24 = vcombine.high %v7039_v3, %v7039_v3  ;;  %v8219_v8 = vsel %vm3822_vm0, %v7039_v3, 0.0  ;;  %v3360_v7 = vcombine.high %v11620_v21, %v11620_v21 }
 0x1c1   :  { %v3361_v49 = vcombine.high %v11624_v39, %v11624_v39  ;;  %v11665_v30 = vrot.slane %v3379_v51, %v8825_v18  ;;  %v4197_v1 = vadd.f32 %v4196_v53, %v4195_v60  ;;  %v3396_v36 = vcombine.high %v11429_v54, %v11429_v54 }
 0x1c2   :  { %v4200_v57 = vsel %vm3822_vm0, %v3292_v28, 0.0  ;;  %v5779_v19 = vcombine.low %v4739_v50, %v4743_v25  ;;  %v5780_v20 = vcombine.low %v4747_v40, %v4751_v23  ;;  %v8220_v51 = vadd.f32 %v8219_v8, %v8218_v58 }
 0x1c3   :  { %v4199_v3 = vadd.f32 %v4198_v55, %v4197_v1  ;;  %v3394_v53 = vcombine.high %v11643_v34, %v11643_v34  ;;  %v4202_v60 = vsel %vm3822_vm0, %v11546_v35, 0.0  ;;  %v7049_v59 = vrot.slane %v6626_v46, %v8825_v18 }
 0x1c4   :  { %v8221_v63 = vsel %vm3822_vm0, %v7041_v24, 0.0  ;;  %v3395_v45 = vcombine.high %v11665_v30, %v11665_v30  ;;  %v11687_v16 = vrot.slane %v11429_v54, %v8825_v18  ;;  %v3413_v28 = vcombine.high %v11432_v33, %v11432_v33 }
 0x1c5   :  { %v4201_v50 = vadd.f32 %v4200_v57, %v4199_v3  ;;  %v11692_v25 = vrot.slane %v3396_v36, %v8825_v18  ;;  %v11696_v40 = vrot.slane %v11432_v33, %v8825_v18  ;;  %v3430_v23 = vcombine.high %v11438_v2, %v11438_v2 }
 0x1c6   :  { %v4204_v54 = vsel %vm3822_vm0, %v3293_v47, 0.0  ;;  %v5787_v55 = vrot.slane %v5779_v19, %v8825_v18  ;;  %v5794_v24 = vrot.slane %v5780_v20, %v8825_v18  ;;  %v8222_v8 = vadd.f32 %v8221_v63, %v8220_v51 }
 0x1c7   :  { %v4203_v58 = vadd.f32 %v4202_v60, %v4201_v50  ;;  %v4206_v1 = vsel %vm3822_vm0, %v11566_v44, 0.0  ;;  %v7042_v36 = vcombine.high %v6626_v46, %v6626_v46  ;;  %v7057_v33 = vcombine.high %v7049_v59, %v7049_v59 }
 0x1c8   :  { %v8223_v57 = vsel %vm3822_vm0, %v7049_v59, 0.0  ;;  %v11712_v35 = vrot.slane %v3413_v28, %v8825_v18  ;;  %v11716_v47 = vrot.slane %v11438_v2, %v8825_v18  ;;  %v3447_v20 = vcombine.high %v11441_v48, %v11441_v48  ;;  %v11731_v2 = vld [vmem:[%s12835_s1 + $0xa1] ss:$2 sm:$0xff] }
 0x1c9   :  { %v4205_v19 = vadd.f32 %v4204_v54, %v4203_v58  ;;  %v4208_v51 = vsel %vm3822_vm0, %v3309_v41, 0.0  ;;  %v11734_v60 = vrot.slane %v3430_v23, %v8825_v18  ;;  %v11738_v59 = vrot.slane %v11441_v48, %v8825_v18 }
 0x1ca   :  { %v8224_v50 = vadd.f32 %v8223_v57, %v8222_v8  ;;  %v4210_v54 = vsel %vm3822_vm0, %v11573_v15, 0.0  ;;  %v5795_v44 = vcombine.low %v5787_v55, %v5794_v24  ;;  %v7056_v41 = vrot.slane %v7042_v36, %v8825_v18 }
 0x1cb   :  { %v4207_v28 = vadd.f32 %v4206_v1, %v4205_v19  ;;  %v8225_v58 = vsel %vm3822_vm0, %v7057_v33, 0.0  ;;  %v4755_v48 = vrot.slane %v11731_v2, %v8793_v4  ;;  %v4212_v8 = vsel %vm3822_vm0, %v3310_v52, 0.0  ;;  %v8704_v52 = vld [vmem:[%s12834_s0 + $0x98] sm:$0xff] }
 0x1cc   :  { %v4759_v55 = vrot.slane %v11731_v2, %v8795_v5  ;;  %v4763_v24 = vrot.slane %v11731_v2, %v8797_v6  ;;  %v4767_v1 = vrot.slane %v11731_v2, %v8804_v9  ;;  %v11761_v36 = vrot.slane %v3447_v20, %v8825_v18 }
 0x1cd   :  { %v4209_v63 = vadd.f32 %v4208_v51, %v4207_v28  ;;  %v3464_v33 = vcombine.high %v11468_v38, %v11468_v38  ;;  %v8226_v19 = vadd.f32 %v8225_v58, %v8224_v50  ;;  %v4214_v15 = vsel %vm3822_vm0, %v11577_v22, 0.0 }
 0x1ce   :  { %v6627_v51 = vmul.f32 %v8704_v52, %v5795_v44  ;;  %v7058_v28 = vcombine.high %v7056_v41, %v7056_v41  ;;  %v8227_v23 = vsel %vm3822_vm0, %v7056_v41, 0.0  ;;  %v4216_v44 = vsel %vm3822_vm0, %v3326_v43, 0.0 }
 0x1cf   :  { %v4211_v57 = vadd.f32 %v4210_v54, %v4209_v63  ;;  %v11777_v63 = vrot.slane %v11468_v38, %v8825_v18  ;;  %v3481_v54 = vcombine.high %v11471_v17, %v11471_v17  ;;  %v5796_v41 = vcombine.low %v4755_v48, %v4759_v55 }
 0x1d0   :  { %v5797_v58 = vcombine.low %v4763_v24, %v4767_v1  ;;  %v11788_v46 = vrot.slane %v3464_v33, %v8825_v18  ;;  %v8228_v38 = vadd.f32 %v8227_v23, %v8226_v19  ;;  %v7066_v22 = vrot.slane %v6627_v51, %v8825_v18 }
 0x1d1   :  { %v4213_v50 = vadd.f32 %v4212_v8, %v4211_v57  ;;  %v11792_v8 = vrot.slane %v11471_v17, %v8825_v18  ;;  %v4218_v57 = vsel %vm3822_vm0, %v11589_v27, 0.0  ;;  %v8229_v43 = vsel %vm3822_vm0, %v7058_v28, 0.0 }
 0x1d2   :  { %v4771_v55 = vrot.slane %v11731_v2, %v8806_v10  ;;  %v4775_v24 = vrot.slane %v11731_v2, %v8808_v11  ;;  %v4779_v23 = vrot.slane %v11731_v2, %v8810_v12  ;;  %v4220_v17 = vsel %vm3822_vm0, %v3327_v62, 0.0 }
 0x1d3   :  { %v4215_v20 = vadd.f32 %v4214_v15, %v4213_v50  ;;  %v4783_v1 = vrot.slane %v11731_v2, %v8812_v13  ;;  %v5804_v33 = vrot.slane %v5796_v41, %v8825_v18  ;;  %v5811_v19 = vrot.slane %v5797_v58, %v8825_v18 }
 0x1d4   :  { %v3498_v28 = vcombine.high %v11484_v0, %v11484_v0  ;;  %v8230_v50 = vadd.f32 %v8229_v43, %v8228_v38  ;;  %v4222_v27 = vsel %vm3822_vm0, %v11597_v56, 0.0  ;;  %v7074_v62 = vcombine.high %v7066_v22, %v7066_v22  ;;  %v11831_v38 = vld [vmem:[%s12835_s1 + $0xb1] ss:$2 sm:$0xff] }
 0x1d5   :  { %v4217_v48 = vadd.f32 %v4216_v44, %v4215_v20  ;;  %v7059_v44 = vcombine.high %v6627_v51, %v6627_v51  ;;  %v8231_v52 = vsel %vm3822_vm0, %v7066_v22, 0.0  ;;  %v11820_v2 = vrot.slane %v3481_v54, %v8825_v18 }
 0x1d6   :  { %v11824_v41 = vrot.slane %v11484_v0, %v8825_v18  ;;  %v3515_v58 = vcombine.high %v11490_v37, %v11490_v37  ;;  %v4224_v51 = vsel %vm3822_vm0, %v3343_v31, 0.0  ;;  %v5812_v54 = vcombine.low %v5804_v33, %v5811_v19 }
 0x1d7   :  { %v4219_v20 = vadd.f32 %v4218_v57, %v4217_v48  ;;  %v5813_v57 = vcombine.low %v4771_v55, %v4775_v24  ;;  %v5814_v22 = vcombine.low %v4779_v23, %v4783_v1  ;;  %v3480_v0 = vcombine.high %v11788_v46, %v11788_v46 }
 0x1d8   :  { %v3496_v43 = vcombine.high %v11792_v8, %v11792_v8  ;;  %v4787_v3 = vrot.slane %v11831_v38, %v8793_v4  ;;  %v7073_v56 = vrot.slane %v7059_v44, %v8825_v18  ;;  %v8233_v31 = vsel %vm3822_vm0, %v7074_v62, 0.0 }
 0x1d9   :  { %v4221_v15 = vadd.f32 %v4220_v17, %v4219_v20  ;;  %v8232_v17 = vadd.f32 %v8231_v52, %v8230_v50  ;;  %v4226_v20 = vsel %vm3822_vm0, %v11610_v32, 0.0  ;;  %v4791_v24 = vrot.slane %v11831_v38, %v8795_v5 }
 0x1da   :  { %v4795_v23 = vrot.slane %v11831_v38, %v8797_v6  ;;  %v4799_v52 = vrot.slane %v11831_v38, %v8804_v9  ;;  %v4228_v1 = vsel %vm3822_vm0, %v3344_v42, 0.0  ;;  %v5821_v33 = vrot.slane %v5813_v57, %v8825_v18 }
 0x1db   :  { %v4223_v48 = vadd.f32 %v4222_v27, %v4221_v15  ;;  %v5828_v19 = vrot.slane %v5814_v22, %v8825_v18  ;;  %v8705_v15 = vld [vmem:[%s12834_s0 + $0xa0] sm:$0xff]  ;;  %v11863_v27 = vrot.slane %v3498_v28, %v8825_v18  ;;  %v11867_v44 = vrot.slane %v11490_v37, %v8825_v18 }
 0x1dc   :  { %v6628_v50 = vmul.f32 %v8705_v15, %v5812_v54  ;;  %v8234_v32 = vadd.f32 %v8233_v31, %v8232_v17  ;;  %v7075_v57 = vcombine.high %v7073_v56, %v7073_v56  ;;  %v8235_v22 = vsel %vm3822_vm0, %v7073_v56, 0.0 }
 0x1dd   :  { %v4225_v55 = vadd.f32 %v4224_v51, %v4223_v48  ;;  %v4230_v51 = vsel %vm3822_vm0, %v11620_v21, 0.0  ;;  %v5830_v48 = vcombine.low %v4787_v3, %v4791_v24  ;;  %v5831_v15 = vcombine.low %v4795_v23, %v4799_v52 }
 0x1de   :  { %v4232_v37 = vsel %vm3822_vm0, %v3360_v7, 0.0  ;;  %v5829_v17 = vcombine.low %v5821_v33, %v5828_v19  ;;  %v7083_v31 = vrot.slane %v6628_v50, %v8825_v18  ;;  %v4803_v56 = vrot.slane %v11831_v38, %v8806_v10 }
 0x1df   :  { %v4227_v62 = vadd.f32 %v4226_v20, %v4225_v55  ;;  %v7076_v20 = vcombine.high %v6628_v50, %v6628_v50  ;;  %v11882_v55 = vrot.slane %v3515_v58, %v8825_v18  ;;  %v8236_v54 = vadd.f32 %v8235_v22, %v8234_v32  ;;  %v11896_v58 = vld [vmem:[%s12835_s1 + $0xc1] ss:$2 sm:$0xff] }
 0x1e0   :  { %v4234_v3 = vsel %vm3822_vm0, %v11624_v39, 0.0  ;;  %v4807_v21 = vrot.slane %v11831_v38, %v8808_v11  ;;  %v4811_v7 = vrot.slane %v11831_v38, %v8810_v12  ;;  %v8237_v24 = vsel %vm3822_vm0, %v7075_v57, 0.0  ;;  %v8706_v50 = vld [vmem:[%s12834_s0 + $0xa8] sm:$0xff] }
 0x1e1   :  { %v4229_v28 = vadd.f32 %v4228_v1, %v4227_v62  ;;  %v4815_v52 = vrot.slane %v11831_v38, %v8812_v13  ;;  %v5838_v1 = vrot.slane %v5830_v48, %v8825_v18  ;;  %v5845_v33 = vrot.slane %v5831_v15, %v8825_v18 }
 0x1e2   :  { %v4236_v19 = vsel %vm3822_vm0, %v3361_v49, 0.0  ;;  %v6629_v62 = vmul.f32 %v8706_v50, %v5829_v17  ;;  %v7090_v32 = vrot.slane %v7076_v20, %v8825_v18  ;;  %v8238_v22 = vadd.f32 %v8237_v24, %v8236_v54 }
 0x1e3   :  { %v4231_v42 = vadd.f32 %v4230_v51, %v4229_v28  ;;  %v3532_v51 = vcombine.high %v11512_v29, %v11512_v29  ;;  %v4238_v39 = vsel %vm3822_vm0, %v11628_v14, 0.0  ;;  %v4819_v49 = vrot.slane %v11896_v58, %v8793_v4 }
 0x1e4   :  { %v5847_v28 = vcombine.low %v4803_v56, %v4807_v21  ;;  %v8239_v48 = vsel %vm3822_vm0, %v7083_v31, 0.0  ;;  %v5848_v17 = vcombine.low %v4811_v7, %v4815_v52  ;;  %v7093_v20 = vcombine.high %v6629_v62, %v6629_v62 }
 0x1e5   :  { %v4233_v23 = vadd.f32 %v4232_v37, %v4231_v42  ;;  %v7091_v42 = vcombine.high %v7083_v31, %v7083_v31  ;;  %v5846_v37 = vcombine.low %v5838_v1, %v5845_v33  ;;  %v13117_v50 = vcombine.high %v11628_v14, %v11628_v14 }
 0x1e6   :  { %v7100_v54 = vrot.slane %v6629_v62, %v8825_v18  ;;  %v4823_v56 = vrot.slane %v11896_v58, %v8795_v5  ;;  %v4827_v31 = vrot.slane %v11896_v58, %v8797_v6  ;;  %v8240_v21 = vadd.f32 %v8239_v48, %v8238_v22  ;;  %v8707_v62 = vld [vmem:[%s12834_s0 + $0xb0] sm:$0xff] }
 0x1e7   :  { %v4235_v57 = vadd.f32 %v4234_v3, %v4233_v23  ;;  %v4240_v38 = vsel %vm3822_vm0, %v13117_v50, 0.0  ;;  %v7092_v3 = vcombine.high %v7090_v32, %v7090_v32  ;;  %v8241_v24 = vsel %vm3822_vm0, %v7091_v42, 0.0 }
 0x1e8   :  { %v4242_v7 = vsel %vm3822_vm0, %v11637_v61, 0.0  ;;  %v4831_v14 = vrot.slane %v11896_v58, %v8804_v9  ;;  %v5855_v52 = vrot.slane %v5847_v28, %v8825_v18  ;;  %v8243_v1 = vsel %vm3822_vm0, %v7090_v32, 0.0 }
 0x1e9   :  { %v4237_v15 = vadd.f32 %v4236_v19, %v4235_v57  ;;  %v5862_v19 = vrot.slane %v5848_v17, %v8825_v18  ;;  %v6630_v42 = vmul.f32 %v8707_v62, %v5846_v37  ;;  %v8242_v57 = vadd.f32 %v8241_v24, %v8240_v21 }
 0x1ea   :  { %v13118_v22 = vcombine.high %v11637_v61, %v11637_v61  ;;  %v7107_v48 = vrot.slane %v7093_v20, %v8825_v18  ;;  %v8245_v28 = vsel %vm3822_vm0, %v7092_v3, 0.0  ;;  %v3530_v32 = vcombine.high %v11867_v44, %v11867_v44 }
 0x1eb   :  { %v4239_v23 = vadd.f32 %v4238_v39, %v4237_v15  ;;  %v7108_v15 = vcombine.high %v7100_v54, %v7100_v54  ;;  %v4835_v17 = vrot.slane %v11896_v58, %v8806_v10  ;;  %v8244_v50 = vadd.f32 %v8243_v1, %v8242_v57 }
 0x1ec   :  { %v4244_v39 = vsel %vm3822_vm0, %v13118_v22, 0.0  ;;  %v4246_v37 = vsel %vm3822_vm0, %v11643_v34, 0.0  ;;  %v5864_v24 = vcombine.low %v4819_v49, %v4823_v56  ;;  %v5865_v61 = vcombine.low %v4827_v31, %v4831_v14  ;;  %v11967_v34 = vld [vmem:[%s12835_s1 + $0xd1] ss:$2 sm:$0xff] }
 0x1ed   :  { %v4241_v33 = vadd.f32 %v4240_v38, %v4239_v23  ;;  %v8247_v23 = vsel %vm3822_vm0, %v7100_v54, 0.0  ;;  %v5863_v20 = vcombine.low %v5855_v52, %v5862_v19  ;;  %v7110_v62 = vcombine.high %v6630_v42, %v6630_v42 }
 0x1ee   :  { %v8246_v22 = vadd.f32 %v8245_v28, %v8244_v50  ;;  %v4248_v3 = vsel %vm3822_vm0, %v3394_v53, 0.0  ;;  %v8249_v1 = vsel %vm3822_vm0, %v7108_v15, 0.0  ;;  %v4839_v49 = vrot.slane %v11896_v58, %v8808_v11 }
 0x1ef   :  { %v4243_v38 = vadd.f32 %v4242_v7, %v4241_v33  ;;  %v7109_v7 = vcombine.high %v7107_v48, %v7107_v48  ;;  %v7117_v33 = vrot.slane %v6630_v42, %v8825_v18  ;;  %v4843_v54 = vrot.slane %v11896_v58, %v8810_v12 }
 0x1f0   :  { %v8248_v56 = vadd.f32 %v8247_v23, %v8246_v22  ;;  %v4250_v31 = vsel %vm3822_vm0, %v11665_v30, 0.0  ;;  %v5872_v53 = vrot.slane %v5864_v24, %v8825_v18  ;;  %v5879_v14 = vrot.slane %v5865_v61, %v8825_v18 }
 0x1f1   :  { %v4245_v21 = vadd.f32 %v4244_v39, %v4243_v38  ;;  %v8251_v52 = vsel %vm3822_vm0, %v7107_v48, 0.0  ;;  %v4847_v42 = vrot.slane %v11896_v58, %v8812_v13  ;;  %v8708_v39 = vld [vmem:[%s12834_s0 + $0xb8] sm:$0xff]  ;;  %v4252_v38 = vsel %vm3822_vm0, %v3395_v45, 0.0 }
 0x1f2   :  { %v6631_v15 = vmul.f32 %v8708_v39, %v5863_v20  ;;  %v8250_v28 = vadd.f32 %v8249_v1, %v8248_v56  ;;  %v7124_v50 = vrot.slane %v7110_v62, %v8825_v18  ;;  %v8253_v48 = vsel %vm3822_vm0, %v7109_v7, 0.0 }
 0x1f3   :  { %v4247_v57 = vadd.f32 %v4246_v37, %v4245_v21  ;;  %v7125_v37 = vcombine.high %v7117_v33, %v7117_v33  ;;  %v11985_v24 = vrot.slane %v11512_v29, %v8825_v18  ;;  %v4851_v61 = vrot.slane %v11967_v34, %v8793_v4 }
 0x1f4   :  { %v8252_v23 = vadd.f32 %v8251_v52, %v8250_v28  ;;  %v4254_v21 = vsel %vm3822_vm0, %v11687_v16, 0.0  ;;  %v5880_v30 = vcombine.low %v5872_v53, %v5879_v14  ;;  %v5881_v20 = vcombine.low %v4835_v17, %v4839_v49 }
 0x1f5   :  { %v4249_v19 = vadd.f32 %v4248_v3, %v4247_v57  ;;  %v8255_v45 = vsel %vm3822_vm0, %v7117_v33, 0.0  ;;  %v5882_v22 = vcombine.low %v4843_v54, %v4847_v42  ;;  %v7127_v3 = vcombine.high %v6631_v15, %v6631_v15 }
 0x1f6   :  { %v8254_v7 = vadd.f32 %v8253_v48, %v8252_v23  ;;  %v13119_v1 = vcombine.high %v11687_v16, %v11687_v16  ;;  %v7126_v56 = vcombine.high %v7124_v50, %v7124_v50  ;;  %v8257_v52 = vsel %vm3822_vm0, %v7125_v37, 0.0 }
 0x1f7   :  { %v4251_v58 = vadd.f32 %v4250_v31, %v4249_v19  ;;  %v7134_v31 = vrot.slane %v6631_v15, %v8825_v18  ;;  %v4855_v17 = vrot.slane %v11967_v34, %v8795_v5  ;;  %v4859_v33 = vrot.slane %v11967_v34, %v8797_v6  ;;  %v8709_v15 = vld [vmem:[%s12834_s0 + $0xc0] sm:$0xff] }
 0x1f8   :  { %v4256_v57 = vsel %vm3822_vm0, %v13119_v1, 0.0  ;;  %v8256_v49 = vadd.f32 %v8255_v45, %v8254_v7  ;;  %v4258_v54 = vsel %vm3822_vm0, %v11692_v25, 0.0  ;;  %v4863_v16 = vrot.slane %v11967_v34, %v8804_v9 }
 0x1f9   :  { %v4253_v62 = vadd.f32 %v4252_v38, %v4251_v58  ;;  %v5889_v53 = vrot.slane %v5881_v20, %v8825_v18  ;;  %v8259_v14 = vsel %vm3822_vm0, %v7124_v50, 0.0  ;;  %v5896_v39 = vrot.slane %v5882_v22, %v8825_v18 }
 0x1fa   :  { %v6632_v28 = vmul.f32 %v8709_v15, %v5880_v30  ;;  %v8258_v38 = vadd.f32 %v8257_v52, %v8256_v49  ;;  %v13120_v37 = vcombine.high %v11692_v25, %v11692_v25  ;;  %v7141_v58 = vrot.slane %v7127_v3, %v8825_v18 }
 0x1fb   :  { %v4255_v19 = vadd.f32 %v4254_v21, %v4253_v62  ;;  %v7142_v23 = vcombine.high %v7134_v31, %v7134_v31  ;;  %v8261_v21 = vsel %vm3822_vm0, %v7126_v56, 0.0  ;;  %v3549_v50 = vcombine.high %v11515_v26, %v11515_v26 }
 0x1fc   :  { %v4260_v48 = vsel %vm3822_vm0, %v13120_v37, 0.0  ;;  %v4867_v45 = vrot.slane %v11967_v34, %v8806_v10  ;;  %v8260_v62 = vadd.f32 %v8259_v14, %v8258_v38  ;;  %v4262_v30 = vsel %vm3822_vm0, %v11696_v40, 0.0  ;;  %v8710_v38 = vld [vmem:[%s12834_s0 + $0xc8] sm:$0xff] }
 0x1fd   :  { %v4257_v42 = vadd.f32 %v4256_v57, %v4255_v19  ;;  %v5898_v22 = vcombine.low %v4851_v61, %v4855_v17  ;;  %v5899_v25 = vcombine.low %v4859_v33, %v4863_v16  ;;  %v8263_v7 = vsel %vm3822_vm0, %v7134_v31, 0.0 }
 0x1fe   :  { %v5897_v3 = vcombine.low %v5889_v53, %v5896_v39  ;;  %v7144_v57 = vcombine.high %v6632_v28, %v6632_v28  ;;  %v8262_v52 = vadd.f32 %v8261_v21, %v8260_v62  ;;  %v13121_v56 = vcombine.high %v11696_v40, %v11696_v40  ;;  %v12040_v40 = vld [vmem:[%s12835_s1 + $0xe1] ss:$2 sm:$0xff] }
 0x1ff   :  { %v4259_v20 = vadd.f32 %v4258_v54, %v4257_v42  ;;  %v7143_v49 = vcombine.high %v7141_v58, %v7141_v58  ;;  %v7151_v54 = vrot.slane %v6632_v28, %v8825_v18  ;;  %v8265_v14 = vsel %vm3822_vm0, %v7142_v23, 0.0 }
 0x200   :  { %v4264_v19 = vsel %vm3822_vm0, %v13121_v56, 0.0  ;;  %v4871_v61 = vrot.slane %v11967_v34, %v8808_v11  ;;  %v4875_v31 = vrot.slane %v11967_v34, %v8810_v12  ;;  %v8264_v17 = vadd.f32 %v8263_v7, %v8262_v52 }
 0x201   :  { %v4261_v1 = vadd.f32 %v4260_v48, %v4259_v20  ;;  %v4266_v33 = vsel %vm3822_vm0, %v11712_v35, 0.0  ;;  %v5906_v16 = vrot.slane %v5898_v22, %v8825_v18  ;;  %v5913_v53 = vrot.slane %v5899_v25, %v8825_v18 }
 0x202   :  { %v8267_v39 = vsel %vm3822_vm0, %v7141_v58, 0.0  ;;  %v4879_v28 = vrot.slane %v11967_v34, %v8812_v13  ;;  %v6633_v37 = vmul.f32 %v8710_v38, %v5897_v3  ;;  %v8266_v48 = vadd.f32 %v8265_v14, %v8264_v17 }
 0x203   :  { %v4263_v42 = vadd.f32 %v4262_v30, %v4261_v1  ;;  %v13122_v23 = vcombine.high %v11712_v35, %v11712_v35  ;;  %v7158_v20 = vrot.slane %v7144_v57, %v8825_v18  ;;  %v7159_v62 = vcombine.high %v7151_v54, %v7151_v54 }
 0x204   :  { %v8269_v58 = vsel %vm3822_vm0, %v7143_v49, 0.0  ;;  %v3531_v30 = vcombine.high %v11882_v55, %v11882_v55  ;;  %v4883_v22 = vrot.slane %v12040_v40, %v8793_v4  ;;  %v8268_v25 = vadd.f32 %v8267_v39, %v8266_v48 }
 0x205   :  { %v4265_v15 = vadd.f32 %v4264_v19, %v4263_v42  ;;  %v4268_v21 = vsel %vm3822_vm0, %v13122_v23, 0.0  ;;  %v4270_v7 = vsel %vm3822_vm0, %v11716_v47, 0.0  ;;  %v5914_v1 = vcombine.low %v5906_v16, %v5913_v53 }
 0x206   :  { %v5915_v35 = vcombine.low %v4867_v45, %v4871_v61  ;;  %v8271_v3 = vsel %vm3822_vm0, %v7151_v54, 0.0  ;;  %v5916_v57 = vcombine.low %v4875_v31, %v4879_v28  ;;  %v7161_v56 = vcombine.high %v6633_v37, %v6633_v37 }
 0x207   :  { %v4267_v34 = vadd.f32 %v4266_v33, %v4265_v15  ;;  %v8270_v19 = vadd.f32 %v8269_v58, %v8268_v25  ;;  %v13123_v49 = vcombine.high %v11716_v47, %v11716_v47  ;;  %v7160_v42 = vcombine.high %v7158_v20, %v7158_v20 }
 0x208   :  { %v7168_v17 = vrot.slane %v6633_v37, %v8825_v18  ;;  %v8273_v33 = vsel %vm3822_vm0, %v7159_v62, 0.0  ;;  %v4887_v45 = vrot.slane %v12040_v40, %v8795_v5  ;;  %v4891_v54 = vrot.slane %v12040_v40, %v8797_v6 }
 0x209   :  { %v4269_v52 = vadd.f32 %v4268_v21, %v4267_v34  ;;  %v4272_v14 = vsel %vm3822_vm0, %v13123_v49, 0.0  ;;  %v8272_v61 = vadd.f32 %v8271_v3, %v8270_v19  ;;  %v4274_v31 = vsel %vm3822_vm0, %v11734_v60, 0.0  ;;  %v8711_v21 = vld [vmem:[%s12834_s0 + $0xd0] sm:$0xff] }
 0x20a   :  { %v4895_v47 = vrot.slane %v12040_v40, %v8804_v9  ;;  %v5923_v16 = vrot.slane %v5915_v35, %v8825_v18  ;;  %v8275_v53 = vsel %vm3822_vm0, %v7158_v20, 0.0  ;;  %v5930_v28 = vrot.slane %v5916_v57, %v8825_v18 }
 0x20b   :  { %v4271_v39 = vadd.f32 %v4270_v7, %v4269_v52  ;;  %v7175_v38 = vrot.slane %v7161_v56, %v8825_v18  ;;  %v8274_v37 = vadd.f32 %v8273_v33, %v8272_v61  ;;  %v13124_v48 = vcombine.high %v11734_v60, %v11734_v60 }
 0x20c   :  { %v6634_v62 = vmul.f32 %v8711_v21, %v5914_v1  ;;  %v7176_v58 = vcombine.high %v7168_v17, %v7168_v17  ;;  %v8277_v34 = vsel %vm3822_vm0, %v7160_v42, 0.0  ;;  %v12093_v20 = vrot.slane %v3532_v51, %v8825_v18 }
 0x20d   :  { %v4273_v15 = vadd.f32 %v4272_v14, %v4271_v39  ;;  %v4276_v23 = vsel %vm3822_vm0, %v13124_v48, 0.0  ;;  %v4899_v60 = vrot.slane %v12040_v40, %v8806_v10  ;;  %v8276_v7 = vadd.f32 %v8275_v53, %v8274_v37 }
 0x20e   :  { %v4278_v35 = vsel %vm3822_vm0, %v11738_v59, 0.0  ;;  %v5932_v3 = vcombine.low %v4883_v22, %v4887_v45  ;;  %v5933_v52 = vcombine.low %v4891_v54, %v4895_v47  ;;  %v8279_v1 = vsel %vm3822_vm0, %v7168_v17, 0.0 }
 0x20f   :  { %v4275_v25 = vadd.f32 %v4274_v31, %v4273_v15  ;;  %v5931_v56 = vcombine.low %v5923_v16, %v5930_v28  ;;  %v7177_v19 = vcombine.high %v7175_v38, %v7175_v38  ;;  %v8278_v49 = vadd.f32 %v8277_v34, %v8276_v7  ;;  %v8712_v15 = vld [vmem:[%s12834_s0 + $0xd8] sm:$0xff] }
 0x210   :  { %v13125_v29 = vcombine.high %v11738_v59, %v11738_v59  ;;  %v7178_v14 = vcombine.high %v6634_v62, %v6634_v62  ;;  %v7185_v42 = vrot.slane %v6634_v62, %v8825_v18  ;;  %v8281_v33 = vsel %vm3822_vm0, %v7176_v58, 0.0  ;;  %v12115_v59 = vld [vmem:[%s12835_s1 + $0xf1] ss:$2 sm:$0xff] }
 0x211   :  { %v4277_v57 = vadd.f32 %v4276_v23, %v4275_v25  ;;  %v4903_v22 = vrot.slane %v12040_v40, %v8808_v11  ;;  %v4907_v17 = vrot.slane %v12040_v40, %v8810_v12  ;;  %v8280_v45 = vadd.f32 %v8279_v1, %v8278_v49 }
 0x212   :  { %v4280_v51 = vsel %vm3822_vm0, %v13125_v29, 0.0  ;;  %v4282_v54 = vsel %vm3822_vm0, %v11761_v36, 0.0  ;;  %v5940_v61 = vrot.slane %v5932_v3, %v8825_v18  ;;  %v5947_v31 = vrot.slane %v5933_v52, %v8825_v18 }
 0x213   :  { %v4279_v39 = vadd.f32 %v4278_v35, %v4277_v57  ;;  %v8283_v47 = vsel %vm3822_vm0, %v7175_v38, 0.0  ;;  %v4911_v53 = vrot.slane %v12040_v40, %v8812_v13  ;;  %v6635_v28 = vmul.f32 %v8712_v15, %v5931_v56 }
 0x214   :  { %v8282_v37 = vadd.f32 %v8281_v33, %v8280_v45  ;;  %v13126_v48 = vcombine.high %v11761_v36, %v11761_v36  ;;  %v7192_v21 = vrot.slane %v7178_v14, %v8825_v18  ;;  %v7193_v62 = vcombine.high %v7185_v42, %v7185_v42 }
 0x215   :  { %v4281_v16 = vadd.f32 %v4280_v51, %v4279_v39  ;;  %v8285_v38 = vsel %vm3822_vm0, %v7177_v19, 0.0  ;;  %v12133_v58 = vrot.slane %v11515_v26, %v8825_v18  ;;  %v4915_v34 = vrot.slane %v12115_v59, %v8793_v4 }
 0x216   :  { %v4284_v23 = vsel %vm3822_vm0, %v13126_v48, 0.0  ;;  %v8284_v25 = vadd.f32 %v8283_v47, %v8282_v37  ;;  %v4286_v7 = vsel %vm3822_vm0, %v11777_v63, 0.0  ;;  %v5948_v36 = vcombine.low %v5940_v61, %v5947_v31 }
 0x217   :  { %v4283_v40 = vadd.f32 %v4282_v54, %v4281_v16  ;;  %v5949_v35 = vcombine.low %v4899_v60, %v4903_v22  ;;  %v8287_v3 = vsel %vm3822_vm0, %v7185_v42, 0.0  ;;  %v5950_v1 = vcombine.low %v4907_v17, %v4911_v53  ;;  %v8713_v53 = vld [vmem:[%s12834_s0 + $0xe0] sm:$0xff] }
 0x218   :  { %v7195_v57 = vcombine.high %v6635_v28, %v6635_v28  ;;  %v8286_v56 = vadd.f32 %v8285_v38, %v8284_v25  ;;  %v13127_v19 = vcombine.high %v11777_v63, %v11777_v63  ;;  %v7194_v29 = vcombine.high %v7192_v21, %v7192_v21 }
 0x219   :  { %v4285_v52 = vadd.f32 %v4284_v23, %v4283_v40  ;;  %v7202_v51 = vrot.slane %v6635_v28, %v8825_v18  ;;  %v8289_v14 = vsel %vm3822_vm0, %v7193_v62, 0.0  ;;  %v4919_v60 = vrot.slane %v12115_v59, %v8795_v5 }
 0x21a   :  { %v4288_v49 = vsel %vm3822_vm0, %v13127_v19, 0.0  ;;  %v4923_v42 = vrot.slane %v12115_v59, %v8797_v6  ;;  %v8288_v39 = vadd.f32 %v8287_v3, %v8286_v56  ;;  %v4290_v22 = vsel %vm3822_vm0, %v11788_v46, 0.0 }
 0x21b   :  { %v4287_v33 = vadd.f32 %v4286_v7, %v4285_v52  ;;  %v4927_v63 = vrot.slane %v12115_v59, %v8804_v9  ;;  %v5957_v17 = vrot.slane %v5949_v35, %v8825_v18  ;;  %v8291_v45 = vsel %vm3822_vm0, %v7192_v21, 0.0 }
 0x21c   :  { %v5964_v61 = vrot.slane %v5950_v1, %v8825_v18  ;;  %v7209_v31 = vrot.slane %v7195_v57, %v8825_v18  ;;  %v8290_v47 = vadd.f32 %v8289_v14, %v8288_v39  ;;  %v4292_v16 = vsel %vm3822_vm0, %v3480_v0, 0.0 }
 0x21d   :  { %v4289_v54 = vadd.f32 %v4288_v49, %v4287_v33  ;;  %v6636_v15 = vmul.f32 %v8713_v53, %v5948_v36  ;;  %v7210_v28 = vcombine.high %v7202_v51, %v7202_v51  ;;  %v8293_v37 = vsel %vm3822_vm0, %v7194_v29, 0.0 }
 0x21e   :  { %v3547_v48 = vcombine.high %v11985_v24, %v11985_v24  ;;  %v4931_v21 = vrot.slane %v12115_v59, %v8806_v10  ;;  %v8292_v62 = vadd.f32 %v8291_v45, %v8290_v47  ;;  %v4294_v46 = vsel %vm3822_vm0, %v11792_v8, 0.0  ;;  %v12188_v8 = vld [vmem:[%s12835_s1 + $0x101] ss:$2 sm:$0xff] }
 0x21f   :  { %v4291_v23 = vadd.f32 %v4290_v22, %v4289_v54  ;;  %v5966_v0 = vcombine.low %v4915_v34, %v4919_v60  ;;  %v5967_v38 = vcombine.low %v4923_v42, %v4927_v63  ;;  %v8295_v40 = vsel %vm3822_vm0, %v7202_v51, 0.0  ;;  %v8714_v42 = vld [vmem:[%s12834_s0 + $0xe8] sm:$0xff] }
 0x220   :  { %v5965_v7 = vcombine.low %v5957_v17, %v5964_v61  ;;  %v7211_v36 = vcombine.high %v7209_v31, %v7209_v31  ;;  %v8294_v35 = vadd.f32 %v8293_v37, %v8292_v62  ;;  %v4296_v3 = vsel %vm3822_vm0, %v3496_v43, 0.0 }
 0x221   :  { %v4293_v25 = vadd.f32 %v4292_v16, %v4291_v23  ;;  %v7212_v52 = vcombine.high %v6636_v15, %v6636_v15  ;;  %v7219_v1 = vrot.slane %v6636_v15, %v8825_v18  ;;  %v8297_v57 = vsel %vm3822_vm0, %v7210_v28, 0.0 }
 0x222   :  { %v4935_v34 = vrot.slane %v12115_v59, %v8808_v11  ;;  %v4939_v19 = vrot.slane %v12115_v59, %v8810_v12  ;;  %v8296_v49 = vadd.f32 %v8295_v40, %v8294_v35  ;;  %v4298_v29 = vsel %vm3822_vm0, %v11820_v2, 0.0 }
 0x223   :  { %v4295_v56 = vadd.f32 %v4294_v46, %v4293_v25  ;;  %v5974_v43 = vrot.slane %v5966_v0, %v8825_v18  ;;  %v5981_v51 = vrot.slane %v5967_v38, %v8825_v18  ;;  %v8299_v14 = vsel %vm3822_vm0, %v7209_v31, 0.0 }
 0x224   :  { %v4943_v60 = vrot.slane %v12115_v59, %v8812_v13  ;;  %v6637_v39 = vmul.f32 %v8714_v42, %v5965_v7  ;;  %v8298_v22 = vadd.f32 %v8297_v57, %v8296_v49  ;;  %v13128_v63 = vcombine.high %v11820_v2, %v11820_v2 }
 0x225   :  { %v4297_v33 = vadd.f32 %v4296_v3, %v4295_v56  ;;  %v7226_v45 = vrot.slane %v7212_v52, %v8825_v18  ;;  %v7227_v54 = vcombine.high %v7219_v1, %v7219_v1  ;;  %v8301_v61 = vsel %vm3822_vm0, %v7211_v36, 0.0 }
 0x226   :  { %v4300_v17 = vsel %vm3822_vm0, %v13128_v63, 0.0  ;;  %v12208_v59 = vrot.slane %v3549_v50, %v8825_v18  ;;  %v4947_v47 = vrot.slane %v12188_v8, %v8793_v4  ;;  %v8300_v16 = vadd.f32 %v8299_v14, %v8298_v22 }
 0x227   :  { %v4299_v31 = vadd.f32 %v4298_v29, %v4297_v33  ;;  %v4302_v2 = vsel %vm3822_vm0, %v11824_v41, 0.0  ;;  %v5982_v53 = vcombine.low %v5974_v43, %v5981_v51  ;;  %v5983_v15 = vcombine.low %v4931_v21, %v4935_v34  ;;  %v8715_v29 = vld [vmem:[%s12834_s0 + $0xf0] sm:$0xff] }
 0x228   :  { %v8303_v28 = vsel %vm3822_vm0, %v7219_v1, 0.0  ;;  %v5984_v23 = vcombine.low %v4939_v19, %v4943_v60  ;;  %v7229_v62 = vcombine.high %v6637_v39, %v6637_v39  ;;  %v8302_v46 = vadd.f32 %v8301_v61, %v8300_v16 }
 0x229   :  { %v4301_v37 = vadd.f32 %v4300_v17, %v4299_v31  ;;  %v13129_v26 = vcombine.high %v11824_v41, %v11824_v41  ;;  %v7228_v0 = vcombine.high %v7226_v45, %v7226_v45  ;;  %v7236_v38 = vrot.slane %v6637_v39, %v8825_v18 }
 0x22a   :  { %v8305_v40 = vsel %vm3822_vm0, %v7227_v54, 0.0  ;;  %v4951_v21 = vrot.slane %v12188_v8, %v8795_v5  ;;  %v4955_v7 = vrot.slane %v12188_v8, %v8797_v6  ;;  %v8304_v36 = vadd.f32 %v8303_v28, %v8302_v46 }
 0x22b   :  { %v4304_v50 = vsel %vm3822_vm0, %v13129_v26, 0.0  ;;  %v4303_v25 = vadd.f32 %v4302_v2, %v4301_v37  ;;  %v4306_v35 = vsel %vm3822_vm0, %v11863_v27, 0.0  ;;  %v4959_v41 = vrot.slane %v12188_v8, %v8804_v9 }
 0x22c   :  { %v5991_v3 = vrot.slane %v5983_v15, %v8825_v18  ;;  %v8307_v52 = vsel %vm3822_vm0, %v7226_v45, 0.0  ;;  %v5998_v57 = vrot.slane %v5984_v23, %v8825_v18  ;;  %v7243_v56 = vrot.slane %v7229_v62, %v8825_v18 }
 0x22d   :  { %v4305_v1 = vadd.f32 %v4304_v50, %v4303_v25  ;;  %v8306_v34 = vadd.f32 %v8305_v40, %v8304_v36  ;;  %v13130_v19 = vcombine.high %v11863_v27, %v11863_v27  ;;  %v6638_v43 = vmul.f32 %v8715_v29, %v5982_v53 }
 0x22e   :  { %v7244_v51 = vcombine.high %v7236_v38, %v7236_v38  ;;  %v8309_v14 = vsel %vm3822_vm0, %v7228_v0, 0.0  ;;  %v3548_v33 = vcombine.high %v12093_v20, %v12093_v20  ;;  %v4963_v42 = vrot.slane %v12188_v8, %v8806_v10 }
 0x22f   :  { %v4308_v49 = vsel %vm3822_vm0, %v13130_v19, 0.0  ;;  %v4307_v60 = vadd.f32 %v4306_v35, %v4305_v1  ;;  %v8308_v39 = vadd.f32 %v8307_v52, %v8306_v34  ;;  %v4310_v27 = vsel %vm3822_vm0, %v11867_v44, 0.0  ;;  %v12263_v44 = vld [vmem:[%s12835_s1 + $0x111] ss:$2 sm:$0xff] }
 0x230   :  { %v6000_v22 = vcombine.low %v4947_v47, %v4951_v21  ;;  %v6001_v63 = vcombine.low %v4955_v7, %v4959_v41  ;;  %v8311_v17 = vsel %vm3822_vm0, %v7236_v38, 0.0  ;;  %v5999_v54 = vcombine.low %v5991_v3, %v5998_v57  ;;  %v8716_v38 = vld [vmem:[%s12834_s0 + $0xf8] sm:$0xff] }
 0x231   :  { %v4309_v45 = vadd.f32 %v4308_v49, %v4307_v60  ;;  %v7245_v61 = vcombine.high %v7243_v56, %v7243_v56  ;;  %v8310_v31 = vadd.f32 %v8309_v14, %v8308_v39  ;;  %v4312_v16 = vsel %vm3822_vm0, %v3530_v32, 0.0 }
 0x232   :  { %v7246_v2 = vcombine.high %v6638_v43, %v6638_v43  ;;  %v7253_v53 = vrot.slane %v6638_v43, %v8825_v18  ;;  %v8313_v15 = vsel %vm3822_vm0, %v7244_v51, 0.0  ;;  %v4967_v47 = vrot.slane %v12188_v8, %v8808_v11 }
 0x233   :  { %v4311_v28 = vadd.f32 %v4310_v27, %v4309_v45  ;;  %v4971_v37 = vrot.slane %v12188_v8, %v8810_v12  ;;  %v8312_v23 = vadd.f32 %v8311_v17, %v8310_v31  ;;  %v4314_v62 = vsel %vm3822_vm0, %v11882_v55, 0.0 }
 0x234   :  { %v6008_v32 = vrot.slane %v6000_v22, %v8825_v18  ;;  %v6015_v46 = vrot.slane %v6001_v63, %v8825_v18  ;;  %v8315_v26 = vsel %vm3822_vm0, %v7243_v56, 0.0  ;;  %v4975_v0 = vrot.slane %v12188_v8, %v8812_v13 }
 0x235   :  { %v4313_v50 = vadd.f32 %v4312_v16, %v4311_v28  ;;  %v6639_v40 = vmul.f32 %v8716_v38, %v5999_v54  ;;  %v8314_v25 = vadd.f32 %v8313_v15, %v8312_v23  ;;  %v4316_v21 = vsel %vm3822_vm0, %v3531_v30, 0.0  ;;  %v8717_v16 = vld [vmem:[%s12834_s0 + $0x100] sm:$0xff] }
 0x236   :  { %v7260_v7 = vrot.slane %v7246_v2, %v8825_v18  ;;  %v7261_v36 = vcombine.high %v7253_v53, %v7253_v53  ;;  %v8317_v35 = vsel %vm3822_vm0, %v7245_v61, 0.0  ;;  %v3564_v41 = vcombine.high %v12133_v58, %v12133_v58 }
 0x237   :  { %v4315_v8 = vadd.f32 %v4314_v62, %v4313_v50  ;;  %v4979_v3 = vrot.slane %v12263_v44, %v8793_v4  ;;  %v8316_v52 = vadd.f32 %v8315_v26, %v8314_v25  ;;  %v4318_v1 = vsel %vm3822_vm0, %v11985_v24, 0.0 }
 0x238   :  { %v6016_v57 = vcombine.low %v6008_v32, %v6015_v46  ;;  %v6017_v55 = vcombine.low %v4963_v42, %v4967_v47  ;;  %v8319_v30 = vsel %vm3822_vm0, %v7253_v53, 0.0  ;;  %v6018_v34 = vcombine.low %v4971_v37, %v4975_v0 }
 0x239   :  { %v4317_v56 = vadd.f32 %v4316_v21, %v4315_v8  ;;  %v7263_v19 = vcombine.high %v6639_v40, %v6639_v40  ;;  %v8318_v49 = vadd.f32 %v8317_v35, %v8316_v52  ;;  %v4320_v29 = vsel %vm3822_vm0, %v3547_v48, 0.0 }
 0x23a   :  { %v7262_v43 = vcombine.high %v7260_v7, %v7260_v7  ;;  %v7270_v51 = vrot.slane %v6639_v40, %v8825_v18  ;;  %v8321_v14 = vsel %vm3822_vm0, %v7261_v36, 0.0  ;;  %v4983_v42 = vrot.slane %v12263_v44, %v8795_v5 }
 0x23b   :  { %v4319_v60 = vadd.f32 %v4318_v1, %v4317_v56  ;;  %v4987_v39 = vrot.slane %v12263_v44, %v8797_v6  ;;  %v8320_v27 = vadd.f32 %v8319_v30, %v8318_v49  ;;  %v4322_v22 = vsel %vm3822_vm0, %v12093_v20, 0.0 }
 0x23c   :  { %v4991_v24 = vrot.slane %v12263_v44, %v8804_v9  ;;  %v6025_v48 = vrot.slane %v6017_v55, %v8825_v18  ;;  %v8323_v63 = vsel %vm3822_vm0, %v7260_v7, 0.0  ;;  %v6032_v45 = vrot.slane %v6018_v34, %v8825_v18  ;;  %v8718_v55 = vld [vmem:[%s12834_s0 + $0x108] sm:$0xff] }
 0x23d   :  { %v4321_v17 = vadd.f32 %v4320_v29, %v4319_v60  ;;  %v7277_v54 = vrot.slane %v7263_v19, %v8825_v18  ;;  %v8322_v61 = vadd.f32 %v8321_v14, %v8320_v27  ;;  %v4324_v31 = vsel %vm3822_vm0, %v3548_v33, 0.0 }
 0x23e   :  { %v6640_v20 = vmul.f32 %v8717_v16, %v6016_v57  ;;  %v7278_v2 = vcombine.high %v7270_v51, %v7270_v51  ;;  %v8325_v53 = vsel %vm3822_vm0, %v7262_v43, 0.0  ;;  %v3565_v15 = vcombine.high %v12208_v59, %v12208_v59 }
 0x23f   :  { %v4323_v28 = vadd.f32 %v4322_v22, %v4321_v17  ;;  %v4995_v47 = vrot.slane %v12263_v44, %v8806_v10  ;;  %v8324_v37 = vadd.f32 %v8323_v63, %v8322_v61  ;;  %v4326_v23 = vsel %vm3822_vm0, %v12133_v58, 0.0 }
 0x240   :  { %v6034_v33 = vcombine.low %v4979_v3, %v4983_v42  ;;  %v6035_v62 = vcombine.low %v4987_v39, %v4991_v24  ;;  %v8327_v32 = vsel %vm3822_vm0, %v7270_v51, 0.0  ;;  %v6033_v26 = vcombine.low %v6025_v48, %v6032_v45 }
 0x241   :  { %v4325_v46 = vadd.f32 %v4324_v31, %v4323_v28  ;;  %v7279_v50 = vcombine.high %v7277_v54, %v7277_v54  ;;  %v8326_v0 = vadd.f32 %v8325_v53, %v8324_v37  ;;  %v4328_v38 = vsel %vm3822_vm0, %v3564_v41, 0.0 }
 0x242   :  { %v7280_v40 = vcombine.high %v6640_v20, %v6640_v20  ;;  %v7287_v25 = vrot.slane %v6640_v20, %v8825_v18  ;;  %v8329_v21 = vsel %vm3822_vm0, %v7278_v2, 0.0  ;;  %v4999_v36 = vrot.slane %v12263_v44, %v8808_v11 }
 0x243   :  { %v4327_v7 = vadd.f32 %v4326_v23, %v4325_v46  ;;  %v5003_v58 = vrot.slane %v12263_v44, %v8810_v12  ;;  %v8328_v35 = vadd.f32 %v8327_v32, %v8326_v0  ;;  %v4330_v8 = vsel %vm3822_vm0, %v12208_v59, 0.0 }
 0x244   :  { %v6042_v3 = vrot.slane %v6034_v33, %v8825_v18  ;;  %v6049_v41 = vrot.slane %v6035_v62, %v8825_v18  ;;  %v8331_v52 = vsel %vm3822_vm0, %v7277_v54, 0.0  ;;  %v5007_v57 = vrot.slane %v12263_v44, %v8812_v13  ;;  %v8668_v44 = vld [vmem:[%s12835_s1 + $0x121] ss:$2 sm:$0xff] }
 0x245   :  { %v4329_v1 = vadd.f32 %v4328_v38, %v4327_v7  ;;  %v6641_v30 = vmul.f32 %v8718_v55, %v6033_v26  ;;  %v8330_v56 = vadd.f32 %v8329_v21, %v8328_v35  ;;  %v4332_v34 = vsel %vm3822_vm0, %v3565_v15, 0.0  ;;  %v8719_v15 = vld [vmem:[%s12834_s0 + $0x110] sm:$0xff] }
 0x246   :  { %v7294_v59 = vrot.slane %v7280_v40, %v8825_v18  ;;  %v7295_v19 = vcombine.high %v7287_v25, %v7287_v25  ;;  %v8333_v49 = vsel %vm3822_vm0, %v7279_v50, 0.0  ;;  %v6050_v51 = vcombine.low %v6042_v3, %v6049_v41 }
 0x247   :  { %v4331_v29 = vadd.f32 %v4330_v8, %v4329_v1  ;;  %v8332_v43 = vadd.f32 %v8331_v52, %v8330_v56  ;;  %v8335_v14 = vsel %vm3822_vm0, %v7287_v25, 0.0  ;;  %v6051_v42 = vcombine.low %v4995_v47, %v4999_v36  ;;  %v8720_v1 = vld [vmem:[%s12834_s0 + $0x118] sm:$0xff] }
 0x248   :  { %v6052_v39 = vcombine.low %v5003_v58, %v5007_v57  ;;  %v7296_v22 = vcombine.high %v7294_v59, %v7294_v59  ;;  %v7297_v24 = vcombine.high %v6641_v30, %v6641_v30  ;;  %v7304_v48 = vrot.slane %v6641_v30, %v8825_v18 }
 0x249   :  { %v4333_v60 = vadd.f32 %v4332_v34, %v4331_v29  ;;  %v8334_v27 = vadd.f32 %v8333_v49, %v8332_v43  ;;  %v8337_v63 = vsel %vm3822_vm0, %v7295_v19, 0.0  ;;  %v5011_v45 = vrot.slane %v8668_v44, %v8793_v4  ;;  %v8669_v19 = vld [vmem:[%s12835_s1 + $0x131] ss:$2 sm:$0xff] }
 0x24a   :  { %v5015_v54 = vrot.slane %v8668_v44, %v8795_v5  ;;  %v5019_v61 = vrot.slane %v8668_v44, %v8797_v6  ;;  %v8339_v31 = vsel %vm3822_vm0, %v7294_v59, 0.0  ;;  %v5023_v16 = vrot.slane %v8668_v44, %v8804_v9 }
 0x24b   :  { %4334 = vadd.xlane.f32.xlu0 %v4333_v60  ;;  %v8336_v17 = vadd.f32 %v8335_v14, %v8334_v27  ;;  %v6059_v20 = vrot.slane %v6051_v42, %v8825_v18  ;;  %v6066_v2 = vrot.slane %v6052_v39, %v8825_v18  ;;  %v6642_v28 = vmul.f32 %v8719_v15, %v6050_v51 }
 0x24c   :  { %v7311_v47 = vrot.slane %v7297_v24, %v8825_v18  ;;  %v7312_v37 = vcombine.high %v7304_v48, %v7304_v48  ;;  %v8341_v23 = vsel %vm3822_vm0, %v7296_v22, 0.0  ;;  %v8343_v62 = vsel %vm3822_vm0, %v7304_v48, 0.0 }
 0x24d   :  { %v8338_v53 = vadd.f32 %v8337_v63, %v8336_v17  ;;  %v6067_v32 = vcombine.low %v6059_v20, %v6066_v2  ;;  %v6068_v46 = vcombine.low %v5011_v45, %v5015_v54  ;;  %v6069_v26 = vcombine.low %v5019_v61, %v5023_v16  ;;  %v8721_v61 = vld [vmem:[%s12834_s0 + $0x120] sm:$0xff] }
 0x24e   :  { %v7313_v0 = vcombine.high %v7311_v47, %v7311_v47  ;;  %v7314_v38 = vcombine.high %v6642_v28, %v6642_v28  ;;  %v7321_v40 = vrot.slane %v6642_v28, %v8825_v18  ;;  %v8345_v25 = vsel %vm3822_vm0, %v7312_v37, 0.0 }
 0x24f   :  { %v8340_v33 = vadd.f32 %v8339_v31, %v8338_v53  ;;  %v5027_v7 = vrot.slane %v8668_v44, %v8806_v10  ;;  %v5031_v36 = vrot.slane %v8668_v44, %v8808_v11  ;;  %v5035_v58 = vrot.slane %v8668_v44, %v8810_v12 }
 0x250   :  { %v8347_v35 = vsel %vm3822_vm0, %v7311_v47, 0.0  ;;  %v5039_v8 = vrot.slane %v8668_v44, %v8812_v13  ;;  %v6076_v3 = vrot.slane %v6068_v46, %v8825_v18  ;;  %v6083_v41 = vrot.slane %v6069_v26, %v8825_v18 }
 0x251   :  { %v8342_v50 = vadd.f32 %v8341_v23, %v8340_v33  ;;  %v6643_v57 = vmul.f32 %v8720_v1, %v6067_v32  ;;  %v7328_v55 = vrot.slane %v7314_v38, %v8825_v18  ;;  %v7329_v30 = vcombine.high %v7321_v40, %v7321_v40 }
 0x252   :  { %v8349_v56 = vsel %vm3822_vm0, %v7313_v0, 0.0  ;;  %v8351_v59 = vsel %vm3822_vm0, %v7321_v40, 0.0  ;;  %v6084_v49 = vcombine.low %v6076_v3, %v6083_v41  ;;  %v6085_v29 = vcombine.low %v5027_v7, %v5031_v36 }
 0x253   :  { %v8344_v21 = vadd.f32 %v8343_v62, %v8342_v50  ;;  %v6086_v43 = vcombine.low %v5035_v58, %v5039_v8  ;;  %v7330_v14 = vcombine.high %v7328_v55, %v7328_v55  ;;  %v7331_v60 = vcombine.high %v6643_v57, %v6643_v57  ;;  %v8722_v58 = vld [vmem:[%s12834_s0 + $0x128] sm:$0xff] }
 0x254   :  { %v7338_v44 = vrot.slane %v6643_v57, %v8825_v18  ;;  %v8353_v42 = vsel %vm3822_vm0, %v7329_v30, 0.0  ;;  %v5043_v27 = vrot.slane %v8669_v19, %v8793_v4  ;;  %v5047_v22 = vrot.slane %v8669_v19, %v8795_v5  ;;  %v8670_v57 = vld [vmem:[%s12835_s1 + $0x141] ss:$2 sm:$0xff] }
 0x255   :  { %v8346_v52 = vadd.f32 %v8345_v25, %v8344_v21  ;;  %v5051_v24 = vrot.slane %v8669_v19, %v8797_v6  ;;  %v8355_v48 = vsel %vm3822_vm0, %v7328_v55, 0.0  ;;  %v5055_v63 = vrot.slane %v8669_v19, %v8804_v9 }
 0x256   :  { %v6093_v17 = vrot.slane %v6085_v29, %v8825_v18  ;;  %v6100_v45 = vrot.slane %v6086_v43, %v8825_v18  ;;  %v6644_v31 = vmul.f32 %v8721_v61, %v6084_v49  ;;  %v7345_v16 = vrot.slane %v7331_v60, %v8825_v18 }
 0x257   :  { %v8348_v34 = vadd.f32 %v8347_v35, %v8346_v52  ;;  %v7346_v20 = vcombine.high %v7338_v44, %v7338_v44  ;;  %v8357_v2 = vsel %vm3822_vm0, %v7330_v14, 0.0  ;;  %v8359_v15 = vsel %vm3822_vm0, %v7338_v44, 0.0 }
 0x258   :  { %v6101_v28 = vcombine.low %v6093_v17, %v6100_v45  ;;  %v6102_v47 = vcombine.low %v5043_v27, %v5047_v22  ;;  %v6103_v37 = vcombine.low %v5051_v24, %v5055_v63  ;;  %v7347_v33 = vcombine.high %v7345_v16, %v7345_v16  ;;  %v8723_v24 = vld [vmem:[%s12834_s0 + $0x130] sm:$0xff] }
 0x259   :  { %v8350_v51 = vadd.f32 %v8349_v56, %v8348_v34  ;;  %v7348_v62 = vcombine.high %v6644_v31, %v6644_v31  ;;  %v7355_v32 = vrot.slane %v6644_v31, %v8825_v18  ;;  %v8361_v46 = vsel %vm3822_vm0, %v7346_v20, 0.0 }
 0x25a   :  { %v5059_v50 = vrot.slane %v8669_v19, %v8806_v10  ;;  %v5063_v0 = vrot.slane %v8669_v19, %v8808_v11  ;;  %v5067_v38 = vrot.slane %v8669_v19, %v8810_v12  ;;  %v8363_v40 = vsel %vm3822_vm0, %v7345_v16, 0.0 }
 0x25b   :  { %v8352_v39 = vadd.f32 %v8351_v59, %v8350_v51  ;;  %v5071_v25 = vrot.slane %v8669_v19, %v8812_v13  ;;  %v6110_v21 = vrot.slane %v6102_v47, %v8825_v18  ;;  %v6117_v7 = vrot.slane %v6103_v37, %v8825_v18 }
 0x25c   :  { %v6645_v35 = vmul.f32 %v8722_v58, %v6101_v28  ;;  %v7362_v8 = vrot.slane %v7348_v62, %v8825_v18  ;;  %v7363_v3 = vcombine.high %v7355_v32, %v7355_v32  ;;  %v8365_v41 = vsel %vm3822_vm0, %v7347_v33, 0.0 }
 0x25d   :  { %v8354_v54 = vadd.f32 %v8353_v42, %v8352_v39  ;;  %v8367_v1 = vsel %vm3822_vm0, %v7355_v32, 0.0  ;;  %v6118_v55 = vcombine.low %v6110_v21, %v6117_v7  ;;  %v6119_v30 = vcombine.low %v5059_v50, %v5063_v0 }
 0x25e   :  { %v6120_v56 = vcombine.low %v5067_v38, %v5071_v25  ;;  %v7364_v59 = vcombine.high %v7362_v8, %v7362_v8  ;;  %v7365_v19 = vcombine.high %v6645_v35, %v6645_v35  ;;  %v7372_v49 = vrot.slane %v6645_v35, %v8825_v18  ;;  %v8724_v38 = vld [vmem:[%s12834_s0 + $0x138] sm:$0xff] }
 0x25f   :  { %v8356_v53 = vadd.f32 %v8355_v48, %v8354_v54  ;;  %v8369_v29 = vsel %vm3822_vm0, %v7363_v3, 0.0  ;;  %v5075_v51 = vrot.slane %v8670_v57, %v8793_v4  ;;  %v5079_v14 = vrot.slane %v8670_v57, %v8795_v5  ;;  %v8671_v35 = vld [vmem:[%s12835_s1 + $0x151] ss:$2 sm:$0xff] }
 0x260   :  { %v5083_v60 = vrot.slane %v8670_v57, %v8797_v6  ;;  %v8371_v44 = vsel %vm3822_vm0, %v7362_v8, 0.0  ;;  %v5087_v42 = vrot.slane %v8670_v57, %v8804_v9  ;;  %v6127_v39 = vrot.slane %v6119_v30, %v8825_v18 }
 0x261   :  { %v8358_v23 = vadd.f32 %v8357_v2, %v8356_v53  ;;  %v6134_v27 = vrot.slane %v6120_v56, %v8825_v18  ;;  %v6646_v48 = vmul.f32 %v8723_v24, %v6118_v55  ;;  %v7379_v63 = vrot.slane %v7365_v19, %v8825_v18 }
 0x262   :  { %v7380_v17 = vcombine.high %v7372_v49, %v7372_v49  ;;  %v8373_v45 = vsel %vm3822_vm0, %v7364_v59, 0.0  ;;  %v8375_v61 = vsel %vm3822_vm0, %v7372_v49, 0.0  ;;  %v6136_v16 = vcombine.low %v5075_v51, %v5079_v14 }
 0x263   :  { %v8360_v26 = vadd.f32 %v8359_v15, %v8358_v23  ;;  %v6135_v31 = vcombine.low %v6127_v39, %v6134_v27  ;;  %v6137_v20 = vcombine.low %v5083_v60, %v5087_v42  ;;  %v7381_v53 = vcombine.high %v7379_v63, %v7379_v63  ;;  %v8725_v60 = vld [vmem:[%s12834_s0 + $0x140] sm:$0xff] }
 0x264   :  { %v7382_v15 = vcombine.high %v6646_v48, %v6646_v48  ;;  %v7389_v28 = vrot.slane %v6646_v48, %v8825_v18  ;;  %v8377_v47 = vsel %vm3822_vm0, %v7380_v17, 0.0  ;;  %v5091_v23 = vrot.slane %v8670_v57, %v8806_v10 }
 0x265   :  { %v8362_v36 = vadd.f32 %v8361_v46, %v8360_v26  ;;  %v5095_v33 = vrot.slane %v8670_v57, %v8808_v11  ;;  %v5099_v62 = vrot.slane %v8670_v57, %v8810_v12  ;;  %v8379_v32 = vsel %vm3822_vm0, %v7379_v63, 0.0 }
 0x266   :  { %v5103_v46 = vrot.slane %v8670_v57, %v8812_v13  ;;  %v6144_v26 = vrot.slane %v6136_v16, %v8825_v18  ;;  %v6151_v50 = vrot.slane %v6137_v20, %v8825_v18  ;;  %v7396_v25 = vrot.slane %v7382_v15, %v8825_v18 }
 0x267   :  { %v8364_v52 = vadd.f32 %v8363_v40, %v8362_v36  ;;  %v6647_v40 = vmul.f32 %v8724_v38, %v6135_v31  ;;  %v7397_v21 = vcombine.high %v7389_v28, %v7389_v28  ;;  %v8381_v7 = vsel %vm3822_vm0, %v7381_v53, 0.0 }
 0x268   :  { %v8383_v58 = vsel %vm3822_vm0, %v7389_v28, 0.0  ;;  %v6152_v8 = vcombine.low %v6144_v26, %v6151_v50  ;;  %v6153_v3 = vcombine.low %v5091_v23, %v5095_v33  ;;  %v5111_v59 = vrot.slane %v8671_v35, %v8795_v5 }
 0x269   :  { %v8366_v34 = vadd.f32 %v8365_v41, %v8364_v52  ;;  %v6154_v41 = vcombine.low %v5099_v62, %v5103_v46  ;;  %v7399_v57 = vcombine.high %v6647_v40, %v6647_v40  ;;  %v7406_v55 = vrot.slane %v6647_v40, %v8825_v18  ;;  %v8726_v62 = vld [vmem:[%s12834_s0 + $0x148] sm:$0xff] }
 0x26a   :  { %v8385_v30 = vsel %vm3822_vm0, %v7397_v21, 0.0  ;;  %v5115_v19 = vrot.slane %v8671_v35, %v8797_v6  ;;  %v8387_v49 = vsel %vm3822_vm0, %v7396_v25, 0.0  ;;  %v5127_v53 = vrot.slane %v8671_v35, %v8808_v11  ;;  %v8672_v40 = vld [vmem:[%s12835_s1 + $0x161] ss:$2 sm:$0xff] }
 0x26b   :  { %v8368_v43 = vadd.f32 %v8367_v1, %v8366_v34  ;;  %v7398_v1 = vcombine.high %v7396_v25, %v7396_v25  ;;  %v5107_v34 = vrot.slane %v8671_v35, %v8793_v4  ;;  %v6168_v51 = vrot.slane %v6154_v41, %v8825_v18 }
 0x26c   :  { %v7413_v42 = vrot.slane %v7399_v57, %v8825_v18  ;;  %v7414_v39 = vcombine.high %v7406_v55, %v7406_v55  ;;  %v8391_v24 = vsel %vm3822_vm0, %v7406_v55, 0.0  ;;  %v5131_v15 = vrot.slane %v8671_v35, %v8810_v12 }
 0x26d   :  { %v8370_v22 = vadd.f32 %v8369_v29, %v8368_v43  ;;  %v5119_v29 = vrot.slane %v8671_v35, %v8804_v9  ;;  %v6161_v43 = vrot.slane %v6153_v3, %v8825_v18  ;;  %v8389_v27 = vsel %vm3822_vm0, %v7398_v1, 0.0 }
 0x26e   :  { %v6170_v63 = vcombine.low %v5107_v34, %v5111_v59  ;;  %v8393_v16 = vsel %vm3822_vm0, %v7414_v39, 0.0  ;;  %v8395_v28 = vsel %vm3822_vm0, %v7413_v42, 0.0  ;;  %v5143_v1 = vrot.slane %v8672_v40, %v8795_v5 }
 0x26f   :  { %v8372_v54 = vadd.f32 %v8371_v44, %v8370_v22  ;;  %v6648_v44 = vmul.f32 %v8725_v60, %v6152_v8  ;;  %v6169_v48 = vcombine.low %v6161_v43, %v6168_v51  ;;  %v6171_v17 = vcombine.low %v5115_v19, %v5119_v29  ;;  %v8727_v19 = vld [vmem:[%s12834_s0 + $0x150] sm:$0xff] }
 0x270   :  { %v5147_v57 = vrot.slane %v8672_v40, %v8797_v6 }
 0x271   :  { %v8374_v2 = vadd.f32 %v8373_v45, %v8372_v54  ;;  %v7415_v54 = vcombine.high %v7413_v42, %v7413_v42  ;;  %v7423_v31 = vrot.slane %v6648_v44, %v8825_v18  ;;  %v6185_v23 = vrot.slane %v6171_v17, %v8825_v18 }
 0x273   :  { %v8376_v37 = vadd.f32 %v8375_v61, %v8374_v2  ;;  %v7416_v61 = vcombine.high %v6648_v44, %v6648_v44  ;;  %v5123_v2 = vrot.slane %v8671_v35, %v8806_v10  ;;  %v7431_v26 = vcombine.high %v7423_v31, %v7423_v31 }
 0x274   :  { %v8397_v50 = vsel %vm3822_vm0, %v7415_v54, 0.0  ;;  %v8399_v38 = vsel %vm3822_vm0, %v7423_v31, 0.0  ;;  %v5159_v54 = vrot.slane %v8672_v40, %v8808_v11 }
 0x275   :  { %v8378_v0 = vadd.f32 %v8377_v47, %v8376_v37  ;;  %v5135_v47 = vrot.slane %v8671_v35, %v8812_v13  ;;  %v6178_v37 = vrot.slane %v6170_v63, %v8825_v18  ;;  %v7430_v46 = vrot.slane %v7416_v61, %v8825_v18 }
 0x276   :  { %v6187_v21 = vcombine.low %v5123_v2, %v5127_v53  ;;  %v8401_v3 = vsel %vm3822_vm0, %v7431_v26, 0.0  ;;  %v5163_v61 = vrot.slane %v8672_v40, %v8810_v12 }
 0x277   :  { %v8380_v36 = vadd.f32 %v8379_v32, %v8378_v0  ;;  %v6649_v32 = vmul.f32 %v8726_v62, %v6169_v48  ;;  %v6186_v25 = vcombine.low %v6178_v37, %v6185_v23  ;;  %v8403_v55 = vsel %vm3822_vm0, %v7430_v46, 0.0 }
 0x279   :  { %v8382_v52 = vadd.f32 %v8381_v7, %v8380_v36  ;;  %v6188_v7 = vcombine.low %v5131_v15, %v5135_v47  ;;  %v7433_v35 = vcombine.high %v6649_v32, %v6649_v32  ;;  %v7440_v8 = vrot.slane %v6649_v32, %v8825_v18  ;;  %v8728_v15 = vld [vmem:[%s12834_s0 + $0x158] sm:$0xff] }
 0x27a   :  { %v8673_v32 = vld [vmem:[%s12835_s1 + $0x171] ss:$2 sm:$0xff] }
 0x27b   :  { %v8384_v56 = vadd.f32 %v8383_v58, %v8382_v52  ;;  %v7432_v58 = vcombine.high %v7430_v46, %v7430_v46  ;;  %v5139_v52 = vrot.slane %v8672_v40, %v8793_v4  ;;  %v6202_v34 = vrot.slane %v6188_v7, %v8825_v18 }
 0x27c   :  { %v7447_v29 = vrot.slane %v7433_v35, %v8825_v18  ;;  %v7448_v43 = vcombine.high %v7440_v8, %v7440_v8  ;;  %v8407_v60 = vsel %vm3822_vm0, %v7440_v8, 0.0  ;;  %v5179_v35 = vrot.slane %v8673_v32, %v8797_v6 }
 0x27d   :  { %v8386_v14 = vadd.f32 %v8385_v30, %v8384_v56  ;;  %v5151_v30 = vrot.slane %v8672_v40, %v8804_v9  ;;  %v6195_v56 = vrot.slane %v6187_v21, %v8825_v18  ;;  %v8405_v51 = vsel %vm3822_vm0, %v7432_v58, 0.0 }
 0x27e   :  { %v6204_v42 = vcombine.low %v5139_v52, %v5143_v1  ;;  %v8409_v63 = vsel %vm3822_vm0, %v7448_v43, 0.0  ;;  %v8411_v31 = vsel %vm3822_vm0, %v7447_v29, 0.0  ;;  %v5175_v58 = vrot.slane %v8673_v32, %v8795_v5 }
 0x27f   :  { %v8388_v22 = vadd.f32 %v8387_v49, %v8386_v14  ;;  %v6650_v49 = vmul.f32 %v8727_v19, %v6186_v25  ;;  %v6203_v44 = vcombine.low %v6195_v56, %v6202_v34  ;;  %v6205_v39 = vcombine.low %v5147_v57, %v5151_v30  ;;  %v8729_v57 = vld [vmem:[%s12834_s0 + $0x160] sm:$0xff] }
 0x281   :  { %v8390_v45 = vadd.f32 %v8389_v27, %v8388_v22  ;;  %v7449_v22 = vcombine.high %v7447_v29, %v7447_v29  ;;  %v7457_v48 = vrot.slane %v6650_v49, %v8825_v18  ;;  %v6219_v2 = vrot.slane %v6205_v39, %v8825_v18 }
 0x283   :  { %v8392_v20 = vadd.f32 %v8391_v24, %v8390_v45  ;;  %v7450_v24 = vcombine.high %v6650_v49, %v6650_v49  ;;  %v5155_v45 = vrot.slane %v8672_v40, %v8806_v10  ;;  %v7465_v37 = vcombine.high %v7457_v48, %v7457_v48 }
 0x284   :  { %v8413_v23 = vsel %vm3822_vm0, %v7449_v22, 0.0  ;;  %v8415_v62 = vsel %vm3822_vm0, %v7457_v48, 0.0  ;;  %v5191_v22 = vrot.slane %v8673_v32, %v8808_v11 }
 0x285   :  { %v8394_v33 = vadd.f32 %v8393_v16, %v8392_v20  ;;  %v5167_v16 = vrot.slane %v8672_v40, %v8812_v13  ;;  %v6212_v20 = vrot.slane %v6204_v42, %v8825_v18  ;;  %v7464_v47 = vrot.slane %v7450_v24, %v8825_v18 }
 0x286   :  { %v6221_v26 = vcombine.low %v5155_v45, %v5159_v54  ;;  %v8417_v21 = vsel %vm3822_vm0, %v7465_v37, 0.0  ;;  %v5195_v24 = vrot.slane %v8673_v32, %v8810_v12 }
 0x287   :  { %v8396_v0 = vadd.f32 %v8395_v28, %v8394_v33  ;;  %v6651_v28 = vmul.f32 %v8728_v15, %v6203_v44  ;;  %v6220_v46 = vcombine.low %v6212_v20, %v6219_v2  ;;  %v8419_v8 = vsel %vm3822_vm0, %v7464_v47, 0.0 }
 0x289   :  { %v8398_v36 = vadd.f32 %v8397_v50, %v8396_v0  ;;  %v6222_v50 = vcombine.low %v5163_v61, %v5167_v16  ;;  %v7467_v40 = vcombine.high %v6651_v28, %v6651_v28  ;;  %v7474_v25 = vrot.slane %v6651_v28, %v8825_v18  ;;  %v8730_v61 = vld [vmem:[%s12834_s0 + $0x168] sm:$0xff] }
 0x28a   :  { %v8674_v28 = vld [vmem:[%s12835_s1 + $0x181] ss:$2 sm:$0xff] }
 0x28b   :  { %v8400_v41 = vadd.f32 %v8399_v38, %v8398_v36  ;;  %v7466_v38 = vcombine.high %v7464_v47, %v7464_v47  ;;  %v5171_v36 = vrot.slane %v8673_v32, %v8793_v4  ;;  %v6236_v52 = vrot.slane %v6222_v50, %v8825_v18 }
 0x28c   :  { %v7481_v30 = vrot.slane %v7467_v40, %v8825_v18  ;;  %v7482_v56 = vcombine.high %v7474_v25, %v7474_v25  ;;  %v8423_v19 = vsel %vm3822_vm0, %v7474_v25, 0.0  ;;  %v5211_v40 = vrot.slane %v8674_v28, %v8797_v6 }
 0x28d   :  { %v8402_v59 = vadd.f32 %v8401_v3, %v8400_v41  ;;  %v5183_v3 = vrot.slane %v8673_v32, %v8804_v9  ;;  %v6229_v41 = vrot.slane %v6221_v26, %v8825_v18  ;;  %v8421_v34 = vsel %vm3822_vm0, %v7466_v38, 0.0 }
 0x28e   :  { %v6238_v29 = vcombine.low %v5171_v36, %v5175_v58  ;;  %v8425_v42 = vsel %vm3822_vm0, %v7482_v56, 0.0  ;;  %v8427_v48 = vsel %vm3822_vm0, %v7481_v30, 0.0  ;;  %v5207_v38 = vrot.slane %v8674_v28, %v8795_v5 }
 0x28f   :  { %v8404_v14 = vadd.f32 %v8403_v55, %v8402_v59  ;;  %v6652_v55 = vmul.f32 %v8729_v57, %v6220_v46  ;;  %v6237_v49 = vcombine.low %v6229_v41, %v6236_v52  ;;  %v6239_v43 = vcombine.low %v5179_v35, %v5183_v3  ;;  %v8731_v35 = vld [vmem:[%s12834_s0 + $0x170] sm:$0xff] }
 0x291   :  { %v8406_v27 = vadd.f32 %v8405_v51, %v8404_v14  ;;  %v7483_v14 = vcombine.high %v7481_v30, %v7481_v30  ;;  %v7491_v44 = vrot.slane %v6652_v55, %v8825_v18  ;;  %v6253_v45 = vrot.slane %v6239_v43, %v8825_v18 }
 0x293   :  { %v8408_v17 = vadd.f32 %v8407_v60, %v8406_v27  ;;  %v7484_v60 = vcombine.high %v6652_v55, %v6652_v55  ;;  %v5187_v27 = vrot.slane %v8673_v32, %v8806_v10  ;;  %v7499_v20 = vcombine.high %v7491_v44, %v7491_v44 }
 0x294   :  { %v8429_v2 = vsel %vm3822_vm0, %v7483_v14, 0.0  ;;  %v8431_v15 = vsel %vm3822_vm0, %v7491_v44, 0.0  ;;  %v5223_v14 = vrot.slane %v8674_v28, %v8808_v11 }
 0x295   :  { %v8410_v53 = vadd.f32 %v8409_v63, %v8408_v17  ;;  %v5199_v63 = vrot.slane %v8673_v32, %v8812_v13  ;;  %v6246_v17 = vrot.slane %v6238_v29, %v8825_v18  ;;  %v7498_v16 = vrot.slane %v7484_v60, %v8825_v18 }
 0x296   :  { %v6255_v37 = vcombine.low %v5187_v27, %v5191_v22  ;;  %v8433_v26 = vsel %vm3822_vm0, %v7499_v20, 0.0  ;;  %v5227_v60 = vrot.slane %v8674_v28, %v8810_v12 }
 0x297   :  { %v8412_v33 = vadd.f32 %v8411_v31, %v8410_v53  ;;  %v6653_v31 = vmul.f32 %v8730_v61, %v6237_v49  ;;  %v6254_v47 = vcombine.low %v6246_v17, %v6253_v45  ;;  %v8435_v25 = vsel %vm3822_vm0, %v7498_v16, 0.0 }
 0x299   :  { %v8414_v0 = vadd.f32 %v8413_v23, %v8412_v33  ;;  %v6256_v23 = vcombine.low %v5195_v24, %v5199_v63  ;;  %v7501_v32 = vcombine.high %v6653_v31, %v6653_v31  ;;  %v7508_v46 = vrot.slane %v6653_v31, %v8825_v18  ;;  %v8732_v24 = vld [vmem:[%s12834_s0 + $0x178] sm:$0xff] }
 0x29a   :  { %v8675_v31 = vld [vmem:[%s12835_s1 + $0x191] ss:$2 sm:$0xff] }
 0x29b   :  { %v8416_v7 = vadd.f32 %v8415_v62, %v8414_v0  ;;  %v7500_v62 = vcombine.high %v7498_v16, %v7498_v16  ;;  %v5203_v0 = vrot.slane %v8674_v28, %v8793_v4  ;;  %v6270_v36 = vrot.slane %v6256_v23, %v8825_v18 }
 0x29c   :  { %v7515_v3 = vrot.slane %v7501_v32, %v8825_v18  ;;  %v7516_v41 = vcombine.high %v7508_v46, %v7508_v46  ;;  %v8439_v57 = vsel %vm3822_vm0, %v7508_v46, 0.0  ;;  %v5243_v32 = vrot.slane %v8675_v31, %v8797_v6 }
 0x29d   :  { %v8418_v1 = vadd.f32 %v8417_v21, %v8416_v7  ;;  %v5215_v21 = vrot.slane %v8674_v28, %v8804_v9  ;;  %v6263_v7 = vrot.slane %v6255_v37, %v8825_v18  ;;  %v8437_v52 = vsel %vm3822_vm0, %v7500_v62, 0.0 }
 0x29e   :  { %v6272_v30 = vcombine.low %v5203_v0, %v5207_v38  ;;  %v8441_v29 = vsel %vm3822_vm0, %v7516_v41, 0.0  ;;  %v8443_v44 = vsel %vm3822_vm0, %v7515_v3, 0.0  ;;  %v5239_v62 = vrot.slane %v8675_v31, %v8795_v5 }
 0x29f   :  { %v8420_v59 = vadd.f32 %v8419_v8, %v8418_v1  ;;  %v6654_v8 = vmul.f32 %v8731_v35, %v6254_v47  ;;  %v6271_v55 = vcombine.low %v6263_v7, %v6270_v36  ;;  %v6273_v56 = vcombine.low %v5211_v40, %v5215_v21  ;;  %v8733_v40 = vld [vmem:[%s12834_s0 + $0x180] sm:$0xff] }
 0x2a1   :  { %v8422_v51 = vadd.f32 %v8421_v34, %v8420_v59  ;;  %v7517_v59 = vcombine.high %v7515_v3, %v7515_v3  ;;  %v7525_v49 = vrot.slane %v6654_v8, %v8825_v18  ;;  %v6287_v27 = vrot.slane %v6273_v56, %v8825_v18 }
 0x2a3   :  { %v8424_v39 = vadd.f32 %v8423_v19, %v8422_v51  ;;  %v7518_v19 = vcombine.high %v6654_v8, %v6654_v8  ;;  %v5219_v51 = vrot.slane %v8674_v28, %v8806_v10  ;;  %v7533_v17 = vcombine.high %v7525_v49, %v7525_v49 }
 0x2a4   :  { %v8445_v45 = vsel %vm3822_vm0, %v7517_v59, 0.0  ;;  %v8447_v61 = vsel %vm3822_vm0, %v7525_v49, 0.0  ;;  %v5255_v59 = vrot.slane %v8675_v31, %v8808_v11 }
 0x2a5   :  { %v8426_v54 = vadd.f32 %v8425_v42, %v8424_v39  ;;  %v5231_v42 = vrot.slane %v8674_v28, %v8812_v13  ;;  %v6280_v39 = vrot.slane %v6272_v30, %v8825_v18  ;;  %v7532_v63 = vrot.slane %v7518_v19, %v8825_v18 }
 0x2a6   :  { %v6289_v20 = vcombine.low %v5219_v51, %v5223_v14  ;;  %v8449_v37 = vsel %vm3822_vm0, %v7533_v17, 0.0  ;;  %v5259_v19 = vrot.slane %v8675_v31, %v8810_v12 }
 0x2a7   :  { %v8428_v53 = vadd.f32 %v8427_v48, %v8426_v54  ;;  %v6655_v48 = vmul.f32 %v8732_v24, %v6271_v55  ;;  %v6288_v16 = vcombine.low %v6280_v39, %v6287_v27  ;;  %v8451_v46 = vsel %vm3822_vm0, %v7532_v63, 0.0 }
 0x2a9   :  { %v8430_v33 = vadd.f32 %v8429_v2, %v8428_v53  ;;  %v6290_v2 = vcombine.low %v5227_v60, %v5231_v42  ;;  %v7535_v28 = vcombine.high %v6655_v48, %v6655_v48  ;;  %v7542_v47 = vrot.slane %v6655_v48, %v8825_v18  ;;  %v8734_v60 = vld [vmem:[%s12834_s0 + $0x188] sm:$0xff] }
 0x2aa   :  { %v8676_v48 = vld [vmem:[%s12835_s1 + $0x1a1] ss:$2 sm:$0xff] }
 0x2ab   :  { %v8432_v50 = vadd.f32 %v8431_v15, %v8430_v33  ;;  %v7534_v15 = vcombine.high %v7532_v63, %v7532_v63  ;;  %v5235_v33 = vrot.slane %v8675_v31, %v8793_v4  ;;  %v6304_v0 = vrot.slane %v6290_v2, %v8825_v18 }
 0x2ac   :  { %v7549_v21 = vrot.slane %v7535_v28, %v8825_v18  ;;  %v7550_v7 = vcombine.high %v7542_v47, %v7542_v47  ;;  %v8455_v35 = vsel %vm3822_vm0, %v7542_v47, 0.0  ;;  %v5275_v28 = vrot.slane %v8676_v48, %v8797_v6 }
 0x2ad   :  { %v8434_v58 = vadd.f32 %v8433_v26, %v8432_v50  ;;  %v5247_v26 = vrot.slane %v8675_v31, %v8804_v9  ;;  %v6297_v50 = vrot.slane %v6289_v20, %v8825_v18  ;;  %v8453_v36 = vsel %vm3822_vm0, %v7534_v15, 0.0 }
 0x2ae   :  { %v6306_v3 = vcombine.low %v5235_v33, %v5239_v62  ;;  %v8457_v30 = vsel %vm3822_vm0, %v7550_v7, 0.0  ;;  %v8459_v49 = vsel %vm3822_vm0, %v7549_v21, 0.0  ;;  %v5271_v15 = vrot.slane %v8676_v48, %v8795_v5 }
 0x2af   :  { %v8436_v1 = vadd.f32 %v8435_v25, %v8434_v58  ;;  %v6656_v25 = vmul.f32 %v8733_v40, %v6288_v16  ;;  %v6305_v8 = vcombine.low %v6297_v50, %v6304_v0  ;;  %v6307_v41 = vcombine.low %v5243_v32, %v5247_v26  ;;  %v8735_v32 = vld [vmem:[%s12834_s0 + $0x190] sm:$0xff] }
 0x2b1   :  { %v8438_v34 = vadd.f32 %v8437_v52, %v8436_v1  ;;  %v7551_v1 = vcombine.high %v7549_v21, %v7549_v21  ;;  %v7559_v55 = vrot.slane %v6656_v25, %v8825_v18  ;;  %v6321_v51 = vrot.slane %v6307_v41, %v8825_v18 }
 0x2b3   :  { %v8440_v43 = vadd.f32 %v8439_v57, %v8438_v34  ;;  %v7552_v57 = vcombine.high %v6656_v25, %v6656_v25  ;;  %v5251_v34 = vrot.slane %v8675_v31, %v8806_v10  ;;  %v7567_v39 = vcombine.high %v7559_v55, %v7559_v55 }
 0x2b4   :  { %v8461_v27 = vsel %vm3822_vm0, %v7551_v1, 0.0  ;;  %v8463_v24 = vsel %vm3822_vm0, %v7559_v55, 0.0  ;;  %v5287_v1 = vrot.slane %v8676_v48, %v8808_v11 }
 0x2b5   :  { %v8442_v22 = vadd.f32 %v8441_v29, %v8440_v43  ;;  %v5263_v29 = vrot.slane %v8675_v31, %v8812_v13  ;;  %v6314_v43 = vrot.slane %v6306_v3, %v8825_v18  ;;  %v7566_v42 = vrot.slane %v7552_v57, %v8825_v18 }
 0x2b6   :  { %v6323_v17 = vcombine.low %v5251_v34, %v5255_v59  ;;  %v8465_v20 = vsel %vm3822_vm0, %v7567_v39, 0.0  ;;  %v5291_v57 = vrot.slane %v8676_v48, %v8810_v12 }
 0x2b7   :  { %v8444_v54 = vadd.f32 %v8443_v44, %v8442_v22  ;;  %v6657_v44 = vmul.f32 %v8734_v60, %v6305_v8  ;;  %v6322_v63 = vcombine.low %v6314_v43, %v6321_v51  ;;  %v8467_v47 = vsel %vm3822_vm0, %v7566_v42, 0.0 }
 0x2b9   :  { %v8446_v53 = vadd.f32 %v8445_v45, %v8444_v54  ;;  %v6324_v45 = vcombine.low %v5259_v19, %v5263_v29  ;;  %v7569_v31 = vcombine.high %v6657_v44, %v6657_v44  ;;  %v7576_v16 = vrot.slane %v6657_v44, %v8825_v18  ;;  %v8736_v19 = vld [vmem:[%s12834_s0 + $0x198] sm:$0xff] }
 0x2ba   :  { %v8677_v44 = vld [vmem:[%s12835_s1 + $0x1b1] ss:$2 sm:$0xff] }
 0x2bb   :  { %v8448_v23 = vadd.f32 %v8447_v61, %v8446_v53  ;;  %v7568_v61 = vcombine.high %v7566_v42, %v7566_v42  ;;  %v5267_v53 = vrot.slane %v8676_v48, %v8793_v4  ;;  %v6338_v33 = vrot.slane %v6324_v45, %v8825_v18 }
 0x2bc   :  { %v7583_v26 = vrot.slane %v7569_v31, %v8825_v18  ;;  %v7584_v50 = vcombine.high %v7576_v16, %v7576_v16  ;;  %v8471_v40 = vsel %vm3822_vm0, %v7576_v16, 0.0  ;;  %v5307_v31 = vrot.slane %v8677_v44, %v8797_v6 }
 0x2bd   :  { %v8450_v38 = vadd.f32 %v8449_v37, %v8448_v23  ;;  %v5279_v37 = vrot.slane %v8676_v48, %v8804_v9  ;;  %v6331_v23 = vrot.slane %v6323_v17, %v8825_v18  ;;  %v8469_v0 = vsel %vm3822_vm0, %v7568_v61, 0.0 }
 0x2be   :  { %v6340_v21 = vcombine.low %v5267_v53, %v5271_v15  ;;  %v8473_v3 = vsel %vm3822_vm0, %v7584_v50, 0.0  ;;  %v8475_v55 = vsel %vm3822_vm0, %v7583_v26, 0.0  ;;  %v5303_v61 = vrot.slane %v8677_v44, %v8795_v5 }
 0x2bf   :  { %v8452_v58 = vadd.f32 %v8451_v46, %v8450_v38  ;;  %v6658_v46 = vmul.f32 %v8735_v32, %v6322_v63  ;;  %v6339_v25 = vcombine.low %v6331_v23, %v6338_v33  ;;  %v6341_v7 = vcombine.low %v5275_v28, %v5279_v37  ;;  %v8737_v28 = vld [vmem:[%s12834_s0 + $0x1a0] sm:$0xff] }
 0x2c1   :  { %v8454_v52 = vadd.f32 %v8453_v36, %v8452_v58  ;;  %v7585_v58 = vcombine.high %v7583_v26, %v7583_v26  ;;  %v7593_v8 = vrot.slane %v6658_v46, %v8825_v18  ;;  %v6355_v34 = vrot.slane %v6341_v7, %v8825_v18 }
 0x2c3   :  { %v8456_v56 = vadd.f32 %v8455_v35, %v8454_v52  ;;  %v7586_v35 = vcombine.high %v6658_v46, %v6658_v46  ;;  %v5283_v52 = vrot.slane %v8676_v48, %v8806_v10  ;;  %v7601_v43 = vcombine.high %v7593_v8, %v7593_v8 }
 0x2c4   :  { %v8477_v51 = vsel %vm3822_vm0, %v7585_v58, 0.0  ;;  %v8479_v60 = vsel %vm3822_vm0, %v7593_v8, 0.0  ;;  %v5319_v58 = vrot.slane %v8677_v44, %v8808_v11 }
 0x2c5   :  { %v8458_v14 = vadd.f32 %v8457_v30, %v8456_v56  ;;  %v5295_v30 = vrot.slane %v8676_v48, %v8812_v13  ;;  %v6348_v56 = vrot.slane %v6340_v21, %v8825_v18  ;;  %v7600_v29 = vrot.slane %v7586_v35, %v8825_v18 }
 0x2c6   :  { %v6357_v39 = vcombine.low %v5283_v52, %v5287_v1  ;;  %v8481_v17 = vsel %vm3822_vm0, %v7601_v43, 0.0  ;;  %v5323_v35 = vrot.slane %v8677_v44, %v8810_v12 }
 0x2c7   :  { %v8460_v22 = vadd.f32 %v8459_v49, %v8458_v14  ;;  %v6659_v49 = vmul.f32 %v8736_v19, %v6339_v25  ;;  %v6356_v42 = vcombine.low %v6348_v56, %v6355_v34  ;;  %v8483_v16 = vsel %vm3822_vm0, %v7600_v29, 0.0 }
 0x2c9   :  { %v8462_v54 = vadd.f32 %v8461_v27, %v8460_v22  ;;  %v6358_v27 = vcombine.low %v5291_v57, %v5295_v30  ;;  %v7603_v48 = vcombine.high %v6659_v49, %v6659_v49  ;;  %v7610_v63 = vrot.slane %v6659_v49, %v8825_v18  ;;  %v8738_v57 = vld [vmem:[%s12834_s0 + $0x1a8] sm:$0xff] }
 0x2ca   :  { %v8678_v49 = vld [vmem:[%s12835_s1 + $0x1c1] ss:$2 sm:$0xff] }
 0x2cb   :  { %v8464_v2 = vadd.f32 %v8463_v24, %v8462_v54  ;;  %v7602_v24 = vcombine.high %v7600_v29, %v7600_v29  ;;  %v5299_v54 = vrot.slane %v8677_v44, %v8793_v4  ;;  %v6372_v53 = vrot.slane %v6358_v27, %v8825_v18 }
 0x2cc   :  { %v7617_v37 = vrot.slane %v7603_v48, %v8825_v18  ;;  %v7618_v23 = vcombine.high %v7610_v63, %v7610_v63  ;;  %v8487_v32 = vsel %vm3822_vm0, %v7610_v63, 0.0  ;;  %v5339_v48 = vrot.slane %v8678_v49, %v8797_v6 }
 0x2cd   :  { %v8466_v62 = vadd.f32 %v8465_v20, %v8464_v2  ;;  %v5311_v20 = vrot.slane %v8677_v44, %v8804_v9  ;;  %v6365_v2 = vrot.slane %v6357_v39, %v8825_v18  ;;  %v8485_v33 = vsel %vm3822_vm0, %v7602_v24, 0.0 }
 0x2ce   :  { %v6374_v26 = vcombine.low %v5299_v54, %v5303_v61  ;;  %v8489_v21 = vsel %vm3822_vm0, %v7618_v23, 0.0  ;;  %v8491_v8 = vsel %vm3822_vm0, %v7617_v37, 0.0  ;;  %v5335_v24 = vrot.slane %v8678_v49, %v8795_v5 }
 0x2cf   :  { %v8468_v38 = vadd.f32 %v8467_v47, %v8466_v62  ;;  %v6660_v47 = vmul.f32 %v8737_v28, %v6356_v42  ;;  %v6373_v46 = vcombine.low %v6365_v2, %v6372_v53  ;;  %v6375_v50 = vcombine.low %v5307_v31, %v5311_v20  ;;  %v8739_v31 = vld [vmem:[%s12834_s0 + $0x1b0] sm:$0xff] }
 0x2d1   :  { %v8470_v36 = vadd.f32 %v8469_v0, %v8468_v38  ;;  %v7619_v38 = vcombine.high %v7617_v37, %v7617_v37  ;;  %v7627_v25 = vrot.slane %v6660_v47, %v8825_v18  ;;  %v6389_v52 = vrot.slane %v6375_v50, %v8825_v18 }
 0x2d3   :  { %v8472_v41 = vadd.f32 %v8471_v40, %v8470_v36  ;;  %v7620_v40 = vcombine.high %v6660_v47, %v6660_v47  ;;  %v5315_v36 = vrot.slane %v8677_v44, %v8806_v10  ;;  %v7635_v56 = vcombine.high %v7627_v25, %v7627_v25 }
 0x2d4   :  { %v8493_v34 = vsel %vm3822_vm0, %v7619_v38, 0.0  ;;  %v8495_v19 = vsel %vm3822_vm0, %v7627_v25, 0.0  ;;  %v5351_v38 = vrot.slane %v8678_v49, %v8808_v11 }
 0x2d5   :  { %v8474_v59 = vadd.f32 %v8473_v3, %v8472_v41  ;;  %v5327_v3 = vrot.slane %v8677_v44, %v8812_v13  ;;  %v6382_v41 = vrot.slane %v6374_v26, %v8825_v18  ;;  %v7634_v30 = vrot.slane %v7620_v40, %v8825_v18 }
 0x2d6   :  { %v6391_v43 = vcombine.low %v5315_v36, %v5319_v58  ;;  %v8497_v39 = vsel %vm3822_vm0, %v7635_v56, 0.0  ;;  %v5355_v40 = vrot.slane %v8678_v49, %v8810_v12 }
 0x2d7   :  { %v8476_v14 = vadd.f32 %v8475_v55, %v8474_v59  ;;  %v6661_v55 = vmul.f32 %v8738_v57, %v6373_v46  ;;  %v6390_v29 = vcombine.low %v6382_v41, %v6389_v52  ;;  %v8499_v63 = vsel %vm3822_vm0, %v7634_v30, 0.0 }
 0x2d9   :  { %v8478_v22 = vadd.f32 %v8477_v51, %v8476_v14  ;;  %v6392_v51 = vcombine.low %v5323_v35, %v5327_v3  ;;  %v7637_v44 = vcombine.high %v6661_v55, %v6661_v55  ;;  %v7644_v42 = vrot.slane %v6661_v55, %v8825_v18  ;;  %v8740_v35 = vld [vmem:[%s12834_s0 + $0x1b8] sm:$0xff] }
 0x2da   :  { %v8679_v55 = vld [vmem:[%s12835_s1 + $0x1d1] ss:$2 sm:$0xff] }
 0x2db   :  { %v8480_v45 = vadd.f32 %v8479_v60, %v8478_v22  ;;  %v7636_v60 = vcombine.high %v7634_v30, %v7634_v30  ;;  %v5331_v22 = vrot.slane %v8678_v49, %v8793_v4  ;;  %v6406_v54 = vrot.slane %v6392_v51, %v8825_v18 }
 0x2dc   :  { %v7651_v20 = vrot.slane %v7637_v44, %v8825_v18  ;;  %v7652_v2 = vcombine.high %v7644_v42, %v7644_v42  ;;  %v8503_v28 = vsel %vm3822_vm0, %v7644_v42, 0.0  ;;  %v5371_v44 = vrot.slane %v8679_v55, %v8797_v6 }
 0x2dd   :  { %v8482_v15 = vadd.f32 %v8481_v17, %v8480_v45  ;;  %v5343_v17 = vrot.slane %v8678_v49, %v8804_v9  ;;  %v6399_v45 = vrot.slane %v6391_v43, %v8825_v18  ;;  %v8501_v53 = vsel %vm3822_vm0, %v7636_v60, 0.0 }
 0x2de   :  { %v6408_v37 = vcombine.low %v5331_v22, %v5335_v24  ;;  %v8505_v26 = vsel %vm3822_vm0, %v7652_v2, 0.0  ;;  %v8507_v25 = vsel %vm3822_vm0, %v7651_v20, 0.0  ;;  %v5367_v60 = vrot.slane %v8679_v55, %v8795_v5 }
 0x2df   :  { %v8484_v62 = vadd.f32 %v8483_v16, %v8482_v15  ;;  %v6662_v16 = vmul.f32 %v8739_v31, %v6390_v29  ;;  %v6407_v47 = vcombine.low %v6399_v45, %v6406_v54  ;;  %v6409_v23 = vcombine.low %v5339_v48, %v5343_v17  ;;  %v8741_v48 = vld [vmem:[%s12834_s0 + $0x1c0] sm:$0xff] }
 0x2e1   :  { %v8486_v0 = vadd.f32 %v8485_v33, %v8484_v62  ;;  %v7653_v62 = vcombine.high %v7651_v20, %v7651_v20  ;;  %v7661_v46 = vrot.slane %v6662_v16, %v8825_v18  ;;  %v6423_v36 = vrot.slane %v6409_v23, %v8825_v18 }
 0x2e3   :  { %v8488_v7 = vadd.f32 %v8487_v32, %v8486_v0  ;;  %v7654_v32 = vcombine.high %v6662_v16, %v6662_v16  ;;  %v5347_v0 = vrot.slane %v8678_v49, %v8806_v10  ;;  %v7669_v41 = vcombine.high %v7661_v46, %v7661_v46 }
 0x2e4   :  { %v8509_v52 = vsel %vm3822_vm0, %v7653_v62, 0.0  ;;  %v8511_v57 = vsel %vm3822_vm0, %v7661_v46, 0.0  ;;  %v5383_v62 = vrot.slane %v8679_v55, %v8808_v11 }
 0x2e5   :  { %v8490_v1 = vadd.f32 %v8489_v21, %v8488_v7  ;;  %v5359_v21 = vrot.slane %v8678_v49, %v8812_v13  ;;  %v6416_v7 = vrot.slane %v6408_v37, %v8825_v18  ;;  %v7668_v3 = vrot.slane %v7654_v32, %v8825_v18 }
 0x2e6   :  { %v6425_v56 = vcombine.low %v5347_v0, %v5351_v38  ;;  %v8513_v43 = vsel %vm3822_vm0, %v7669_v41, 0.0  ;;  %v5387_v32 = vrot.slane %v8679_v55, %v8810_v12 }
 0x2e7   :  { %v8492_v59 = vadd.f32 %v8491_v8, %v8490_v1  ;;  %v6663_v8 = vmul.f32 %v8740_v35, %v6407_v47  ;;  %v6424_v30 = vcombine.low %v6416_v7, %v6423_v36  ;;  %v8515_v42 = vsel %vm3822_vm0, %v7668_v3, 0.0 }
 0x2e9   :  { %v8494_v14 = vadd.f32 %v8493_v34, %v8492_v59  ;;  %v6426_v34 = vcombine.low %v5355_v40, %v5359_v21  ;;  %v7671_v49 = vcombine.high %v6663_v8, %v6663_v8  ;;  %v7678_v29 = vrot.slane %v6663_v8, %v8825_v18  ;;  %v8742_v40 = vld [vmem:[%s12834_s0 + $0x1c8] sm:$0xff] }
 0x2ea   :  { %v8680_v8 = vld [vmem:[%s12835_s1 + $0x1e1] ss:$2 sm:$0xff] }
 0x2eb   :  { %v8496_v27 = vadd.f32 %v8495_v19, %v8494_v14  ;;  %v7670_v19 = vcombine.high %v7668_v3, %v7668_v3  ;;  %v5363_v14 = vrot.slane %v8679_v55, %v8793_v4  ;;  %v6440_v22 = vrot.slane %v6426_v34, %v8825_v18 }
 0x2ec   :  { %v7685_v17 = vrot.slane %v7671_v49, %v8825_v18  ;;  %v7686_v45 = vcombine.high %v7678_v29, %v7678_v29  ;;  %v8519_v31 = vsel %vm3822_vm0, %v7678_v29, 0.0  ;;  %v5403_v49 = vrot.slane %v8680_v8, %v8797_v6 }
 0x2ed   :  { %v8498_v61 = vadd.f32 %v8497_v39, %v8496_v27  ;;  %v5375_v39 = vrot.slane %v8679_v55, %v8804_v9  ;;  %v6433_v27 = vrot.slane %v6425_v56, %v8825_v18  ;;  %v8517_v54 = vsel %vm3822_vm0, %v7670_v19, 0.0 }
 0x2ee   :  { %v6442_v20 = vcombine.low %v5363_v14, %v5367_v60  ;;  %v8521_v37 = vsel %vm3822_vm0, %v7686_v45, 0.0  ;;  %v8523_v46 = vsel %vm3822_vm0, %v7685_v17, 0.0  ;;  %v5399_v19 = vrot.slane %v8680_v8, %v8795_v5 }
 0x2ef   :  { %v8500_v15 = vadd.f32 %v8499_v63, %v8498_v61  ;;  %v6664_v63 = vmul.f32 %v8741_v48, %v6424_v30  ;;  %v6441_v16 = vcombine.low %v6433_v27, %v6440_v22  ;;  %v6443_v2 = vcombine.low %v5371_v44, %v5375_v39  ;;  %v8743_v44 = vld [vmem:[%s12834_s0 + $0x1d0] sm:$0xff] }
 0x2f1   :  { %v8502_v33 = vadd.f32 %v8501_v53, %v8500_v15  ;;  %v7687_v15 = vcombine.high %v7685_v17, %v7685_v17  ;;  %v7695_v47 = vrot.slane %v6664_v63, %v8825_v18  ;;  %v6457_v0 = vrot.slane %v6443_v2, %v8825_v18 }
 0x2f3   :  { %v8504_v50 = vadd.f32 %v8503_v28, %v8502_v33  ;;  %v7688_v28 = vcombine.high %v6664_v63, %v6664_v63  ;;  %v5379_v33 = vrot.slane %v8679_v55, %v8806_v10  ;;  %v7703_v7 = vcombine.high %v7695_v47, %v7695_v47 }
 0x2f4   :  { %v8525_v36 = vsel %vm3822_vm0, %v7687_v15, 0.0  ;;  %v8527_v35 = vsel %vm3822_vm0, %v7695_v47, 0.0  ;;  %v5415_v15 = vrot.slane %v8680_v8, %v8808_v11 }
 0x2f5   :  { %v8506_v58 = vadd.f32 %v8505_v26, %v8504_v50  ;;  %v5391_v26 = vrot.slane %v8679_v55, %v8812_v13  ;;  %v6450_v50 = vrot.slane %v6442_v20, %v8825_v18  ;;  %v7702_v21 = vrot.slane %v7688_v28, %v8825_v18 }
 0x2f6   :  { %v6459_v41 = vcombine.low %v5379_v33, %v5383_v62  ;;  %v8529_v56 = vsel %vm3822_vm0, %v7703_v7, 0.0  ;;  %v5419_v28 = vrot.slane %v8680_v8, %v8810_v12 }
 0x2f7   :  { %v8508_v1 = vadd.f32 %v8507_v25, %v8506_v58  ;;  %v6665_v25 = vmul.f32 %v8742_v40, %v6441_v16  ;;  %v6458_v3 = vcombine.low %v6450_v50, %v6457_v0  ;;  %v8531_v29 = vsel %vm3822_vm0, %v7702_v21, 0.0 }
 0x2f9   :  { %v8510_v59 = vadd.f32 %v8509_v52, %v8508_v1  ;;  %v6460_v52 = vcombine.low %v5387_v32, %v5391_v26  ;;  %v7705_v55 = vcombine.high %v6665_v25, %v6665_v25  ;;  %v7712_v30 = vrot.slane %v6665_v25, %v8825_v18  ;;  %v8744_v32 = vld [vmem:[%s12834_s0 + $0x1d8] sm:$0xff] }
 0x2fa   :  { %v8681_v25 = vld [vmem:[%s12835_s1 + $0x1f1] ss:$2 sm:$0xff] }
 0x2fb   :  { %v8512_v51 = vadd.f32 %v8511_v57, %v8510_v59  ;;  %v7704_v57 = vcombine.high %v7702_v21, %v7702_v21  ;;  %v5395_v59 = vrot.slane %v8680_v8, %v8793_v4  ;;  %v6474_v14 = vrot.slane %v6460_v52, %v8825_v18 }
 0x2fc   :  { %v7719_v39 = vrot.slane %v7705_v55, %v8825_v18  ;;  %v7720_v27 = vcombine.high %v7712_v30, %v7712_v30  ;;  %v8535_v48 = vsel %vm3822_vm0, %v7712_v30, 0.0  ;;  %v5435_v55 = vrot.slane %v8681_v25, %v8797_v6 }
 0x2fd   :  { %v8514_v24 = vadd.f32 %v8513_v43, %v8512_v51  ;;  %v5407_v43 = vrot.slane %v8680_v8, %v8804_v9  ;;  %v6467_v51 = vrot.slane %v6459_v41, %v8825_v18  ;;  %v8533_v22 = vsel %vm3822_vm0, %v7704_v57, 0.0 }
 0x2fe   :  { %v6476_v17 = vcombine.low %v5395_v59, %v5399_v19  ;;  %v8537_v20 = vsel %vm3822_vm0, %v7720_v27, 0.0  ;;  %v8539_v47 = vsel %vm3822_vm0, %v7719_v39, 0.0  ;;  %v5431_v57 = vrot.slane %v8681_v25, %v8795_v5 }
 0x2ff   :  { %v8516_v61 = vadd.f32 %v8515_v42, %v8514_v24  ;;  %v6666_v42 = vmul.f32 %v8743_v44, %v6458_v3  ;;  %v6475_v63 = vcombine.low %v6467_v51, %v6474_v14  ;;  %v6477_v45 = vcombine.low %v5403_v49, %v5407_v43  ;;  %v8745_v49 = vld [vmem:[%s12834_s0 + $0x1e0] sm:$0xff] }
 0x301   :  { %v8518_v53 = vadd.f32 %v8517_v54, %v8516_v61  ;;  %v7721_v61 = vcombine.high %v7719_v39, %v7719_v39  ;;  %v7729_v16 = vrot.slane %v6666_v42, %v8825_v18  ;;  %v6491_v33 = vrot.slane %v6477_v45, %v8825_v18 }
 0x303   :  { %v8520_v23 = vadd.f32 %v8519_v31, %v8518_v53  ;;  %v7722_v31 = vcombine.high %v6666_v42, %v6666_v42  ;;  %v5411_v53 = vrot.slane %v8680_v8, %v8806_v10  ;;  %v7737_v50 = vcombine.high %v7729_v16, %v7729_v16 }
 0x304   :  { %v8541_v0 = vsel %vm3822_vm0, %v7721_v61, 0.0  ;;  %v8543_v40 = vsel %vm3822_vm0, %v7729_v16, 0.0 }
 0x305   :  { %v8522_v38 = vadd.f32 %v8521_v37, %v8520_v23  ;;  %v5423_v37 = vrot.slane %v8680_v8, %v8812_v13  ;;  %v6484_v23 = vrot.slane %v6476_v17, %v8825_v18  ;;  %v7736_v26 = vrot.slane %v7722_v31, %v8825_v18 }
 0x306   :  { %v6493_v7 = vcombine.low %v5411_v53, %v5415_v15  ;;  %v8545_v41 = vsel %vm3822_vm0, %v7737_v50, 0.0  ;;  %v5451_v17 = vrot.slane %v8681_v25, %v8810_v12 }
 0x307   :  { %v8524_v58 = vadd.f32 %v8523_v46, %v8522_v38  ;;  %v6667_v46 = vmul.f32 %v8744_v32, %v6475_v63  ;;  %v6492_v21 = vcombine.low %v6484_v23, %v6491_v33  ;;  %v8547_v30 = vsel %vm3822_vm0, %v7736_v26, 0.0 }
 0x308   :  { %v5447_v63 = vrot.slane %v8681_v25, %v8808_v11 }
 0x309   :  { %v8526_v1 = vadd.f32 %v8525_v36, %v8524_v58  ;;  %v6494_v36 = vcombine.low %v5419_v28, %v5423_v37  ;;  %v7739_v8 = vcombine.high %v6667_v46, %v6667_v46  ;;  %v7746_v3 = vrot.slane %v6667_v46, %v8825_v18 }
 0x30b   :  { %v8528_v34 = vadd.f32 %v8527_v35, %v8526_v1  ;;  %v7738_v35 = vcombine.high %v7736_v26, %v7736_v26  ;;  %v5427_v1 = vrot.slane %v8681_v25, %v8793_v4  ;;  %v6508_v59 = vrot.slane %v6494_v36, %v8825_v18 }
 0x30c   :  { %v7753_v4 = vrot.slane %v7739_v8, %v8825_v18  ;;  %v7754_v43 = vcombine.high %v7746_v3, %v7746_v3  ;;  %v8551_v51 = vsel %vm3822_vm0, %v7746_v3, 0.0 }
 0x30d   :  { %v8530_v60 = vadd.f32 %v8529_v56, %v8528_v34  ;;  %v5439_v56 = vrot.slane %v8681_v25, %v8804_v9  ;;  %v6501_v34 = vrot.slane %v6493_v7, %v8825_v18  ;;  %v8549_v5 = vsel %vm3822_vm0, %v7738_v35, 0.0 }
 0x30e   :  { %v6510_v9 = vcombine.low %v5427_v1, %v5431_v57  ;;  %v7755_v42 = vcombine.high %v7753_v4, %v7753_v4  ;;  %v8555_v45 = vsel %vm3822_vm0, %v7753_v4, 0.0 }
 0x30f   :  { %v8532_v24 = vadd.f32 %v8531_v29, %v8530_v60  ;;  %v6668_v29 = vmul.f32 %v8745_v49, %v6492_v21  ;;  %v6509_v14 = vcombine.low %v6501_v34, %v6508_v59  ;;  %v6511_v60 = vcombine.low %v5435_v55, %v5439_v56  ;;  %v8748_v34 = vld [vmem:[%s12834_s0 + $0x1f8] sm:$0xff] }
 0x310   :  { %v6518_v61 = vrot.slane %v6510_v9, %v8825_v18  ;;  %v8557_v11 = vsel %vm3822_vm0, %v7755_v42, 0.0 }
 0x311   :  { %v8534_v54 = vadd.f32 %v8533_v22, %v8532_v24  ;;  %v7756_v39 = vcombine.high %v6668_v29, %v6668_v29  ;;  %v7763_v27 = vrot.slane %v6668_v29, %v8825_v18  ;;  %v8553_v22 = vsel %vm3822_vm0, %v7754_v43, 0.0 }
 0x312   :  { %v6525_v31 = vrot.slane %v6511_v60, %v8825_v18 }
 0x313   :  { %v8536_v2 = vadd.f32 %v8535_v48, %v8534_v54  ;;  %v5443_v48 = vrot.slane %v8681_v25, %v8806_v10  ;;  %v5455_v54 = vrot.slane %v8681_v25, %v8812_v13  ;;  %v7770_v10 = vrot.slane %v7756_v39, %v8825_v18 }
 0x314   :  { %v7771_v53 = vcombine.high %v7763_v27, %v7763_v27  ;;  %v8559_v15 = vsel %vm3822_vm0, %v7763_v27, 0.0  ;;  %v6526_v28 = vcombine.low %v6518_v61, %v6525_v31 }
 0x315   :  { %v8538_v62 = vadd.f32 %v8537_v20, %v8536_v2  ;;  %v8746_v20 = vld [vmem:[%s12834_s0 + $0x1e8] sm:$0xff]  ;;  %v6527_v13 = vcombine.low %v5443_v48, %v5447_v63  ;;  %v7772_v23 = vcombine.high %v7770_v10, %v7770_v10  ;;  %v8563_v26 = vsel %vm3822_vm0, %v7770_v10, 0.0  ;;  %v8682_v10 = vld [vmem:[%s12836_s2] ss:$0 sm:$0xff] }
 0x316   :  { %v6669_v2 = vmul.f32 %v8746_v20, %v6509_v14  ;;  %v8561_v32 = vsel %vm3822_vm0, %v7771_v53, 0.0 }
 0x317   :  { %v8540_v38 = vadd.f32 %v8539_v47, %v8538_v62  ;;  %v6528_v47 = vcombine.low %v5451_v17, %v5455_v54  ;;  %v6535_v50 = vrot.slane %v6527_v13, %v8825_v18  ;;  %v8565_v36 = vsel %vm3822_vm0, %v7772_v23, 0.0 }
 0x318   :  { %v7773_v33 = vcombine.high %v6669_v2, %v6669_v2  ;;  %v7780_v62 = vrot.slane %v6669_v2, %v8825_v18 }
 0x319   :  { %v8542_v58 = vadd.f32 %v8541_v0, %v8540_v38  ;;  %v6542_v0 = vrot.slane %v6528_v47, %v8825_v18 }
 0x31a   :  { %v7787_v21 = vrot.slane %v7773_v33, %v8825_v18  ;;  %v7788_v7 = vcombine.high %v7780_v62, %v7780_v62  ;;  %v8567_v35 = vsel %vm3822_vm0, %v7780_v62, 0.0 }
 0x31b   :  { %v8544_v52 = vadd.f32 %v8543_v40, %v8542_v58  ;;  %v8747_v40 = vld [vmem:[%s12834_s0 + $0x1f0] sm:$0xff]  ;;  %v6543_v8 = vcombine.low %v6535_v50, %v6542_v0 }
 0x31c   :  { %v6670_v25 = vmul.f32 %v8747_v40, %v6526_v28  ;;  %v8569_v57 = vsel %vm3822_vm0, %v7788_v7, 0.0 }
 0x31d   :  { %v8546_v19 = vadd.f32 %v8545_v41, %v8544_v52  ;;  %v7789_v41 = vcombine.high %v7787_v21, %v7787_v21  ;;  %v6671_v59 = vmul.f32 %v8748_v34, %v6543_v8 }
 0x31e   :  { %v7790_v52 = vcombine.high %v6670_v25, %v6670_v25  ;;  %v7797_v1 = vrot.slane %v6670_v25, %v8825_v18 }
 0x31f   :  { %v8548_v6 = vadd.f32 %v8547_v30, %v8546_v19  ;;  %v8571_v30 = vsel %vm3822_vm0, %v7787_v21, 0.0  ;;  %v8573_v29 = vsel %vm3822_vm0, %v7789_v41, 0.0  ;;  %v7814_v14 = vrot.slane %v6671_v59, %v8825_v18 }
 0x320   :  { %v7804_v19 = vrot.slane %v7790_v52, %v8825_v18  ;;  %v7805_v49 = vcombine.high %v7797_v1, %v7797_v1  ;;  %v8575_v43 = vsel %vm3822_vm0, %v7797_v1, 0.0 }
 0x321   :  { %v8550_v44 = vadd.f32 %v8549_v5, %v8548_v6  ;;  %v7822_v27 = vcombine.high %v7814_v14, %v7814_v14  ;;  %v8583_v48 = vsel %vm3822_vm0, %v7814_v14, 0.0 }
 0x322   :  { %v7806_v6 = vcombine.high %v7804_v19, %v7804_v19  ;;  %v8577_v9 = vsel %vm3822_vm0, %v7805_v49, 0.0 }
 0x323   :  { %v8552_v24 = vadd.f32 %v8551_v51, %v8550_v44  ;;  %v7807_v51 = vcombine.high %v6671_v59, %v6671_v59  ;;  %v8579_v44 = vsel %vm3822_vm0, %v7804_v19, 0.0 }
 0x325   :  { %v8554_v16 = vadd.f32 %v8553_v22, %v8552_v24  ;;  %v7821_v39 = vrot.slane %v7807_v51, %v8825_v18  ;;  %v8581_v22 = vsel %vm3822_vm0, %v7806_v6, 0.0  ;;  %v4335_v18 = vpop.xlane.xlu0 %4334 }
 0x327   :  { %v8556_v12 = vadd.f32 %v8555_v45, %v8554_v16  ;;  %v7823_v17 = vcombine.high %v7821_v39, %v7821_v39  ;;  %v8585_v45 = vsel %vm3822_vm0, %v7822_v27, 0.0  ;;  %v8587_v61 = vsel %vm3822_vm0, %v7821_v39, 0.0 }
 0x329   :  { %v8558_v37 = vadd.f32 %v8557_v11, %v8556_v12  ;;  %v8589_v16 = vsel %vm3822_vm0, %v7823_v17, 0.0 }
 0x32b   :  { %v8560_v46 = vadd.f32 %v8559_v15, %v8558_v37 }
 0x32d   :  { %v8562_v38 = vadd.f32 %v8561_v32, %v8560_v46 }
 0x32f   :  { %v8564_v58 = vadd.f32 %v8563_v26, %v8562_v38 }
 0x331   :  { %v8566_v3 = vadd.f32 %v8565_v36, %v8564_v58 }
 0x333   :  { %v8568_v55 = vadd.f32 %v8567_v35, %v8566_v3 }
 0x335   :  { %v8570_v56 = vadd.f32 %v8569_v57, %v8568_v55 }
 0x337   :  { %v8572_v4 = vadd.f32 %v8571_v30, %v8570_v56 }
 0x339   :  { %v8574_v5 = vadd.f32 %v8573_v29, %v8572_v4 }
 0x33b   :  { %v8576_v60 = vadd.f32 %v8575_v43, %v8574_v5 }
 0x33d   :  { %v8578_v42 = vadd.f32 %v8577_v9, %v8576_v60 }
 0x33f   :  { %v8580_v24 = vadd.f32 %v8579_v44, %v8578_v42 }
 0x341   :  { %v8582_v63 = vadd.f32 %v8581_v22, %v8580_v24 }
 0x343   :  { %v8584_v54 = vadd.f32 %v8583_v48, %v8582_v63 }
 0x345   :  { %v8586_v31 = vadd.f32 %v8585_v45, %v8584_v54 }
 0x347   :  { %v8588_v20 = vadd.f32 %v8587_v61, %v8586_v31 }
 0x349   :  { %v8590_v2 = vadd.f32 %v8589_v16, %v8588_v20 }
 0x34b   :  { %8591 = vadd.xlane.f32.xlu0 %v8590_v2 }
 0x3d4   :  { %v8592_v53 = vpop.xlane.xlu0 %8591 }
 0x3d5   :  { %v8594_v11 = vsel %vm8593_vm1, %v4335_v18, %v8592_v53 }
 0x3d6   :  { %v8602_v12 = vadd.f32 %v8682_v10, %v8594_v11 }
 0x3d8   :  { %8604 = vst.msk [vmem:[#allocation2] sm:$0x3] %vm8603_vm2, %v8602_v12 }
 0x3d9   :  { %8760 = shalt.err (!%p8757_p4)
}
 0x3da   :  { %8614 = dma.vmem_to_hbm [thread:$0]  %s8612_s19, 32, %s12837_s3, [#allocation3]  }
 0x3db   :  { %8769 = dma.done.wait [#allocation3], 32  }
 0x3dc   :  { %8770 = vsyncadd [#allocation3], 4294967264 }
 0x3dd   :  { %8618 = vsyncpa [#allocation3], 1 }

</bundles_post_ra>
